<compile_context>
chip_gen: v7x
topology: tpu7x:2x2x1
jax: 0.10.0
libtpu: 0.0.40
codegen_flags: <defaults>
</compile_context>

<pallas_src>
import math
import functools

import jax
import jax.numpy as jnp
from jax import lax
from jax.experimental import pallas as pl
from jax.experimental.pallas import tpu as pltpu

D_HEAD = 64            # GPT2Config: n_embd = n_head * 64
LN_EPS = 1e-5

# Tile caps (bf16 activations/weights, f32 accumulation / statistics).
_TM_CAP = 512          # token (sublane) tile for the in-block matmuls
_TM_LM_CAP = 1024      # token tile for the lm_head (weight re-reads dominate)
_TN_CAP = 4096         # output-feature tile: full N for QKV/FC/proj at GPT-2 scale
_TK_CAP = 1024         # contraction tile for the un-fused (no-LN) matmuls
_TV_CAP = 1024         # vocab tile for the lm_head / fused cross-entropy


def _scoped_vmem_limit():
    """Per-generation scoped-VMEM budget: ~3/4 of physical, capped at 96 MB
    (=> 48 MB on v7x's 64 MiB VMEM, 96 MB on v5e/v6e's 128 MiB)."""
    try:
        cap = int(pltpu.get_tpu_info().vmem_capacity_bytes)
    except Exception:
        cap = 64 * 1024 * 1024
    return min(cap * 3 // 4, 96 * 1024 * 1024)


_VMEM_LIMIT = _scoped_vmem_limit()


def _pick_tile(dim, cap, mult):
    """Largest tile <= cap that divides dim and is a multiple of mult.
    Falls back to the full dim (a full-extent block is always legal)."""
    if dim <= cap:
        return dim
    best = None
    t = mult
    while t <= cap:
        if dim % t == 0:
            best = t
        t += mult
    return best if best is not None else dim
    # TODO(synk): vocab sizes that are not multiples of 128 (e.g. 50257) need
    # padding (e.g. to 50304 with masked columns) before the lm_head /
    # cross-entropy can be vocab-tiled at real GPT-2 scale.


# ----------------------------- Pallas kernels -----------------------------

def _dense_kernel(*refs, activation, fuse_ln, cache_ln, single_k, has_residual):
    """Tiled (M, N, K) matmul.  Optional fused pre-LayerNorm (tk == K enforced
    by the wrapper; LN is cached in a VMEM scratch when the N axis is tiled),
    bias + gelu_new + residual applied at the last K step (or directly when
    there is a single K step)."""
    idx = 0
    x_ref = refs[idx]; idx += 1
    w_ref = refs[idx]; idx += 1
    b_ref = refs[idx]; idx += 1
    if fuse_ln:
        g_ref = refs[idx]; idx += 1
        beta_ref = refs[idx]; idx += 1
    if has_residual:
        r_ref = refs[idx]; idx += 1
    o_ref = refs[idx]; idx += 1
    if not single_k:
        acc_ref = refs[idx]; idx += 1
    if cache_ln:
        xn_ref = refs[idx]; idx += 1

    j = pl.program_id(1)
    k = pl.program_id(2)
    nk = pl.num_programs(2)

    def _layernorm(x):
        xf = x.astype(jnp.float32)
        mu = jnp.mean(xf, axis=-1, keepdims=True)
        var = jnp.mean(jnp.square(xf - mu), axis=-1, keepdims=True)
        xf = (xf - mu) * lax.rsqrt(var + LN_EPS)
        return xf * g_ref[...].astype(jnp.float32) + beta_ref[...].astype(jnp.float32)

    if fuse_ln:
        if cache_ln:
            # Recompute LN only on the first output tile of each row block.
            @pl.when(j == 0)
            def _():
                xn_ref[...] = _layernorm(x_ref[...]).astype(xn_ref.dtype)
            x = xn_ref[...]
        else:
            x = _layernorm(x_ref[...]).astype(w_ref.dtype)
    else:
        x = x_ref[...]

    contrib = jnp.dot(x, w_ref[...], preferred_element_type=jnp.float32)

    def _finalize(acc):
        acc = acc + b_ref[...].astype(jnp.float32)
        if activation == "gelu_new":
            c = math.sqrt(2.0 / math.pi)
            acc = 0.5 * acc * (1.0 + jnp.tanh(c * (acc + 0.044715 * acc * acc * acc)))
        if has_residual:
            acc = acc + r_ref[...].astype(jnp.float32)
        return acc.astype(o_ref.dtype)

    if single_k:
        o_ref[...] = _finalize(contrib)
    else:
        @pl.when(k == 0)
        def _():
            acc_ref[...] = jnp.zeros_like(acc_ref)
        acc_ref[...] += contrib

        @pl.when(k == nk - 1)
        def _():
            o_ref[...] = _finalize(acc_ref[...])


def _attention_kernel(q_ref, k_ref, v_ref, o_ref, *, heads_per_block):
    """Causal MHA for one (batch, head-pair).  q/k/v refs are lane-dense
    (T, heads_per_block*64) slices of the QKV slab; output is (T, 128)."""
    # TODO(synk): flash-style KV tiling (online softmax over K/V tiles) is
    # needed before long contexts; the full (T, T) f32 score tile per head is
    # fine at small/medium T but exceeds v7x's 64 MiB VMEM around T=4096.
    T = q_ref.shape[0]
    scale = 1.0 / math.sqrt(D_HEAD)       # exact power of two for d_head = 64

    q_all = q_ref[...]
    k_all = k_ref[...]
    v_all = v_ref[...]

    row = lax.broadcasted_iota(jnp.int32, (T, T), 0)
    col = lax.broadcasted_iota(jnp.int32, (T, T), 1)
    causal = col <= row

    outs = []
    for h in range(heads_per_block):
        sl = slice(h * D_HEAD, (h + 1) * D_HEAD)
        q = q_all[:, sl] * scale           # fold scale into q (exact in bf16)
        k = k_all[:, sl]
        v = v_all[:, sl]
        s = lax.dot_general(q, k, (((1,), (1,)), ((), ())),
                            preferred_element_type=jnp.float32)
        s = jnp.where(causal, s, -1e30)
        s = s - jnp.max(s, axis=-1, keepdims=True)
        p = jnp.exp(s)
        denom = jnp.sum(p, axis=-1, keepdims=True)
        o = jnp.dot(p.astype(v.dtype), v, preferred_element_type=jnp.float32)
        outs.append(o * pl.reciprocal(denom, approx=True))
    o_ref[...] = jnp.concatenate(outs, axis=-1).astype(o_ref.dtype)


def _lmhead_xent_kernel(x_ref, w_ref, g_ref, b_ref, lab_ref, mask_ref,
                        logits_ref, nll_ref, xn_ref, m_ref, l_ref, t_ref, *, tv):
    """Fused ln_f -> tied lm_head matmul -> online (vocab-tiled) logsumexp
    cross-entropy.  Vocab axis (grid 1) is the reduction axis; the f32 logits
    never leave VMEM (the returned logits tensor is written once, in bf16)."""
    j = pl.program_id(1)
    nj = pl.num_programs(1)

    @pl.when(j == 0)
    def _():
        xf = x_ref[...].astype(jnp.float32)
        mu = jnp.mean(xf, axis=-1, keepdims=True)
        var = jnp.mean(jnp.square(xf - mu), axis=-1, keepdims=True)
        xf = (xf - mu) * lax.rsqrt(var + LN_EPS)
        xf = xf * g_ref[...].astype(jnp.float32) + b_ref[...].astype(jnp.float32)
        xn_ref[...] = xf.astype(xn_ref.dtype)
        m_ref[...] = jnp.full(m_ref.shape, -1e30, jnp.float32)
        l_ref[...] = jnp.zeros(l_ref.shape, jnp.float32)
        t_ref[...] = jnp.zeros(t_ref.shape, jnp.float32)

    logits = jnp.dot(xn_ref[...], w_ref[...], preferred_element_type=jnp.float32)
    logits_ref[...] = logits.astype(logits_ref.dtype)

    col = j * tv + lax.broadcasted_iota(jnp.int32, logits.shape, 1)
    t_ref[...] += jnp.sum(jnp.where(col == lab_ref[...], logits, 0.0),
                          axis=-1, keepdims=True)

    m_old = m_ref[...]
    m_new = jnp.maximum(m_old, jnp.max(logits, axis=-1, keepdims=True))
    l_ref[...] = (l_ref[...] * jnp.exp(m_old - m_new)
                  + jnp.sum(jnp.exp(logits - m_new), axis=-1, keepdims=True))
    m_ref[...] = m_new

    @pl.when(j == nj - 1)
    def _():
        nll_ref[...] = (m_ref[...] + jnp.log(l_ref[...]) - t_ref[...]) * mask_ref[...]


# ------------------------------ Pallas wrappers -----------------------------

def dense(x, w, b, *, ln=None, residual=None, activation=None,
          out_dtype=None, tn_cap=_TN_CAP, tk_cap=_TK_CAP):
    """y = act(LN?(x) @ w + b) (+ residual), tiled over (M, N, K)."""
    M, K = x.shape
    Kw, N = w.shape
    assert Kw == K
    out_dtype = out_dtype or x.dtype

    m_mult = 16 if x.dtype == jnp.bfloat16 else 8
    tm = _pick_tile(M, _TM_CAP, m_mult)
    tn = _pick_tile(N, tn_cap, 128)
    tk = K if ln is not None else _pick_tile(K, tk_cap, 128)
    assert M % tm == 0 and N % tn == 0 and K % tk == 0
    nj, nk = N // tn, K // tk
    single_k = nk == 1
    cache_ln = ln is not None and nj > 1

    in_specs = [pl.BlockSpec((tm, tk), lambda i, j, k: (i, k)),
                pl.BlockSpec((tk, tn), lambda i, j, k: (k, j)),
                pl.BlockSpec((1, tn), lambda i, j, k: (0, j))]     # bias
    args = [x, w, b.reshape(1, N)]
    if ln is not None:
        g, beta = ln
        in_specs += [pl.BlockSpec((1, tk), lambda i, j, k: (0, k)),   # gamma
                     pl.BlockSpec((1, tk), lambda i, j, k: (0, k))]   # beta
        args += [g.reshape(1, K), beta.reshape(1, K)]
    if residual is not None:
        in_specs.append(pl.BlockSpec((tm, tn), lambda i, j, k: (i, j)))
        args.append(residual)

    scratch = []
    if not single_k:
        scratch.append(pltpu.VMEM((tm, tn), jnp.float32))   # f32 accumulator
    if cache_ln:
        scratch.append(pltpu.VMEM((tm, tk), w.dtype))       # cached LN(x)

    kernel = functools.partial(
        _dense_kernel, activation=activation, fuse_ln=ln is not None,
        cache_ln=cache_ln, single_k=single_k, has_residual=residual is not None)

    return pl.pallas_call(
        kernel,
        grid=(M // tm, nj, nk),
        in_specs=in_specs,
        out_specs=pl.BlockSpec((tm, tn), lambda i, j, k: (i, j)),
        out_shape=jax.ShapeDtypeStruct((M, N), out_dtype),
        scratch_shapes=scratch,
        compiler_params=pltpu.CompilerParams(
            dimension_semantics=("parallel",
                                 "arbitrary" if cache_ln else "parallel",
                                 "arbitrary"),
            vmem_limit_bytes=_VMEM_LIMIT),
    )(*args)


def causal_attention(qkv, B, T, n_head):
    """Causal MHA reading (T, 128) head-pair slices of the (B, T, 3D) QKV slab."""
    D = n_head * D_HEAD
    assert qkv.shape == (B * T, 3 * D)
    # TODO(synk): odd n_head needs a single-head (64-lane) fallback kernel.
    assert n_head % 2 == 0, "causal_attention assumes an even head count"
    hpb = 2
    lane = hpb * D_HEAD                      # 128-lane blocks
    hb = n_head // hpb                       # head-pair blocks
    qkv3 = qkv.reshape(B, T, 3 * D)

    out = pl.pallas_call(
        functools.partial(_attention_kernel, heads_per_block=hpb),
        grid=(B, hb),
        in_specs=[pl.BlockSpec((None, T, lane), lambda b, hp: (b, 0, hp)),
                  pl.BlockSpec((None, T, lane), lambda b, hp: (b, 0, hb + hp)),
                  pl.BlockSpec((None, T, lane), lambda b, hp: (b, 0, 2 * hb + hp))],
        out_specs=pl.BlockSpec((None, T, lane), lambda b, hp: (b, 0, hp)),
        out_shape=jax.ShapeDtypeStruct((B, T, D), qkv.dtype),
        compiler_params=pltpu.CompilerParams(
            dimension_semantics=("parallel", "parallel"),
            vmem_limit_bytes=_VMEM_LIMIT),
    )(qkv3, qkv3, qkv3)
    return out.reshape(B * T, D)


def lm_head_with_loss(x, wte_t, ln_g, ln_b, labels, mask,
                      *, logits_dtype=jnp.bfloat16):
    """Fused ln_f + tied lm_head + shifted cross-entropy (mean over mask)."""
    M, D = x.shape
    Dw, V = wte_t.shape
    assert Dw == D
    tm = _pick_tile(M, _TM_LM_CAP, 16)
    tv = _pick_tile(V, _TV_CAP, 128)
    assert M % tm == 0 and V % tv == 0

    labels2 = labels.reshape(M, 1).astype(jnp.int32)
    mask2 = mask.reshape(M, 1).astype(jnp.float32)

    logits, nll = pl.pallas_call(
        functools.partial(_lmhead_xent_kernel, tv=tv),
        grid=(M // tm, V // tv),
        in_specs=[pl.BlockSpec((tm, D), lambda i, j: (i, 0)),
                  pl.BlockSpec((D, tv), lambda i, j: (0, j)),
                  pl.BlockSpec((1, D), lambda i, j: (0, 0)),
                  pl.BlockSpec((1, D), lambda i, j: (0, 0)),
                  pl.BlockSpec((tm, 1), lambda i, j: (i, 0)),
                  pl.BlockSpec((tm, 1), lambda i, j: (i, 0))],
        out_specs=[pl.BlockSpec((tm, tv), lambda i, j: (i, j)),
                   pl.BlockSpec((tm, 1), lambda i, j: (i, 0))],
        out_shape=(jax.ShapeDtypeStruct((M, V), logits_dtype),
                   jax.ShapeDtypeStruct((M, 1), jnp.float32)),
        scratch_shapes=[pltpu.VMEM((tm, D), x.dtype),       # cached ln_f(x)
                        pltpu.VMEM((tm, 1), jnp.float32),    # running max
                        pltpu.VMEM((tm, 1), jnp.float32),    # running sum-exp
                        pltpu.VMEM((tm, 1), jnp.float32)],   # target logit acc
        compiler_params=pltpu.CompilerParams(
            dimension_semantics=("parallel", "arbitrary"),
            vmem_limit_bytes=_VMEM_LIMIT),
    )(x, wte_t, ln_g.reshape(1, D), ln_b.reshape(1, D), labels2, mask2)

    loss = jnp.sum(nll) / jnp.sum(mask2)
    return logits, loss


# --------------------------- pure-JAX reference ops --------------------------
# Mirrors the kernels' dtype-cast points; used for the correctness check.

def _ref_dense(x, w, b, *, ln=None, residual=None, activation=None,
               out_dtype=None):
    out_dtype = out_dtype or x.dtype
    if ln is not None:
        g, beta = ln
        xf = x.astype(jnp.float32)
        mu = jnp.mean(xf, axis=-1, keepdims=True)
        var = jnp.mean(jnp.square(xf - mu), axis=-1, keepdims=True)
        xf = (xf - mu) * lax.rsqrt(var + LN_EPS)
        xf = xf * g.astype(jnp.float32) + beta.astype(jnp.float32)
        xin = xf.astype(w.dtype)
    else:
        xin = x
    acc = jnp.dot(xin, w, preferred_element_type=jnp.float32)
    acc = acc + b.astype(jnp.float32)
    if activation == "gelu_new":
        c = math.sqrt(2.0 / math.pi)
        acc = 0.5 * acc * (1.0 + jnp.tanh(c * (acc + 0.044715 * acc * acc * acc)))
    if residual is not None:
        acc = acc + residual.astype(jnp.float32)
    return acc.astype(out_dtype)


def _ref_attention(qkv, B, T, n_head):
    D = n_head * D_HEAD
    scale = 1.0 / math.sqrt(D_HEAD)
    qkv5 = qkv.reshape(B, T, 3, n_head, D_HEAD)
    q, k, v = qkv5[:, :, 0], qkv5[:, :, 1], qkv5[:, :, 2]     # (B, T, H, Dh)
    s = jnp.einsum("bqhd,bkhd->bhqk", q, k,
                   preferred_element_type=jnp.float32) * scale
    row = lax.broadcasted_iota(jnp.int32, (T, T), 0)
    col = lax.broadcasted_iota(jnp.int32, (T, T), 1)
    s = jnp.where((col <= row)[None, None], s, -1e30)
    s = s - jnp.max(s, axis=-1, keepdims=True)
    p = jnp.exp(s)
    p = p / jnp.sum(p, axis=-1, keepdims=True)
    o = jnp.einsum("bhqk,bkhd->bqhd", p.astype(qkv.dtype), v,
                   preferred_element_type=jnp.float32)
    return o.reshape(B, T, D).astype(qkv.dtype).reshape(B * T, D)


def _ref_cross_entropy(logits, labels, mask):
    x = logits.astype(jnp.float32)
    m = jnp.max(x, axis=-1, keepdims=True)
    lse = jnp.log(jnp.sum(jnp.exp(x - m), axis=-1, keepdims=True)) + m
    tgt = jnp.take_along_axis(x, labels.astype(jnp.int32)[:, None], axis=-1)
    nll = (lse - tgt)[:, 0] * mask.astype(jnp.float32)
    return jnp.sum(nll) / jnp.sum(mask.astype(jnp.float32))


# ---------------------------------- model -----------------------------------

def init_params(key, vocab_size, n_positions, n_layer, n_head):
    d = n_head * D_HEAD
    std = 0.02
    wdt = jnp.bfloat16
    keys = iter(jax.random.split(key, 2 + 4 * n_layer))
    wte = (jax.random.normal(next(keys), (vocab_size, d)) * std).astype(wdt)
    params = {
        "wte": wte,
        "wte_t": wte.T,   # one-time (D, V) copy: standard (K, N) lm_head layout
        "wpe": (jax.random.normal(next(keys), (n_positions, d)) * std).astype(wdt),
        "ln_f_g": jnp.ones((d,), jnp.float32),
        "ln_f_b": jnp.zeros((d,), jnp.float32),
        "blocks": [],
    }
    for _ in range(n_layer):
        blk = {
            "ln1_g": jnp.ones((d,), jnp.float32),
            "ln1_b": jnp.zeros((d,), jnp.float32),
            "attn_w": (jax.random.normal(next(keys), (d, 3 * d)) * std).astype(wdt),
            "attn_b": jnp.zeros((3 * d,), jnp.float32),
            "attn_proj_w": (jax.random.normal(next(keys), (d, d)) * std).astype(wdt),
            "attn_proj_b": jnp.zeros((d,), jnp.float32),
            "ln2_g": jnp.ones((d,), jnp.float32),
            "ln2_b": jnp.zeros((d,), jnp.float32),
            "fc_w": (jax.random.normal(next(keys), (d, 4 * d)) * std).astype(wdt),
            "fc_b": jnp.zeros((4 * d,), jnp.float32),
            "proj_w": (jax.random.normal(next(keys), (4 * d, d)) * std).astype(wdt),
            "proj_b": jnp.zeros((d,), jnp.float32),
        }
        params["blocks"].append(blk)
    return params


def gpt2_forward(params, input_ids, labels=None, *, n_head, use_pallas=True):
    dense_fn = dense if use_pallas else _ref_dense
    attn_fn = causal_attention if use_pallas else _ref_attention

    B, T = input_ids.shape
    d = params["wte"].shape[1]
    vocab = params["wte"].shape[0]

    # embedding gather (data-dependent) stays in JAX glue
    h = jnp.take(params["wte"], input_ids, axis=0) + params["wpe"][:T][None]
    x = h.reshape(B * T, d).astype(jnp.bfloat16)

    for blk in params["blocks"]:
        # attention sub-block: fused LN1 -> QKV, attention, proj + residual
        qkv = dense_fn(x, blk["attn_w"], blk["attn_b"],
                       ln=(blk["ln1_g"], blk["ln1_b"]))
        o = attn_fn(qkv, B, T, n_head)
        x = dense_fn(o, blk["attn_proj_w"], blk["attn_proj_b"], residual=x)

        # MLP sub-block: fused LN2 -> fc + gelu, proj + residual
        m = dense_fn(x, blk["fc_w"], blk["fc_b"],
                     ln=(blk["ln2_g"], blk["ln2_b"]), activation="gelu_new")
        x = dense_fn(m, blk["proj_w"], blk["proj_b"], residual=x)

    zero_bias = jnp.zeros((vocab,), jnp.float32)

    if labels is None:
        if use_pallas:
            logits = dense(x, params["wte_t"], zero_bias,
                           ln=(params["ln_f_g"], params["ln_f_b"]),
                           out_dtype=jnp.float32, tn_cap=_TV_CAP)
        else:
            logits = _ref_dense(x, params["wte_t"], zero_bias,
                                ln=(params["ln_f_g"], params["ln_f_b"]),
                                out_dtype=jnp.float32)
        return logits.reshape(B, T, vocab), None

    # HF GPT2 loss: shift logits[..., :-1, :] vs labels[..., 1:], mean-reduced.
    # TODO(synk): HF ignore_index=-100 label masking is not handled.
    shifted_labels = jnp.concatenate(
        [labels[:, 1:], jnp.zeros((B, 1), labels.dtype)], axis=1).reshape(-1)
    valid = jnp.concatenate(
        [jnp.ones((B, T - 1), jnp.float32), jnp.zeros((B, 1), jnp.float32)],
        axis=1).reshape(-1)

    if use_pallas:
        logits_flat, loss = lm_head_with_loss(
            x, params["wte_t"], params["ln_f_g"], params["ln_f_b"],
            shifted_labels, valid)
    else:
        logits_flat = _ref_dense(x, params["wte_t"], zero_bias,
                                 ln=(params["ln_f_g"], params["ln_f_b"]),
                                 out_dtype=jnp.float32)
        loss = _ref_cross_entropy(logits_flat, shifted_labels, valid)
    return logits_flat.reshape(B, T, vocab), loss


# ----------------------------------- main ------------------------------------

if __name__ == "__main__":
    # Small, shape-consistent config (n_embd = n_head * 64).  VOCAB=2048 keeps
    # the vocab-tiled (online) lm_head/cross-entropy running multi-step grids.
    VOCAB, N_POS, N_LAYER, N_HEAD = 2048, 64, 2, 4
    B, T = 2, 8

    key = jax.random.PRNGKey(0)
    pkey, ikey, dkey = jax.random.split(key, 3)
    params = init_params(pkey, VOCAB, N_POS, N_LAYER, N_HEAD)
    input_ids = jax.random.randint(ikey, (B, T), 0, VOCAB, dtype=jnp.int32)

    fwd = jax.jit(functools.partial(gpt2_forward, n_head=N_HEAD, use_pallas=True))
    ref = jax.jit(functools.partial(gpt2_forward, n_head=N_HEAD, use_pallas=False))

    logits, loss = fwd(params, input_ids, input_ids)
    jax.block_until_ready((logits, loss))

    r_logits, r_loss = ref(params, input_ids, input_ids)
    jax.block_until_ready((r_logits, r_loss))

    assert logits.shape == (B, T, VOCAB)
    assert bool(jnp.isfinite(loss))
    max_err = float(jnp.max(jnp.abs(logits.astype(jnp.float32) - r_logits)))
    assert max_err < 0.05, f"logits mismatch vs reference: {max_err}"
    assert abs(float(loss) - float(r_loss)) < 0.05 * max(1.0, abs(float(r_loss))), \
        (float(loss), float(r_loss))

    # labels=None path: exercises the vocab-tiled plain lm_head dense with the
    # cached-LN scratch (N-axis tiled => cache_ln=True).
    logits_nl, loss_nl = fwd(params, input_ids, None)
    jax.block_until_ready(logits_nl)
    assert loss_nl is None
    max_err_nl = float(jnp.max(jnp.abs(logits_nl - r_logits)))
    assert max_err_nl < 0.05, f"no-label logits mismatch vs reference: {max_err_nl}"

    # K-tiled accumulator path of dense() (forced small tk).
    xk = (jax.random.normal(dkey, (16, 512)) * 0.1).astype(jnp.bfloat16)
    wk = (jax.random.normal(jax.random.PRNGKey(1), (512, 256)) * 0.05
          ).astype(jnp.bfloat16)
    bk = jnp.zeros((256,), jnp.float32)
    yk = dense(xk, wk, bk, tk_cap=128)
    jax.block_until_ready(yk)
    yr = _ref_dense(xk, wk, bk)
    err_k = float(jnp.max(jnp.abs(yk.astype(jnp.float32) - yr.astype(jnp.float32))))
    assert err_k < 0.05, f"k-tiled dense mismatch vs reference: {err_k}"

    print("KERNEL_OK")
</pallas_src>

<mosaic_0001>
module attributes {stable_mosaic.version = 11 : i64} {
  func.func @_attention_kernel(%arg0: i32, %arg1: i32, %arg2: memref<1x8x128xbf16, #tpu.memory_space<vmem>>, %arg3: memref<1x8x128xbf16, #tpu.memory_space<vmem>>, %arg4: memref<1x8x128xbf16, #tpu.memory_space<vmem>>, %arg5: memref<1x8x128xbf16, #tpu.memory_space<vmem>>) attributes {dimension_semantics = [#tpu.dimension_semantics<parallel>, #tpu.dimension_semantics<parallel>], iteration_bounds = array<i64: 2, 2>, scalar_prefetch = 0 : i64, scratch_operands = 0 : i64, tpu.core_type = #tpu.core_type<tc>, window_params = [{transform_indices = @transform_0, window_bounds = array<i64: 1, 8, 128>}, {transform_indices = @transform_1, window_bounds = array<i64: 1, 8, 128>}, {transform_indices = @transform_2, window_bounds = array<i64: 1, 8, 128>}, {transform_indices = @transform_3, window_bounds = array<i64: 1, 8, 128>}]} {
    %c0 = arith.constant 0 : index
    %c0_0 = arith.constant 0 : index
    %c0_1 = arith.constant 0 : index
    %0 = vector.load %arg2[%c0, %c0_0, %c0_1] : memref<1x8x128xbf16, #tpu.memory_space<vmem>>, vector<1x8x128xbf16>
    %1 = vector.shape_cast %0 : vector<1x8x128xbf16> to vector<8x128xbf16>
    %c0_2 = arith.constant 0 : index
    %c0_3 = arith.constant 0 : index
    %c0_4 = arith.constant 0 : index
    %2 = vector.load %arg3[%c0_2, %c0_3, %c0_4] : memref<1x8x128xbf16, #tpu.memory_space<vmem>>, vector<1x8x128xbf16>
    %3 = vector.shape_cast %2 : vector<1x8x128xbf16> to vector<8x128xbf16>
    %c0_5 = arith.constant 0 : index
    %c0_6 = arith.constant 0 : index
    %c0_7 = arith.constant 0 : index
    %4 = vector.load %arg4[%c0_5, %c0_6, %c0_7] : memref<1x8x128xbf16, #tpu.memory_space<vmem>>, vector<1x8x128xbf16>
    %5 = vector.shape_cast %4 : vector<1x8x128xbf16> to vector<8x128xbf16>
    %6 = tpu.iota {dimensions = array<i32: 0>} : vector<8x8xi32>
    %7 = tpu.iota {dimensions = array<i32: 1>} : vector<8x8xi32>
    %8 = arith.cmpi sle, %7, %6 : vector<8x8xi32>
    %9 = vector.extract_strided_slice %1 {offsets = [0, 0], sizes = [8, 64], strides = [1, 1]} : vector<8x128xbf16> to vector<8x64xbf16>
    %cst = arith.constant 1.250000e-01 : bf16
    %10 = vector.broadcast %cst : bf16 to vector<8x64xbf16>
    %11 = arith.mulf %9, %10 : vector<8x64xbf16>
    %12 = vector.extract_strided_slice %3 {offsets = [0, 0], sizes = [8, 64], strides = [1, 1]} : vector<8x128xbf16> to vector<8x64xbf16>
    %13 = vector.extract_strided_slice %5 {offsets = [0, 0], sizes = [8, 64], strides = [1, 1]} : vector<8x128xbf16> to vector<8x64xbf16>
    %cst_8 = arith.constant dense<0.000000e+00> : vector<8x8xf32>
    %14 = tpu.matmul %11, %12, %cst_8 {dimension_numbers = #tpu.dot_dimension_numbers<[1], [1], [0], [0], [0, 0, 1, 0], [], []>} : vector<8x64xbf16>, vector<8x64xbf16>, vector<8x8xf32> -> vector<8x8xf32>
    %cst_9 = arith.constant -1.000000e+30 : f32
    %15 = vector.broadcast %cst_9 : f32 to vector<8x8xf32>
    %16 = arith.select %8, %14, %15 : vector<8x8xi1>, vector<8x8xf32>
    %cst_10 = arith.constant dense<0xFF800000> : vector<8xf32>
    %17 = vector.multi_reduction <maximumf>, %16, %cst_10 [1] : vector<8x8xf32> to vector<8xf32>
    %18 = vector.shape_cast %17 : vector<8xf32> to vector<8x1xf32>
    %19 = vector.broadcast %18 : vector<8x1xf32> to vector<8x8xf32>
    %20 = arith.subf %16, %19 : vector<8x8xf32>
    %21 = math.exp %20 : vector<8x8xf32>
    %cst_11 = arith.constant dense<0.000000e+00> : vector<8xf32>
    %22 = vector.multi_reduction <add>, %21, %cst_11 [1] : vector<8x8xf32> to vector<8xf32>
    %23 = vector.shape_cast %22 : vector<8xf32> to vector<8x1xf32>
    %24 = arith.truncf %21 : vector<8x8xf32> to vector<8x8xbf16>
    %cst_12 = arith.constant dense<0.000000e+00> : vector<8x64xf32>
    %25 = tpu.matmul %24, %13, %cst_12 {dimension_numbers = #tpu.dot_dimension_numbers<[1], [0], [0], [1], [0, 0, 1, 1], [], []>} : vector<8x8xbf16>, vector<8x64xbf16>, vector<8x64xf32> -> vector<8x64xf32>
    %26 = tpu.reciprocal %23 {approx = true} : vector<8x1xf32> -> vector<8x1xf32>
    %27 = vector.broadcast %26 : vector<8x1xf32> to vector<8x64xf32>
    %28 = arith.mulf %25, %27 : vector<8x64xf32>
    %29 = vector.extract_strided_slice %1 {offsets = [0, 64], sizes = [8, 64], strides = [1, 1]} : vector<8x128xbf16> to vector<8x64xbf16>
    %cst_13 = arith.constant 1.250000e-01 : bf16
    %30 = vector.broadcast %cst_13 : bf16 to vector<8x64xbf16>
    %31 = arith.mulf %29, %30 : vector<8x64xbf16>
    %32 = vector.extract_strided_slice %3 {offsets = [0, 64], sizes = [8, 64], strides = [1, 1]} : vector<8x128xbf16> to vector<8x64xbf16>
    %33 = vector.extract_strided_slice %5 {offsets = [0, 64], sizes = [8, 64], strides = [1, 1]} : vector<8x128xbf16> to vector<8x64xbf16>
    %cst_14 = arith.constant dense<0.000000e+00> : vector<8x8xf32>
    %34 = tpu.matmul %31, %32, %cst_14 {dimension_numbers = #tpu.dot_dimension_numbers<[1], [1], [0], [0], [0, 0, 1, 0], [], []>} : vector<8x64xbf16>, vector<8x64xbf16>, vector<8x8xf32> -> vector<8x8xf32>
    %cst_15 = arith.constant -1.000000e+30 : f32
    %35 = vector.broadcast %cst_15 : f32 to vector<8x8xf32>
    %36 = arith.select %8, %34, %35 : vector<8x8xi1>, vector<8x8xf32>
    %cst_16 = arith.constant dense<0xFF800000> : vector<8xf32>
    %37 = vector.multi_reduction <maximumf>, %36, %cst_16 [1] : vector<8x8xf32> to vector<8xf32>
    %38 = vector.shape_cast %37 : vector<8xf32> to vector<8x1xf32>
    %39 = vector.broadcast %38 : vector<8x1xf32> to vector<8x8xf32>
    %40 = arith.subf %36, %39 : vector<8x8xf32>
    %41 = math.exp %40 : vector<8x8xf32>
    %cst_17 = arith.constant dense<0.000000e+00> : vector<8xf32>
    %42 = vector.multi_reduction <add>, %41, %cst_17 [1] : vector<8x8xf32> to vector<8xf32>
    %43 = vector.shape_cast %42 : vector<8xf32> to vector<8x1xf32>
    %44 = arith.truncf %41 : vector<8x8xf32> to vector<8x8xbf16>
    %cst_18 = arith.constant dense<0.000000e+00> : vector<8x64xf32>
    %45 = tpu.matmul %44, %33, %cst_18 {dimension_numbers = #tpu.dot_dimension_numbers<[1], [0], [0], [1], [0, 0, 1, 1], [], []>} : vector<8x8xbf16>, vector<8x64xbf16>, vector<8x64xf32> -> vector<8x64xf32>
    %46 = tpu.reciprocal %43 {approx = true} : vector<8x1xf32> -> vector<8x1xf32>
    %47 = vector.broadcast %46 : vector<8x1xf32> to vector<8x64xf32>
    %48 = arith.mulf %45, %47 : vector<8x64xf32>
    %49 = tpu.concatenate %28, %48 in 1 : vector<8x64xf32>, vector<8x64xf32> -> vector<8x128xf32>
    %50 = arith.truncf %49 : vector<8x128xf32> to vector<8x128xbf16>
    %c0_19 = arith.constant 0 : index
    %c0_20 = arith.constant 0 : index
    %c0_21 = arith.constant 0 : index
    %51 = vector.load %arg5[%c0_19, %c0_20, %c0_21] : memref<1x8x128xbf16, #tpu.memory_space<vmem>>, vector<1x8x128xbf16>
    %52 = vector.shape_cast %51 : vector<1x8x128xbf16> to vector<8x128xbf16>
    %53 = vector.shape_cast %50 : vector<8x128xbf16> to vector<1x8x128xbf16>
    tpu.vector_store %arg5[%c0_19, %c0_20, %c0_21], %53 {strides = array<i32>} : memref<1x8x128xbf16, #tpu.memory_space<vmem>>, vector<1x8x128xbf16>,
    return
  }
  func.func @transform_0(%arg0: i32, %arg1: i32) -> (i32, i32, i32) {
    %c0_i32 = arith.constant 0 : i32
    %c0_i32_0 = arith.constant 0 : i32
    return %arg0, %c0_i32, %arg1 : i32, i32, i32
  }
  func.func @transform_1(%arg0: i32, %arg1: i32) -> (i32, i32, i32) {
    %c2_i32 = arith.constant 2 : i32
    %0 = arith.addi %c2_i32, %arg1 : i32
    %c0_i32 = arith.constant 0 : i32
    %c0_i32_0 = arith.constant 0 : i32
    return %arg0, %c0_i32, %0 : i32, i32, i32
  }
  func.func @transform_2(%arg0: i32, %arg1: i32) -> (i32, i32, i32) {
    %c4_i32 = arith.constant 4 : i32
    %0 = arith.addi %c4_i32, %arg1 : i32
    %c0_i32 = arith.constant 0 : i32
    %c0_i32_0 = arith.constant 0 : i32
    return %arg0, %c0_i32, %0 : i32, i32, i32
  }
  func.func @transform_3(%arg0: i32, %arg1: i32) -> (i32, i32, i32) {
    %c0_i32 = arith.constant 0 : i32
    %c0_i32_0 = arith.constant 0 : i32
    return %arg0, %c0_i32, %arg1 : i32, i32, i32
  }
}

module attributes {stable_mosaic.version = 11 : i64} {
  func.func @_dense_kernel(%arg0: i32, %arg1: i32, %arg2: i32, %arg3: memref<16x256xbf16, #tpu.memory_space<vmem>>, %arg4: memref<256x256xbf16, #tpu.memory_space<vmem>>, %arg5: memref<1x256xf32, #tpu.memory_space<vmem>>, %arg6: memref<16x256xbf16, #tpu.memory_space<vmem>>, %arg7: memref<16x256xbf16, #tpu.memory_space<vmem>>) attributes {dimension_semantics = [#tpu.dimension_semantics<parallel>, #tpu.dimension_semantics<parallel>, #tpu.dimension_semantics<arbitrary>], iteration_bounds = array<i64: 1, 1, 1>, scalar_prefetch = 0 : i64, scratch_operands = 0 : i64, tpu.core_type = #tpu.core_type<tc>, window_params = [{transform_indices = @transform_0, window_bounds = array<i64: 16, 256>}, {transform_indices = @transform_1, window_bounds = array<i64: 256, 256>}, {transform_indices = @transform_2, window_bounds = array<i64: 1, 256>}, {transform_indices = @transform_3, window_bounds = array<i64: 16, 256>}, {transform_indices = @transform_4, window_bounds = array<i64: 16, 256>}]} {
    %c0 = arith.constant 0 : index
    %c0_0 = arith.constant 0 : index
    %0 = vector.load %arg3[%c0, %c0_0] : memref<16x256xbf16, #tpu.memory_space<vmem>>, vector<16x256xbf16>
    %c0_1 = arith.constant 0 : index
    %c0_2 = arith.constant 0 : index
    %1 = vector.load %arg4[%c0_1, %c0_2] : memref<256x256xbf16, #tpu.memory_space<vmem>>, vector<256x256xbf16>
    %cst = arith.constant dense<0.000000e+00> : vector<16x256xf32>
    %2 = tpu.matmul %0, %1, %cst {dimension_numbers = #tpu.dot_dimension_numbers<[1], [0], [0], [1], [0, 0, 1, 1], [], []>} : vector<16x256xbf16>, vector<256x256xbf16>, vector<16x256xf32> -> vector<16x256xf32>
    %c0_3 = arith.constant 0 : index
    %c0_4 = arith.constant 0 : index
    %3 = vector.load %arg5[%c0_3, %c0_4] : memref<1x256xf32, #tpu.memory_space<vmem>>, vector<1x256xf32>
    %4 = vector.broadcast %3 : vector<1x256xf32> to vector<16x256xf32>
    %5 = arith.addf %2, %4 : vector<16x256xf32>
    %c0_5 = arith.constant 0 : index
    %c0_6 = arith.constant 0 : index
    %6 = vector.load %arg6[%c0_5, %c0_6] : memref<16x256xbf16, #tpu.memory_space<vmem>>, vector<16x256xbf16>
    %7 = arith.extf %6 : vector<16x256xbf16> to vector<16x256xf32>
    %8 = arith.addf %5, %7 : vector<16x256xf32>
    %9 = arith.truncf %8 : vector<16x256xf32> to vector<16x256xbf16>
    %c0_7 = arith.constant 0 : index
    %c0_8 = arith.constant 0 : index
    %10 = vector.load %arg7[%c0_7, %c0_8] : memref<16x256xbf16, #tpu.memory_space<vmem>>, vector<16x256xbf16>
    tpu.vector_store %arg7[%c0_7, %c0_8], %9 {strides = array<i32>} : memref<16x256xbf16, #tpu.memory_space<vmem>>, vector<16x256xbf16>,
    return
  }
  func.func @transform_0(%arg0: i32, %arg1: i32, %arg2: i32) -> (i32, i32) {
    %c0_i32 = arith.constant 0 : i32
    return %arg0, %arg2 : i32, i32
  }
  func.func @transform_1(%arg0: i32, %arg1: i32, %arg2: i32) -> (i32, i32) {
    %c0_i32 = arith.constant 0 : i32
    return %arg2, %arg1 : i32, i32
  }
  func.func @transform_2(%arg0: i32, %arg1: i32, %arg2: i32) -> (i32, i32) {
    %c0_i32 = arith.constant 0 : i32
    %c0_i32_0 = arith.constant 0 : i32
    return %c0_i32, %arg1 : i32, i32
  }
  func.func @transform_3(%arg0: i32, %arg1: i32, %arg2: i32) -> (i32, i32) {
    %c0_i32 = arith.constant 0 : i32
    return %arg0, %arg1 : i32, i32
  }
  func.func @transform_4(%arg0: i32, %arg1: i32, %arg2: i32) -> (i32, i32) {
    %c0_i32 = arith.constant 0 : i32
    return %arg0, %arg1 : i32, i32
  }
}

module attributes {stable_mosaic.version = 11 : i64} {
  func.func @_dense_kernel(%arg0: i32, %arg1: i32, %arg2: i32, %arg3: memref<16x256xbf16, #tpu.memory_space<vmem>>, %arg4: memref<256x768xbf16, #tpu.memory_space<vmem>>, %arg5: memref<1x768xf32, #tpu.memory_space<vmem>>, %arg6: memref<1x256xf32, #tpu.memory_space<vmem>>, %arg7: memref<1x256xf32, #tpu.memory_space<vmem>>, %arg8: memref<16x768xbf16, #tpu.memory_space<vmem>>) attributes {dimension_semantics = [#tpu.dimension_semantics<parallel>, #tpu.dimension_semantics<parallel>, #tpu.dimension_semantics<arbitrary>], iteration_bounds = array<i64: 1, 1, 1>, scalar_prefetch = 0 : i64, scratch_operands = 0 : i64, tpu.core_type = #tpu.core_type<tc>, window_params = [{transform_indices = @transform_0, window_bounds = array<i64: 16, 256>}, {transform_indices = @transform_1, window_bounds = array<i64: 256, 768>}, {transform_indices = @transform_2, window_bounds = array<i64: 1, 768>}, {transform_indices = @transform_3, window_bounds = array<i64: 1, 256>}, {transform_indices = @transform_4, window_bounds = array<i64: 1, 256>}, {transform_indices = @transform_5, window_bounds = array<i64: 16, 768>}]} {
    %c0 = arith.constant 0 : index
    %c0_0 = arith.constant 0 : index
    %0 = vector.load %arg3[%c0, %c0_0] : memref<16x256xbf16, #tpu.memory_space<vmem>>, vector<16x256xbf16>
    %1 = arith.extf %0 : vector<16x256xbf16> to vector<16x256xf32>
    %cst = arith.constant dense<0.000000e+00> : vector<16xf32>
    %2 = vector.multi_reduction <add>, %1, %cst [1] : vector<16x256xf32> to vector<16xf32>
    %3 = vector.shape_cast %2 : vector<16xf32> to vector<16x1xf32>
    %cst_1 = arith.constant 2.560000e+02 : f32
    %4 = vector.broadcast %cst_1 : f32 to vector<16x1xf32>
    %5 = arith.divf %3, %4 : vector<16x1xf32>
    %6 = vector.broadcast %5 : vector<16x1xf32> to vector<16x256xf32>
    %7 = arith.subf %1, %6 : vector<16x256xf32>
    %8 = arith.mulf %7, %7 : vector<16x256xf32>
    %cst_2 = arith.constant dense<0.000000e+00> : vector<16xf32>
    %9 = vector.multi_reduction <add>, %8, %cst_2 [1] : vector<16x256xf32> to vector<16xf32>
    %10 = vector.shape_cast %9 : vector<16xf32> to vector<16x1xf32>
    %cst_3 = arith.constant 2.560000e+02 : f32
    %11 = vector.broadcast %cst_3 : f32 to vector<16x1xf32>
    %12 = arith.divf %10, %11 : vector<16x1xf32>
    %13 = vector.broadcast %5 : vector<16x1xf32> to vector<16x256xf32>
    %14 = arith.subf %1, %13 : vector<16x256xf32>
    %cst_4 = arith.constant 9.99999974E-6 : f32
    %15 = vector.broadcast %cst_4 : f32 to vector<16x1xf32>
    %16 = arith.addf %12, %15 : vector<16x1xf32>
    %17 = math.rsqrt %16 : vector<16x1xf32>
    %18 = vector.broadcast %17 : vector<16x1xf32> to vector<16x256xf32>
    %19 = arith.mulf %14, %18 : vector<16x256xf32>
    %c0_5 = arith.constant 0 : index
    %c0_6 = arith.constant 0 : index
    %20 = vector.load %arg6[%c0_5, %c0_6] : memref<1x256xf32, #tpu.memory_space<vmem>>, vector<1x256xf32>
    %21 = vector.broadcast %20 : vector<1x256xf32> to vector<16x256xf32>
    %22 = arith.mulf %19, %21 : vector<16x256xf32>
    %c0_7 = arith.constant 0 : index
    %c0_8 = arith.constant 0 : index
    %23 = vector.load %arg7[%c0_7, %c0_8] : memref<1x256xf32, #tpu.memory_space<vmem>>, vector<1x256xf32>
    %24 = vector.broadcast %23 : vector<1x256xf32> to vector<16x256xf32>
    %25 = arith.addf %22, %24 : vector<16x256xf32>
    %26 = arith.truncf %25 : vector<16x256xf32> to vector<16x256xbf16>
    %c0_9 = arith.constant 0 : index
    %c0_10 = arith.constant 0 : index
    %27 = vector.load %arg4[%c0_9, %c0_10] : memref<256x768xbf16, #tpu.memory_space<vmem>>, vector<256x768xbf16>
    %cst_11 = arith.constant dense<0.000000e+00> : vector<16x768xf32>
    %28 = tpu.matmul %26, %27, %cst_11 {dimension_numbers = #tpu.dot_dimension_numbers<[1], [0], [0], [1], [0, 0, 1, 1], [], []>} : vector<16x256xbf16>, vector<256x768xbf16>, vector<16x768xf32> -> vector<16x768xf32>
    %c0_12 = arith.constant 0 : index
    %c0_13 = arith.constant 0 : index
    %29 = vector.load %arg5[%c0_12, %c0_13] : memref<1x768xf32, #tpu.memory_space<vmem>>, vector<1x768xf32>
    %30 = vector.broadcast %29 : vector<1x768xf32> to vector<16x768xf32>
    %31 = arith.addf %28, %30 : vector<16x768xf32>
    %32 = arith.truncf %31 : vector<16x768xf32> to vector<16x768xbf16>
    %c0_14 = arith.constant 0 : index
    %c0_15 = arith.constant 0 : index
    %33 = vector.load %arg8[%c0_14, %c0_15] : memref<16x768xbf16, #tpu.memory_space<vmem>>, vector<16x768xbf16>
    tpu.vector_store %arg8[%c0_14, %c0_15], %32 {strides = array<i32>} : memref<16x768xbf16, #tpu.memory_space<vmem>>, vector<16x768xbf16>,
    return
  }
  func.func @transform_0(%arg0: i32, %arg1: i32, %arg2: i32) -> (i32, i32) {
    %c0_i32 = arith.constant 0 : i32
    return %arg0, %arg2 : i32, i32
  }
  func.func @transform_1(%arg0: i32, %arg1: i32, %arg2: i32) -> (i32, i32) {
    %c0_i32 = arith.constant 0 : i32
    return %arg2, %arg1 : i32, i32
  }
  func.func @transform_2(%arg0: i32, %arg1: i32, %arg2: i32) -> (i32, i32) {
    %c0_i32 = arith.constant 0 : i32
    %c0_i32_0 = arith.constant 0 : i32
    return %c0_i32, %arg1 : i32, i32
  }
  func.func @transform_3(%arg0: i32, %arg1: i32, %arg2: i32) -> (i32, i32) {
    %c0_i32 = arith.constant 0 : i32
    %c0_i32_0 = arith.constant 0 : i32
    return %c0_i32, %arg2 : i32, i32
  }
  func.func @transform_4(%arg0: i32, %arg1: i32, %arg2: i32) -> (i32, i32) {
    %c0_i32 = arith.constant 0 : i32
    %c0_i32_0 = arith.constant 0 : i32
    return %c0_i32, %arg2 : i32, i32
  }
  func.func @transform_5(%arg0: i32, %arg1: i32, %arg2: i32) -> (i32, i32) {
    %c0_i32 = arith.constant 0 : i32
    return %arg0, %arg1 : i32, i32
  }
}

module attributes {stable_mosaic.version = 11 : i64} {
  func.func @_dense_kernel(%arg0: i32, %arg1: i32, %arg2: i32, %arg3: memref<16x256xbf16, #tpu.memory_space<vmem>>, %arg4: memref<256x1024xbf16, #tpu.memory_space<vmem>>, %arg5: memref<1x1024xf32, #tpu.memory_space<vmem>>, %arg6: memref<1x256xf32, #tpu.memory_space<vmem>>, %arg7: memref<1x256xf32, #tpu.memory_space<vmem>>, %arg8: memref<16x1024xbf16, #tpu.memory_space<vmem>>) attributes {dimension_semantics = [#tpu.dimension_semantics<parallel>, #tpu.dimension_semantics<parallel>, #tpu.dimension_semantics<arbitrary>], iteration_bounds = array<i64: 1, 1, 1>, scalar_prefetch = 0 : i64, scratch_operands = 0 : i64, tpu.core_type = #tpu.core_type<tc>, window_params = [{transform_indices = @transform_0, window_bounds = array<i64: 16, 256>}, {transform_indices = @transform_1, window_bounds = array<i64: 256, 1024>}, {transform_indices = @transform_2, window_bounds = array<i64: 1, 1024>}, {transform_indices = @transform_3, window_bounds = array<i64: 1, 256>}, {transform_indices = @transform_4, window_bounds = array<i64: 1, 256>}, {transform_indices = @transform_5, window_bounds = array<i64: 16, 1024>}]} {
    %c0 = arith.constant 0 : index
    %c0_0 = arith.constant 0 : index
    %0 = vector.load %arg3[%c0, %c0_0] : memref<16x256xbf16, #tpu.memory_space<vmem>>, vector<16x256xbf16>
    %1 = arith.extf %0 : vector<16x256xbf16> to vector<16x256xf32>
    %cst = arith.constant dense<0.000000e+00> : vector<16xf32>
    %2 = vector.multi_reduction <add>, %1, %cst [1] : vector<16x256xf32> to vector<16xf32>
    %3 = vector.shape_cast %2 : vector<16xf32> to vector<16x1xf32>
    %cst_1 = arith.constant 2.560000e+02 : f32
    %4 = vector.broadcast %cst_1 : f32 to vector<16x1xf32>
    %5 = arith.divf %3, %4 : vector<16x1xf32>
    %6 = vector.broadcast %5 : vector<16x1xf32> to vector<16x256xf32>
    %7 = arith.subf %1, %6 : vector<16x256xf32>
    %8 = arith.mulf %7, %7 : vector<16x256xf32>
    %cst_2 = arith.constant dense<0.000000e+00> : vector<16xf32>
    %9 = vector.multi_reduction <add>, %8, %cst_2 [1] : vector<16x256xf32> to vector<16xf32>
    %10 = vector.shape_cast %9 : vector<16xf32> to vector<16x1xf32>
    %cst_3 = arith.constant 2.560000e+02 : f32
    %11 = vector.broadcast %cst_3 : f32 to vector<16x1xf32>
    %12 = arith.divf %10, %11 : vector<16x1xf32>
    %13 = vector.broadcast %5 : vector<16x1xf32> to vector<16x256xf32>
    %14 = arith.subf %1, %13 : vector<16x256xf32>
    %cst_4 = arith.constant 9.99999974E-6 : f32
    %15 = vector.broadcast %cst_4 : f32 to vector<16x1xf32>
    %16 = arith.addf %12, %15 : vector<16x1xf32>
    %17 = math.rsqrt %16 : vector<16x1xf32>
    %18 = vector.broadcast %17 : vector<16x1xf32> to vector<16x256xf32>
    %19 = arith.mulf %14, %18 : vector<16x256xf32>
    %c0_5 = arith.constant 0 : index
    %c0_6 = arith.constant 0 : index
    %20 = vector.load %arg6[%c0_5, %c0_6] : memref<1x256xf32, #tpu.memory_space<vmem>>, vector<1x256xf32>
    %21 = vector.broadcast %20 : vector<1x256xf32> to vector<16x256xf32>
    %22 = arith.mulf %19, %21 : vector<16x256xf32>
    %c0_7 = arith.constant 0 : index
    %c0_8 = arith.constant 0 : index
    %23 = vector.load %arg7[%c0_7, %c0_8] : memref<1x256xf32, #tpu.memory_space<vmem>>, vector<1x256xf32>
    %24 = vector.broadcast %23 : vector<1x256xf32> to vector<16x256xf32>
    %25 = arith.addf %22, %24 : vector<16x256xf32>
    %26 = arith.truncf %25 : vector<16x256xf32> to vector<16x256xbf16>
    %c0_9 = arith.constant 0 : index
    %c0_10 = arith.constant 0 : index
    %27 = vector.load %arg4[%c0_9, %c0_10] : memref<256x1024xbf16, #tpu.memory_space<vmem>>, vector<256x1024xbf16>
    %cst_11 = arith.constant dense<0.000000e+00> : vector<16x1024xf32>
    %28 = tpu.matmul %26, %27, %cst_11 {dimension_numbers = #tpu.dot_dimension_numbers<[1], [0], [0], [1], [0, 0, 1, 1], [], []>} : vector<16x256xbf16>, vector<256x1024xbf16>, vector<16x1024xf32> -> vector<16x1024xf32>
    %c0_12 = arith.constant 0 : index
    %c0_13 = arith.constant 0 : index
    %29 = vector.load %arg5[%c0_12, %c0_13] : memref<1x1024xf32, #tpu.memory_space<vmem>>, vector<1x1024xf32>
    %30 = vector.broadcast %29 : vector<1x1024xf32> to vector<16x1024xf32>
    %31 = arith.addf %28, %30 : vector<16x1024xf32>
    %cst_14 = arith.constant 5.000000e-01 : f32
    %32 = vector.broadcast %cst_14 : f32 to vector<16x1024xf32>
    %33 = arith.mulf %32, %31 : vector<16x1024xf32>
    %cst_15 = arith.constant 4.471500e-02 : f32
    %34 = vector.broadcast %cst_15 : f32 to vector<16x1024xf32>
    %35 = arith.mulf %34, %31 : vector<16x1024xf32>
    %36 = arith.mulf %35, %31 : vector<16x1024xf32>
    %37 = arith.mulf %36, %31 : vector<16x1024xf32>
    %38 = arith.addf %31, %37 : vector<16x1024xf32>
    %cst_16 = arith.constant 0.797884583 : f32
    %39 = vector.broadcast %cst_16 : f32 to vector<16x1024xf32>
    %40 = arith.mulf %39, %38 : vector<16x1024xf32>
    %41 = math.tanh %40 : vector<16x1024xf32>
    %cst_17 = arith.constant 1.000000e+00 : f32
    %42 = vector.broadcast %cst_17 : f32 to vector<16x1024xf32>
    %43 = arith.addf %42, %41 : vector<16x1024xf32>
    %44 = arith.mulf %33, %43 : vector<16x1024xf32>
    %45 = arith.truncf %44 : vector<16x1024xf32> to vector<16x1024xbf16>
    %c0_18 = arith.constant 0 : index
    %c0_19 = arith.constant 0 : index
    %46 = vector.load %arg8[%c0_18, %c0_19] : memref<16x1024xbf16, #tpu.memory_space<vmem>>, vector<16x1024xbf16>
    tpu.vector_store %arg8[%c0_18, %c0_19], %45 {strides = array<i32>} : memref<16x1024xbf16, #tpu.memory_space<vmem>>, vector<16x1024xbf16>,
    return
  }
  func.func @transform_0(%arg0: i32, %arg1: i32, %arg2: i32) -> (i32, i32) {
    %c0_i32 = arith.constant 0 : i32
    return %arg0, %arg2 : i32, i32
  }
  func.func @transform_1(%arg0: i32, %arg1: i32, %arg2: i32) -> (i32, i32) {
    %c0_i32 = arith.constant 0 : i32
    return %arg2, %arg1 : i32, i32
  }
  func.func @transform_2(%arg0: i32, %arg1: i32, %arg2: i32) -> (i32, i32) {
    %c0_i32 = arith.constant 0 : i32
    %c0_i32_0 = arith.constant 0 : i32
    return %c0_i32, %arg1 : i32, i32
  }
  func.func @transform_3(%arg0: i32, %arg1: i32, %arg2: i32) -> (i32, i32) {
    %c0_i32 = arith.constant 0 : i32
    %c0_i32_0 = arith.constant 0 : i32
    return %c0_i32, %arg2 : i32, i32
  }
  func.func @transform_4(%arg0: i32, %arg1: i32, %arg2: i32) -> (i32, i32) {
    %c0_i32 = arith.constant 0 : i32
    %c0_i32_0 = arith.constant 0 : i32
    return %c0_i32, %arg2 : i32, i32
  }
  func.func @transform_5(%arg0: i32, %arg1: i32, %arg2: i32) -> (i32, i32) {
    %c0_i32 = arith.constant 0 : i32
    return %arg0, %arg1 : i32, i32
  }
}

module attributes {stable_mosaic.version = 11 : i64} {
  func.func @_dense_kernel(%arg0: i32, %arg1: i32, %arg2: i32, %arg3: memref<16x1024xbf16, #tpu.memory_space<vmem>>, %arg4: memref<1024x256xbf16, #tpu.memory_space<vmem>>, %arg5: memref<1x256xf32, #tpu.memory_space<vmem>>, %arg6: memref<16x256xbf16, #tpu.memory_space<vmem>>, %arg7: memref<16x256xbf16, #tpu.memory_space<vmem>>) attributes {dimension_semantics = [#tpu.dimension_semantics<parallel>, #tpu.dimension_semantics<parallel>, #tpu.dimension_semantics<arbitrary>], iteration_bounds = array<i64: 1, 1, 1>, scalar_prefetch = 0 : i64, scratch_operands = 0 : i64, tpu.core_type = #tpu.core_type<tc>, window_params = [{transform_indices = @transform_0, window_bounds = array<i64: 16, 1024>}, {transform_indices = @transform_1, window_bounds = array<i64: 1024, 256>}, {transform_indices = @transform_2, window_bounds = array<i64: 1, 256>}, {transform_indices = @transform_3, window_bounds = array<i64: 16, 256>}, {transform_indices = @transform_4, window_bounds = array<i64: 16, 256>}]} {
    %c0 = arith.constant 0 : index
    %c0_0 = arith.constant 0 : index
    %0 = vector.load %arg3[%c0, %c0_0] : memref<16x1024xbf16, #tpu.memory_space<vmem>>, vector<16x1024xbf16>
    %c0_1 = arith.constant 0 : index
    %c0_2 = arith.constant 0 : index
    %1 = vector.load %arg4[%c0_1, %c0_2] : memref<1024x256xbf16, #tpu.memory_space<vmem>>, vector<1024x256xbf16>
    %cst = arith.constant dense<0.000000e+00> : vector<16x256xf32>
    %2 = tpu.matmul %0, %1, %cst {dimension_numbers = #tpu.dot_dimension_numbers<[1], [0], [0], [1], [0, 0, 1, 1], [], []>} : vector<16x1024xbf16>, vector<1024x256xbf16>, vector<16x256xf32> -> vector<16x256xf32>
    %c0_3 = arith.constant 0 : index
    %c0_4 = arith.constant 0 : index
    %3 = vector.load %arg5[%c0_3, %c0_4] : memref<1x256xf32, #tpu.memory_space<vmem>>, vector<1x256xf32>
    %4 = vector.broadcast %3 : vector<1x256xf32> to vector<16x256xf32>
    %5 = arith.addf %2, %4 : vector<16x256xf32>
    %c0_5 = arith.constant 0 : index
    %c0_6 = arith.constant 0 : index
    %6 = vector.load %arg6[%c0_5, %c0_6] : memref<16x256xbf16, #tpu.memory_space<vmem>>, vector<16x256xbf16>
    %7 = arith.extf %6 : vector<16x256xbf16> to vector<16x256xf32>
    %8 = arith.addf %5, %7 : vector<16x256xf32>
    %9 = arith.truncf %8 : vector<16x256xf32> to vector<16x256xbf16>
    %c0_7 = arith.constant 0 : index
    %c0_8 = arith.constant 0 : index
    %10 = vector.load %arg7[%c0_7, %c0_8] : memref<16x256xbf16, #tpu.memory_space<vmem>>, vector<16x256xbf16>
    tpu.vector_store %arg7[%c0_7, %c0_8], %9 {strides = array<i32>} : memref<16x256xbf16, #tpu.memory_space<vmem>>, vector<16x256xbf16>,
    return
  }
  func.func @transform_0(%arg0: i32, %arg1: i32, %arg2: i32) -> (i32, i32) {
    %c0_i32 = arith.constant 0 : i32
    return %arg0, %arg2 : i32, i32
  }
  func.func @transform_1(%arg0: i32, %arg1: i32, %arg2: i32) -> (i32, i32) {
    %c0_i32 = arith.constant 0 : i32
    return %arg2, %arg1 : i32, i32
  }
  func.func @transform_2(%arg0: i32, %arg1: i32, %arg2: i32) -> (i32, i32) {
    %c0_i32 = arith.constant 0 : i32
    %c0_i32_0 = arith.constant 0 : i32
    return %c0_i32, %arg1 : i32, i32
  }
  func.func @transform_3(%arg0: i32, %arg1: i32, %arg2: i32) -> (i32, i32) {
    %c0_i32 = arith.constant 0 : i32
    return %arg0, %arg1 : i32, i32
  }
  func.func @transform_4(%arg0: i32, %arg1: i32, %arg2: i32) -> (i32, i32) {
    %c0_i32 = arith.constant 0 : i32
    return %arg0, %arg1 : i32, i32
  }
}

module attributes {stable_mosaic.version = 11 : i64} {
  func.func @_dense_kernel(%arg0: i32, %arg1: i32, %arg2: i32, %arg3: memref<16x256xbf16, #tpu.memory_space<vmem>>, %arg4: memref<256x768xbf16, #tpu.memory_space<vmem>>, %arg5: memref<1x768xf32, #tpu.memory_space<vmem>>, %arg6: memref<1x256xf32, #tpu.memory_space<vmem>>, %arg7: memref<1x256xf32, #tpu.memory_space<vmem>>, %arg8: memref<16x768xbf16, #tpu.memory_space<vmem>>) attributes {dimension_semantics = [#tpu.dimension_semantics<parallel>, #tpu.dimension_semantics<parallel>, #tpu.dimension_semantics<arbitrary>], iteration_bounds = array<i64: 1, 1, 1>, scalar_prefetch = 0 : i64, scratch_operands = 0 : i64, tpu.core_type = #tpu.core_type<tc>, window_params = [{transform_indices = @transform_0, window_bounds = array<i64: 16, 256>}, {transform_indices = @transform_1, window_bounds = array<i64: 256, 768>}, {transform_indices = @transform_2, window_bounds = array<i64: 1, 768>}, {transform_indices = @transform_3, window_bounds = array<i64: 1, 256>}, {transform_indices = @transform_4, window_bounds = array<i64: 1, 256>}, {transform_indices = @transform_5, window_bounds = array<i64: 16, 768>}]} {
    %c0 = arith.constant 0 : index
    %c0_0 = arith.constant 0 : index
    %0 = vector.load %arg3[%c0, %c0_0] : memref<16x256xbf16, #tpu.memory_space<vmem>>, vector<16x256xbf16>
    %1 = arith.extf %0 : vector<16x256xbf16> to vector<16x256xf32>
    %cst = arith.constant dense<0.000000e+00> : vector<16xf32>
    %2 = vector.multi_reduction <add>, %1, %cst [1] : vector<16x256xf32> to vector<16xf32>
    %3 = vector.shape_cast %2 : vector<16xf32> to vector<16x1xf32>
    %cst_1 = arith.constant 2.560000e+02 : f32
    %4 = vector.broadcast %cst_1 : f32 to vector<16x1xf32>
    %5 = arith.divf %3, %4 : vector<16x1xf32>
    %6 = vector.broadcast %5 : vector<16x1xf32> to vector<16x256xf32>
    %7 = arith.subf %1, %6 : vector<16x256xf32>
    %8 = arith.mulf %7, %7 : vector<16x256xf32>
    %cst_2 = arith.constant dense<0.000000e+00> : vector<16xf32>
    %9 = vector.multi_reduction <add>, %8, %cst_2 [1] : vector<16x256xf32> to vector<16xf32>
    %10 = vector.shape_cast %9 : vector<16xf32> to vector<16x1xf32>
    %cst_3 = arith.constant 2.560000e+02 : f32
    %11 = vector.broadcast %cst_3 : f32 to vector<16x1xf32>
    %12 = arith.divf %10, %11 : vector<16x1xf32>
    %13 = vector.broadcast %5 : vector<16x1xf32> to vector<16x256xf32>
    %14 = arith.subf %1, %13 : vector<16x256xf32>
    %cst_4 = arith.constant 9.99999974E-6 : f32
    %15 = vector.broadcast %cst_4 : f32 to vector<16x1xf32>
    %16 = arith.addf %12, %15 : vector<16x1xf32>
    %17 = math.rsqrt %16 : vector<16x1xf32>
    %18 = vector.broadcast %17 : vector<16x1xf32> to vector<16x256xf32>
    %19 = arith.mulf %14, %18 : vector<16x256xf32>
    %c0_5 = arith.constant 0 : index
    %c0_6 = arith.constant 0 : index
    %20 = vector.load %arg6[%c0_5, %c0_6] : memref<1x256xf32, #tpu.memory_space<vmem>>, vector<1x256xf32>
    %21 = vector.broadcast %20 : vector<1x256xf32> to vector<16x256xf32>
    %22 = arith.mulf %19, %21 : vector<16x256xf32>
    %c0_7 = arith.constant 0 : index
    %c0_8 = arith.constant 0 : index
    %23 = vector.load %arg7[%c0_7, %c0_8] : memref<1x256xf32, #tpu.memory_space<vmem>>, vector<1x256xf32>
    %24 = vector.broadcast %23 : vector<1x256xf32> to vector<16x256xf32>
    %25 = arith.addf %22, %24 : vector<16x256xf32>
    %26 = arith.truncf %25 : vector<16x256xf32> to vector<16x256xbf16>
    %c0_9 = arith.constant 0 : index
    %c0_10 = arith.constant 0 : index
    %27 = vector.load %arg4[%c0_9, %c0_10] : memref<256x768xbf16, #tpu.memory_space<vmem>>, vector<256x768xbf16>
    %cst_11 = arith.constant dense<0.000000e+00> : vector<16x768xf32>
    %28 = tpu.matmul %26, %27, %cst_11 {dimension_numbers = #tpu.dot_dimension_numbers<[1], [0], [0], [1], [0, 0, 1, 1], [], []>} : vector<16x256xbf16>, vector<256x768xbf16>, vector<16x768xf32> -> vector<16x768xf32>
    %c0_12 = arith.constant 0 : index
    %c0_13 = arith.constant 0 : index
    %29 = vector.load %arg5[%c0_12, %c0_13] : memref<1x768xf32, #tpu.memory_space<vmem>>, vector<1x768xf32>
    %30 = vector.broadcast %29 : vector<1x768xf32> to vector<16x768xf32>
    %31 = arith.addf %28, %30 : vector<16x768xf32>
    %32 = arith.truncf %31 : vector<16x768xf32> to vector<16x768xbf16>
    %c0_14 = arith.constant 0 : index
    %c0_15 = arith.constant 0 : index
    %33 = vector.load %arg8[%c0_14, %c0_15] : memref<16x768xbf16, #tpu.memory_space<vmem>>, vector<16x768xbf16>
    tpu.vector_store %arg8[%c0_14, %c0_15], %32 {strides = array<i32>} : memref<16x768xbf16, #tpu.memory_space<vmem>>, vector<16x768xbf16>,
    return
  }
  func.func @transform_0(%arg0: i32, %arg1: i32, %arg2: i32) -> (i32, i32) {
    %c0_i32 = arith.constant 0 : i32
    return %arg0, %arg2 : i32, i32
  }
  func.func @transform_1(%arg0: i32, %arg1: i32, %arg2: i32) -> (i32, i32) {
    %c0_i32 = arith.constant 0 : i32
    return %arg2, %arg1 : i32, i32
  }
  func.func @transform_2(%arg0: i32, %arg1: i32, %arg2: i32) -> (i32, i32) {
    %c0_i32 = arith.constant 0 : i32
    %c0_i32_0 = arith.constant 0 : i32
    return %c0_i32, %arg1 : i32, i32
  }
  func.func @transform_3(%arg0: i32, %arg1: i32, %arg2: i32) -> (i32, i32) {
    %c0_i32 = arith.constant 0 : i32
    %c0_i32_0 = arith.constant 0 : i32
    return %c0_i32, %arg2 : i32, i32
  }
  func.func @transform_4(%arg0: i32, %arg1: i32, %arg2: i32) -> (i32, i32) {
    %c0_i32 = arith.constant 0 : i32
    %c0_i32_0 = arith.constant 0 : i32
    return %c0_i32, %arg2 : i32, i32
  }
  func.func @transform_5(%arg0: i32, %arg1: i32, %arg2: i32) -> (i32, i32) {
    %c0_i32 = arith.constant 0 : i32
    return %arg0, %arg1 : i32, i32
  }
}

module attributes {stable_mosaic.version = 11 : i64} {
  func.func @_dense_kernel(%arg0: i32, %arg1: i32, %arg2: i32, %arg3: memref<16x256xbf16, #tpu.memory_space<vmem>>, %arg4: memref<256x256xbf16, #tpu.memory_space<vmem>>, %arg5: memref<1x256xf32, #tpu.memory_space<vmem>>, %arg6: memref<16x256xbf16, #tpu.memory_space<vmem>>, %arg7: memref<16x256xbf16, #tpu.memory_space<vmem>>) attributes {dimension_semantics = [#tpu.dimension_semantics<parallel>, #tpu.dimension_semantics<parallel>, #tpu.dimension_semantics<arbitrary>], iteration_bounds = array<i64: 1, 1, 1>, scalar_prefetch = 0 : i64, scratch_operands = 0 : i64, tpu.core_type = #tpu.core_type<tc>, window_params = [{transform_indices = @transform_0, window_bounds = array<i64: 16, 256>}, {transform_indices = @transform_1, window_bounds = array<i64: 256, 256>}, {transform_indices = @transform_2, window_bounds = array<i64: 1, 256>}, {transform_indices = @transform_3, window_bounds = array<i64: 16, 256>}, {transform_indices = @transform_4, window_bounds = array<i64: 16, 256>}]} {
    %c0 = arith.constant 0 : index
    %c0_0 = arith.constant 0 : index
    %0 = vector.load %arg3[%c0, %c0_0] : memref<16x256xbf16, #tpu.memory_space<vmem>>, vector<16x256xbf16>
    %c0_1 = arith.constant 0 : index
    %c0_2 = arith.constant 0 : index
    %1 = vector.load %arg4[%c0_1, %c0_2] : memref<256x256xbf16, #tpu.memory_space<vmem>>, vector<256x256xbf16>
    %cst = arith.constant dense<0.000000e+00> : vector<16x256xf32>
    %2 = tpu.matmul %0, %1, %cst {dimension_numbers = #tpu.dot_dimension_numbers<[1], [0], [0], [1], [0, 0, 1, 1], [], []>} : vector<16x256xbf16>, vector<256x256xbf16>, vector<16x256xf32> -> vector<16x256xf32>
    %c0_3 = arith.constant 0 : index
    %c0_4 = arith.constant 0 : index
    %3 = vector.load %arg5[%c0_3, %c0_4] : memref<1x256xf32, #tpu.memory_space<vmem>>, vector<1x256xf32>
    %4 = vector.broadcast %3 : vector<1x256xf32> to vector<16x256xf32>
    %5 = arith.addf %2, %4 : vector<16x256xf32>
    %c0_5 = arith.constant 0 : index
    %c0_6 = arith.constant 0 : index
    %6 = vector.load %arg6[%c0_5, %c0_6] : memref<16x256xbf16, #tpu.memory_space<vmem>>, vector<16x256xbf16>
    %7 = arith.extf %6 : vector<16x256xbf16> to vector<16x256xf32>
    %8 = arith.addf %5, %7 : vector<16x256xf32>
    %9 = arith.truncf %8 : vector<16x256xf32> to vector<16x256xbf16>
    %c0_7 = arith.constant 0 : index
    %c0_8 = arith.constant 0 : index
    %10 = vector.load %arg7[%c0_7, %c0_8] : memref<16x256xbf16, #tpu.memory_space<vmem>>, vector<16x256xbf16>
    tpu.vector_store %arg7[%c0_7, %c0_8], %9 {strides = array<i32>} : memref<16x256xbf16, #tpu.memory_space<vmem>>, vector<16x256xbf16>,
    return
  }
  func.func @transform_0(%arg0: i32, %arg1: i32, %arg2: i32) -> (i32, i32) {
    %c0_i32 = arith.constant 0 : i32
    return %arg0, %arg2 : i32, i32
  }
  func.func @transform_1(%arg0: i32, %arg1: i32, %arg2: i32) -> (i32, i32) {
    %c0_i32 = arith.constant 0 : i32
    return %arg2, %arg1 : i32, i32
  }
  func.func @transform_2(%arg0: i32, %arg1: i32, %arg2: i32) -> (i32, i32) {
    %c0_i32 = arith.constant 0 : i32
    %c0_i32_0 = arith.constant 0 : i32
    return %c0_i32, %arg1 : i32, i32
  }
  func.func @transform_3(%arg0: i32, %arg1: i32, %arg2: i32) -> (i32, i32) {
    %c0_i32 = arith.constant 0 : i32
    return %arg0, %arg1 : i32, i32
  }
  func.func @transform_4(%arg0: i32, %arg1: i32, %arg2: i32) -> (i32, i32) {
    %c0_i32 = arith.constant 0 : i32
    return %arg0, %arg1 : i32, i32
  }
}

module attributes {stable_mosaic.version = 11 : i64} {
  func.func @_dense_kernel(%arg0: i32, %arg1: i32, %arg2: i32, %arg3: memref<16x256xbf16, #tpu.memory_space<vmem>>, %arg4: memref<256x1024xbf16, #tpu.memory_space<vmem>>, %arg5: memref<1x1024xf32, #tpu.memory_space<vmem>>, %arg6: memref<1x256xf32, #tpu.memory_space<vmem>>, %arg7: memref<1x256xf32, #tpu.memory_space<vmem>>, %arg8: memref<16x1024xbf16, #tpu.memory_space<vmem>>) attributes {dimension_semantics = [#tpu.dimension_semantics<parallel>, #tpu.dimension_semantics<parallel>, #tpu.dimension_semantics<arbitrary>], iteration_bounds = array<i64: 1, 1, 1>, scalar_prefetch = 0 : i64, scratch_operands = 0 : i64, tpu.core_type = #tpu.core_type<tc>, window_params = [{transform_indices = @transform_0, window_bounds = array<i64: 16, 256>}, {transform_indices = @transform_1, window_bounds = array<i64: 256, 1024>}, {transform_indices = @transform_2, window_bounds = array<i64: 1, 1024>}, {transform_indices = @transform_3, window_bounds = array<i64: 1, 256>}, {transform_indices = @transform_4, window_bounds = array<i64: 1, 256>}, {transform_indices = @transform_5, window_bounds = array<i64: 16, 1024>}]} {
    %c0 = arith.constant 0 : index
    %c0_0 = arith.constant 0 : index
    %0 = vector.load %arg3[%c0, %c0_0] : memref<16x256xbf16, #tpu.memory_space<vmem>>, vector<16x256xbf16>
    %1 = arith.extf %0 : vector<16x256xbf16> to vector<16x256xf32>
    %cst = arith.constant dense<0.000000e+00> : vector<16xf32>
    %2 = vector.multi_reduction <add>, %1, %cst [1] : vector<16x256xf32> to vector<16xf32>
    %3 = vector.shape_cast %2 : vector<16xf32> to vector<16x1xf32>
    %cst_1 = arith.constant 2.560000e+02 : f32
    %4 = vector.broadcast %cst_1 : f32 to vector<16x1xf32>
    %5 = arith.divf %3, %4 : vector<16x1xf32>
    %6 = vector.broadcast %5 : vector<16x1xf32> to vector<16x256xf32>
    %7 = arith.subf %1, %6 : vector<16x256xf32>
    %8 = arith.mulf %7, %7 : vector<16x256xf32>
    %cst_2 = arith.constant dense<0.000000e+00> : vector<16xf32>
    %9 = vector.multi_reduction <add>, %8, %cst_2 [1] : vector<16x256xf32> to vector<16xf32>
    %10 = vector.shape_cast %9 : vector<16xf32> to vector<16x1xf32>
    %cst_3 = arith.constant 2.560000e+02 : f32
    %11 = vector.broadcast %cst_3 : f32 to vector<16x1xf32>
    %12 = arith.divf %10, %11 : vector<16x1xf32>
    %13 = vector.broadcast %5 : vector<16x1xf32> to vector<16x256xf32>
    %14 = arith.subf %1, %13 : vector<16x256xf32>
    %cst_4 = arith.constant 9.99999974E-6 : f32
    %15 = vector.broadcast %cst_4 : f32 to vector<16x1xf32>
    %16 = arith.addf %12, %15 : vector<16x1xf32>
    %17 = math.rsqrt %16 : vector<16x1xf32>
    %18 = vector.broadcast %17 : vector<16x1xf32> to vector<16x256xf32>
    %19 = arith.mulf %14, %18 : vector<16x256xf32>
    %c0_5 = arith.constant 0 : index
    %c0_6 = arith.constant 0 : index
    %20 = vector.load %arg6[%c0_5, %c0_6] : memref<1x256xf32, #tpu.memory_space<vmem>>, vector<1x256xf32>
    %21 = vector.broadcast %20 : vector<1x256xf32> to vector<16x256xf32>
    %22 = arith.mulf %19, %21 : vector<16x256xf32>
    %c0_7 = arith.constant 0 : index
    %c0_8 = arith.constant 0 : index
    %23 = vector.load %arg7[%c0_7, %c0_8] : memref<1x256xf32, #tpu.memory_space<vmem>>, vector<1x256xf32>
    %24 = vector.broadcast %23 : vector<1x256xf32> to vector<16x256xf32>
    %25 = arith.addf %22, %24 : vector<16x256xf32>
    %26 = arith.truncf %25 : vector<16x256xf32> to vector<16x256xbf16>
    %c0_9 = arith.constant 0 : index
    %c0_10 = arith.constant 0 : index
    %27 = vector.load %arg4[%c0_9, %c0_10] : memref<256x1024xbf16, #tpu.memory_space<vmem>>, vector<256x1024xbf16>
    %cst_11 = arith.constant dense<0.000000e+00> : vector<16x1024xf32>
    %28 = tpu.matmul %26, %27, %cst_11 {dimension_numbers = #tpu.dot_dimension_numbers<[1], [0], [0], [1], [0, 0, 1, 1], [], []>} : vector<16x256xbf16>, vector<256x1024xbf16>, vector<16x1024xf32> -> vector<16x1024xf32>
    %c0_12 = arith.constant 0 : index
    %c0_13 = arith.constant 0 : index
    %29 = vector.load %arg5[%c0_12, %c0_13] : memref<1x1024xf32, #tpu.memory_space<vmem>>, vector<1x1024xf32>
    %30 = vector.broadcast %29 : vector<1x1024xf32> to vector<16x1024xf32>
    %31 = arith.addf %28, %30 : vector<16x1024xf32>
    %cst_14 = arith.constant 5.000000e-01 : f32
    %32 = vector.broadcast %cst_14 : f32 to vector<16x1024xf32>
    %33 = arith.mulf %32, %31 : vector<16x1024xf32>
    %cst_15 = arith.constant 4.471500e-02 : f32
    %34 = vector.broadcast %cst_15 : f32 to vector<16x1024xf32>
    %35 = arith.mulf %34, %31 : vector<16x1024xf32>
    %36 = arith.mulf %35, %31 : vector<16x1024xf32>
    %37 = arith.mulf %36, %31 : vector<16x1024xf32>
    %38 = arith.addf %31, %37 : vector<16x1024xf32>
    %cst_16 = arith.constant 0.797884583 : f32
    %39 = vector.broadcast %cst_16 : f32 to vector<16x1024xf32>
    %40 = arith.mulf %39, %38 : vector<16x1024xf32>
    %41 = math.tanh %40 : vector<16x1024xf32>
    %cst_17 = arith.constant 1.000000e+00 : f32
    %42 = vector.broadcast %cst_17 : f32 to vector<16x1024xf32>
    %43 = arith.addf %42, %41 : vector<16x1024xf32>
    %44 = arith.mulf %33, %43 : vector<16x1024xf32>
    %45 = arith.truncf %44 : vector<16x1024xf32> to vector<16x1024xbf16>
    %c0_18 = arith.constant 0 : index
    %c0_19 = arith.constant 0 : index
    %46 = vector.load %arg8[%c0_18, %c0_19] : memref<16x1024xbf16, #tpu.memory_space<vmem>>, vector<16x1024xbf16>
    tpu.vector_store %arg8[%c0_18, %c0_19], %45 {strides = array<i32>} : memref<16x1024xbf16, #tpu.memory_space<vmem>>, vector<16x1024xbf16>,
    return
  }
  func.func @transform_0(%arg0: i32, %arg1: i32, %arg2: i32) -> (i32, i32) {
    %c0_i32 = arith.constant 0 : i32
    return %arg0, %arg2 : i32, i32
  }
  func.func @transform_1(%arg0: i32, %arg1: i32, %arg2: i32) -> (i32, i32) {
    %c0_i32 = arith.constant 0 : i32
    return %arg2, %arg1 : i32, i32
  }
  func.func @transform_2(%arg0: i32, %arg1: i32, %arg2: i32) -> (i32, i32) {
    %c0_i32 = arith.constant 0 : i32
    %c0_i32_0 = arith.constant 0 : i32
    return %c0_i32, %arg1 : i32, i32
  }
  func.func @transform_3(%arg0: i32, %arg1: i32, %arg2: i32) -> (i32, i32) {
    %c0_i32 = arith.constant 0 : i32
    %c0_i32_0 = arith.constant 0 : i32
    return %c0_i32, %arg2 : i32, i32
  }
  func.func @transform_4(%arg0: i32, %arg1: i32, %arg2: i32) -> (i32, i32) {
    %c0_i32 = arith.constant 0 : i32
    %c0_i32_0 = arith.constant 0 : i32
    return %c0_i32, %arg2 : i32, i32
  }
  func.func @transform_5(%arg0: i32, %arg1: i32, %arg2: i32) -> (i32, i32) {
    %c0_i32 = arith.constant 0 : i32
    return %arg0, %arg1 : i32, i32
  }
}

module attributes {stable_mosaic.version = 11 : i64} {
  func.func @_lmhead_xent_kernel(%arg0: i32, %arg1: i32, %arg2: memref<16x256xbf16, #tpu.memory_space<vmem>>, %arg3: memref<256x1024xbf16, #tpu.memory_space<vmem>>, %arg4: memref<1x256xf32, #tpu.memory_space<vmem>>, %arg5: memref<1x256xf32, #tpu.memory_space<vmem>>, %arg6: memref<16x1xi32, #tpu.memory_space<vmem>>, %arg7: memref<16x1xf32, #tpu.memory_space<vmem>>, %arg8: memref<16x1024xbf16, #tpu.memory_space<vmem>>, %arg9: memref<16x1xf32, #tpu.memory_space<vmem>>, %arg10: memref<16x256xbf16, #tpu.memory_space<vmem>>, %arg11: memref<16x1xf32, #tpu.memory_space<vmem>>, %arg12: memref<16x1xf32, #tpu.memory_space<vmem>>, %arg13: memref<16x1xf32, #tpu.memory_space<vmem>>) attributes {dimension_semantics = [#tpu.dimension_semantics<parallel>, #tpu.dimension_semantics<arbitrary>], iteration_bounds = array<i64: 1, 2>, scalar_prefetch = 0 : i64, scratch_operands = 4 : i64, tpu.core_type = #tpu.core_type<tc>, window_params = [{transform_indices = @transform_0, window_bounds = array<i64: 16, 256>}, {transform_indices = @transform_1, window_bounds = array<i64: 256, 1024>}, {pipeline_mode = #tpu.pipeline_mode<synchronous>, transform_indices = @transform_2, window_bounds = array<i64: 1, 256>}, {pipeline_mode = #tpu.pipeline_mode<synchronous>, transform_indices = @transform_3, window_bounds = array<i64: 1, 256>}, {transform_indices = @transform_4, window_bounds = array<i64: 16, 1>}, {transform_indices = @transform_5, window_bounds = array<i64: 16, 1>}, {transform_indices = @transform_6, window_bounds = array<i64: 16, 1024>}, {transform_indices = @transform_7, window_bounds = array<i64: 16, 1>}]} {
    %c0_i32 = arith.constant 0 : i32
    %0 = arith.cmpi eq, %arg1, %c0_i32 : i32
    %1 = arith.extui %0 : i1 to i32
    %c0_i32_0 = arith.constant 0 : i32
    %2 = arith.cmpi ne, %1, %c0_i32_0 : i32
    scf.if %2 {
      %c0_25 = arith.constant 0 : index
      %c0_26 = arith.constant 0 : index
      %41 = vector.load %arg2[%c0_25, %c0_26] : memref<16x256xbf16, #tpu.memory_space<vmem>>, vector<16x256xbf16>
      %42 = arith.extf %41 : vector<16x256xbf16> to vector<16x256xf32>
      %cst_27 = arith.constant dense<0.000000e+00> : vector<16xf32>
      %43 = vector.multi_reduction <add>, %42, %cst_27 [1] : vector<16x256xf32> to vector<16xf32>
      %44 = vector.shape_cast %43 : vector<16xf32> to vector<16x1xf32>
      %cst_28 = arith.constant 2.560000e+02 : f32
      %45 = vector.broadcast %cst_28 : f32 to vector<16x1xf32>
      %46 = arith.divf %44, %45 : vector<16x1xf32>
      %47 = vector.broadcast %46 : vector<16x1xf32> to vector<16x256xf32>
      %48 = arith.subf %42, %47 : vector<16x256xf32>
      %49 = arith.mulf %48, %48 : vector<16x256xf32>
      %cst_29 = arith.constant dense<0.000000e+00> : vector<16xf32>
      %50 = vector.multi_reduction <add>, %49, %cst_29 [1] : vector<16x256xf32> to vector<16xf32>
      %51 = vector.shape_cast %50 : vector<16xf32> to vector<16x1xf32>
      %cst_30 = arith.constant 2.560000e+02 : f32
      %52 = vector.broadcast %cst_30 : f32 to vector<16x1xf32>
      %53 = arith.divf %51, %52 : vector<16x1xf32>
      %54 = vector.broadcast %46 : vector<16x1xf32> to vector<16x256xf32>
      %55 = arith.subf %42, %54 : vector<16x256xf32>
      %cst_31 = arith.constant 9.99999974E-6 : f32
      %56 = vector.broadcast %cst_31 : f32 to vector<16x1xf32>
      %57 = arith.addf %53, %56 : vector<16x1xf32>
      %58 = math.rsqrt %57 : vector<16x1xf32>
      %59 = vector.broadcast %58 : vector<16x1xf32> to vector<16x256xf32>
      %60 = arith.mulf %55, %59 : vector<16x256xf32>
      %c0_32 = arith.constant 0 : index
      %c0_33 = arith.constant 0 : index
      %61 = vector.load %arg4[%c0_32, %c0_33] : memref<1x256xf32, #tpu.memory_space<vmem>>, vector<1x256xf32>
      %62 = vector.broadcast %61 : vector<1x256xf32> to vector<16x256xf32>
      %63 = arith.mulf %60, %62 : vector<16x256xf32>
      %c0_34 = arith.constant 0 : index
      %c0_35 = arith.constant 0 : index
      %64 = vector.load %arg5[%c0_34, %c0_35] : memref<1x256xf32, #tpu.memory_space<vmem>>, vector<1x256xf32>
      %65 = vector.broadcast %64 : vector<1x256xf32> to vector<16x256xf32>
      %66 = arith.addf %63, %65 : vector<16x256xf32>
      %67 = arith.truncf %66 : vector<16x256xf32> to vector<16x256xbf16>
      %c0_36 = arith.constant 0 : index
      %c0_37 = arith.constant 0 : index
      %68 = vector.load %arg10[%c0_36, %c0_37] : memref<16x256xbf16, #tpu.memory_space<vmem>>, vector<16x256xbf16>
      tpu.vector_store %arg10[%c0_36, %c0_37], %67 {strides = array<i32>} : memref<16x256xbf16, #tpu.memory_space<vmem>>, vector<16x256xbf16>,
      %cst_38 = arith.constant -1.000000e+30 : f32
      %69 = vector.broadcast %cst_38 : f32 to vector<16x1xf32>
      %c0_39 = arith.constant 0 : index
      %c0_40 = arith.constant 0 : index
      %70 = vector.load %arg11[%c0_39, %c0_40] : memref<16x1xf32, #tpu.memory_space<vmem>>, vector<16x1xf32>
      tpu.vector_store %arg11[%c0_39, %c0_40], %69 {strides = array<i32>} : memref<16x1xf32, #tpu.memory_space<vmem>>, vector<16x1xf32>,
      %cst_41 = arith.constant 0.000000e+00 : f32
      %71 = vector.broadcast %cst_41 : f32 to vector<16x1xf32>
      %c0_42 = arith.constant 0 : index
      %c0_43 = arith.constant 0 : index
      %72 = vector.load %arg12[%c0_42, %c0_43] : memref<16x1xf32, #tpu.memory_space<vmem>>, vector<16x1xf32>
      tpu.vector_store %arg12[%c0_42, %c0_43], %71 {strides = array<i32>} : memref<16x1xf32, #tpu.memory_space<vmem>>, vector<16x1xf32>,
      %cst_44 = arith.constant 0.000000e+00 : f32
      %73 = vector.broadcast %cst_44 : f32 to vector<16x1xf32>
      %c0_45 = arith.constant 0 : index
      %c0_46 = arith.constant 0 : index
      %74 = vector.load %arg13[%c0_45, %c0_46] : memref<16x1xf32, #tpu.memory_space<vmem>>, vector<16x1xf32>
      tpu.vector_store %arg13[%c0_45, %c0_46], %73 {strides = array<i32>} : memref<16x1xf32, #tpu.memory_space<vmem>>, vector<16x1xf32>,
    } else {
    }
    %c0 = arith.constant 0 : index
    %c0_1 = arith.constant 0 : index
    %3 = vector.load %arg10[%c0, %c0_1] : memref<16x256xbf16, #tpu.memory_space<vmem>>, vector<16x256xbf16>
    %c0_2 = arith.constant 0 : index
    %c0_3 = arith.constant 0 : index
    %4 = vector.load %arg3[%c0_2, %c0_3] : memref<256x1024xbf16, #tpu.memory_space<vmem>>, vector<256x1024xbf16>
    %cst = arith.constant dense<0.000000e+00> : vector<16x1024xf32>
    %5 = tpu.matmul %3, %4, %cst {dimension_numbers = #tpu.dot_dimension_numbers<[1], [0], [0], [1], [0, 0, 1, 1], [], []>} : vector<16x256xbf16>, vector<256x1024xbf16>, vector<16x1024xf32> -> vector<16x1024xf32>
    %6 = arith.truncf %5 : vector<16x1024xf32> to vector<16x1024xbf16>
    %c0_4 = arith.constant 0 : index
    %c0_5 = arith.constant 0 : index
    %7 = vector.load %arg8[%c0_4, %c0_5] : memref<16x1024xbf16, #tpu.memory_space<vmem>>, vector<16x1024xbf16>
    tpu.vector_store %arg8[%c0_4, %c0_5], %6 {strides = array<i32>} : memref<16x1024xbf16, #tpu.memory_space<vmem>>, vector<16x1024xbf16>,
    %c1024_i32 = arith.constant 1024 : i32
    %8 = arith.muli %arg1, %c1024_i32 : i32
    %9 = tpu.iota {dimensions = array<i32: 1>} : vector<16x1024xi32>
    %10 = vector.broadcast %8 : i32 to vector<16x1024xi32>
    %11 = arith.addi %10, %9 : vector<16x1024xi32>
    %c0_6 = arith.constant 0 : index
    %c0_7 = arith.constant 0 : index
    %12 = vector.load %arg13[%c0_6, %c0_7] : memref<16x1xf32, #tpu.memory_space<vmem>>, vector<16x1xf32>
    %c0_8 = arith.constant 0 : index
    %c0_9 = arith.constant 0 : index
    %13 = vector.load %arg6[%c0_8, %c0_9] : memref<16x1xi32, #tpu.memory_space<vmem>>, vector<16x1xi32>
    %14 = vector.broadcast %13 : vector<16x1xi32> to vector<16x1024xi32>
    %15 = arith.cmpi eq, %11, %14 : vector<16x1024xi32>
    %cst_10 = arith.constant 0.000000e+00 : f32
    %16 = vector.broadcast %cst_10 : f32 to vector<16x1024xf32>
    %17 = arith.select %15, %5, %16 : vector<16x1024xi1>, vector<16x1024xf32>
    %cst_11 = arith.constant dense<0.000000e+00> : vector<16xf32>
    %18 = vector.multi_reduction <add>, %17, %cst_11 [1] : vector<16x1024xf32> to vector<16xf32>
    %19 = vector.shape_cast %18 : vector<16xf32> to vector<16x1xf32>
    %20 = arith.addf %12, %19 : vector<16x1xf32>
    %c0_12 = arith.constant 0 : index
    %c0_13 = arith.constant 0 : index
    %21 = vector.load %arg13[%c0_12, %c0_13] : memref<16x1xf32, #tpu.memory_space<vmem>>, vector<16x1xf32>
    tpu.vector_store %arg13[%c0_12, %c0_13], %20 {strides = array<i32>} : memref<16x1xf32, #tpu.memory_space<vmem>>, vector<16x1xf32>,
    %c0_14 = arith.constant 0 : index
    %c0_15 = arith.constant 0 : index
    %22 = vector.load %arg11[%c0_14, %c0_15] : memref<16x1xf32, #tpu.memory_space<vmem>>, vector<16x1xf32>
    %cst_16 = arith.constant dense<0xFF800000> : vector<16xf32>
    %23 = vector.multi_reduction <maximumf>, %5, %cst_16 [1] : vector<16x1024xf32> to vector<16xf32>
    %24 = vector.shape_cast %23 : vector<16xf32> to vector<16x1xf32>
    %25 = arith.maximumf %22, %24 : vector<16x1xf32>
    %c0_17 = arith.constant 0 : index
    %c0_18 = arith.constant 0 : index
    %26 = vector.load %arg12[%c0_17, %c0_18] : memref<16x1xf32, #tpu.memory_space<vmem>>, vector<16x1xf32>
    %27 = arith.subf %22, %25 : vector<16x1xf32>
    %28 = math.exp %27 : vector<16x1xf32>
    %29 = arith.mulf %26, %28 : vector<16x1xf32>
    %30 = vector.broadcast %25 : vector<16x1xf32> to vector<16x1024xf32>
    %31 = arith.subf %5, %30 : vector<16x1024xf32>
    %32 = math.exp %31 : vector<16x1024xf32>
    %cst_19 = arith.constant dense<0.000000e+00> : vector<16xf32>
    %33 = vector.multi_reduction <add>, %32, %cst_19 [1] : vector<16x1024xf32> to vector<16xf32>
    %34 = vector.shape_cast %33 : vector<16xf32> to vector<16x1xf32>
    %35 = arith.addf %29, %34 : vector<16x1xf32>
    %c0_20 = arith.constant 0 : index
    %c0_21 = arith.constant 0 : index
    %36 = vector.load %arg12[%c0_20, %c0_21] : memref<16x1xf32, #tpu.memory_space<vmem>>, vector<16x1xf32>
    tpu.vector_store %arg12[%c0_20, %c0_21], %35 {strides = array<i32>} : memref<16x1xf32, #tpu.memory_space<vmem>>, vector<16x1xf32>,
    %c0_22 = arith.constant 0 : index
    %c0_23 = arith.constant 0 : index
    %37 = vector.load %arg11[%c0_22, %c0_23] : memref<16x1xf32, #tpu.memory_space<vmem>>, vector<16x1xf32>
    tpu.vector_store %arg11[%c0_22, %c0_23], %25 {strides = array<i32>} : memref<16x1xf32, #tpu.memory_space<vmem>>, vector<16x1xf32>,
    %c1_i32 = arith.constant 1 : i32
    %38 = arith.cmpi eq, %arg1, %c1_i32 : i32
    %39 = arith.extui %38 : i1 to i32
    %c0_i32_24 = arith.constant 0 : i32
    %40 = arith.cmpi ne, %39, %c0_i32_24 : i32
    scf.if %40 {
      %c0_25 = arith.constant 0 : index
      %c0_26 = arith.constant 0 : index
      %41 = vector.load %arg11[%c0_25, %c0_26] : memref<16x1xf32, #tpu.memory_space<vmem>>, vector<16x1xf32>
      %c0_27 = arith.constant 0 : index
      %c0_28 = arith.constant 0 : index
      %42 = vector.load %arg12[%c0_27, %c0_28] : memref<16x1xf32, #tpu.memory_space<vmem>>, vector<16x1xf32>
      %43 = math.log %42 : vector<16x1xf32>
      %44 = arith.addf %41, %43 : vector<16x1xf32>
      %c0_29 = arith.constant 0 : index
      %c0_30 = arith.constant 0 : index
      %45 = vector.load %arg13[%c0_29, %c0_30] : memref<16x1xf32, #tpu.memory_space<vmem>>, vector<16x1xf32>
      %46 = arith.subf %44, %45 : vector<16x1xf32>
      %c0_31 = arith.constant 0 : index
      %c0_32 = arith.constant 0 : index
      %47 = vector.load %arg7[%c0_31, %c0_32] : memref<16x1xf32, #tpu.memory_space<vmem>>, vector<16x1xf32>
      %48 = arith.mulf %46, %47 : vector<16x1xf32>
      %c0_33 = arith.constant 0 : index
      %c0_34 = arith.constant 0 : index
      %49 = vector.load %arg9[%c0_33, %c0_34] : memref<16x1xf32, #tpu.memory_space<vmem>>, vector<16x1xf32>
      tpu.vector_store %arg9[%c0_33, %c0_34], %48 {strides = array<i32>} : memref<16x1xf32, #tpu.memory_space<vmem>>, vector<16x1xf32>,
    } else {
    }
    return
  }
  func.func @transform_0(%arg0: i32, %arg1: i32) -> (i32, i32) {
    %c0_i32 = arith.constant 0 : i32
    %c0_i32_0 = arith.constant 0 : i32
    return %arg0, %c0_i32 : i32, i32
  }
  func.func @transform_1(%arg0: i32, %arg1: i32) -> (i32, i32) {
    %c0_i32 = arith.constant 0 : i32
    %c0_i32_0 = arith.constant 0 : i32
    return %c0_i32, %arg1 : i32, i32
  }
  func.func @transform_2(%arg0: i32, %arg1: i32) -> (i32, i32) {
    %c0_i32 = arith.constant 0 : i32
    %c0_i32_0 = arith.constant 0 : i32
    %c0_i32_1 = arith.constant 0 : i32
    return %c0_i32, %c0_i32_0 : i32, i32
  }
  func.func @transform_3(%arg0: i32, %arg1: i32) -> (i32, i32) {
    %c0_i32 = arith.constant 0 : i32
    %c0_i32_0 = arith.constant 0 : i32
    %c0_i32_1 = arith.constant 0 : i32
    return %c0_i32, %c0_i32_0 : i32, i32
  }
  func.func @transform_4(%arg0: i32, %arg1: i32) -> (i32, i32) {
    %c0_i32 = arith.constant 0 : i32
    %c0_i32_0 = arith.constant 0 : i32
    return %arg0, %c0_i32 : i32, i32
  }
  func.func @transform_5(%arg0: i32, %arg1: i32) -> (i32, i32) {
    %c0_i32 = arith.constant 0 : i32
    %c0_i32_0 = arith.constant 0 : i32
    return %arg0, %c0_i32 : i32, i32
  }
  func.func @transform_6(%arg0: i32, %arg1: i32) -> (i32, i32) {
    %c0_i32 = arith.constant 0 : i32
    return %arg0, %arg1 : i32, i32
  }
  func.func @transform_7(%arg0: i32, %arg1: i32) -> (i32, i32) {
    %c0_i32 = arith.constant 0 : i32
    %c0_i32_0 = arith.constant 0 : i32
    return %arg0, %c0_i32 : i32, i32
  }
}

</mosaic_0001>

<bundles_post_ra>
// kernel: gpt2_forward.12
= control target key start
LH: loop header
LB: loop body
LE: loop exit
PB: predicated region body
PF: predicated region fallthrough
CT: control target
= control target key end

     0   :  { %s814_s12 = smov 0   ;;  %s816_s13 = smov 0   ;;  %s919_s0 = inlined_call_operand.vmem [shape: bf16[2,8,768], index: 0, kind: input, shape index: {}, may-alias: {0,1,2}]   ;;  %s920_s1 = inlined_call_operand.vmem [shape: bf16[2,8,768], index: 1, kind: input, shape index: {}, may-alias: {0,1,2}]   ;;  %s921_s2 = inlined_call_operand.vmem [shape: bf16[2,8,768], index: 2, kind: input, shape index: {}, may-alias: {0,1,2}]   ;;  %s922_s3 = inlined_call_operand.vmem [shape: bf16[2,8,256], index: 3, kind: output, shape index: {}]  }
   0x1   :  { %s818_s14 = smov 0   ;;  %s820_s15 = smov 0  }
   0x2   :  { %s822_s16 = smov 0  }
   0x3 LB: > { %s22_s17 = sadd.s32 1, %s781_s14  ;;  %s25_s18 = sadd.s32 1, %s785_s15  ;;  %s789_s16 = sphi %s822_s16, %s13_s16   ;;  %s785_s15 = sphi %s820_s15, %s926_s15   ;;  %s781_s14 = sphi %s818_s14, %s925_s14   ;;  %s777_s13 = sphi %s816_s13, %s924_s13   ;;  %s773_s12 = sphi %s814_s12, %s923_s12  }
   0x4   : > { %p23_p0 = scmp.ge.s32.totalorder %s22_s17, 2  ;;  %p650_p1 = scmp.ge.s32.totalorder %s789_s16, 1 }
   0x5   : > { %p194_p2 = scmp.lt.s32.totalorder %s789_s16, 5 }
   0x6   : > { %s928_s17 = smov (%p23_p0, %s22_s17), 0  ;;  %s930_s18 = smov (!%p23_p0, %s25_s18), %s785_s15 }
   0x7   : > { %p195_p3 = pnand %p650_p1, %p194_p2  ;;  %p27_p4 = scmp.ge.s32.totalorder %s930_s18, 2 }
   0x8   : > { %p242_p5 = scmp.lt.s32.totalorder (!%p195_p3), %s777_s13, 1  ;;  %s250_s19 = sadd.s32 (!%p195_p3), 2, %s773_s12  ;;  %v791_v0 = vmov (!%p195_p3), 0.0   ;;  %vm792_vm0 = vmmov (!%p195_p3), 0   ;;  %vm289_vm1 = vcmask (!%p195_p3), 523264   ;;  %v283_v6 = vlaneseq (!%p195_p3) }
   0x9   : > { %s932_s18 = smov (%p27_p4, %s930_s18), 0  ;;  %198 = sbr.rel (%p195_p3) target bundleno = 1118 (0x45e), region = 32 }
   0xa   : > { %673 = vmatprep.subr.bf16.mxu0 (!%p195_p3), %v791_v0  ;;  %p253_p6 = scmp.lt.s32.totalorder (!%p195_p3), %s250_s19, 5  ;;  %675 = vmatprep.mubr.msk.bf16.mxu0 (!%p195_p3), %vm792_vm0, %v791_v0  ;;  %p244_p7 = scmp.lt.s32.totalorder (!%p195_p3), %s773_s12, 5  ;;  %v284_v7 = vshrl.u32 (!%p195_p3), %v283_v6, 7  ;;  %v286_v8 = vand.u32 (!%p195_p3), 127, %v283_v6  ;;  %vm337_vm3 = vcmask (!%p195_p3), 64512   ;;  %vm351_vm4 = vcmask (!%p195_p3), 1043456  }
   0xb   : > { %679 = vmatprep.subr.bf16.mxu1 (!%p195_p3), %v791_v0  ;;  %681 = vmatprep.mubr.msk.bf16.mxu1 (!%p195_p3), %vm792_vm0, %v791_v0  ;;  %s793_s5 = smov (!%p195_p3), 64   ;;  %s260_s6 = sadd.s32 (!%p195_p3), 4, %s773_s12 }
   0xc   : > { %vm287_vm2 = vcmp.le.s32.totalorder (!%p195_p3), %v286_v8, %v284_v7  ;;  %p263_p8 = scmp.lt.s32.totalorder (!%p195_p3), %s260_s6, 5  ;;  %p272_p9 = scmp.lt.s32.totalorder (!%p195_p3), %s773_s12, 1 }
  0x10   : > { %s934_s13 = smov (!%p242_p5, %s777_s13), 1  ;;  %s936_s19 = smov (!%p253_p6, %s250_s19), 5 }
  0x11   : > { %s857_s20 = smul.u32 6, %s934_s13  ;;  %s938_s6 = smov (!%p263_p8, %s260_s6), 5 }
  0x12   : > { %s245_s21 = scalar_select %p244_p7, %s773_s12, 5 }
  0x13   : > { %s256_s22 = sadd.s32 %s857_s20, %s936_s19  ;;  %s266_s7 = sadd.s32 %s857_s20, %s938_s6 }
  0x14   : > { %s652_s23 = sshll.u32 %s256_s22, 2  ;;  %s247_s24 = sadd.s32 %s857_s20, %s245_s21 }
  0x15   : > { %s258_s27 = scalar_lea.vmem %s920_s1, %s652_s23  ;;  %s651_s28 = sshll.u32 %s247_s24, 2 }
  0x16   : > { %v281_v1 = vld [vmem:[%s258_s27] sm:$0xf]  ;;  %s249_s4 = scalar_lea.vmem %s919_s0, %s651_s28  ;;  %s653_s8 = sshll.u32 %s266_s7, 2 }
  0x17   : > { %v294_v2 = vsel %vm289_vm1, %v281_v1, 0  ;;  %v280_v3 = vld [vmem:[%s249_s4] sm:$0xf]  ;;  %v659_v15 = vcombine.low %v281_v1, %v281_v1  ;;  %s268_s11 = scalar_lea.vmem %s921_s2, %s653_s8  ;;  %s940_s12 = smov (!%p272_p9, %s773_s12), 1 }
  0x18   : > { %674 = vmatpush3.bf16.xpose.msra.mxu0 %v294_v2  ;;  %v288_v4 = vmul.bf16 1040203264, %v280_v3  ;;  %v282_v16 = vld [vmem:[%s268_s11] sm:$0xf]  ;;  %s654_s19 = sshll.u32 %s934_s13, 1 }
  0x19   : > { %691 = vmatprep.subr.bf16.mxu0 %v791_v0  ;;  %v353_v17 = vsel %vm351_vm4, %v282_v16, 0  ;;  %v661_v18 = vcombine.low %v282_v16, %v282_v16  ;;  %s275_s20 = sadd.s32 %s654_s19, %s940_s12 }
  0x1a   : > { %v658_v5 = vcombine.low %v288_v4, %v288_v4  ;;  %680 = vmatpush3.bf16.msra.mxu1 %v353_v17  ;;  %s655_s21 = sshll.u32 %s275_s20, 2 }
  0x1b   : > { %685 = vmatprep.subr.bf16.mxu1 %v791_v0  ;;  %s277_s24 = scalar_lea.vmem %s922_s3, %s655_s21 }
  0x1c   : > { %400 = vrot.lane.b32.xlu1 %v658_v5, %s793_s5 }
  0x1f   : > { %676 = vmatmul.mubr.msk.bf16.vlgmr.msra.gmra.mrb[0].mxu0 %vm289_vm1, %v288_v4 }
  0x20   : > { %693 = vmatprep.mubr.msk.bf16.mxu0 %vm792_vm0, %v791_v0 }
  0x8e   : > { %v401_v26 = vpop.permute.xlu1 %400 }
  0xf2   : > { %v330_v9 = vpop.f32.mrb[0].mxu0 }
  0xf3   : > { %v336_v10 = vsel %vm287_vm2, %v330_v9, -1e+30  ;;  %v677_v11 = vpop.f32.mrb[1].mxu0 }
  0xf4   : > { %v333_v12 = vpop.f32.mrb[2].mxu0  ;;  %v338_v13 = vsel %vm337_vm3, %v336_v10, -inf }
  0xf5   : > { %339 = vmax.xlane.f32.xlu0 %v338_v13  ;;  %v678_v14 = vpop.f32.mrb[3].mxu0 }
 0x10b   : > { %405 = vrot.lane.b32.xlu0 %v659_v15, %s793_s5 }
 0x10f   : > { %467 = vrot.lane.b32.xlu0 %v661_v18, %s793_s5 }
 0x182   : > { %v340_v19 = vpop.xlane.xlu0 %339 }
 0x183   : > { %v341_v20 = vsub.f32 %v336_v10, %v340_v19 }
 0x185   : > { %v342_v21 = vmul.f32 1.442695, %v341_v20 }
 0x186   : > { %v406_v22 = vpop.permute.xlu0 %405 }
 0x187   : > { %743 = vpow2.f32 %v342_v21  ;;  %v411_v24 = vsel %vm289_vm1, %v406_v22, 0 }
 0x18a   : > { %v468_v38 = vpop.permute.xlu0 %467 }
 0x18b   : > { %v473_v39 = vsel %vm351_vm4, %v468_v38, 0 }
 0x18c   : > { %692 = vmatpush3.bf16.msra.mxu0 %v473_v39 }
 0x191   : > { %v744_v23 = vpop.eup %743 }
 0x192   : > { %v347_v25 = vpack.c.bf16 %v744_v23, %v744_v23  ;;  %v344_v37 = vsel %vm337_vm3, %v744_v23, 0.0 }
 0x194   : > { %682 = vmatmul.mubr.msk.bf16.vlgmr.msra.gmra.mrb[0].mxu1 %vm337_vm3, %v347_v25 }
 0x195   : > { %686 = vmatpush3.bf16.xpose.msra.mxu1 %v411_v24  ;;  %687 = vmatprep.mubr.msk.bf16.mxu1 %vm792_vm0, %v791_v0 }
 0x19c   : > { %688 = vmatmul.mubr.msk.bf16.vlgmr.msra.gmra.mrb[4].mxu1 %vm289_vm1, %v401_v26 }
 0x267   : > { %v389_v27 = vpop.f32.mrb[0].mxu1 }
 0x268   : > { %v683_v28 = vpop.f32.mrb[1].mxu1 }
 0x269   : > { %v392_v29 = vpop.f32.mrb[2].mxu1 }
 0x26a   : > { %v684_v30 = vpop.f32.mrb[3].mxu1 }
 0x26f   : > { %v447_v31 = vpop.f32.mrb[4].mxu1 }
 0x270   : > { %v453_v32 = vsel %vm287_vm2, %v447_v31, -1e+30  ;;  %v689_v33 = vpop.f32.mrb[5].mxu1 }
 0x271   : > { %v450_v34 = vpop.f32.mrb[6].mxu1  ;;  %v454_v35 = vsel %vm337_vm3, %v453_v32, -inf }
 0x272   : > { %455 = vmax.xlane.f32.xlu1 %v454_v35  ;;  %v690_v36 = vpop.f32.mrb[7].mxu1 }
 0x276   : > { %345 = vadd.xlane.f32.xlu1 %v344_v37 }
 0x2ff   : > { %v456_v40 = vpop.xlane.xlu1 %455 }
 0x300   : > { %v457_v41 = vsub.f32 %v453_v32, %v456_v40 }
 0x302   : > { %v458_v42 = vmul.f32 1.442695, %v457_v41 }
 0x303   : > { %v346_v53 = vpop.xlane.xlu1 %345 }
 0x304   : > { %745 = vpow2.f32 %v458_v42 }
 0x30e   : > { %v746_v43 = vpop.eup %745 }
 0x30f   : > { %v460_v44 = vsel %vm337_vm3, %v746_v43, 0.0  ;;  %v463_v45 = vpack.c.bf16 %v746_v43, %v746_v43 }
 0x310   : > { %461 = vadd.xlane.f32.xlu0 %v460_v44 }
 0x311   : > { %694 = vmatmul.mubr.msk.bf16.vlgmr.msra.gmra.mrb[4].mxu0 %vm337_vm3, %v463_v45 }
 0x39d   : > { %v462_v46 = vpop.xlane.xlu0 %461 }
 0x39e   : > { %747 = vrcp.f32 %v462_v46 }
 0x39f   : > { %749 = vrcp.f32 %v346_v53 }
 0x3a8   : > { %v748_v47 = vpop.eup %747 }
 0x3a9   : > { %v750_v54 = vpop.eup %749 }
 0x3aa   : > { %v396_v55 = vmul.f32 %v750_v54, %v389_v27 }
 0x3e4   : > { %v509_v48 = vpop.f32.mrb[4].mxu0 }
 0x3e5   : > { %v516_v49 = vmul.f32 %v748_v47, %v509_v48  ;;  %v695_v50 = vpop.f32.mrb[5].mxu0 }
 0x3e6   : > { %v512_v51 = vpop.f32.mrb[6].mxu0 }
 0x3e7   : > { %518 = vrot.lane.b32.xlu1 %v516_v49, %s793_s5  ;;  %v696_v52 = vpop.f32.mrb[7].mxu0 }
 0x459   : > { %v519_v56 = vpop.permute.xlu1 %518 }
 0x45a   : > { %v521_v57 = vsel %vm289_vm1, %v396_v55, %v519_v56 }
 0x45b   : > { %v522_v58 = vpack.c.bf16 %v521_v57, %v521_v57 }
 0x45d   : > { %523 = vst [vmem:[%s277_s24] sm:$0xf] %v522_v58 }
 0x45e PF: > { %s13_s16 = sadd.s32 1, %s789_s16   ;;  %s923_s12 = smov %s781_s14 }
 0x45f   : > { %p10_p10 = scmp.ge.s32.totalorder %s13_s16, 6   ;;  %s924_s13 = smov %s785_s15 }
 0x460   : > { %s925_s14 = smov %s928_s17  ;;  %s926_s15 = smov %s932_s18 }
 0x461   :  { %12 = sbr.rel (!%p10_p10) target bundleno = 3 (0x3), region = 68 }

// kernel: gpt2_forward.13
= control target key start
LH: loop header
LB: loop body
LE: loop exit
PB: predicated region body
PF: predicated region fallthrough
CT: control target
= control target key end

     0   :  { %9 = vsyncpa [#allocation3], 0  ;;  %s431_s15 = smov [#allocation2]   ;;  %s583_s0 = inlined_call_operand.vmem [shape: bf16[16,256], index: 0, kind: input, shape index: {}]   ;;  %s584_s1 = inlined_call_operand.vmem [shape: bf16[256,256], index: 1, kind: input, shape index: {}]   ;;  %s585_s2 = inlined_call_operand.hbm [shape: f32[1,256], index: 2, kind: input, shape index: {}]   ;;  %s586_s3 = inlined_call_operand.vmem [shape: bf16[16,256], index: 3, kind: input, shape index: {}]   ;;  %s587_s4 = inlined_call_operand.vmem [shape: bf16[16,256], index: 4, kind: output, shape index: {}]  }
   0x1   :  { %s20_s16 = sshll.u32 %s431_s15, 4  ;;  %s407_s19 = scalar_lea.hbm %s585_s2, 32  ;;  %s21_s16 = int_to_ptr.vmem [resolvable:$true] %s20_s16 }
   0x2   :  { %p408_p0 = scmp.ne.s32.totalorder %s585_s2, %s407_s19  ;;  %p411_p1 = scmp.lt.u32.totalorder %s407_s19, %s585_s2 }
   0x4   :  { %p413_p2 = pnand %p411_p1, %p408_p0 }
   0x6   :  { %416 = shalt.err (!%p413_p2)
}
   0x7   :  { %s417_s24 = scalar_lea.vmem %s21_s16, 32  ;;  %p422_p4 = scmp.lt.s32.totalorder %s21_s16, %s21_s16 }
   0x8   :  { %p418_p3 = scmp.ne.s32.totalorder %s21_s16, %s417_s24  ;;  %p423_p5 = scmp.lt.s32.totalorder %s417_s24, %s417_s24 }
   0xa   :  { %p424_p6 = por %p423_p5, %p422_p4 }
   0xc   :  { %p425_p7 = pnand %p424_p6, %p418_p3 }
   0xe   :  { %428 = shalt.err (!%p425_p7)
}
   0xf   :  { %23 = dma.hbm_to_vmem [thread:$0]  %s585_s2, 32, %s21_s16, [#allocation3]  }
  0x10   :  { %429 = dma.done.wait [#allocation3], 32  }
  0x11   :  { %430 = vsyncadd [#allocation3], 4294967264  ;;  %v356_v0 = vld [vmem:[%s584_s1 + $0x4] ss:$8 sps:$4 sm:$0xff]   ;;  %v358_v1 = vld [vmem:[%s584_s1] ss:$8 sps:$4 sm:$0xff]   ;;  %v65_v34 = vlaneseq }
  0x12   :  { %245 = vmatprep.subr.bf16.mxu0 %v356_v0  ;;  %v359_v2 = vld [vmem:[%s584_s1 + $0x14] ss:$8 sps:$4 sm:$0xff]   ;;  %v361_v3 = vld [vmem:[%s584_s1 + $0x10] ss:$8 sps:$4 sm:$0xff]   ;;  %v362_v4 = vld [vmem:[%s584_s1 + $0x24] ss:$8 sps:$4 sm:$0xff]  }
  0x13   :  { %246 = vmatpush1.bf16.msra.mxu0 %v358_v1  ;;  %v364_v5 = vld [vmem:[%s584_s1 + $0x20] ss:$8 sps:$4 sm:$0xff]   ;;  %v365_v6 = vld [vmem:[%s584_s1 + $0x34] ss:$8 sps:$4 sm:$0xff]   ;;  %v367_v7 = vld [vmem:[%s584_s1 + $0x30] ss:$8 sps:$4 sm:$0xff]  }
  0x14   :  { %247 = vmatprep.subr.bf16.mxu0 %v359_v2  ;;  %v368_v8 = vld [vmem:[%s584_s1 + $0x44] ss:$8 sps:$4 sm:$0xff]   ;;  %v370_v9 = vld [vmem:[%s584_s1 + $0x40] ss:$8 sps:$4 sm:$0xff]   ;;  %v371_v10 = vld [vmem:[%s584_s1 + $0x54] ss:$8 sps:$4 sm:$0xff]  }
  0x15   :  { %v373_v11 = vld [vmem:[%s584_s1 + $0x50] ss:$8 sps:$4 sm:$0xff]   ;;  %v374_v12 = vld [vmem:[%s584_s1 + $0x64] ss:$8 sps:$4 sm:$0xff]   ;;  %v376_v14 = vld [vmem:[%s584_s1 + $0x60] ss:$8 sps:$4 sm:$0xff]  }
  0x16   :  { %v406_v13 = vld [vmem:[%s583_s0 + $0x4] ss:$8 sps:$4 sm:$0xff]   ;;  %v377_v15 = vld [vmem:[%s584_s1 + $0x74] ss:$8 sps:$4 sm:$0xff]   ;;  %v379_v16 = vld [vmem:[%s584_s1 + $0x70] ss:$8 sps:$4 sm:$0xff]  }
  0x17   :  { %248 = vmatpush1.bf16.msra.mxu0 %v361_v3  ;;  %277 = vmatprep.mubr.bf16.mxu0 %v406_v13  ;;  %v380_v17 = vld [vmem:[%s584_s1 + $0x84] ss:$8 sps:$4 sm:$0xff]   ;;  %v382_v18 = vld [vmem:[%s584_s1 + $0x80] ss:$8 sps:$4 sm:$0xff]   ;;  %v383_v19 = vld [vmem:[%s584_s1 + $0x94] ss:$8 sps:$4 sm:$0xff]  }
  0x18   :  { %249 = vmatprep.subr.bf16.mxu0 %v362_v4  ;;  %v385_v20 = vld [vmem:[%s584_s1 + $0x90] ss:$8 sps:$4 sm:$0xff]   ;;  %v386_v21 = vld [vmem:[%s584_s1 + $0xa4] ss:$8 sps:$4 sm:$0xff]   ;;  %v388_v22 = vld [vmem:[%s584_s1 + $0xa0] ss:$8 sps:$4 sm:$0xff]  }
  0x19   :  { %v389_v23 = vld [vmem:[%s584_s1 + $0xb4] ss:$8 sps:$4 sm:$0xff]   ;;  %v391_v24 = vld [vmem:[%s584_s1 + $0xb0] ss:$8 sps:$4 sm:$0xff]   ;;  %v392_v25 = vld [vmem:[%s584_s1 + $0xc4] ss:$8 sps:$4 sm:$0xff]  }
  0x1a   :  { %v394_v26 = vld [vmem:[%s584_s1 + $0xc0] ss:$8 sps:$4 sm:$0xff]   ;;  %v395_v27 = vld [vmem:[%s584_s1 + $0xd4] ss:$8 sps:$4 sm:$0xff]   ;;  %v397_v28 = vld [vmem:[%s584_s1 + $0xd0] ss:$8 sps:$4 sm:$0xff]  }
  0x1b   :  { %250 = vmatpush1.bf16.msra.mxu0 %v364_v5  ;;  %v398_v29 = vld [vmem:[%s584_s1 + $0xe4] ss:$8 sps:$4 sm:$0xff]   ;;  %v400_v30 = vld [vmem:[%s584_s1 + $0xe0] ss:$8 sps:$4 sm:$0xff]   ;;  %v401_v31 = vld [vmem:[%s584_s1 + $0xf4] ss:$8 sps:$4 sm:$0xff]  }
  0x1c   :  { %251 = vmatprep.subr.bf16.mxu0 %v365_v6  ;;  %v403_v32 = vld [vmem:[%s584_s1 + $0xf0] ss:$8 sps:$4 sm:$0xff]   ;;  %v404_v33 = vld [vmem:[%s583_s0] ss:$8 sps:$4 sm:$0xff]   ;;  %v66_v35 = vshrl.u32 %v65_v34, 7 }
  0x1d   :  { %v63_v37 = vld [vmem:[#allocation2] sm:$0x3]  ;;  %v289_v42 = vld [vmem:[%s586_s3 + $0x8] sm:$0xff] }
  0x1e   :  { %v67_v36 = vsub.s32 0, %v66_v35  ;;  %v71_v38 = vsub.s32 1, %v66_v35  ;;  %v288_v39 = vld [vmem:[%s586_s3] sm:$0xff]  ;;  %v292_v48 = vunpack.c.l.bf16 %v289_v42  ;;  %v293_v51 = vunpack.c.h.bf16 %v289_v42 }
  0x1f   :  { %252 = vmatpush1.bf16.msra.mxu0 %v367_v7  ;;  %v290_v43 = vunpack.c.l.bf16 %v288_v39  ;;  %v291_v45 = vunpack.c.h.bf16 %v288_v39 }
  0x20   :  { %253 = vmatprep.subr.bf16.mxu0 %v368_v8  ;;  %v68_v40 = vrot.slane %v63_v37, %v67_v36  ;;  %v72_v41 = vrot.slane %v63_v37, %v71_v38 }
  0x23   :  { %254 = vmatpush1.bf16.msra.mxu0 %v370_v9 }
  0x24   :  { %255 = vmatprep.subr.bf16.mxu0 %v371_v10 }
  0x27   :  { %256 = vmatpush1.bf16.msra.mxu0 %v373_v11 }
  0x28   :  { %257 = vmatprep.subr.bf16.mxu0 %v374_v12 }
  0x2b   :  { %258 = vmatpush1.bf16.msra.mxu0 %v376_v14 }
  0x2c   :  { %259 = vmatprep.subr.bf16.mxu0 %v377_v15 }
  0x2f   :  { %260 = vmatpush1.bf16.msra.mxu0 %v379_v16 }
  0x30   :  { %261 = vmatprep.subr.bf16.mxu0 %v380_v17 }
  0x33   :  { %262 = vmatpush1.bf16.msra.mxu0 %v382_v18 }
  0x34   :  { %263 = vmatprep.subr.bf16.mxu0 %v383_v19 }
  0x37   :  { %264 = vmatpush1.bf16.msra.mxu0 %v385_v20 }
  0x38   :  { %265 = vmatprep.subr.bf16.mxu0 %v386_v21 }
  0x3b   :  { %266 = vmatpush1.bf16.msra.mxu0 %v388_v22 }
  0x3c   :  { %267 = vmatprep.subr.bf16.mxu0 %v389_v23 }
  0x3f   :  { %268 = vmatpush1.bf16.msra.mxu0 %v391_v24 }
  0x40   :  { %269 = vmatprep.subr.bf16.mxu0 %v392_v25 }
  0x43   :  { %270 = vmatpush1.bf16.msra.mxu0 %v394_v26 }
  0x44   :  { %271 = vmatprep.subr.bf16.mxu0 %v395_v27 }
  0x47   :  { %272 = vmatpush1.bf16.msra.mxu0 %v397_v28 }
  0x48   :  { %273 = vmatprep.subr.bf16.mxu0 %v398_v29 }
  0x4b   :  { %274 = vmatpush1.bf16.msra.mxu0 %v400_v30 }
  0x4c   :  { %275 = vmatprep.subr.bf16.mxu0 %v401_v31 }
  0x4f   :  { %276 = vmatpush1.bf16.msra.mxu0 %v403_v32 }
  0x52   :  { %278 = vmatmul.mubr.bf16.vlgmr.msra.gmra.mrb[0].mxu0 %v404_v33 }
 0x125   :  { %v279_v44 = vpop.f32.mrb[0].mxu0 }
 0x126   :  { %v280_v46 = vadd.f32 %v279_v44, %v68_v40  ;;  %v281_v47 = vpop.f32.mrb[1].mxu0 }
 0x127   :  { %v282_v49 = vadd.f32 %v281_v47, %v72_v41  ;;  %v283_v50 = vpop.f32.mrb[2].mxu0 }
 0x128   :  { %v294_v52 = vadd.f32 %v290_v43, %v280_v46  ;;  %v284_v53 = vadd.f32 %v283_v50, %v68_v40  ;;  %v285_v54 = vpop.f32.mrb[3].mxu0 }
 0x129   :  { %v295_v55 = vadd.f32 %v291_v45, %v282_v49  ;;  %v286_v56 = vadd.f32 %v285_v54, %v72_v41 }
 0x12a   :  { %v296_v57 = vadd.f32 %v292_v48, %v284_v53 }
 0x12b   :  { %v353_v58 = vpack.c.bf16 %v295_v55, %v294_v52  ;;  %v297_v59 = vadd.f32 %v293_v51, %v286_v56 }
 0x12d   :  { %310 = vst [vmem:[%s587_s4] sm:$0xff] %v353_v58  ;;  %v354_v60 = vpack.c.bf16 %v297_v59, %v296_v57 }
 0x12f   :  { %311 = vst [vmem:[%s587_s4 + $0x8] sm:$0xff] %v354_v60 }
 0x130   :  { %316 = vsyncpa [#allocation3], 1 }

// kernel: gpt2_forward.11
= control target key start
LH: loop header
LB: loop body
LE: loop exit
PB: predicated region body
PF: predicated region fallthrough
CT: control target
= control target key end

     0   :  { %10 = vsyncpa [#allocation3], 0  ;;  %s1367_s0 = inlined_call_operand.vmem [shape: bf16[16,256], index: 0, kind: input, shape index: {}]   ;;  %s1368_s1 = inlined_call_operand.hbm [shape: bf16[256,768], index: 1, kind: input, shape index: {}]   ;;  %s1369_s2 = inlined_call_operand.vmem [shape: f32[1,768], index: 2, kind: input, shape index: {}]   ;;  %s1370_s3 = inlined_call_operand.vmem [shape: f32[1,256], index: 3, kind: input, shape index: {}]   ;;  %s1371_s4 = inlined_call_operand.hbm [shape: f32[1,256], index: 4, kind: input, shape index: {}]   ;;  %s1372_s5 = inlined_call_operand.vmem [shape: bf16[16,768], index: 5, kind: output, shape index: {}]  }
   0x1   :  { %11 = vsyncpa [#allocation5], 0  ;;  %s1212_s18 = smov [#allocation2]   ;;  %s1164_s22 = scalar_lea.hbm %s1368_s1, 12288 }
   0x2   :  { %s19_s19 = sshll.u32 %s1212_s18, 4  ;;  %p1165_p0 = scmp.ne.s32.totalorder %s1368_s1, %s1164_s22  ;;  %s20_s19 = int_to_ptr.vmem [resolvable:$true] %s19_s19 }
   0x3   :  { %p1168_p1 = scmp.lt.u32.totalorder %s1164_s22, %s1368_s1 }
   0x5   :  { %p1170_p2 = pnand %p1168_p1, %p1165_p0 }
   0x7   :  { %1173 = shalt.err (!%p1170_p2)
}
   0x8   :  { %s1174_s27 = scalar_lea.vmem %s20_s19, 12288  ;;  %p1179_p4 = scmp.lt.s32.totalorder %s20_s19, %s20_s19 }
   0x9   :  { %p1175_p3 = scmp.ne.s32.totalorder %s20_s19, %s1174_s27  ;;  %p1180_p5 = scmp.lt.s32.totalorder %s1174_s27, %s1174_s27 }
   0xb   :  { %p1181_p6 = por %p1180_p5, %p1179_p4 }
   0xd   :  { %p1182_p7 = pnand %p1181_p6, %p1175_p3 }
   0xf   :  { %1185 = shalt.err (!%p1182_p7)
}
  0x10   :  { %s1213_s28 = smov 384   ;;  %s1214_s29 = smov 24  }
  0x11   :  { %25 = dma.hbm_to_vmem [thread:$0]  %s1368_s1, 12288, %s20_s19, [#allocation3], %s1213_s28, %s1213_s28, %s1214_s29  }
  0x12   :  { %s1215_s7 = smov [#allocation4]   ;;  %s1186_s11 = scalar_lea.hbm %s1371_s4, 32 }
  0x13   :  { %s36_s8 = sshll.u32 %s1215_s7, 4  ;;  %p1187_p8 = scmp.ne.s32.totalorder %s1371_s4, %s1186_s11  ;;  %s37_s8 = int_to_ptr.vmem [resolvable:$true] %s36_s8 }
  0x14   :  { %p1190_p9 = scmp.lt.u32.totalorder %s1186_s11, %s1371_s4 }
  0x16   :  { %p1192_p10 = pnand %p1190_p9, %p1187_p8 }
  0x18   :  { %1195 = shalt.err (!%p1192_p10)
}
  0x19   :  { %s1196_s16 = scalar_lea.vmem %s37_s8, 32  ;;  %p1201_p12 = scmp.lt.s32.totalorder %s37_s8, %s37_s8 }
  0x1a   :  { %p1197_p11 = scmp.ne.s32.totalorder %s37_s8, %s1196_s16  ;;  %p1202_p13 = scmp.lt.s32.totalorder %s1196_s16, %s1196_s16 }
  0x1c   :  { %p1203_p0 = por %p1202_p13, %p1201_p12 }
  0x1e   :  { %p1204_p1 = pnand %p1203_p0, %p1197_p11 }
  0x20   :  { %1207 = shalt.err (!%p1204_p1)
}
  0x21   :  { %39 = dma.hbm_to_vmem [thread:$0]  %s1371_s4, 32, %s37_s8, [#allocation5]  }
  0x22   :  { %1208 = dma.done.wait [#allocation3], 12288  }
  0x23   :  { %1209 = vsyncadd [#allocation3], 4294955008 }
  0x24   :  { %1210 = dma.done.wait [#allocation5], 32  }
  0x25   :  { %1211 = vsyncadd [#allocation5], 4294967264  ;;  %v1273_v0 = vld [vmem:[%s1367_s0] sm:$0xff]  ;;  %v1278_v1 = vld [vmem:[%s1367_s0 + $0x8] sm:$0xff] }
  0x26   :  { %v48_v2 = vunpack.c.l.bf16 %v1273_v0  ;;  %v49_v3 = vunpack.c.h.bf16 %v1273_v0  ;;  %v50_v4 = vunpack.c.l.bf16 %v1278_v1  ;;  %v51_v5 = vunpack.c.h.bf16 %v1278_v1  ;;  %v1016_v8 = vld [vmem:[#allocation2 + $0x4] ss:$24 sps:$4 sm:$0xff]   ;;  %v1018_v9 = vld [vmem:[#allocation2] ss:$24 sps:$4 sm:$0xff]   ;;  %v1022_v12 = vld [vmem:[#allocation2 + $0x34] ss:$24 sps:$4 sm:$0xff]  }
  0x27   :  { %v1019_v10 = vld [vmem:[#allocation2 + $0xc] ss:$24 sps:$4 sm:$0xff]   ;;  %v1021_v11 = vld [vmem:[#allocation2 + $0x8] ss:$24 sps:$4 sm:$0xff]   ;;  %727 = vmatprep.subr.bf16.mxu0 %v1016_v8  ;;  %v1025_v13 = vld [vmem:[#allocation2 + $0x3c] ss:$24 sps:$4 sm:$0xff]  }
  0x28   :  { %v52_v6 = vadd.f32 %v49_v3, %v48_v2  ;;  %v55_v7 = vadd.f32 %v51_v5, %v50_v4  ;;  %770 = vmatprep.subr.bf16.mxu1 %v1019_v10  ;;  %728 = vmatpush1.bf16.msra.mxu0 %v1018_v9  ;;  %v1024_v14 = vld [vmem:[#allocation2 + $0x30] ss:$24 sps:$4 sm:$0xff]   ;;  %v1028_v16 = vld [vmem:[#allocation2 + $0x64] ss:$24 sps:$4 sm:$0xff]   ;;  %v1030_v18 = vld [vmem:[#allocation2 + $0x60] ss:$24 sps:$4 sm:$0xff]  }
  0x29   :  { %771 = vmatpush1.bf16.msra.mxu1 %v1021_v11  ;;  %v1027_v15 = vld [vmem:[#allocation2 + $0x38] ss:$24 sps:$4 sm:$0xff]   ;;  %729 = vmatprep.subr.bf16.mxu0 %v1022_v12  ;;  %v1031_v17 = vld [vmem:[#allocation2 + $0x6c] ss:$24 sps:$4 sm:$0xff]   ;;  %v1033_v19 = vld [vmem:[#allocation2 + $0x68] ss:$24 sps:$4 sm:$0xff]  }
  0x2a   :  { %53 = vadd.xlane.f32.xlu0 %v52_v6  ;;  %772 = vmatprep.subr.bf16.mxu1 %v1025_v13  ;;  %v1034_v20 = vld [vmem:[#allocation2 + $0x94] ss:$24 sps:$4 sm:$0xff]   ;;  %v1036_v22 = vld [vmem:[#allocation2 + $0x90] ss:$24 sps:$4 sm:$0xff]   ;;  %v1040_v24 = vld [vmem:[#allocation2 + $0xc4] ss:$24 sps:$4 sm:$0xff]  }
  0x2b   :  { %v1037_v21 = vld [vmem:[#allocation2 + $0x9c] ss:$24 sps:$4 sm:$0xff]   ;;  %v1039_v23 = vld [vmem:[#allocation2 + $0x98] ss:$24 sps:$4 sm:$0xff]   ;;  %v1043_v25 = vld [vmem:[#allocation2 + $0xcc] ss:$24 sps:$4 sm:$0xff]  }
  0x2c   :  { %730 = vmatpush1.bf16.msra.mxu0 %v1024_v14  ;;  %v1042_v26 = vld [vmem:[#allocation2 + $0xc0] ss:$24 sps:$4 sm:$0xff]   ;;  %v1046_v28 = vld [vmem:[#allocation2 + $0xf4] ss:$24 sps:$4 sm:$0xff]   ;;  %v1048_v30 = vld [vmem:[#allocation2 + $0xf0] ss:$24 sps:$4 sm:$0xff]  }
  0x2d   :  { %773 = vmatpush1.bf16.msra.mxu1 %v1027_v15  ;;  %731 = vmatprep.subr.bf16.mxu0 %v1028_v16  ;;  %v1045_v27 = vld [vmem:[#allocation2 + $0xc8] ss:$24 sps:$4 sm:$0xff]   ;;  %v1049_v29 = vld [vmem:[#allocation2 + $0xfc] ss:$24 sps:$4 sm:$0xff]   ;;  %v1051_v31 = vld [vmem:[#allocation2 + $0xf8] ss:$24 sps:$4 sm:$0xff]  }
  0x2e   :  { %56 = vadd.xlane.f32.xlu0 %v55_v7  ;;  %774 = vmatprep.subr.bf16.mxu1 %v1031_v17  ;;  %v1052_v32 = vld [vmem:[#allocation2 + $0x124] ss:$24 sps:$4 sm:$0xff]   ;;  %v1054_v34 = vld [vmem:[#allocation2 + $0x120] ss:$24 sps:$4 sm:$0xff]   ;;  %v1058_v36 = vld [vmem:[#allocation2 + $0x154] ss:$24 sps:$4 sm:$0xff]  }
  0x2f   :  { %v1055_v33 = vld [vmem:[#allocation2 + $0x12c] ss:$24 sps:$4 sm:$0xff]   ;;  %v1057_v35 = vld [vmem:[#allocation2 + $0x128] ss:$24 sps:$4 sm:$0xff]   ;;  %v1061_v37 = vld [vmem:[#allocation2 + $0x15c] ss:$24 sps:$4 sm:$0xff]  }
  0x30   :  { %732 = vmatpush1.bf16.msra.mxu0 %v1030_v18  ;;  %v1060_v38 = vld [vmem:[#allocation2 + $0x150] ss:$24 sps:$4 sm:$0xff]   ;;  %v1064_v40 = vld [vmem:[#allocation2 + $0x184] ss:$24 sps:$4 sm:$0xff]   ;;  %v1066_v42 = vld [vmem:[#allocation2 + $0x180] ss:$24 sps:$4 sm:$0xff]  }
  0x31   :  { %775 = vmatpush1.bf16.msra.mxu1 %v1033_v19  ;;  %733 = vmatprep.subr.bf16.mxu0 %v1034_v20  ;;  %v1063_v39 = vld [vmem:[#allocation2 + $0x158] ss:$24 sps:$4 sm:$0xff]   ;;  %v1067_v41 = vld [vmem:[#allocation2 + $0x18c] ss:$24 sps:$4 sm:$0xff]   ;;  %v1069_v43 = vld [vmem:[#allocation2 + $0x188] ss:$24 sps:$4 sm:$0xff]  }
  0x32   :  { %776 = vmatprep.subr.bf16.mxu1 %v1037_v21  ;;  %v1070_v44 = vld [vmem:[#allocation2 + $0x1b4] ss:$24 sps:$4 sm:$0xff]   ;;  %v1072_v59 = vld [vmem:[#allocation2 + $0x1b0] ss:$24 sps:$4 sm:$0xff]   ;;  %v1076_v62 = vld [vmem:[#allocation2 + $0x1e4] ss:$24 sps:$4 sm:$0xff]  }
  0x33   :  { %v1073_v60 = vld [vmem:[#allocation2 + $0x1bc] ss:$24 sps:$4 sm:$0xff]   ;;  %v1075_v61 = vld [vmem:[#allocation2 + $0x1b8] ss:$24 sps:$4 sm:$0xff]   ;;  %v1079_v0 = vld [vmem:[#allocation2 + $0x1ec] ss:$24 sps:$4 sm:$0xff]  }
  0x34   :  { %734 = vmatpush1.bf16.msra.mxu0 %v1036_v22  ;;  %v1078_v63 = vld [vmem:[#allocation2 + $0x1e0] ss:$24 sps:$4 sm:$0xff]   ;;  %v1088_v6 = vld [vmem:[#allocation2 + $0x244] ss:$24 sps:$4 sm:$0xff]   ;;  %v1094_v10 = vld [vmem:[#allocation2 + $0x274] ss:$24 sps:$4 sm:$0xff]  }
  0x35   :  { %777 = vmatpush1.bf16.msra.mxu1 %v1039_v23  ;;  %735 = vmatprep.subr.bf16.mxu0 %v1040_v24  ;;  %v1081_v1 = vld [vmem:[#allocation2 + $0x1e8] ss:$24 sps:$4 sm:$0xff]   ;;  %v1091_v8 = vld [vmem:[#allocation2 + $0x24c] ss:$24 sps:$4 sm:$0xff]   ;;  %v1097_v11 = vld [vmem:[#allocation2 + $0x27c] ss:$24 sps:$4 sm:$0xff]  }
  0x36   :  { %778 = vmatprep.subr.bf16.mxu1 %v1043_v25  ;;  %v1090_v7 = vld [vmem:[#allocation2 + $0x240] ss:$24 sps:$4 sm:$0xff]   ;;  %v1096_v12 = vld [vmem:[#allocation2 + $0x270] ss:$24 sps:$4 sm:$0xff]   ;;  %v1100_v14 = vld [vmem:[#allocation2 + $0x2a4] ss:$24 sps:$4 sm:$0xff]  }
  0x37   :  { %v1093_v9 = vld [vmem:[#allocation2 + $0x248] ss:$24 sps:$4 sm:$0xff]   ;;  %v1099_v13 = vld [vmem:[#allocation2 + $0x278] ss:$24 sps:$4 sm:$0xff]   ;;  %v1103_v15 = vld [vmem:[#allocation2 + $0x2ac] ss:$24 sps:$4 sm:$0xff]  }
  0x38   :  { %736 = vmatpush1.bf16.msra.mxu0 %v1042_v26  ;;  %v1102_v16 = vld [vmem:[#allocation2 + $0x2a0] ss:$24 sps:$4 sm:$0xff]   ;;  %v1106_v18 = vld [vmem:[#allocation2 + $0x2d4] ss:$24 sps:$4 sm:$0xff]   ;;  %v1108_v20 = vld [vmem:[#allocation2 + $0x2d0] ss:$24 sps:$4 sm:$0xff]  }
  0x39   :  { %779 = vmatpush1.bf16.msra.mxu1 %v1045_v27  ;;  %737 = vmatprep.subr.bf16.mxu0 %v1046_v28  ;;  %v1105_v17 = vld [vmem:[#allocation2 + $0x2a8] ss:$24 sps:$4 sm:$0xff]   ;;  %v1109_v19 = vld [vmem:[#allocation2 + $0x2dc] ss:$24 sps:$4 sm:$0xff]   ;;  %v1111_v21 = vld [vmem:[#allocation2 + $0x2d8] ss:$24 sps:$4 sm:$0xff]   ;;  %v87_v27 = vlaneseq }
  0x3a   :  { %780 = vmatprep.subr.bf16.mxu1 %v1049_v29  ;;  %v1114_v22 = vld [vmem:[#allocation2 + $0x14] ss:$24 sps:$4 sm:$0xff]  }
  0x3c   :  { %738 = vmatpush1.bf16.msra.mxu0 %v1048_v30  ;;  %v1316_v30 = vshrl.u32 %v87_v27, 7 }
  0x3d   :  { %781 = vmatpush1.bf16.msra.mxu1 %v1051_v31  ;;  %739 = vmatprep.subr.bf16.mxu0 %v1052_v32 }
  0x3e   :  { %782 = vmatprep.subr.bf16.mxu1 %v1055_v33  ;;  %v1319_v31 = vsub.s32 1, %v1316_v30  ;;  %v1322_v32 = vsub.s32 0, %v1316_v30  ;;  %v85_v33 = vld [vmem:[%s1370_s3] sm:$0x3] }
  0x40   :  { %740 = vmatpush1.bf16.msra.mxu0 %v1054_v34 }
  0x41   :  { %783 = vmatpush1.bf16.msra.mxu1 %v1057_v35  ;;  %741 = vmatprep.subr.bf16.mxu0 %v1058_v36  ;;  %v94_v36 = vrot.slane %v85_v33, %v1319_v31 }
  0x42   :  { %784 = vmatprep.subr.bf16.mxu1 %v1061_v37  ;;  %v101_v37 = vld [vmem:[#allocation4] sm:$0x3] }
  0x44   :  { %742 = vmatpush1.bf16.msra.mxu0 %v1060_v38 }
  0x45   :  { %785 = vmatpush1.bf16.msra.mxu1 %v1063_v39  ;;  %743 = vmatprep.subr.bf16.mxu0 %v1064_v40  ;;  %v90_v39 = vrot.slane %v85_v33, %v1322_v32 }
  0x46   :  { %786 = vmatprep.subr.bf16.mxu1 %v1067_v41  ;;  %v110_v41 = vrot.slane %v101_v37, %v1319_v31 }
  0x48   :  { %744 = vmatpush1.bf16.msra.mxu0 %v1066_v42  ;;  %v106_v42 = vrot.slane %v101_v37, %v1322_v32 }
  0x49   :  { %787 = vmatpush1.bf16.msra.mxu1 %v1069_v43  ;;  %745 = vmatprep.subr.bf16.mxu0 %v1070_v44 }
  0x4a   :  { %788 = vmatprep.subr.bf16.mxu1 %v1073_v60  ;;  %v1123_v60 = vld [vmem:[#allocation2 + $0xa4] ss:$24 sps:$4 sm:$0xff]  }
  0x4c   :  { %746 = vmatpush1.bf16.msra.mxu0 %v1072_v59  ;;  %v1118_v59 = vld [vmem:[#allocation2 + $0x70] ss:$24 sps:$4 sm:$0xff]  }
  0x4d   :  { %789 = vmatpush1.bf16.msra.mxu1 %v1075_v61  ;;  %747 = vmatprep.subr.bf16.mxu0 %v1076_v62  ;;  %v1121_v61 = vld [vmem:[#allocation2 + $0xa0] ss:$24 sps:$4 sm:$0xff]   ;;  %v1126_v62 = vld [vmem:[#allocation2 + $0xd4] ss:$24 sps:$4 sm:$0xff]  }
  0x4e   :  { %790 = vmatprep.subr.bf16.mxu1 %v1079_v0  ;;  %v1129_v0 = vld [vmem:[#allocation2 + $0x104] ss:$24 sps:$4 sm:$0xff]  }
  0x50   :  { %748 = vmatpush1.bf16.msra.mxu0 %v1078_v63  ;;  %v1124_v63 = vld [vmem:[#allocation2 + $0xd0] ss:$24 sps:$4 sm:$0xff]  }
  0x51   :  { %791 = vmatpush1.bf16.msra.mxu1 %v1081_v1  ;;  %v1127_v1 = vld [vmem:[#allocation2 + $0x100] ss:$24 sps:$4 sm:$0xff]  }
  0xb7   :  { %v54_v45 = vpop.xlane.xlu0 %53 }
  0xb8   :  { %v59_v46 = vmul.f32 0.00390625, %v54_v45 }
  0xba   :  { %v1294_v47 = vsub.f32 %v48_v2, %v59_v46  ;;  %v1298_v48 = vsub.f32 %v49_v3, %v59_v46  ;;  %v1082_v2 = vld [vmem:[#allocation2 + $0x214] ss:$24 sps:$4 sm:$0xff]   ;;  %v1084_v3 = vld [vmem:[#allocation2 + $0x210] ss:$24 sps:$4 sm:$0xff]  }
  0xbb   :  { %v57_v49 = vpop.xlane.xlu0 %56  ;;  %749 = vmatprep.subr.bf16.mxu0 %v1082_v2  ;;  %v1132_v2 = vld [vmem:[#allocation2 + $0x134] ss:$24 sps:$4 sm:$0xff]  }
  0xbc   :  { %v60_v50 = vmul.f32 0.00390625, %v57_v49  ;;  %v65_v51 = vmul.f32 %v1294_v47, %v1294_v47  ;;  %v66_v52 = vmul.f32 %v1298_v48, %v1298_v48  ;;  %750 = vmatpush1.bf16.msra.mxu0 %v1084_v3  ;;  %v1130_v3 = vld [vmem:[#allocation2 + $0x130] ss:$24 sps:$4 sm:$0xff]  }
  0xbd   :  { %751 = vmatprep.subr.bf16.mxu0 %v1088_v6  ;;  %v1138_v6 = vld [vmem:[#allocation2 + $0x194] ss:$24 sps:$4 sm:$0xff]  }
  0xbe   :  { %v1306_v53 = vsub.f32 %v50_v4, %v60_v50  ;;  %v1310_v54 = vsub.f32 %v51_v5, %v60_v50  ;;  %v69_v55 = vadd.f32 %v66_v52, %v65_v51  ;;  %v1085_v4 = vld [vmem:[#allocation2 + $0x21c] ss:$24 sps:$4 sm:$0xff]   ;;  %v1087_v5 = vld [vmem:[#allocation2 + $0x218] ss:$24 sps:$4 sm:$0xff]  }
  0xbf   :  { %792 = vmatprep.subr.bf16.mxu1 %v1085_v4  ;;  %v1135_v4 = vld [vmem:[#allocation2 + $0x164] ss:$24 sps:$4 sm:$0xff]  }
  0xc0   :  { %70 = vadd.xlane.f32.xlu1 %v69_v55  ;;  %v67_v56 = vmul.f32 %v1306_v53, %v1306_v53  ;;  %v68_v57 = vmul.f32 %v1310_v54, %v1310_v54  ;;  %793 = vmatpush1.bf16.msra.mxu1 %v1087_v5  ;;  %v1133_v5 = vld [vmem:[#allocation2 + $0x160] ss:$24 sps:$4 sm:$0xff]  }
  0xc1   :  { %794 = vmatprep.subr.bf16.mxu1 %v1091_v8  ;;  %752 = vmatpush1.bf16.msra.mxu0 %v1090_v7  ;;  %v1136_v7 = vld [vmem:[#allocation2 + $0x190] ss:$24 sps:$4 sm:$0xff]   ;;  %v1141_v8 = vld [vmem:[#allocation2 + $0x1c4] ss:$24 sps:$4 sm:$0xff]  }
  0xc2   :  { %v72_v58 = vadd.f32 %v68_v57, %v67_v56  ;;  %753 = vmatprep.subr.bf16.mxu0 %v1094_v10  ;;  %v1112_v56 = vld [vmem:[#allocation2 + $0x10] ss:$24 sps:$4 sm:$0xff]   ;;  %v1144_v10 = vld [vmem:[#allocation2 + $0x1f4] ss:$24 sps:$4 sm:$0xff]  }
  0xc4   :  { %73 = vadd.xlane.f32.xlu1 %v72_v58  ;;  %795 = vmatpush1.bf16.msra.mxu1 %v1093_v9  ;;  %v1117_v58 = vld [vmem:[#allocation2 + $0x44] ss:$24 sps:$4 sm:$0xff]   ;;  %v1139_v9 = vld [vmem:[#allocation2 + $0x1c0] ss:$24 sps:$4 sm:$0xff]  }
  0xc5   :  { %796 = vmatprep.subr.bf16.mxu1 %v1097_v11  ;;  %754 = vmatpush1.bf16.msra.mxu0 %v1096_v12  ;;  %v1142_v11 = vld [vmem:[#allocation2 + $0x1f0] ss:$24 sps:$4 sm:$0xff]   ;;  %v1147_v12 = vld [vmem:[#allocation2 + $0x224] ss:$24 sps:$4 sm:$0xff]  }
  0xc6   :  { %755 = vmatprep.subr.bf16.mxu0 %v1100_v14  ;;  %v1150_v14 = vld [vmem:[#allocation2 + $0x254] ss:$24 sps:$4 sm:$0xff]  }
  0xc8   :  { %797 = vmatpush1.bf16.msra.mxu1 %v1099_v13  ;;  %v1145_v13 = vld [vmem:[#allocation2 + $0x220] ss:$24 sps:$4 sm:$0xff]  }
  0xc9   :  { %798 = vmatprep.subr.bf16.mxu1 %v1103_v15  ;;  %756 = vmatpush1.bf16.msra.mxu0 %v1102_v16  ;;  %v1148_v15 = vld [vmem:[#allocation2 + $0x250] ss:$24 sps:$4 sm:$0xff]   ;;  %v1153_v16 = vld [vmem:[#allocation2 + $0x284] ss:$24 sps:$4 sm:$0xff]  }
  0xca   :  { %757 = vmatprep.subr.bf16.mxu0 %v1106_v18  ;;  %v1156_v18 = vld [vmem:[#allocation2 + $0x2b4] ss:$24 sps:$4 sm:$0xff]  }
  0xcc   :  { %799 = vmatpush1.bf16.msra.mxu1 %v1105_v17  ;;  %v1151_v17 = vld [vmem:[#allocation2 + $0x280] ss:$24 sps:$4 sm:$0xff]  }
  0xcd   :  { %800 = vmatprep.subr.bf16.mxu1 %v1109_v19  ;;  %758 = vmatpush1.bf16.msra.mxu0 %v1108_v20  ;;  %v1154_v19 = vld [vmem:[#allocation2 + $0x2b0] ss:$24 sps:$4 sm:$0xff]   ;;  %v1159_v20 = vld [vmem:[#allocation2 + $0x2e4] ss:$24 sps:$4 sm:$0xff]  }
  0xce   :  { %813 = vmatprep.subr.bf16.mxu0 %v1114_v22  ;;  %v227_v22 = vsub.s32 2, %v1316_v30 }
  0xd0   :  { %801 = vmatpush1.bf16.msra.mxu1 %v1111_v21  ;;  %v1157_v21 = vld [vmem:[#allocation2 + $0x2e0] ss:$24 sps:$4 sm:$0xff]  }
 0x14d   :  { %v71_v23 = vpop.xlane.xlu1 %70 }
 0x14e   :  { %v75_v24 = vmul.f32 0.00390625, %v71_v23  ;;  %v215_v23 = vld [vmem:[%s1369_s2] sm:$0x3f] }
 0x14f   :  { %v224_v27 = vrot.slane %v215_v23, %v1319_v31 }
 0x150   :  { %v77_v25 = vadd.f32 1e-05, %v75_v24  ;;  %v231_v24 = vsub.s32 3, %v1316_v30 }
 0x151   :  { %v74_v26 = vpop.xlane.xlu1 %73 }
 0x152   :  { %1160 = vrsqrt.f32 %v77_v25  ;;  %v76_v28 = vmul.f32 0.00390625, %v74_v26  ;;  %v220_v25 = vrot.slane %v215_v23, %v1322_v32  ;;  %v228_v26 = vrot.slane %v215_v23, %v227_v22 }
 0x154   :  { %v78_v29 = vadd.f32 1e-05, %v76_v28  ;;  %v232_v28 = vrot.slane %v215_v23, %v231_v24 }
 0x156   :  { %1162 = vrsqrt.f32 %v78_v29 }
 0x15c   :  { %v1161_v34 = vpop.eup %1160 }
 0x15d   :  { %v82_v35 = vmul.f32 %v1161_v34, %v1298_v48  ;;  %v81_v38 = vmul.f32 %v1161_v34, %v1294_v47 }
 0x15f   :  { %v98_v44 = vmul.f32 %v94_v36, %v82_v35  ;;  %v97_v46 = vmul.f32 %v90_v39, %v81_v38 }
 0x160   :  { %v1163_v40 = vpop.eup %1162 }
 0x161   :  { %v84_v43 = vmul.f32 %v1163_v40, %v1310_v54  ;;  %v83_v45 = vmul.f32 %v1163_v40, %v1306_v53  ;;  %v114_v50 = vadd.f32 %v110_v41, %v98_v44  ;;  %v113_v52 = vadd.f32 %v106_v42, %v97_v46  ;;  %v1115_v53 = vld [vmem:[#allocation2 + $0x40] ss:$24 sps:$4 sm:$0xff]   ;;  %v1120_v54 = vld [vmem:[#allocation2 + $0x74] ss:$24 sps:$4 sm:$0xff]  }
 0x163   :  { %v100_v49 = vmul.f32 %v94_v36, %v84_v43  ;;  %v99_v48 = vmul.f32 %v90_v39, %v83_v45 }
 0x165   :  { %v116_v51 = vadd.f32 %v110_v41, %v100_v49  ;;  %v115_v55 = vadd.f32 %v106_v42, %v99_v48 }
 0x167   :  { %v118_v47 = vpack.c.bf16 %v116_v51, %v114_v50  ;;  %v1335_v57 = vpack.c.bf16 %v115_v55, %v113_v52  ;;  %v235_v51 = vsub.s32 4, %v1316_v30  ;;  %v239_v52 = vsub.s32 5, %v1316_v30 }
 0x169   :  { %759 = vmatprep.mubr.bf16.mxu0 %v118_v47  ;;  %802 = vmatprep.mubr.bf16.mxu1 %v118_v47  ;;  %v236_v55 = vrot.slane %v215_v23, %v235_v51 }
 0x16a   :  { %760 = vmatmul.mubr.bf16.vlgmr.msra.gmra.mrb[0].mxu0 %v1335_v57  ;;  %803 = vmatmul.mubr.bf16.vlgmr.msra.gmra.mrb[0].mxu1 %v1335_v57 }
 0x16b   :  { %814 = vmatpush1.bf16.msra.mxu0 %v1112_v56  ;;  %845 = vmatprep.mubr.bf16.mxu0 %v118_v47  ;;  %v240_v47 = vrot.slane %v215_v23, %v239_v52 }
 0x16c   :  { %815 = vmatprep.subr.bf16.mxu0 %v1117_v58 }
 0x16f   :  { %816 = vmatpush1.bf16.msra.mxu0 %v1115_v53 }
 0x170   :  { %817 = vmatprep.subr.bf16.mxu0 %v1120_v54 }
 0x173   :  { %818 = vmatpush1.bf16.msra.mxu0 %v1118_v59 }
 0x174   :  { %819 = vmatprep.subr.bf16.mxu0 %v1123_v60 }
 0x177   :  { %820 = vmatpush1.bf16.msra.mxu0 %v1121_v61 }
 0x178   :  { %821 = vmatprep.subr.bf16.mxu0 %v1126_v62 }
 0x17b   :  { %822 = vmatpush1.bf16.msra.mxu0 %v1124_v63 }
 0x17c   :  { %823 = vmatprep.subr.bf16.mxu0 %v1129_v0 }
 0x17f   :  { %824 = vmatpush1.bf16.msra.mxu0 %v1127_v1 }
 0x180   :  { %825 = vmatprep.subr.bf16.mxu0 %v1132_v2 }
 0x183   :  { %826 = vmatpush1.bf16.msra.mxu0 %v1130_v3 }
 0x184   :  { %827 = vmatprep.subr.bf16.mxu0 %v1135_v4 }
 0x187   :  { %828 = vmatpush1.bf16.msra.mxu0 %v1133_v5 }
 0x188   :  { %829 = vmatprep.subr.bf16.mxu0 %v1138_v6 }
 0x18b   :  { %830 = vmatpush1.bf16.msra.mxu0 %v1136_v7 }
 0x18c   :  { %831 = vmatprep.subr.bf16.mxu0 %v1141_v8 }
 0x18f   :  { %832 = vmatpush1.bf16.msra.mxu0 %v1139_v9 }
 0x190   :  { %833 = vmatprep.subr.bf16.mxu0 %v1144_v10 }
 0x193   :  { %834 = vmatpush1.bf16.msra.mxu0 %v1142_v11 }
 0x194   :  { %835 = vmatprep.subr.bf16.mxu0 %v1147_v12 }
 0x197   :  { %836 = vmatpush1.bf16.msra.mxu0 %v1145_v13 }
 0x198   :  { %837 = vmatprep.subr.bf16.mxu0 %v1150_v14 }
 0x19b   :  { %838 = vmatpush1.bf16.msra.mxu0 %v1148_v15 }
 0x19c   :  { %839 = vmatprep.subr.bf16.mxu0 %v1153_v16 }
 0x19f   :  { %840 = vmatpush1.bf16.msra.mxu0 %v1151_v17 }
 0x1a0   :  { %841 = vmatprep.subr.bf16.mxu0 %v1156_v18 }
 0x1a3   :  { %842 = vmatpush1.bf16.msra.mxu0 %v1154_v19 }
 0x1a4   :  { %843 = vmatprep.subr.bf16.mxu0 %v1159_v20 }
 0x1a7   :  { %844 = vmatpush1.bf16.msra.mxu0 %v1157_v21 }
 0x1aa   :  { %846 = vmatmul.mubr.bf16.vlgmr.msra.gmra.mrb[4].mxu0 %v1335_v57 }
 0x23d   :  { %v761_v29 = vpop.f32.mrb[0].mxu0  ;;  %v804_v33 = vpop.f32.mrb[0].mxu1 }
 0x23e   :  { %v762_v34 = vadd.f32 %v761_v29, %v220_v25  ;;  %v805_v35 = vadd.f32 %v804_v33, %v228_v26  ;;  %v763_v36 = vpop.f32.mrb[1].mxu0  ;;  %v806_v37 = vpop.f32.mrb[1].mxu1 }
 0x23f   :  { %v764_v38 = vadd.f32 %v763_v36, %v224_v27  ;;  %v807_v39 = vadd.f32 %v806_v37, %v232_v28  ;;  %v765_v40 = vpop.f32.mrb[2].mxu0  ;;  %v808_v41 = vpop.f32.mrb[2].mxu1 }
 0x240   :  { %v766_v42 = vadd.f32 %v765_v40, %v220_v25  ;;  %v809_v43 = vadd.f32 %v808_v41, %v228_v26  ;;  %v767_v44 = vpop.f32.mrb[3].mxu0  ;;  %v810_v45 = vpop.f32.mrb[3].mxu1 }
 0x241   :  { %v1006_v46 = vpack.c.bf16 %v764_v38, %v762_v34  ;;  %v1007_v32 = vpack.c.bf16 %v807_v39, %v805_v35  ;;  %v768_v49 = vadd.f32 %v767_v44, %v224_v27  ;;  %v811_v48 = vadd.f32 %v810_v45, %v232_v28 }
 0x243   :  { %892 = vst [vmem:[%s1372_s5] sm:$0xff] %v1006_v46  ;;  %893 = vst [vmem:[%s1372_s5 + $0x8] sm:$0xff] %v1007_v32  ;;  %v1009_v31 = vpack.c.bf16 %v768_v49, %v766_v42  ;;  %v1010_v50 = vpack.c.bf16 %v811_v48, %v809_v43 }
 0x245   :  { %895 = vst [vmem:[%s1372_s5 + $0x18] sm:$0xff] %v1009_v31  ;;  %896 = vst [vmem:[%s1372_s5 + $0x20] sm:$0xff] %v1010_v50 }
 0x27d   :  { %v847_v56 = vpop.f32.mrb[4].mxu0 }
 0x27e   :  { %v848_v57 = vadd.f32 %v847_v56, %v236_v55  ;;  %v849_v58 = vpop.f32.mrb[5].mxu0 }
 0x27f   :  { %v850_v53 = vadd.f32 %v849_v58, %v240_v47  ;;  %v851_v54 = vpop.f32.mrb[6].mxu0 }
 0x280   :  { %v852_v59 = vadd.f32 %v851_v54, %v236_v55  ;;  %v853_v60 = vpop.f32.mrb[7].mxu0 }
 0x281   :  { %v1008_v61 = vpack.c.bf16 %v850_v53, %v848_v57  ;;  %v854_v62 = vadd.f32 %v853_v60, %v240_v47 }
 0x283   :  { %894 = vst [vmem:[%s1372_s5 + $0x10] sm:$0xff] %v1008_v61  ;;  %v1011_v63 = vpack.c.bf16 %v854_v62, %v852_v59 }
 0x285   :  { %897 = vst [vmem:[%s1372_s5 + $0x28] sm:$0xff] %v1011_v63 }
 0x286   :  { %902 = vsyncpa [#allocation3], 1 }
 0x287   :  { %903 = vsyncpa [#allocation5], 1 }

// kernel: gpt2_forward.14
= control target key start
LH: loop header
LB: loop body
LE: loop exit
PB: predicated region body
PF: predicated region fallthrough
CT: control target
= control target key end

     0   :  { %10 = vsyncpa [#allocation3], 0  ;;  %s1497_s18 = smov [#allocation2]   ;;  %s2152_s0 = inlined_call_operand.vmem [shape: bf16[16,256], index: 0, kind: input, shape index: {}]   ;;  %s2153_s1 = inlined_call_operand.vmem [shape: bf16[256,1024], index: 1, kind: input, shape index: {}]   ;;  %s2154_s2 = inlined_call_operand.vmem [shape: f32[1,1024], index: 2, kind: input, shape index: {}]   ;;  %s2155_s3 = inlined_call_operand.vmem [shape: f32[1,256], index: 3, kind: input, shape index: {}]   ;;  %s2156_s4 = inlined_call_operand.hbm [shape: f32[1,256], index: 4, kind: input, shape index: {}]   ;;  %s2157_s5 = inlined_call_operand.vmem [shape: bf16[16,1024], index: 5, kind: output, shape index: {}]  }
   0x1   :  { %s25_s19 = sshll.u32 %s1497_s18, 4  ;;  %s1473_s22 = scalar_lea.hbm %s2156_s4, 32  ;;  %s26_s19 = int_to_ptr.vmem [resolvable:$true] %s25_s19 }
   0x2   :  { %p1474_p0 = scmp.ne.s32.totalorder %s2156_s4, %s1473_s22  ;;  %p1477_p1 = scmp.lt.u32.totalorder %s1473_s22, %s2156_s4 }
   0x4   :  { %p1479_p2 = pnand %p1477_p1, %p1474_p0 }
   0x6   :  { %1482 = shalt.err (!%p1479_p2)
}
   0x7   :  { %s1483_s27 = scalar_lea.vmem %s26_s19, 32  ;;  %p1488_p4 = scmp.lt.s32.totalorder %s26_s19, %s26_s19 }
   0x8   :  { %p1484_p3 = scmp.ne.s32.totalorder %s26_s19, %s1483_s27  ;;  %p1489_p5 = scmp.lt.s32.totalorder %s1483_s27, %s1483_s27 }
   0xa   :  { %p1490_p6 = por %p1489_p5, %p1488_p4 }
   0xc   :  { %p1491_p7 = pnand %p1490_p6, %p1484_p3 }
   0xe   :  { %1494 = shalt.err (!%p1491_p7)
}
   0xf   :  { %28 = dma.hbm_to_vmem [thread:$0]  %s2156_s4, 32, %s26_s19, [#allocation3]  }
  0x10   :  { %1495 = dma.done.wait [#allocation3], 32  }
  0x11   :  { %1496 = vsyncadd [#allocation3], 4294967264  ;;  %v1543_v0 = vld [vmem:[%s2152_s0] sm:$0xff]  ;;  %v1548_v1 = vld [vmem:[%s2152_s0 + $0x8] sm:$0xff] }
  0x12   :  { %v34_v2 = vunpack.c.l.bf16 %v1543_v0  ;;  %v35_v3 = vunpack.c.h.bf16 %v1543_v0  ;;  %v36_v4 = vunpack.c.l.bf16 %v1548_v1  ;;  %v37_v5 = vunpack.c.h.bf16 %v1548_v1  ;;  %v105_v8 = vld [vmem:[%s2153_s1] sm:$0xff]  ;;  %v106_v10 = vld [vmem:[%s2153_s1 + $0x8] sm:$0xff] }
  0x13   :  { %v109_v9 = vld [vmem:[%s2153_s1 + $0x20] sm:$0xff]  ;;  %v110_v12 = vld [vmem:[%s2153_s1 + $0x28] sm:$0xff] }
  0x14   :  { %v38_v6 = vadd.f32 %v35_v3, %v34_v2  ;;  %v41_v7 = vadd.f32 %v37_v5, %v36_v4  ;;  %v1293_v11 = vcombine.high %v105_v8, %v109_v9  ;;  %v1292_v13 = vcombine.low %v105_v8, %v109_v9  ;;  %v113_v14 = vld [vmem:[%s2153_s1 + $0x40] sm:$0xff]  ;;  %v114_v19 = vld [vmem:[%s2153_s1 + $0x48] sm:$0xff] }
  0x15   :  { %v117_v15 = vld [vmem:[%s2153_s1 + $0x60] sm:$0xff]  ;;  %v1295_v16 = vcombine.high %v106_v10, %v110_v12  ;;  %v1294_v17 = vcombine.low %v106_v10, %v110_v12  ;;  %v118_v20 = vld [vmem:[%s2153_s1 + $0x68] sm:$0xff] }
  0x16   :  { %39 = vadd.xlane.f32.xlu0 %v38_v6  ;;  %v1301_v18 = vcombine.high %v113_v14, %v117_v15  ;;  %v121_v21 = vld [vmem:[%s2153_s1 + $0x80] sm:$0xff]  ;;  %915 = vmatprep.subr.bf16.mxu0 %v1293_v11  ;;  %v1303_v22 = vcombine.high %v114_v19, %v118_v20  ;;  %v122_v24 = vld [vmem:[%s2153_s1 + $0x88] sm:$0xff]  ;;  %v1300_v26 = vcombine.low %v113_v14, %v117_v15 }
  0x17   :  { %v125_v23 = vld [vmem:[%s2153_s1 + $0xa0] sm:$0xff]  ;;  %v126_v25 = vld [vmem:[%s2153_s1 + $0xa8] sm:$0xff]  ;;  %958 = vmatprep.subr.bf16.mxu1 %v1295_v16  ;;  %916 = vmatpush1.bf16.msra.mxu0 %v1292_v13  ;;  %v1302_v27 = vcombine.low %v114_v19, %v118_v20 }
  0x18   :  { %959 = vmatpush1.bf16.msra.mxu1 %v1294_v17  ;;  %917 = vmatprep.subr.bf16.mxu0 %v1301_v18  ;;  %v1309_v28 = vcombine.high %v121_v21, %v125_v23  ;;  %v1311_v29 = vcombine.high %v122_v24, %v126_v25  ;;  %v129_v30 = vld [vmem:[%s2153_s1 + $0xc0] sm:$0xff]  ;;  %v130_v32 = vld [vmem:[%s2153_s1 + $0xc8] sm:$0xff]  ;;  %v1308_v34 = vcombine.low %v121_v21, %v125_v23 }
  0x19   :  { %960 = vmatprep.subr.bf16.mxu1 %v1303_v22  ;;  %v133_v31 = vld [vmem:[%s2153_s1 + $0xe0] sm:$0xff]  ;;  %v134_v33 = vld [vmem:[%s2153_s1 + $0xe8] sm:$0xff]  ;;  %v1310_v35 = vcombine.low %v122_v24, %v126_v25 }
  0x1a   :  { %42 = vadd.xlane.f32.xlu0 %v41_v7  ;;  %v1317_v36 = vcombine.high %v129_v30, %v133_v31  ;;  %v1319_v37 = vcombine.high %v130_v32, %v134_v33  ;;  %v137_v38 = vld [vmem:[%s2153_s1 + $0x100] sm:$0xff]  ;;  %v138_v40 = vld [vmem:[%s2153_s1 + $0x108] sm:$0xff]  ;;  %v1316_v42 = vcombine.low %v129_v30, %v133_v31  ;;  %v1318_v43 = vcombine.low %v130_v32, %v134_v33 }
  0x1b   :  { %918 = vmatpush1.bf16.msra.mxu0 %v1300_v26  ;;  %v141_v39 = vld [vmem:[%s2153_s1 + $0x120] sm:$0xff]  ;;  %v142_v41 = vld [vmem:[%s2153_s1 + $0x128] sm:$0xff] }
  0x1c   :  { %961 = vmatpush1.bf16.msra.mxu1 %v1302_v27  ;;  %919 = vmatprep.subr.bf16.mxu0 %v1309_v28  ;;  %v1325_v44 = vcombine.high %v137_v38, %v141_v39  ;;  %v1327_v45 = vcombine.high %v138_v40, %v142_v41  ;;  %v145_v46 = vld [vmem:[%s2153_s1 + $0x140] sm:$0xff]  ;;  %v146_v48 = vld [vmem:[%s2153_s1 + $0x148] sm:$0xff]  ;;  %v1324_v50 = vcombine.low %v137_v38, %v141_v39 }
  0x1d   :  { %962 = vmatprep.subr.bf16.mxu1 %v1311_v29  ;;  %v149_v47 = vld [vmem:[%s2153_s1 + $0x160] sm:$0xff]  ;;  %v150_v49 = vld [vmem:[%s2153_s1 + $0x168] sm:$0xff]  ;;  %v1326_v51 = vcombine.low %v138_v40, %v142_v41 }
  0x1e   :  { %v1333_v52 = vcombine.high %v145_v46, %v149_v47  ;;  %v1335_v53 = vcombine.high %v146_v48, %v150_v49  ;;  %v153_v54 = vld [vmem:[%s2153_s1 + $0x180] sm:$0xff]  ;;  %v154_v56 = vld [vmem:[%s2153_s1 + $0x188] sm:$0xff]  ;;  %v1332_v58 = vcombine.low %v145_v46, %v149_v47  ;;  %v1334_v59 = vcombine.low %v146_v48, %v150_v49 }
  0x1f   :  { %920 = vmatpush1.bf16.msra.mxu0 %v1308_v34  ;;  %v157_v55 = vld [vmem:[%s2153_s1 + $0x1a0] sm:$0xff]  ;;  %v158_v57 = vld [vmem:[%s2153_s1 + $0x1a8] sm:$0xff] }
  0x20   :  { %963 = vmatpush1.bf16.msra.mxu1 %v1310_v35  ;;  %921 = vmatprep.subr.bf16.mxu0 %v1317_v36  ;;  %v1341_v60 = vcombine.high %v153_v54, %v157_v55  ;;  %v1343_v61 = vcombine.high %v154_v56, %v158_v57  ;;  %v161_v62 = vld [vmem:[%s2153_s1 + $0x1c0] sm:$0xff]  ;;  %v162_v6 = vld [vmem:[%s2153_s1 + $0x1c8] sm:$0xff]  ;;  %v1340_v8 = vcombine.low %v153_v54, %v157_v55 }
  0x21   :  { %964 = vmatprep.subr.bf16.mxu1 %v1319_v37  ;;  %v165_v63 = vld [vmem:[%s2153_s1 + $0x1e0] sm:$0xff]  ;;  %v166_v7 = vld [vmem:[%s2153_s1 + $0x1e8] sm:$0xff]  ;;  %v1342_v9 = vcombine.low %v154_v56, %v158_v57 }
  0x22   :  { %v1349_v10 = vcombine.high %v161_v62, %v165_v63  ;;  %v1351_v11 = vcombine.high %v162_v6, %v166_v7  ;;  %v169_v12 = vld [vmem:[%s2153_s1 + $0x200] sm:$0xff]  ;;  %v170_v14 = vld [vmem:[%s2153_s1 + $0x208] sm:$0xff]  ;;  %v1348_v16 = vcombine.low %v161_v62, %v165_v63  ;;  %v1350_v17 = vcombine.low %v162_v6, %v166_v7 }
  0x23   :  { %922 = vmatpush1.bf16.msra.mxu0 %v1316_v42  ;;  %v173_v13 = vld [vmem:[%s2153_s1 + $0x220] sm:$0xff]  ;;  %v174_v15 = vld [vmem:[%s2153_s1 + $0x228] sm:$0xff] }
  0x24   :  { %965 = vmatpush1.bf16.msra.mxu1 %v1318_v43  ;;  %923 = vmatprep.subr.bf16.mxu0 %v1325_v44  ;;  %v1357_v18 = vcombine.high %v169_v12, %v173_v13  ;;  %v1359_v19 = vcombine.high %v170_v14, %v174_v15  ;;  %v177_v20 = vld [vmem:[%s2153_s1 + $0x240] sm:$0xff]  ;;  %v178_v22 = vld [vmem:[%s2153_s1 + $0x248] sm:$0xff]  ;;  %v1356_v24 = vcombine.low %v169_v12, %v173_v13 }
  0x25   :  { %966 = vmatprep.subr.bf16.mxu1 %v1327_v45  ;;  %v181_v21 = vld [vmem:[%s2153_s1 + $0x260] sm:$0xff]  ;;  %v182_v23 = vld [vmem:[%s2153_s1 + $0x268] sm:$0xff]  ;;  %v1358_v25 = vcombine.low %v170_v14, %v174_v15 }
  0x26   :  { %v1365_v26 = vcombine.high %v177_v20, %v181_v21  ;;  %v1367_v27 = vcombine.high %v178_v22, %v182_v23  ;;  %v1364_v39 = vcombine.low %v177_v20, %v181_v21  ;;  %v1366_v40 = vcombine.low %v178_v22, %v182_v23  ;;  %v185_v1 = vld [vmem:[%s2153_s1 + $0x280] sm:$0xff]  ;;  %v190_v42 = vld [vmem:[%s2153_s1 + $0x2a8] sm:$0xff] }
  0x27   :  { %924 = vmatpush1.bf16.msra.mxu0 %v1324_v50  ;;  %v193_v46 = vld [vmem:[%s2153_s1 + $0x2c0] sm:$0xff]  ;;  %v194_v48 = vld [vmem:[%s2153_s1 + $0x2c8] sm:$0xff] }
  0x28   :  { %967 = vmatpush1.bf16.msra.mxu1 %v1326_v51  ;;  %925 = vmatprep.subr.bf16.mxu0 %v1333_v52  ;;  %v197_v47 = vld [vmem:[%s2153_s1 + $0x2e0] sm:$0xff]  ;;  %v198_v50 = vld [vmem:[%s2153_s1 + $0x2e8] sm:$0xff] }
  0x29   :  { %968 = vmatprep.subr.bf16.mxu1 %v1335_v53  ;;  %v1381_v49 = vcombine.high %v193_v46, %v197_v47  ;;  %v1383_v51 = vcombine.high %v194_v48, %v198_v50  ;;  %v1380_v52 = vcombine.low %v193_v46, %v197_v47  ;;  %v1382_v53 = vcombine.low %v194_v48, %v198_v50  ;;  %v201_v54 = vld [vmem:[%s2153_s1 + $0x300] sm:$0xff]  ;;  %v202_v56 = vld [vmem:[%s2153_s1 + $0x308] sm:$0xff] }
  0x2a   :  { %v205_v55 = vld [vmem:[%s2153_s1 + $0x320] sm:$0xff]  ;;  %v210_v6 = vld [vmem:[%s2153_s1 + $0x348] sm:$0xff] }
  0x2b   :  { %926 = vmatpush1.bf16.msra.mxu0 %v1332_v58  ;;  %v1389_v57 = vcombine.high %v201_v54, %v205_v55  ;;  %v206_v58 = vld [vmem:[%s2153_s1 + $0x328] sm:$0xff]  ;;  %v209_v62 = vld [vmem:[%s2153_s1 + $0x340] sm:$0xff] }
  0x2c   :  { %969 = vmatpush1.bf16.msra.mxu1 %v1334_v59  ;;  %927 = vmatprep.subr.bf16.mxu0 %v1341_v60  ;;  %v1391_v59 = vcombine.high %v202_v56, %v206_v58  ;;  %v1388_v60 = vcombine.low %v201_v54, %v205_v55  ;;  %v213_v63 = vld [vmem:[%s2153_s1 + $0x360] sm:$0xff]  ;;  %v218_v14 = vld [vmem:[%s2153_s1 + $0x388] sm:$0xff] }
  0x2d   :  { %970 = vmatprep.subr.bf16.mxu1 %v1343_v61  ;;  %v1390_v61 = vcombine.low %v202_v56, %v206_v58  ;;  %v1397_v7 = vcombine.high %v209_v62, %v213_v63  ;;  %v217_v12 = vld [vmem:[%s2153_s1 + $0x380] sm:$0xff]  ;;  %v226_v22 = vld [vmem:[%s2153_s1 + $0x3c8] sm:$0xff] }
  0x2e   :  { %v221_v13 = vld [vmem:[%s2153_s1 + $0x3a0] sm:$0xff] }
  0x2f   :  { %928 = vmatpush1.bf16.msra.mxu0 %v1340_v8  ;;  %v214_v8 = vld [vmem:[%s2153_s1 + $0x368] sm:$0xff]  ;;  %v1405_v15 = vcombine.high %v217_v12, %v221_v13  ;;  %v225_v20 = vld [vmem:[%s2153_s1 + $0x3c0] sm:$0xff] }
  0x30   :  { %971 = vmatpush1.bf16.msra.mxu1 %v1342_v9  ;;  %929 = vmatprep.subr.bf16.mxu0 %v1349_v10  ;;  %v1399_v9 = vcombine.high %v210_v6, %v214_v8  ;;  %v1396_v10 = vcombine.low %v209_v62, %v213_v63  ;;  %v229_v21 = vld [vmem:[%s2153_s1 + $0x3e0] sm:$0xff]  ;;  %v115_v62 = vld [vmem:[%s2153_s1 + $0x50] sm:$0xff] }
  0x31   :  { %972 = vmatprep.subr.bf16.mxu1 %v1351_v11  ;;  %v1398_v11 = vcombine.low %v210_v6, %v214_v8  ;;  %v1413_v23 = vcombine.high %v225_v20, %v229_v21  ;;  %v119_v63 = vld [vmem:[%s2153_s1 + $0x70] sm:$0xff] }
  0x32   :  { %v123_v8 = vld [vmem:[%s2153_s1 + $0x90] sm:$0xff] }
  0x33   :  { %930 = vmatpush1.bf16.msra.mxu0 %v1348_v16  ;;  %v222_v16 = vld [vmem:[%s2153_s1 + $0x3a8] sm:$0xff] }
  0x34   :  { %973 = vmatpush1.bf16.msra.mxu1 %v1350_v17  ;;  %931 = vmatprep.subr.bf16.mxu0 %v1357_v18  ;;  %v1407_v17 = vcombine.high %v218_v14, %v222_v16  ;;  %v1404_v18 = vcombine.low %v217_v12, %v221_v13  ;;  %v124_v12 = vld [vmem:[%s2153_s1 + $0x98] sm:$0xff] }
  0x35   :  { %974 = vmatprep.subr.bf16.mxu1 %v1359_v19  ;;  %v1406_v19 = vcombine.low %v218_v14, %v222_v16  ;;  %v128_v13 = vld [vmem:[%s2153_s1 + $0xb8] sm:$0xff]  ;;  %v1304_v14 = vcombine.low %v115_v62, %v119_v63 }
  0x37   :  { %932 = vmatpush1.bf16.msra.mxu0 %v1356_v24  ;;  %v230_v24 = vld [vmem:[%s2153_s1 + $0x3e8] sm:$0xff] }
  0x38   :  { %975 = vmatpush1.bf16.msra.mxu1 %v1358_v25  ;;  %933 = vmatprep.subr.bf16.mxu0 %v1365_v26  ;;  %v1412_v25 = vcombine.low %v225_v20, %v229_v21  ;;  %v1415_v26 = vcombine.high %v226_v22, %v230_v24  ;;  %v132_v20 = vld [vmem:[%s2153_s1 + $0xd8] sm:$0xff] }
  0x39   :  { %976 = vmatprep.subr.bf16.mxu1 %v1367_v27  ;;  %v1414_v27 = vcombine.low %v226_v22, %v230_v24  ;;  %v136_v21 = vld [vmem:[%s2153_s1 + $0xf8] sm:$0xff] }
  0x3b   :  { %934 = vmatpush1.bf16.msra.mxu0 %v1364_v39 }
  0x3c   :  { %977 = vmatpush1.bf16.msra.mxu1 %v1366_v40 }
  0xa3   :  { %v40_v28 = vpop.xlane.xlu0 %39 }
  0xa4   :  { %v45_v29 = vmul.f32 0.00390625, %v40_v28  ;;  %v107_v28 = vld [vmem:[%s2153_s1 + $0x10] sm:$0xff] }
  0xa6   :  { %v1684_v30 = vsub.f32 %v34_v2, %v45_v29  ;;  %v1688_v31 = vsub.f32 %v35_v3, %v45_v29  ;;  %v111_v29 = vld [vmem:[%s2153_s1 + $0x30] sm:$0xff] }
  0xa7   :  { %v43_v32 = vpop.xlane.xlu0 %42 }
  0xa8   :  { %v46_v33 = vmul.f32 0.00390625, %v43_v32  ;;  %v51_v34 = vmul.f32 %v1684_v30, %v1684_v30  ;;  %v52_v35 = vmul.f32 %v1688_v31, %v1688_v31  ;;  %v108_v32 = vld [vmem:[%s2153_s1 + $0x18] sm:$0xff] }
  0xaa   :  { %v1696_v36 = vsub.f32 %v36_v4, %v46_v33  ;;  %v1700_v2 = vsub.f32 %v37_v5, %v46_v33  ;;  %v55_v37 = vadd.f32 %v52_v35, %v51_v34  ;;  %v189_v4 = vld [vmem:[%s2153_s1 + $0x2a0] sm:$0xff]  ;;  %v186_v5 = vld [vmem:[%s2153_s1 + $0x288] sm:$0xff]  ;;  %v1297_v33 = vcombine.high %v107_v28, %v111_v29  ;;  %v112_v34 = vld [vmem:[%s2153_s1 + $0x38] sm:$0xff] }
  0xab   :  { %v1373_v41 = vcombine.high %v185_v1, %v189_v4  ;;  %v1375_v43 = vcombine.high %v186_v5, %v190_v42  ;;  %v1372_v44 = vcombine.low %v185_v1, %v189_v4  ;;  %v1374_v45 = vcombine.low %v186_v5, %v190_v42 }
  0xac   :  { %56 = vadd.xlane.f32.xlu1 %v55_v37  ;;  %v53_v0 = vmul.f32 %v1696_v36, %v1696_v36  ;;  %v54_v3 = vmul.f32 %v1700_v2, %v1700_v2  ;;  %v1296_v35 = vcombine.low %v107_v28, %v111_v29  ;;  %v1298_v37 = vcombine.low %v108_v32, %v112_v34  ;;  %v140_v28 = vld [vmem:[%s2153_s1 + $0x118] sm:$0xff] }
  0xad   :  { %935 = vmatprep.subr.bf16.mxu0 %v1373_v41  ;;  %978 = vmatprep.subr.bf16.mxu1 %v1375_v43  ;;  %v73_v1 = vlaneseq  ;;  %v144_v29 = vld [vmem:[%s2153_s1 + $0x138] sm:$0xff] }
  0xae   :  { %v58_v38 = vadd.f32 %v54_v3, %v53_v0  ;;  %936 = vmatpush1.bf16.msra.mxu0 %v1372_v44  ;;  %979 = vmatpush1.bf16.msra.mxu1 %v1374_v45  ;;  %v1299_v0 = vcombine.high %v108_v32, %v112_v34  ;;  %v71_v44 = vld [vmem:[%s2155_s3] sm:$0x3] }
  0xaf   :  { %937 = vmatprep.subr.bf16.mxu0 %v1381_v49  ;;  %980 = vmatprep.subr.bf16.mxu1 %v1383_v51  ;;  %v1790_v41 = vshrl.u32 %v73_v1, 7  ;;  %v87_v49 = vld [vmem:[#allocation2] sm:$0x3] }
  0xb0   :  { %59 = vadd.xlane.f32.xlu1 %v58_v38 }
  0xb1   :  { %v1793_v42 = vsub.s32 1, %v1790_v41  ;;  %v1796_v43 = vsub.s32 0, %v1790_v41 }
  0xb2   :  { %938 = vmatpush1.bf16.msra.mxu0 %v1380_v52  ;;  %981 = vmatpush1.bf16.msra.mxu1 %v1382_v53 }
  0xb3   :  { %939 = vmatprep.subr.bf16.mxu0 %v1389_v57  ;;  %982 = vmatprep.subr.bf16.mxu1 %v1391_v59  ;;  %v80_v48 = vrot.slane %v71_v44, %v1793_v42  ;;  %v76_v50 = vrot.slane %v71_v44, %v1796_v43  ;;  %v96_v52 = vrot.slane %v87_v49, %v1793_v42  ;;  %v159_v44 = vld [vmem:[%s2153_s1 + $0x1b0] sm:$0xff] }
  0xb4   :  { %v92_v53 = vrot.slane %v87_v49, %v1796_v43 }
  0xb6   :  { %940 = vmatpush1.bf16.msra.mxu0 %v1388_v60  ;;  %983 = vmatpush1.bf16.msra.mxu1 %v1390_v61 }
  0xb7   :  { %941 = vmatprep.subr.bf16.mxu0 %v1397_v7  ;;  %984 = vmatprep.subr.bf16.mxu1 %v1399_v9  ;;  %v1305_v9 = vcombine.high %v115_v62, %v119_v63 }
  0xba   :  { %942 = vmatpush1.bf16.msra.mxu0 %v1396_v10  ;;  %985 = vmatpush1.bf16.msra.mxu1 %v1398_v11  ;;  %v127_v11 = vld [vmem:[%s2153_s1 + $0xb0] sm:$0xff] }
  0xbb   :  { %943 = vmatprep.subr.bf16.mxu0 %v1405_v15  ;;  %986 = vmatprep.subr.bf16.mxu1 %v1407_v17  ;;  %v1313_v16 = vcombine.high %v123_v8, %v127_v11  ;;  %v1315_v17 = vcombine.high %v124_v12, %v128_v13  ;;  %v1312_v22 = vcombine.low %v123_v8, %v127_v11  ;;  %v180_v8 = vld [vmem:[%s2153_s1 + $0x258] sm:$0xff] }
  0xbe   :  { %944 = vmatpush1.bf16.msra.mxu0 %v1404_v18  ;;  %987 = vmatpush1.bf16.msra.mxu1 %v1406_v19  ;;  %v131_v18 = vld [vmem:[%s2153_s1 + $0xd0] sm:$0xff] }
  0xbf   :  { %945 = vmatprep.subr.bf16.mxu0 %v1413_v23  ;;  %988 = vmatprep.subr.bf16.mxu1 %v1415_v26  ;;  %v135_v19 = vld [vmem:[%s2153_s1 + $0xf0] sm:$0xff]  ;;  %v1314_v23 = vcombine.low %v124_v12, %v128_v13 }
  0xc0   :  { %v1321_v24 = vcombine.high %v131_v18, %v135_v19  ;;  %v139_v26 = vld [vmem:[%s2153_s1 + $0x110] sm:$0xff]  ;;  %v1320_v32 = vcombine.low %v131_v18, %v135_v19 }
  0xc2   :  { %946 = vmatpush1.bf16.msra.mxu0 %v1412_v25  ;;  %989 = vmatpush1.bf16.msra.mxu1 %v1414_v27  ;;  %v1323_v25 = vcombine.high %v132_v20, %v136_v21  ;;  %v143_v27 = vld [vmem:[%s2153_s1 + $0x130] sm:$0xff] }
  0xc3   :  { %1001 = vmatprep.subr.bf16.mxu0 %v1297_v33  ;;  %1044 = vmatprep.subr.bf16.mxu1 %v1299_v0  ;;  %v1322_v33 = vcombine.low %v132_v20, %v136_v21  ;;  %v1329_v34 = vcombine.high %v139_v26, %v143_v27  ;;  %v151_v0 = vld [vmem:[%s2153_s1 + $0x170] sm:$0xff] }
 0x139   :  { %v57_v3 = vpop.xlane.xlu1 %56 }
 0x13a   :  { %v61_v38 = vmul.f32 0.00390625, %v57_v3  ;;  %v148_v3 = vld [vmem:[%s2153_s1 + $0x158] sm:$0xff] }
 0x13c   :  { %v63_v39 = vadd.f32 1e-05, %v61_v38  ;;  %v152_v38 = vld [vmem:[%s2153_s1 + $0x178] sm:$0xff] }
 0x13d   :  { %v60_v40 = vpop.xlane.xlu1 %59 }
 0x13e   :  { %1437 = vrsqrt.f32 %v63_v39  ;;  %v62_v4 = vmul.f32 0.00390625, %v60_v40  ;;  %v1328_v39 = vcombine.low %v139_v26, %v143_v27  ;;  %v1330_v40 = vcombine.low %v140_v28, %v144_v29 }
 0x140   :  { %v64_v5 = vadd.f32 1e-05, %v62_v4  ;;  %v1339_v4 = vcombine.high %v148_v3, %v152_v38 }
 0x142   :  { %1439 = vrsqrt.f32 %v64_v5  ;;  %v155_v5 = vld [vmem:[%s2153_s1 + $0x190] sm:$0xff] }
 0x143   :  { %v1345_v49 = vcombine.high %v155_v5, %v159_v44 }
 0x148   :  { %v1438_v45 = vpop.eup %1437 }
 0x149   :  { %v67_v46 = vmul.f32 %v1438_v45, %v1684_v30  ;;  %v68_v47 = vmul.f32 %v1438_v45, %v1688_v31  ;;  %v156_v45 = vld [vmem:[%s2153_s1 + $0x198] sm:$0xff] }
 0x14b   :  { %v84_v56 = vmul.f32 %v80_v48, %v68_v47  ;;  %v83_v57 = vmul.f32 %v76_v50, %v67_v46  ;;  %v160_v46 = vld [vmem:[%s2153_s1 + $0x1b8] sm:$0xff] }
 0x14c   :  { %v1440_v51 = vpop.eup %1439 }
 0x14d   :  { %v69_v54 = vmul.f32 %v1440_v51, %v1696_v36  ;;  %v70_v55 = vmul.f32 %v1440_v51, %v1700_v2  ;;  %v100_v59 = vadd.f32 %v96_v52, %v84_v56  ;;  %v99_v60 = vadd.f32 %v92_v53, %v83_v57  ;;  %v116_v36 = vld [vmem:[%s2153_s1 + $0x58] sm:$0xff]  ;;  %v163_v51 = vld [vmem:[%s2153_s1 + $0x1d0] sm:$0xff] }
 0x14e   :  { %v120_v2 = vld [vmem:[%s2153_s1 + $0x78] sm:$0xff]  ;;  %v1346_v56 = vcombine.low %v156_v45, %v160_v46 }
 0x14f   :  { %v86_v58 = vmul.f32 %v80_v48, %v70_v55  ;;  %v85_v30 = vmul.f32 %v76_v50, %v69_v54  ;;  %v1307_v10 = vcombine.high %v116_v36, %v120_v2  ;;  %v1306_v15 = vcombine.low %v116_v36, %v120_v2  ;;  %v168_v54 = vld [vmem:[%s2153_s1 + $0x1f8] sm:$0xff]  ;;  %v179_v2 = vld [vmem:[%s2153_s1 + $0x250] sm:$0xff] }
 0x150   :  { %v1338_v48 = vcombine.low %v148_v3, %v152_v38  ;;  %v1347_v50 = vcombine.high %v156_v45, %v160_v46  ;;  %v1344_v55 = vcombine.low %v155_v5, %v159_v44 }
 0x151   :  { %v102_v31 = vadd.f32 %v96_v52, %v86_v58  ;;  %v101_v61 = vadd.f32 %v92_v53, %v85_v30  ;;  %v167_v52 = vld [vmem:[%s2153_s1 + $0x1f0] sm:$0xff]  ;;  %v164_v53 = vld [vmem:[%s2153_s1 + $0x1d8] sm:$0xff] }
 0x152   :  { %v1353_v57 = vcombine.high %v163_v51, %v167_v52  ;;  %v1355_v58 = vcombine.high %v164_v53, %v168_v54  ;;  %v171_v30 = vld [vmem:[%s2153_s1 + $0x210] sm:$0xff]  ;;  %v1354_v62 = vcombine.low %v164_v53, %v168_v54 }
 0x153   :  { %v104_v6 = vpack.c.bf16 %v102_v31, %v100_v59  ;;  %v1821_v7 = vpack.c.bf16 %v101_v61, %v99_v60  ;;  %v175_v59 = vld [vmem:[%s2153_s1 + $0x230] sm:$0xff]  ;;  %v172_v31 = vld [vmem:[%s2153_s1 + $0x218] sm:$0xff]  ;;  %v1352_v61 = vcombine.low %v163_v51, %v167_v52 }
 0x154   :  { %v176_v60 = vld [vmem:[%s2153_s1 + $0x238] sm:$0xff]  ;;  %v1361_v63 = vcombine.high %v171_v30, %v175_v59 }
 0x155   :  { %947 = vmatprep.mubr.bf16.mxu0 %v104_v6  ;;  %990 = vmatprep.mubr.bf16.mxu1 %v104_v6  ;;  %v1363_v36 = vcombine.high %v172_v31, %v176_v60  ;;  %v1362_v11 = vcombine.low %v172_v31, %v176_v60 }
 0x156   :  { %948 = vmatmul.mubr.bf16.vlgmr.msra.gmra.mrb[0].mxu0 %v1821_v7  ;;  %991 = vmatmul.mubr.bf16.vlgmr.msra.gmra.mrb[0].mxu1 %v1821_v7 }
 0x157   :  { %1002 = vmatpush1.bf16.msra.mxu0 %v1296_v35  ;;  %1045 = vmatpush1.bf16.msra.mxu1 %v1298_v37  ;;  %v1331_v35 = vcombine.high %v140_v28, %v144_v29  ;;  %v147_v37 = vld [vmem:[%s2153_s1 + $0x150] sm:$0xff] }
 0x158   :  { %1033 = vmatprep.mubr.bf16.mxu0 %v104_v6  ;;  %1076 = vmatprep.mubr.bf16.mxu1 %v104_v6  ;;  %v1337_v1 = vcombine.high %v147_v37, %v151_v0  ;;  %v1336_v47 = vcombine.low %v147_v37, %v151_v0  ;;  %v183_v6 = vld [vmem:[%s2153_s1 + $0x270] sm:$0xff] }
 0x159   :  { %1003 = vmatprep.subr.bf16.mxu0 %v1305_v9  ;;  %1046 = vmatprep.subr.bf16.mxu1 %v1307_v10  ;;  %v184_v9 = vld [vmem:[%s2153_s1 + $0x278] sm:$0xff]  ;;  %v1360_v10 = vcombine.low %v171_v30, %v175_v59  ;;  %v1369_v12 = vcombine.high %v179_v2, %v183_v6  ;;  %v1368_v18 = vcombine.low %v179_v2, %v183_v6  ;;  %v249_v2 = vsub.s32 3, %v1790_v41 }
 0x15a   :  { %v1371_v13 = vcombine.high %v180_v8, %v184_v9  ;;  %v1370_v19 = vcombine.low %v180_v8, %v184_v9 }
 0x15b   :  { %1004 = vmatpush1.bf16.msra.mxu0 %v1304_v14  ;;  %1047 = vmatpush1.bf16.msra.mxu1 %v1306_v15  ;;  %v187_v14 = vld [vmem:[%s2153_s1 + $0x290] sm:$0xff] }
 0x15c   :  { %1005 = vmatprep.subr.bf16.mxu0 %v1313_v16  ;;  %1048 = vmatprep.subr.bf16.mxu1 %v1315_v17  ;;  %v191_v15 = vld [vmem:[%s2153_s1 + $0x2b0] sm:$0xff]  ;;  %v188_v16 = vld [vmem:[%s2153_s1 + $0x298] sm:$0xff] }
 0x15d   :  { %v192_v17 = vld [vmem:[%s2153_s1 + $0x2b8] sm:$0xff]  ;;  %v1377_v20 = vcombine.high %v187_v14, %v191_v15  ;;  %v1376_v26 = vcombine.low %v187_v14, %v191_v15 }
 0x15e   :  { %v1379_v21 = vcombine.high %v188_v16, %v192_v17  ;;  %v1378_v27 = vcombine.low %v188_v16, %v192_v17 }
 0x15f   :  { %1006 = vmatpush1.bf16.msra.mxu0 %v1312_v22  ;;  %1049 = vmatpush1.bf16.msra.mxu1 %v1314_v23  ;;  %v195_v22 = vld [vmem:[%s2153_s1 + $0x2d0] sm:$0xff] }
 0x160   :  { %1007 = vmatprep.subr.bf16.mxu0 %v1321_v24  ;;  %1050 = vmatprep.subr.bf16.mxu1 %v1323_v25  ;;  %v199_v23 = vld [vmem:[%s2153_s1 + $0x2f0] sm:$0xff]  ;;  %v196_v24 = vld [vmem:[%s2153_s1 + $0x2d8] sm:$0xff] }
 0x161   :  { %v200_v25 = vld [vmem:[%s2153_s1 + $0x2f8] sm:$0xff]  ;;  %v1385_v28 = vcombine.high %v195_v22, %v199_v23  ;;  %v1384_v37 = vcombine.low %v195_v22, %v199_v23 }
 0x162   :  { %v1387_v29 = vcombine.high %v196_v24, %v200_v25  ;;  %v1386_v0 = vcombine.low %v196_v24, %v200_v25 }
 0x163   :  { %1008 = vmatpush1.bf16.msra.mxu0 %v1320_v32  ;;  %1051 = vmatpush1.bf16.msra.mxu1 %v1322_v33  ;;  %v203_v32 = vld [vmem:[%s2153_s1 + $0x310] sm:$0xff] }
 0x164   :  { %1009 = vmatprep.subr.bf16.mxu0 %v1329_v34  ;;  %1052 = vmatprep.subr.bf16.mxu1 %v1331_v35  ;;  %v207_v33 = vld [vmem:[%s2153_s1 + $0x330] sm:$0xff]  ;;  %v204_v34 = vld [vmem:[%s2153_s1 + $0x318] sm:$0xff] }
 0x165   :  { %v208_v35 = vld [vmem:[%s2153_s1 + $0x338] sm:$0xff]  ;;  %v1393_v3 = vcombine.high %v203_v32, %v207_v33  ;;  %v1392_v5 = vcombine.low %v203_v32, %v207_v33 }
 0x166   :  { %v1395_v38 = vcombine.high %v204_v34, %v208_v35  ;;  %v1394_v44 = vcombine.low %v204_v34, %v208_v35 }
 0x167   :  { %1010 = vmatpush1.bf16.msra.mxu0 %v1328_v39  ;;  %1053 = vmatpush1.bf16.msra.mxu1 %v1330_v40  ;;  %v211_v39 = vld [vmem:[%s2153_s1 + $0x350] sm:$0xff] }
 0x168   :  { %1011 = vmatprep.subr.bf16.mxu0 %v1337_v1  ;;  %1054 = vmatprep.subr.bf16.mxu1 %v1339_v4  ;;  %v215_v40 = vld [vmem:[%s2153_s1 + $0x370] sm:$0xff]  ;;  %v212_v1 = vld [vmem:[%s2153_s1 + $0x358] sm:$0xff] }
 0x169   :  { %v216_v4 = vld [vmem:[%s2153_s1 + $0x378] sm:$0xff]  ;;  %v1401_v45 = vcombine.high %v211_v39, %v215_v40  ;;  %v1400_v51 = vcombine.low %v211_v39, %v215_v40 }
 0x16a   :  { %v1403_v46 = vcombine.high %v212_v1, %v216_v4  ;;  %v1402_v52 = vcombine.low %v212_v1, %v216_v4 }
 0x16b   :  { %1012 = vmatpush1.bf16.msra.mxu0 %v1336_v47  ;;  %1055 = vmatpush1.bf16.msra.mxu1 %v1338_v48  ;;  %v219_v47 = vld [vmem:[%s2153_s1 + $0x390] sm:$0xff] }
 0x16c   :  { %1013 = vmatprep.subr.bf16.mxu0 %v1345_v49  ;;  %1056 = vmatprep.subr.bf16.mxu1 %v1347_v50  ;;  %v223_v48 = vld [vmem:[%s2153_s1 + $0x3b0] sm:$0xff]  ;;  %v220_v49 = vld [vmem:[%s2153_s1 + $0x398] sm:$0xff] }
 0x16d   :  { %v224_v50 = vld [vmem:[%s2153_s1 + $0x3b8] sm:$0xff]  ;;  %v1409_v53 = vcombine.high %v219_v47, %v223_v48  ;;  %v1408_v30 = vcombine.low %v219_v47, %v223_v48 }
 0x16e   :  { %v1411_v54 = vcombine.high %v220_v49, %v224_v50  ;;  %v1410_v59 = vcombine.low %v220_v49, %v224_v50 }
 0x16f   :  { %1014 = vmatpush1.bf16.msra.mxu0 %v1344_v55  ;;  %1057 = vmatpush1.bf16.msra.mxu1 %v1346_v56  ;;  %v227_v55 = vld [vmem:[%s2153_s1 + $0x3d0] sm:$0xff] }
 0x170   :  { %1015 = vmatprep.subr.bf16.mxu0 %v1353_v57  ;;  %1058 = vmatprep.subr.bf16.mxu1 %v1355_v58  ;;  %v231_v56 = vld [vmem:[%s2153_s1 + $0x3f0] sm:$0xff]  ;;  %v228_v57 = vld [vmem:[%s2153_s1 + $0x3d8] sm:$0xff] }
 0x171   :  { %v232_v58 = vld [vmem:[%s2153_s1 + $0x3f8] sm:$0xff]  ;;  %v1417_v31 = vcombine.high %v227_v55, %v231_v56 }
 0x172   :  { %v1419_v60 = vcombine.high %v228_v57, %v232_v58 }
 0x173   :  { %1016 = vmatpush1.bf16.msra.mxu0 %v1352_v61  ;;  %1059 = vmatpush1.bf16.msra.mxu1 %v1354_v62  ;;  %v1416_v61 = vcombine.low %v227_v55, %v231_v56  ;;  %v1418_v62 = vcombine.low %v228_v57, %v232_v58 }
 0x174   :  { %1017 = vmatprep.subr.bf16.mxu0 %v1361_v63  ;;  %1060 = vmatprep.subr.bf16.mxu1 %v1363_v36  ;;  %v245_v63 = vsub.s32 2, %v1790_v41  ;;  %v1999_v36 = vld [vmem:[%s2154_s2] sm:$0xff] }
 0x175   :  { %v238_v6 = vrot.slane %v1999_v36, %v1796_v43  ;;  %v242_v9 = vrot.slane %v1999_v36, %v1793_v42 }
 0x176   :  { %v246_v8 = vrot.slane %v1999_v36, %v245_v63 }
 0x177   :  { %1018 = vmatpush1.bf16.msra.mxu0 %v1360_v10  ;;  %1061 = vmatpush1.bf16.msra.mxu1 %v1362_v11  ;;  %v250_v10 = vrot.slane %v1999_v36, %v249_v2 }
 0x178   :  { %1019 = vmatprep.subr.bf16.mxu0 %v1369_v12  ;;  %1062 = vmatprep.subr.bf16.mxu1 %v1371_v13 }
 0x17b   :  { %1020 = vmatpush1.bf16.msra.mxu0 %v1368_v18  ;;  %1063 = vmatpush1.bf16.msra.mxu1 %v1370_v19 }
 0x17c   :  { %1021 = vmatprep.subr.bf16.mxu0 %v1377_v20  ;;  %1064 = vmatprep.subr.bf16.mxu1 %v1379_v21 }
 0x17f   :  { %1022 = vmatpush1.bf16.msra.mxu0 %v1376_v26  ;;  %1065 = vmatpush1.bf16.msra.mxu1 %v1378_v27 }
 0x180   :  { %1023 = vmatprep.subr.bf16.mxu0 %v1385_v28  ;;  %1066 = vmatprep.subr.bf16.mxu1 %v1387_v29 }
 0x183   :  { %1024 = vmatpush1.bf16.msra.mxu0 %v1384_v37  ;;  %1067 = vmatpush1.bf16.msra.mxu1 %v1386_v0 }
 0x184   :  { %1025 = vmatprep.subr.bf16.mxu0 %v1393_v3  ;;  %1068 = vmatprep.subr.bf16.mxu1 %v1395_v38 }
 0x187   :  { %1026 = vmatpush1.bf16.msra.mxu0 %v1392_v5  ;;  %1069 = vmatpush1.bf16.msra.mxu1 %v1394_v44 }
 0x188   :  { %1027 = vmatprep.subr.bf16.mxu0 %v1401_v45  ;;  %1070 = vmatprep.subr.bf16.mxu1 %v1403_v46 }
 0x18b   :  { %1028 = vmatpush1.bf16.msra.mxu0 %v1400_v51  ;;  %1071 = vmatpush1.bf16.msra.mxu1 %v1402_v52 }
 0x18c   :  { %1029 = vmatprep.subr.bf16.mxu0 %v1409_v53  ;;  %1072 = vmatprep.subr.bf16.mxu1 %v1411_v54 }
 0x18f   :  { %1030 = vmatpush1.bf16.msra.mxu0 %v1408_v30  ;;  %1073 = vmatpush1.bf16.msra.mxu1 %v1410_v59 }
 0x190   :  { %1031 = vmatprep.subr.bf16.mxu0 %v1417_v31  ;;  %1074 = vmatprep.subr.bf16.mxu1 %v1419_v60 }
 0x193   :  { %1032 = vmatpush1.bf16.msra.mxu0 %v1416_v61  ;;  %1075 = vmatpush1.bf16.msra.mxu1 %v1418_v62 }
 0x196   :  { %1034 = vmatmul.mubr.bf16.vlgmr.msra.gmra.mrb[4].mxu0 %v1821_v7  ;;  %1077 = vmatmul.mubr.bf16.vlgmr.msra.gmra.mrb[4].mxu1 %v1821_v7 }
 0x229   :  { %v949_v7 = vpop.f32.mrb[0].mxu0  ;;  %v992_v11 = vpop.f32.mrb[0].mxu1 }
 0x22a   :  { %v2008_v12 = vadd.f32 %v949_v7, %v238_v6  ;;  %v2010_v13 = vadd.f32 %v992_v11, %v246_v8  ;;  %v951_v14 = vpop.f32.mrb[1].mxu0  ;;  %v994_v15 = vpop.f32.mrb[1].mxu1 }
 0x22b   :  { %v2012_v16 = vadd.f32 %v951_v14, %v242_v9  ;;  %v2014_v17 = vadd.f32 %v994_v15, %v250_v10  ;;  %v953_v43 = vpop.f32.mrb[2].mxu0  ;;  %v996_v18 = vpop.f32.mrb[2].mxu1 }
 0x22c   :  { %v1103_v19 = vmul.f32 0.044715, %v2008_v12  ;;  %v1105_v42 = vmul.f32 0.044715, %v2010_v13  ;;  %v2022_v24 = vadd.f32 %v953_v43, %v238_v6  ;;  %v2024_v25 = vadd.f32 %v996_v18, %v246_v8  ;;  %v955_v26 = vpop.f32.mrb[3].mxu0  ;;  %v998_v27 = vpop.f32.mrb[3].mxu1 }
 0x22d   :  { %v1104_v20 = vmul.f32 0.044715, %v2012_v16  ;;  %v1106_v21 = vmul.f32 0.044715, %v2014_v17  ;;  %v2028_v32 = vadd.f32 %v955_v26, %v242_v9  ;;  %v2039_v1 = vadd.f32 %v998_v27, %v250_v10 }
 0x22e   :  { %v1119_v22 = vmul.f32 %v1103_v19, %v2008_v12  ;;  %v1121_v23 = vmul.f32 %v1105_v42, %v2010_v13  ;;  %v1111_v35 = vmul.f32 0.044715, %v2022_v24  ;;  %v1113_v3 = vmul.f32 0.044715, %v2024_v25 }
 0x22f   :  { %v1120_v28 = vmul.f32 %v1104_v20, %v2012_v16  ;;  %v1122_v29 = vmul.f32 %v1106_v21, %v2014_v17  ;;  %v1112_v45 = vmul.f32 0.044715, %v2028_v32  ;;  %v1114_v54 = vmul.f32 0.044715, %v2039_v1 }
 0x230   :  { %v1135_v33 = vmul.f32 %v1119_v22, %v2008_v12  ;;  %v1137_v34 = vmul.f32 %v1121_v23, %v2010_v13  ;;  %v1127_v40 = vmul.f32 %v1111_v35, %v2022_v24  ;;  %v1129_v44 = vmul.f32 %v1113_v3, %v2024_v25 }
 0x231   :  { %v1136_v37 = vmul.f32 %v1120_v28, %v2012_v16  ;;  %v1138_v0 = vmul.f32 %v1122_v29, %v2014_v17  ;;  %v1128_v52 = vmul.f32 %v1112_v45, %v2028_v32  ;;  %v1130_v58 = vmul.f32 %v1114_v54, %v2039_v1 }
 0x232   :  { %v1151_v38 = vadd.f32 %v1135_v33, %v2008_v12  ;;  %v1153_v39 = vadd.f32 %v1137_v34, %v2010_v13  ;;  %v1143_v48 = vmul.f32 %v1127_v40, %v2022_v24  ;;  %v1145_v51 = vmul.f32 %v1129_v44, %v2024_v25 }
 0x233   :  { %v1152_v4 = vadd.f32 %v1136_v37, %v2012_v16  ;;  %v1154_v5 = vadd.f32 %v1138_v0, %v2014_v17  ;;  %v1144_v56 = vmul.f32 %v1128_v52, %v2028_v32  ;;  %v1146_v31 = vmul.f32 %v1130_v58, %v2039_v1 }
 0x234   :  { %v1167_v46 = vmul.f32 0.7978846, %v1151_v38  ;;  %v1169_v47 = vmul.f32 0.7978846, %v1153_v39  ;;  %v1159_v53 = vadd.f32 %v1143_v48, %v2022_v24  ;;  %v1161_v55 = vadd.f32 %v1145_v51, %v2024_v25 }
 0x235   :  { %v1168_v49 = vmul.f32 0.7978846, %v1152_v4  ;;  %v1170_v50 = vmul.f32 0.7978846, %v1154_v5  ;;  %v1160_v59 = vadd.f32 %v1144_v56, %v2028_v32  ;;  %v1162_v61 = vadd.f32 %v1146_v31, %v2039_v1 }
 0x236   :  { %1441 = vtanh.f32 %v1167_v46  ;;  %v1175_v57 = vmul.f32 0.7978846, %v1159_v53  ;;  %v1177_v30 = vmul.f32 0.7978846, %v1161_v55  ;;  %v1087_v6 = vmul.f32 0.5, %v2008_v12 }
 0x237   :  { %1443 = vtanh.f32 %v1169_v47  ;;  %v1176_v60 = vmul.f32 0.7978846, %v1160_v59  ;;  %v1178_v62 = vmul.f32 0.7978846, %v1162_v61  ;;  %v1089_v10 = vmul.f32 0.5, %v2010_v13 }
 0x238   :  { %1445 = vtanh.f32 %v1168_v49  ;;  %v1088_v15 = vmul.f32 0.5, %v2012_v16  ;;  %v1090_v42 = vmul.f32 0.5, %v2014_v17  ;;  %v1095_v12 = vmul.f32 0.5, %v2022_v24 }
 0x239   :  { %1447 = vtanh.f32 %v1170_v50  ;;  %v1096_v34 = vmul.f32 0.5, %v2028_v32  ;;  %v1097_v17 = vmul.f32 0.5, %v2024_v25  ;;  %v1098_v0 = vmul.f32 0.5, %v2039_v1 }
 0x23a   :  { %1449 = vtanh.f32 %v1175_v57  ;;  %v253_v25 = vsub.s32 4, %v1790_v41  ;;  %v261_v40 = vsub.s32 6, %v1790_v41  ;;  %v257_v4 = vsub.s32 5, %v1790_v41 }
 0x23b   :  { %1451 = vtanh.f32 %v1177_v30  ;;  %v265_v1 = vsub.s32 7, %v1790_v41 }
 0x23c   :  { %1453 = vtanh.f32 %v1176_v60  ;;  %v254_v5 = vrot.slane %v1999_v36, %v253_v25  ;;  %v262_v44 = vrot.slane %v1999_v36, %v261_v40  ;;  %v258_v45 = vrot.slane %v1999_v36, %v257_v4 }
 0x23d   :  { %1455 = vtanh.f32 %v1178_v62  ;;  %v266_v46 = vrot.slane %v1999_v36, %v265_v1 }
 0x240   :  { %v1442_v63 = vpop.eup %1441 }
 0x241   :  { %v1444_v2 = vpop.eup %1443  ;;  %v1199_v8 = vadd.f32 1.0, %v1442_v63 }
 0x242   :  { %v1446_v9 = vpop.eup %1445  ;;  %v1201_v7 = vadd.f32 1.0, %v1444_v2 }
 0x243   :  { %v1448_v11 = vpop.eup %1447  ;;  %v1215_v14 = vmul.f32 %v1199_v8, %v1087_v6  ;;  %v1200_v43 = vadd.f32 1.0, %v1446_v9 }
 0x244   :  { %v1450_v18 = vpop.eup %1449  ;;  %v1217_v19 = vmul.f32 %v1201_v7, %v1089_v10  ;;  %v1202_v20 = vadd.f32 1.0, %v1448_v11 }
 0x245   :  { %v1452_v21 = vpop.eup %1451  ;;  %v1216_v22 = vmul.f32 %v1200_v43, %v1088_v15  ;;  %v1207_v23 = vadd.f32 1.0, %v1450_v18 }
 0x246   :  { %v1218_v26 = vmul.f32 %v1202_v20, %v1090_v42  ;;  %v1454_v27 = vpop.eup %1453  ;;  %v1209_v13 = vadd.f32 1.0, %v1452_v21 }
 0x247   :  { %v1428_v28 = vpack.c.bf16 %v1216_v22, %v1215_v14  ;;  %v1223_v33 = vmul.f32 %v1207_v23, %v1095_v12  ;;  %v1208_v16 = vadd.f32 1.0, %v1454_v27  ;;  %v1456_v35 = vpop.eup %1455 }
 0x248   :  { %v1429_v29 = vpack.c.bf16 %v1218_v26, %v1217_v19  ;;  %v1225_v37 = vmul.f32 %v1209_v13, %v1097_v17  ;;  %v1210_v3 = vadd.f32 1.0, %v1456_v35 }
 0x249   :  { %1279 = vst [vmem:[%s2157_s5] sm:$0xff] %v1428_v28  ;;  %v1224_v24 = vmul.f32 %v1208_v16, %v1096_v34 }
 0x24a   :  { %1280 = vst [vmem:[%s2157_s5 + $0x8] sm:$0xff] %v1429_v29  ;;  %v1226_v39 = vmul.f32 %v1210_v3, %v1098_v0 }
 0x24b   :  { %v1432_v38 = vpack.c.bf16 %v1224_v24, %v1223_v33 }
 0x24c   :  { %v1433_v32 = vpack.c.bf16 %v1226_v39, %v1225_v37 }
 0x24d   :  { %1283 = vst [vmem:[%s2157_s5 + $0x20] sm:$0xff] %v1432_v38 }
 0x24e   :  { %1284 = vst [vmem:[%s2157_s5 + $0x28] sm:$0xff] %v1433_v32 }
 0x269   :  { %v1035_v47 = vpop.f32.mrb[4].mxu0  ;;  %v1078_v48 = vpop.f32.mrb[4].mxu1 }
 0x26a   :  { %v2084_v49 = vadd.f32 %v1035_v47, %v254_v5  ;;  %v2086_v50 = vadd.f32 %v1078_v48, %v262_v44  ;;  %v1037_v51 = vpop.f32.mrb[5].mxu0  ;;  %v1080_v52 = vpop.f32.mrb[5].mxu1 }
 0x26b   :  { %v2088_v53 = vadd.f32 %v1037_v51, %v258_v45  ;;  %v2090_v54 = vadd.f32 %v1080_v52, %v266_v46  ;;  %v1039_v41 = vpop.f32.mrb[6].mxu0  ;;  %v1082_v55 = vpop.f32.mrb[6].mxu1 }
 0x26c   :  { %v1107_v56 = vmul.f32 0.044715, %v2084_v49  ;;  %v1109_v57 = vmul.f32 0.044715, %v2086_v50  ;;  %v2098_v31 = vadd.f32 %v1039_v41, %v254_v5  ;;  %v2100_v60 = vadd.f32 %v1082_v55, %v262_v44  ;;  %v1041_v61 = vpop.f32.mrb[7].mxu0  ;;  %v1084_v62 = vpop.f32.mrb[7].mxu1 }
 0x26d   :  { %v1108_v36 = vmul.f32 0.044715, %v2088_v53  ;;  %v1110_v58 = vmul.f32 0.044715, %v2090_v54  ;;  %v2104_v6 = vadd.f32 %v1041_v61, %v258_v45  ;;  %v2115_v19 = vadd.f32 %v1084_v62, %v266_v46 }
 0x26e   :  { %v1123_v30 = vmul.f32 %v1107_v56, %v2084_v49  ;;  %v1125_v59 = vmul.f32 %v1109_v57, %v2086_v50  ;;  %v1115_v10 = vmul.f32 0.044715, %v2098_v31  ;;  %v1117_v14 = vmul.f32 0.044715, %v2100_v60 }
 0x26f   :  { %v1124_v63 = vmul.f32 %v1108_v36, %v2088_v53  ;;  %v1126_v2 = vmul.f32 %v1110_v58, %v2090_v54  ;;  %v1116_v22 = vmul.f32 0.044715, %v2104_v6  ;;  %v1118_v34 = vmul.f32 0.044715, %v2115_v19 }
 0x270   :  { %v1139_v8 = vmul.f32 %v1123_v30, %v2084_v49  ;;  %v1141_v9 = vmul.f32 %v1125_v59, %v2086_v50  ;;  %v1131_v18 = vmul.f32 %v1115_v10, %v2098_v31  ;;  %v1133_v21 = vmul.f32 %v1117_v14, %v2100_v60 }
 0x271   :  { %v1140_v7 = vmul.f32 %v1124_v63, %v2088_v53  ;;  %v1142_v11 = vmul.f32 %v1126_v2, %v2090_v54  ;;  %v1132_v29 = vmul.f32 %v1116_v22, %v2104_v6  ;;  %v1134_v24 = vmul.f32 %v1118_v34, %v2115_v19 }
 0x272   :  { %v1155_v15 = vadd.f32 %v1139_v8, %v2084_v49  ;;  %v1157_v43 = vadd.f32 %v1141_v9, %v2086_v50  ;;  %v1147_v12 = vmul.f32 %v1131_v18, %v2098_v31  ;;  %v1149_v13 = vmul.f32 %v1133_v21, %v2100_v60 }
 0x273   :  { %v1156_v42 = vadd.f32 %v1140_v7, %v2088_v53  ;;  %v1158_v20 = vadd.f32 %v1142_v11, %v2090_v54  ;;  %v1148_v17 = vmul.f32 %v1132_v29, %v2104_v6  ;;  %v1150_v3 = vmul.f32 %v1134_v24, %v2115_v19 }
 0x274   :  { %v1171_v23 = vmul.f32 0.7978846, %v1155_v15  ;;  %v1173_v26 = vmul.f32 0.7978846, %v1157_v43  ;;  %v1163_v33 = vadd.f32 %v1147_v12, %v2098_v31  ;;  %v1165_v16 = vadd.f32 %v1149_v13, %v2100_v60 }
 0x275   :  { %v1172_v27 = vmul.f32 0.7978846, %v1156_v42  ;;  %v1174_v28 = vmul.f32 0.7978846, %v1158_v20  ;;  %v1164_v0 = vadd.f32 %v1148_v17, %v2104_v6  ;;  %v1166_v39 = vadd.f32 %v1150_v3, %v2115_v19 }
 0x276   :  { %1457 = vtanh.f32 %v1171_v23  ;;  %v1179_v35 = vmul.f32 0.7978846, %v1163_v33  ;;  %v1181_v37 = vmul.f32 0.7978846, %v1165_v16  ;;  %v1091_v4 = vmul.f32 0.5, %v2084_v49 }
 0x277   :  { %1459 = vtanh.f32 %v1173_v26  ;;  %v1180_v38 = vmul.f32 0.7978846, %v1164_v0  ;;  %v1182_v32 = vmul.f32 0.7978846, %v1166_v39  ;;  %v1093_v44 = vmul.f32 0.5, %v2086_v50 }
 0x278   :  { %1461 = vtanh.f32 %v1172_v27  ;;  %v1092_v48 = vmul.f32 0.5, %v2088_v53  ;;  %v1094_v55 = vmul.f32 0.5, %v2090_v54  ;;  %v1099_v49 = vmul.f32 0.5, %v2098_v31 }
 0x279   :  { %1463 = vtanh.f32 %v1174_v28  ;;  %v1100_v2 = vmul.f32 0.5, %v2104_v6  ;;  %v1101_v54 = vmul.f32 0.5, %v2100_v60  ;;  %v1102_v10 = vmul.f32 0.5, %v2115_v19 }
 0x27a   :  { %1465 = vtanh.f32 %v1179_v35 }
 0x27b   :  { %1467 = vtanh.f32 %v1181_v37 }
 0x27c   :  { %1469 = vtanh.f32 %v1180_v38 }
 0x27d   :  { %1471 = vtanh.f32 %v1182_v32 }
 0x280   :  { %v1458_v25 = vpop.eup %1457 }
 0x281   :  { %v1460_v40 = vpop.eup %1459  ;;  %v1203_v1 = vadd.f32 1.0, %v1458_v25 }
 0x282   :  { %v1462_v5 = vpop.eup %1461  ;;  %v1205_v45 = vadd.f32 1.0, %v1460_v40 }
 0x283   :  { %v1464_v46 = vpop.eup %1463  ;;  %v1219_v47 = vmul.f32 %v1203_v1, %v1091_v4  ;;  %v1204_v51 = vadd.f32 1.0, %v1462_v5 }
 0x284   :  { %v1466_v52 = vpop.eup %1465  ;;  %v1221_v41 = vmul.f32 %v1205_v45, %v1093_v44  ;;  %v1206_v56 = vadd.f32 1.0, %v1464_v46 }
 0x285   :  { %v1468_v57 = vpop.eup %1467  ;;  %v1220_v36 = vmul.f32 %v1204_v51, %v1092_v48  ;;  %v1211_v58 = vadd.f32 1.0, %v1466_v52 }
 0x286   :  { %v1222_v30 = vmul.f32 %v1206_v56, %v1094_v55  ;;  %v1470_v59 = vpop.eup %1469  ;;  %v1213_v50 = vadd.f32 1.0, %v1468_v57 }
 0x287   :  { %v1430_v61 = vpack.c.bf16 %v1220_v36, %v1219_v47  ;;  %v1227_v63 = vmul.f32 %v1211_v58, %v1099_v49  ;;  %v1212_v53 = vadd.f32 1.0, %v1470_v59  ;;  %v1472_v8 = vpop.eup %1471 }
 0x288   :  { %v1431_v62 = vpack.c.bf16 %v1222_v30, %v1221_v41  ;;  %v1229_v9 = vmul.f32 %v1213_v50, %v1101_v54  ;;  %v1214_v7 = vadd.f32 1.0, %v1472_v8 }
 0x289   :  { %1281 = vst [vmem:[%s2157_s5 + $0x10] sm:$0xff] %v1430_v61  ;;  %v1228_v31 = vmul.f32 %v1212_v53, %v1100_v2 }
 0x28a   :  { %1282 = vst [vmem:[%s2157_s5 + $0x18] sm:$0xff] %v1431_v62  ;;  %v1230_v14 = vmul.f32 %v1214_v7, %v1102_v10 }
 0x28b   :  { %v1434_v11 = vpack.c.bf16 %v1228_v31, %v1227_v63 }
 0x28c   :  { %v1435_v6 = vpack.c.bf16 %v1230_v14, %v1229_v9 }
 0x28d   :  { %1285 = vst [vmem:[%s2157_s5 + $0x30] sm:$0xff] %v1434_v11 }
 0x28e   :  { %1286 = vst [vmem:[%s2157_s5 + $0x38] sm:$0xff] %v1435_v6 }
 0x28f   :  { %1291 = vsyncpa [#allocation3], 1 }

// kernel: gpt2_forward.15
= control target key start
LH: loop header
LB: loop body
LE: loop exit
PB: predicated region body
PF: predicated region fallthrough
CT: control target
= control target key end

     0   :  { %s1857_s1 = inlined_call_operand.vmem [shape: bf16[1024,256], index: 1, kind: input, shape index: {}]   ;;  %s1858_s0 = inlined_call_operand.vmem [shape: bf16[16,1024], index: 0, kind: input, shape index: {}]   ;;  %s1859_s2 = inlined_call_operand.vmem [shape: f32[1,256], index: 2, kind: input, shape index: {}]   ;;  %s1860_s3 = inlined_call_operand.vmem [shape: bf16[16,256], index: 3, kind: input, shape index: {}]   ;;  %s1861_s4 = inlined_call_operand.vmem [shape: bf16[16,256], index: 4, kind: output, shape index: {}]  }
   0x1   :  { %v1201_v0 = vld [vmem:[%s1857_s1 + $0x4] ss:$8 sps:$4 sm:$0xff]   ;;  %v1205_v2 = vld [vmem:[%s1857_s1] ss:$8 sps:$4 sm:$0xff]   ;;  %v1207_v4 = vld [vmem:[%s1857_s1 + $0x14] ss:$8 sps:$4 sm:$0xff]  }
   0x2   :  { %v1203_v1 = vld [vmem:[%s1857_s1 + $0x204] ss:$8 sps:$4 sm:$0xff]   ;;  %845 = vmatprep.subr.bf16.mxu1 %v1201_v0  ;;  %v1206_v3 = vld [vmem:[%s1857_s1 + $0x200] ss:$8 sps:$4 sm:$0xff]   ;;  %v1209_v5 = vld [vmem:[%s1857_s1 + $0x214] ss:$8 sps:$4 sm:$0xff]  }
   0x3   :  { %931 = vmatprep.subr.bf16.mxu0 %v1203_v1  ;;  %846 = vmatpush1.bf16.msra.mxu1 %v1205_v2  ;;  %v1211_v6 = vld [vmem:[%s1857_s1 + $0x10] ss:$8 sps:$4 sm:$0xff]   ;;  %v1213_v8 = vld [vmem:[%s1857_s1 + $0x24] ss:$8 sps:$4 sm:$0xff]   ;;  %v1217_v10 = vld [vmem:[%s1857_s1 + $0x20] ss:$8 sps:$4 sm:$0xff]  }
   0x4   :  { %932 = vmatpush1.bf16.msra.mxu0 %v1206_v3  ;;  %847 = vmatprep.subr.bf16.mxu1 %v1207_v4  ;;  %v1212_v7 = vld [vmem:[%s1857_s1 + $0x210] ss:$8 sps:$4 sm:$0xff]   ;;  %v1215_v9 = vld [vmem:[%s1857_s1 + $0x224] ss:$8 sps:$4 sm:$0xff]   ;;  %v1218_v11 = vld [vmem:[%s1857_s1 + $0x220] ss:$8 sps:$4 sm:$0xff]  }
   0x5   :  { %933 = vmatprep.subr.bf16.mxu0 %v1209_v5  ;;  %v1219_v12 = vld [vmem:[%s1857_s1 + $0x34] ss:$8 sps:$4 sm:$0xff]   ;;  %v1223_v14 = vld [vmem:[%s1857_s1 + $0x30] ss:$8 sps:$4 sm:$0xff]   ;;  %v1225_v16 = vld [vmem:[%s1857_s1 + $0x44] ss:$8 sps:$4 sm:$0xff]  }
   0x6   :  { %v1221_v13 = vld [vmem:[%s1857_s1 + $0x234] ss:$8 sps:$4 sm:$0xff]   ;;  %v1224_v15 = vld [vmem:[%s1857_s1 + $0x230] ss:$8 sps:$4 sm:$0xff]   ;;  %v1227_v17 = vld [vmem:[%s1857_s1 + $0x244] ss:$8 sps:$4 sm:$0xff]  }
   0x7   :  { %848 = vmatpush1.bf16.msra.mxu1 %v1211_v6  ;;  %v1229_v18 = vld [vmem:[%s1857_s1 + $0x40] ss:$8 sps:$4 sm:$0xff]   ;;  %v1231_v20 = vld [vmem:[%s1857_s1 + $0x54] ss:$8 sps:$4 sm:$0xff]   ;;  %v1235_v22 = vld [vmem:[%s1857_s1 + $0x50] ss:$8 sps:$4 sm:$0xff]  }
   0x8   :  { %934 = vmatpush1.bf16.msra.mxu0 %v1212_v7  ;;  %849 = vmatprep.subr.bf16.mxu1 %v1213_v8  ;;  %v1230_v19 = vld [vmem:[%s1857_s1 + $0x240] ss:$8 sps:$4 sm:$0xff]   ;;  %v1233_v21 = vld [vmem:[%s1857_s1 + $0x254] ss:$8 sps:$4 sm:$0xff]   ;;  %v1236_v23 = vld [vmem:[%s1857_s1 + $0x250] ss:$8 sps:$4 sm:$0xff]  }
   0x9   :  { %935 = vmatprep.subr.bf16.mxu0 %v1215_v9  ;;  %v1237_v24 = vld [vmem:[%s1857_s1 + $0x64] ss:$8 sps:$4 sm:$0xff]   ;;  %v1241_v26 = vld [vmem:[%s1857_s1 + $0x60] ss:$8 sps:$4 sm:$0xff]   ;;  %v1243_v28 = vld [vmem:[%s1857_s1 + $0x74] ss:$8 sps:$4 sm:$0xff]  }
   0xa   :  { %v1239_v25 = vld [vmem:[%s1857_s1 + $0x264] ss:$8 sps:$4 sm:$0xff]   ;;  %v1242_v27 = vld [vmem:[%s1857_s1 + $0x260] ss:$8 sps:$4 sm:$0xff]   ;;  %v1245_v29 = vld [vmem:[%s1857_s1 + $0x274] ss:$8 sps:$4 sm:$0xff]  }
   0xb   :  { %850 = vmatpush1.bf16.msra.mxu1 %v1217_v10  ;;  %v1247_v30 = vld [vmem:[%s1857_s1 + $0x70] ss:$8 sps:$4 sm:$0xff]   ;;  %v1249_v32 = vld [vmem:[%s1857_s1 + $0x84] ss:$8 sps:$4 sm:$0xff]   ;;  %v1253_v34 = vld [vmem:[%s1857_s1 + $0x80] ss:$8 sps:$4 sm:$0xff]  }
   0xc   :  { %936 = vmatpush1.bf16.msra.mxu0 %v1218_v11  ;;  %851 = vmatprep.subr.bf16.mxu1 %v1219_v12  ;;  %v1248_v31 = vld [vmem:[%s1857_s1 + $0x270] ss:$8 sps:$4 sm:$0xff]   ;;  %v1251_v33 = vld [vmem:[%s1857_s1 + $0x284] ss:$8 sps:$4 sm:$0xff]   ;;  %v1254_v35 = vld [vmem:[%s1857_s1 + $0x280] ss:$8 sps:$4 sm:$0xff]  }
   0xd   :  { %937 = vmatprep.subr.bf16.mxu0 %v1221_v13  ;;  %v1255_v36 = vld [vmem:[%s1857_s1 + $0x94] ss:$8 sps:$4 sm:$0xff]   ;;  %v1259_v38 = vld [vmem:[%s1857_s1 + $0x90] ss:$8 sps:$4 sm:$0xff]   ;;  %v1261_v40 = vld [vmem:[%s1857_s1 + $0xa4] ss:$8 sps:$4 sm:$0xff]  }
   0xe   :  { %v1257_v37 = vld [vmem:[%s1857_s1 + $0x294] ss:$8 sps:$4 sm:$0xff]   ;;  %v1260_v39 = vld [vmem:[%s1857_s1 + $0x290] ss:$8 sps:$4 sm:$0xff]   ;;  %v1263_v41 = vld [vmem:[%s1857_s1 + $0x2a4] ss:$8 sps:$4 sm:$0xff]  }
   0xf   :  { %852 = vmatpush1.bf16.msra.mxu1 %v1223_v14  ;;  %v1265_v42 = vld [vmem:[%s1857_s1 + $0xa0] ss:$8 sps:$4 sm:$0xff]   ;;  %v1267_v44 = vld [vmem:[%s1857_s1 + $0xb4] ss:$8 sps:$4 sm:$0xff]   ;;  %v1271_v46 = vld [vmem:[%s1857_s1 + $0xb0] ss:$8 sps:$4 sm:$0xff]  }
  0x10   :  { %938 = vmatpush1.bf16.msra.mxu0 %v1224_v15  ;;  %853 = vmatprep.subr.bf16.mxu1 %v1225_v16  ;;  %v1266_v43 = vld [vmem:[%s1857_s1 + $0x2a0] ss:$8 sps:$4 sm:$0xff]   ;;  %v1269_v45 = vld [vmem:[%s1857_s1 + $0x2b4] ss:$8 sps:$4 sm:$0xff]   ;;  %v1272_v47 = vld [vmem:[%s1857_s1 + $0x2b0] ss:$8 sps:$4 sm:$0xff]  }
  0x11   :  { %939 = vmatprep.subr.bf16.mxu0 %v1227_v17  ;;  %v17_v48 = vld [vmem:[%s1858_s0] sm:$0xff]  ;;  %v19_v53 = vld [vmem:[%s1858_s0 + $0x10] sm:$0xff] }
  0x12   :  { %v21_v49 = vld [vmem:[%s1858_s0 + $0x20] sm:$0xff]  ;;  %v23_v54 = vld [vmem:[%s1858_s0 + $0x30] sm:$0xff] }
  0x13   :  { %854 = vmatpush1.bf16.msra.mxu1 %v1229_v18  ;;  %v1273_v50 = vld [vmem:[%s1857_s1 + $0xc4] ss:$8 sps:$4 sm:$0xff]   ;;  %v1046_v52 = vcombine.high %v17_v48, %v21_v49  ;;  %v1050_v55 = vcombine.high %v19_v53, %v23_v54  ;;  %v1277_v56 = vld [vmem:[%s1857_s1 + $0xc0] ss:$8 sps:$4 sm:$0xff]   ;;  %v1279_v58 = vld [vmem:[%s1857_s1 + $0xd4] ss:$8 sps:$4 sm:$0xff]   ;;  %v1045_v8 = vcombine.low %v17_v48, %v21_v49  ;;  %v1049_v10 = vcombine.low %v19_v53, %v23_v54 }
  0x14   :  { %940 = vmatpush1.bf16.msra.mxu0 %v1230_v19  ;;  %855 = vmatprep.subr.bf16.mxu1 %v1231_v20  ;;  %v1275_v51 = vld [vmem:[%s1857_s1 + $0x2c4] ss:$8 sps:$4 sm:$0xff]   ;;  %v1278_v57 = vld [vmem:[%s1857_s1 + $0x2c0] ss:$8 sps:$4 sm:$0xff]   ;;  %v1281_v59 = vld [vmem:[%s1857_s1 + $0x2d4] ss:$8 sps:$4 sm:$0xff]  }
  0x15   :  { %941 = vmatprep.subr.bf16.mxu0 %v1233_v21  ;;  %877 = vmatprep.mubr.bf16.mxu1 %v1046_v52  ;;  %v1283_v60 = vld [vmem:[%s1857_s1 + $0xd0] ss:$8 sps:$4 sm:$0xff]   ;;  %v1285_v62 = vld [vmem:[%s1857_s1 + $0xe4] ss:$8 sps:$4 sm:$0xff]   ;;  %v1289_v0 = vld [vmem:[%s1857_s1 + $0xe0] ss:$8 sps:$4 sm:$0xff]  }
  0x16   :  { %963 = vmatprep.mubr.bf16.mxu0 %v1050_v55  ;;  %v1284_v61 = vld [vmem:[%s1857_s1 + $0x2d0] ss:$8 sps:$4 sm:$0xff]   ;;  %v1287_v63 = vld [vmem:[%s1857_s1 + $0x2e4] ss:$8 sps:$4 sm:$0xff]   ;;  %v1290_v1 = vld [vmem:[%s1857_s1 + $0x2e0] ss:$8 sps:$4 sm:$0xff]  }
  0x17   :  { %856 = vmatpush1.bf16.msra.mxu1 %v1235_v22  ;;  %v1291_v2 = vld [vmem:[%s1857_s1 + $0xf4] ss:$8 sps:$4 sm:$0xff]   ;;  %v1295_v4 = vld [vmem:[%s1857_s1 + $0xf0] ss:$8 sps:$4 sm:$0xff]   ;;  %v1299_v6 = vld [vmem:[%s1857_s1 + $0x104] ss:$8 sps:$4 sm:$0xff]  }
  0x18   :  { %942 = vmatpush1.bf16.msra.mxu0 %v1236_v23  ;;  %857 = vmatprep.subr.bf16.mxu1 %v1237_v24  ;;  %v1293_v3 = vld [vmem:[%s1857_s1 + $0x2f4] ss:$8 sps:$4 sm:$0xff]   ;;  %v1296_v5 = vld [vmem:[%s1857_s1 + $0x2f0] ss:$8 sps:$4 sm:$0xff]   ;;  %v1302_v7 = vld [vmem:[%s1857_s1 + $0x304] ss:$8 sps:$4 sm:$0xff]  }
  0x19   :  { %943 = vmatprep.subr.bf16.mxu0 %v1239_v25  ;;  %v1297_v9 = vld [vmem:[%s1857_s1 + $0x100] ss:$8 sps:$4 sm:$0xff]   ;;  %v1305_v12 = vld [vmem:[%s1857_s1 + $0x114] ss:$8 sps:$4 sm:$0xff]   ;;  %v1303_v14 = vld [vmem:[%s1857_s1 + $0x110] ss:$8 sps:$4 sm:$0xff]  }
  0x1a   :  { %v1300_v11 = vld [vmem:[%s1857_s1 + $0x300] ss:$8 sps:$4 sm:$0xff]   ;;  %v1308_v13 = vld [vmem:[%s1857_s1 + $0x314] ss:$8 sps:$4 sm:$0xff]   ;;  %v1306_v15 = vld [vmem:[%s1857_s1 + $0x310] ss:$8 sps:$4 sm:$0xff]  }
  0x1b   :  { %858 = vmatpush1.bf16.msra.mxu1 %v1241_v26  ;;  %v1311_v16 = vld [vmem:[%s1857_s1 + $0x124] ss:$8 sps:$4 sm:$0xff]   ;;  %v1309_v18 = vld [vmem:[%s1857_s1 + $0x120] ss:$8 sps:$4 sm:$0xff]   ;;  %v1317_v20 = vld [vmem:[%s1857_s1 + $0x134] ss:$8 sps:$4 sm:$0xff]  }
  0x1c   :  { %944 = vmatpush1.bf16.msra.mxu0 %v1242_v27  ;;  %859 = vmatprep.subr.bf16.mxu1 %v1243_v28  ;;  %v1314_v17 = vld [vmem:[%s1857_s1 + $0x324] ss:$8 sps:$4 sm:$0xff]   ;;  %v1312_v19 = vld [vmem:[%s1857_s1 + $0x320] ss:$8 sps:$4 sm:$0xff]   ;;  %v1320_v21 = vld [vmem:[%s1857_s1 + $0x334] ss:$8 sps:$4 sm:$0xff]  }
  0x1d   :  { %945 = vmatprep.subr.bf16.mxu0 %v1245_v29  ;;  %v1315_v22 = vld [vmem:[%s1857_s1 + $0x130] ss:$8 sps:$4 sm:$0xff]   ;;  %v1323_v24 = vld [vmem:[%s1857_s1 + $0x144] ss:$8 sps:$4 sm:$0xff]   ;;  %v1321_v26 = vld [vmem:[%s1857_s1 + $0x140] ss:$8 sps:$4 sm:$0xff]  }
  0x1e   :  { %v1318_v23 = vld [vmem:[%s1857_s1 + $0x330] ss:$8 sps:$4 sm:$0xff]   ;;  %v1326_v25 = vld [vmem:[%s1857_s1 + $0x344] ss:$8 sps:$4 sm:$0xff]   ;;  %v1324_v27 = vld [vmem:[%s1857_s1 + $0x340] ss:$8 sps:$4 sm:$0xff]  }
  0x1f   :  { %860 = vmatpush1.bf16.msra.mxu1 %v1247_v30  ;;  %v1329_v28 = vld [vmem:[%s1857_s1 + $0x154] ss:$8 sps:$4 sm:$0xff]   ;;  %v1327_v30 = vld [vmem:[%s1857_s1 + $0x150] ss:$8 sps:$4 sm:$0xff]   ;;  %v1345_v48 = vld [vmem:[%s1857_s1 + $0x180] ss:$8 sps:$4 sm:$0xff]  }
  0x20   :  { %946 = vmatpush1.bf16.msra.mxu0 %v1248_v31  ;;  %861 = vmatprep.subr.bf16.mxu1 %v1249_v32  ;;  %v1332_v29 = vld [vmem:[%s1857_s1 + $0x354] ss:$8 sps:$4 sm:$0xff]   ;;  %v1330_v31 = vld [vmem:[%s1857_s1 + $0x350] ss:$8 sps:$4 sm:$0xff]   ;;  %v1335_v32 = vld [vmem:[%s1857_s1 + $0x164] ss:$8 sps:$4 sm:$0xff]  }
  0x21   :  { %947 = vmatprep.subr.bf16.mxu0 %v1251_v33  ;;  %v1338_v33 = vld [vmem:[%s1857_s1 + $0x364] ss:$8 sps:$4 sm:$0xff]   ;;  %v1348_v49 = vld [vmem:[%s1857_s1 + $0x380] ss:$8 sps:$4 sm:$0xff]   ;;  %v1351_v52 = vld [vmem:[%s1857_s1 + $0x190] ss:$8 sps:$4 sm:$0xff]  }
  0x22   :  { %v1354_v53 = vld [vmem:[%s1857_s1 + $0x390] ss:$8 sps:$4 sm:$0xff]   ;;  %v1359_v54 = vld [vmem:[%s1857_s1 + $0x1a4] ss:$8 sps:$4 sm:$0xff]  }
  0x23   :  { %862 = vmatpush1.bf16.msra.mxu1 %v1253_v34  ;;  %v1703_v34 = vld [vmem:[%s1858_s0 + $0x8] sm:$0xff] }
  0x24   :  { %948 = vmatpush1.bf16.msra.mxu0 %v1254_v35  ;;  %863 = vmatprep.subr.bf16.mxu1 %v1255_v36  ;;  %v1708_v35 = vld [vmem:[%s1858_s0 + $0x28] sm:$0xff]  ;;  %v1713_v36 = vld [vmem:[%s1858_s0 + $0x18] sm:$0xff] }
  0x25   :  { %949 = vmatprep.subr.bf16.mxu0 %v1257_v37  ;;  %v1718_v37 = vld [vmem:[%s1858_s0 + $0x38] sm:$0xff]  ;;  %v1362_v55 = vld [vmem:[%s1857_s1 + $0x3a4] ss:$8 sps:$4 sm:$0xff]  }
  0x27   :  { %864 = vmatpush1.bf16.msra.mxu1 %v1259_v38  ;;  %v1333_v38 = vld [vmem:[%s1857_s1 + $0x160] ss:$8 sps:$4 sm:$0xff]  }
  0x28   :  { %950 = vmatpush1.bf16.msra.mxu0 %v1260_v39  ;;  %865 = vmatprep.subr.bf16.mxu1 %v1261_v40  ;;  %v1336_v39 = vld [vmem:[%s1857_s1 + $0x360] ss:$8 sps:$4 sm:$0xff]   ;;  %v1048_v40 = vcombine.high %v1703_v34, %v1708_v35 }
  0x29   :  { %951 = vmatprep.subr.bf16.mxu0 %v1263_v41  ;;  %v1341_v41 = vld [vmem:[%s1857_s1 + $0x174] ss:$8 sps:$4 sm:$0xff]  }
  0x2b   :  { %866 = vmatpush1.bf16.msra.mxu1 %v1265_v42  ;;  %v1344_v42 = vld [vmem:[%s1857_s1 + $0x374] ss:$8 sps:$4 sm:$0xff]  }
  0x2c   :  { %952 = vmatpush1.bf16.msra.mxu0 %v1266_v43  ;;  %867 = vmatprep.subr.bf16.mxu1 %v1267_v44  ;;  %v1052_v43 = vcombine.high %v1713_v36, %v1718_v37  ;;  %v1339_v44 = vld [vmem:[%s1857_s1 + $0x170] ss:$8 sps:$4 sm:$0xff]  }
  0x2d   :  { %953 = vmatprep.subr.bf16.mxu0 %v1269_v45  ;;  %v1342_v45 = vld [vmem:[%s1857_s1 + $0x370] ss:$8 sps:$4 sm:$0xff]  }
  0x2f   :  { %868 = vmatpush1.bf16.msra.mxu1 %v1271_v46  ;;  %v1347_v46 = vld [vmem:[%s1857_s1 + $0x184] ss:$8 sps:$4 sm:$0xff]  }
  0x30   :  { %954 = vmatpush1.bf16.msra.mxu0 %v1272_v47  ;;  %869 = vmatprep.subr.bf16.mxu1 %v1273_v50  ;;  %v1350_v47 = vld [vmem:[%s1857_s1 + $0x384] ss:$8 sps:$4 sm:$0xff]   ;;  %v1353_v50 = vld [vmem:[%s1857_s1 + $0x194] ss:$8 sps:$4 sm:$0xff]  }
  0x31   :  { %955 = vmatprep.subr.bf16.mxu0 %v1275_v51  ;;  %v1356_v51 = vld [vmem:[%s1857_s1 + $0x394] ss:$8 sps:$4 sm:$0xff]  }
  0x33   :  { %870 = vmatpush1.bf16.msra.mxu1 %v1277_v56  ;;  %v1357_v56 = vld [vmem:[%s1857_s1 + $0x1a0] ss:$8 sps:$4 sm:$0xff]  }
  0x34   :  { %956 = vmatpush1.bf16.msra.mxu0 %v1278_v57  ;;  %871 = vmatprep.subr.bf16.mxu1 %v1279_v58  ;;  %v1360_v57 = vld [vmem:[%s1857_s1 + $0x3a0] ss:$8 sps:$4 sm:$0xff]   ;;  %v1365_v58 = vld [vmem:[%s1857_s1 + $0x1b4] ss:$8 sps:$4 sm:$0xff]  }
  0x35   :  { %957 = vmatprep.subr.bf16.mxu0 %v1281_v59  ;;  %v1368_v59 = vld [vmem:[%s1857_s1 + $0x3b4] ss:$8 sps:$4 sm:$0xff]  }
  0x37   :  { %872 = vmatpush1.bf16.msra.mxu1 %v1283_v60  ;;  %v1363_v60 = vld [vmem:[%s1857_s1 + $0x1b0] ss:$8 sps:$4 sm:$0xff]  }
  0x38   :  { %958 = vmatpush1.bf16.msra.mxu0 %v1284_v61  ;;  %873 = vmatprep.subr.bf16.mxu1 %v1285_v62  ;;  %v1366_v61 = vld [vmem:[%s1857_s1 + $0x3b0] ss:$8 sps:$4 sm:$0xff]   ;;  %v1371_v62 = vld [vmem:[%s1857_s1 + $0x1c4] ss:$8 sps:$4 sm:$0xff]  }
  0x39   :  { %959 = vmatprep.subr.bf16.mxu0 %v1287_v63  ;;  %v1374_v63 = vld [vmem:[%s1857_s1 + $0x3c4] ss:$8 sps:$4 sm:$0xff]  }
  0x3b   :  { %874 = vmatpush1.bf16.msra.mxu1 %v1289_v0  ;;  %v1369_v0 = vld [vmem:[%s1857_s1 + $0x1c0] ss:$8 sps:$4 sm:$0xff]  }
  0x3c   :  { %960 = vmatpush1.bf16.msra.mxu0 %v1290_v1  ;;  %875 = vmatprep.subr.bf16.mxu1 %v1291_v2  ;;  %v1372_v1 = vld [vmem:[%s1857_s1 + $0x3c0] ss:$8 sps:$4 sm:$0xff]   ;;  %v1377_v2 = vld [vmem:[%s1857_s1 + $0x1d4] ss:$8 sps:$4 sm:$0xff]  }
  0x3d   :  { %961 = vmatprep.subr.bf16.mxu0 %v1293_v3  ;;  %v1380_v3 = vld [vmem:[%s1857_s1 + $0x3d4] ss:$8 sps:$4 sm:$0xff]  }
  0x3f   :  { %876 = vmatpush1.bf16.msra.mxu1 %v1295_v4  ;;  %v1375_v4 = vld [vmem:[%s1857_s1 + $0x1d0] ss:$8 sps:$4 sm:$0xff]  }
  0x40   :  { %962 = vmatpush1.bf16.msra.mxu0 %v1296_v5  ;;  %888 = vmatprep.subr.bf16.mxu1 %v1299_v6  ;;  %v1378_v5 = vld [vmem:[%s1857_s1 + $0x3d0] ss:$8 sps:$4 sm:$0xff]   ;;  %v1383_v6 = vld [vmem:[%s1857_s1 + $0x1e4] ss:$8 sps:$4 sm:$0xff]  }
  0x41   :  { %974 = vmatprep.subr.bf16.mxu0 %v1302_v7  ;;  %v1386_v7 = vld [vmem:[%s1857_s1 + $0x3e4] ss:$8 sps:$4 sm:$0xff]  }
  0x42   :  { %878 = vmatmul.mubr.bf16.vlgmr.msra.gmra.mrb[0].mxu1 %v1045_v8  ;;  %v1381_v8 = vld [vmem:[%s1857_s1 + $0x1e0] ss:$8 sps:$4 sm:$0xff]  }
  0x43   :  { %964 = vmatmul.mubr.bf16.vlgmr.msra.gmra.mrb[0].mxu0 %v1049_v10  ;;  %889 = vmatpush1.bf16.msra.mxu1 %v1297_v9  ;;  %v1384_v9 = vld [vmem:[%s1857_s1 + $0x3e0] ss:$8 sps:$4 sm:$0xff]   ;;  %v1389_v10 = vld [vmem:[%s1857_s1 + $0x1f4] ss:$8 sps:$4 sm:$0xff]  }
  0x44   :  { %975 = vmatpush1.bf16.msra.mxu0 %v1300_v11  ;;  %890 = vmatprep.subr.bf16.mxu1 %v1305_v12  ;;  %v1392_v11 = vld [vmem:[%s1857_s1 + $0x3f4] ss:$8 sps:$4 sm:$0xff]   ;;  %v1387_v12 = vld [vmem:[%s1857_s1 + $0x1f0] ss:$8 sps:$4 sm:$0xff]  }
  0x45   :  { %976 = vmatprep.subr.bf16.mxu0 %v1308_v13  ;;  %920 = vmatprep.mubr.bf16.mxu1 %v1048_v40  ;;  %v1390_v13 = vld [vmem:[%s1857_s1 + $0x3f0] ss:$8 sps:$4 sm:$0xff]  }
  0x46   :  { %1006 = vmatprep.mubr.bf16.mxu0 %v1052_v43 }
  0x47   :  { %891 = vmatpush1.bf16.msra.mxu1 %v1303_v14  ;;  %v1047_v14 = vcombine.low %v1703_v34, %v1708_v35 }
  0x48   :  { %977 = vmatpush1.bf16.msra.mxu0 %v1306_v15  ;;  %892 = vmatprep.subr.bf16.mxu1 %v1311_v16  ;;  %v1051_v15 = vcombine.low %v1713_v36, %v1718_v37  ;;  %v155_v16 = vlaneseq }
  0x49   :  { %978 = vmatprep.subr.bf16.mxu0 %v1314_v17 }
  0x4a   :  { %v156_v17 = vshrl.u32 %v155_v16, 7 }
  0x4b   :  { %893 = vmatpush1.bf16.msra.mxu1 %v1309_v18 }
  0x4c   :  { %979 = vmatpush1.bf16.msra.mxu0 %v1312_v19  ;;  %894 = vmatprep.subr.bf16.mxu1 %v1317_v20  ;;  %v157_v18 = vsub.s32 0, %v156_v17  ;;  %v153_v19 = vld [vmem:[%s1859_s2] sm:$0x3]  ;;  %v161_v20 = vsub.s32 1, %v156_v17 }
  0x4d   :  { %980 = vmatprep.subr.bf16.mxu0 %v1320_v21 }
  0x4e   :  { %v158_v21 = vrot.slane %v153_v19, %v157_v18 }
  0x4f   :  { %895 = vmatpush1.bf16.msra.mxu1 %v1315_v22  ;;  %v1017_v22 = vld [vmem:[%s1860_s3] sm:$0xff] }
  0x50   :  { %981 = vmatpush1.bf16.msra.mxu0 %v1318_v23  ;;  %896 = vmatprep.subr.bf16.mxu1 %v1323_v24  ;;  %v162_v23 = vrot.slane %v153_v19, %v161_v20 }
  0x51   :  { %982 = vmatprep.subr.bf16.mxu0 %v1326_v25 }
  0x53   :  { %897 = vmatpush1.bf16.msra.mxu1 %v1321_v26  ;;  %v1018_v26 = vld [vmem:[%s1860_s3 + $0x8] sm:$0xff] }
  0x54   :  { %983 = vmatpush1.bf16.msra.mxu0 %v1324_v27  ;;  %898 = vmatprep.subr.bf16.mxu1 %v1329_v28  ;;  %v1019_v28 = vunpack.c.l.bf16 %v1017_v22  ;;  %v1021_v37 = vunpack.c.l.bf16 %v1018_v26 }
  0x55   :  { %984 = vmatprep.subr.bf16.mxu0 %v1332_v29 }
  0x57   :  { %899 = vmatpush1.bf16.msra.mxu1 %v1327_v30 }
  0x58   :  { %985 = vmatpush1.bf16.msra.mxu0 %v1330_v31  ;;  %900 = vmatprep.subr.bf16.mxu1 %v1335_v32  ;;  %v1020_v32 = vunpack.c.h.bf16 %v1017_v22 }
  0x59   :  { %986 = vmatprep.subr.bf16.mxu0 %v1338_v33 }
  0x5b   :  { %901 = vmatpush1.bf16.msra.mxu1 %v1333_v38 }
  0x5c   :  { %987 = vmatpush1.bf16.msra.mxu0 %v1336_v39  ;;  %902 = vmatprep.subr.bf16.mxu1 %v1341_v41 }
  0x5d   :  { %988 = vmatprep.subr.bf16.mxu0 %v1344_v42  ;;  %v1022_v42 = vunpack.c.h.bf16 %v1018_v26 }
  0x5f   :  { %903 = vmatpush1.bf16.msra.mxu1 %v1339_v44 }
  0x60   :  { %989 = vmatpush1.bf16.msra.mxu0 %v1342_v45  ;;  %904 = vmatprep.subr.bf16.mxu1 %v1347_v46 }
  0x61   :  { %990 = vmatprep.subr.bf16.mxu0 %v1350_v47 }
  0x63   :  { %905 = vmatpush1.bf16.msra.mxu1 %v1345_v48 }
  0x64   :  { %991 = vmatpush1.bf16.msra.mxu0 %v1348_v49  ;;  %906 = vmatprep.subr.bf16.mxu1 %v1353_v50 }
  0x65   :  { %992 = vmatprep.subr.bf16.mxu0 %v1356_v51 }
  0x67   :  { %907 = vmatpush1.bf16.msra.mxu1 %v1351_v52 }
  0x68   :  { %993 = vmatpush1.bf16.msra.mxu0 %v1354_v53  ;;  %908 = vmatprep.subr.bf16.mxu1 %v1359_v54 }
  0x69   :  { %994 = vmatprep.subr.bf16.mxu0 %v1362_v55 }
  0x6b   :  { %909 = vmatpush1.bf16.msra.mxu1 %v1357_v56 }
  0x6c   :  { %995 = vmatpush1.bf16.msra.mxu0 %v1360_v57  ;;  %910 = vmatprep.subr.bf16.mxu1 %v1365_v58 }
  0x6d   :  { %996 = vmatprep.subr.bf16.mxu0 %v1368_v59 }
  0x6f   :  { %911 = vmatpush1.bf16.msra.mxu1 %v1363_v60 }
  0x70   :  { %997 = vmatpush1.bf16.msra.mxu0 %v1366_v61  ;;  %912 = vmatprep.subr.bf16.mxu1 %v1371_v62 }
  0x71   :  { %998 = vmatprep.subr.bf16.mxu0 %v1374_v63 }
  0x73   :  { %913 = vmatpush1.bf16.msra.mxu1 %v1369_v0 }
  0x74   :  { %999 = vmatpush1.bf16.msra.mxu0 %v1372_v1  ;;  %914 = vmatprep.subr.bf16.mxu1 %v1377_v2 }
  0x75   :  { %1000 = vmatprep.subr.bf16.mxu0 %v1380_v3 }
  0x77   :  { %915 = vmatpush1.bf16.msra.mxu1 %v1375_v4 }
  0x78   :  { %1001 = vmatpush1.bf16.msra.mxu0 %v1378_v5  ;;  %916 = vmatprep.subr.bf16.mxu1 %v1383_v6 }
  0x79   :  { %1002 = vmatprep.subr.bf16.mxu0 %v1386_v7 }
  0x7b   :  { %917 = vmatpush1.bf16.msra.mxu1 %v1381_v8 }
  0x7c   :  { %1003 = vmatpush1.bf16.msra.mxu0 %v1384_v9  ;;  %918 = vmatprep.subr.bf16.mxu1 %v1389_v10 }
  0x7d   :  { %1004 = vmatprep.subr.bf16.mxu0 %v1392_v11 }
  0x7f   :  { %919 = vmatpush1.bf16.msra.mxu1 %v1387_v12 }
  0x80   :  { %1005 = vmatpush1.bf16.msra.mxu0 %v1390_v13 }
  0x82   :  { %921 = vmatmul.mubr.bf16.vlgmr.msra.gmra.mrb[0].mxu1 %v1047_v14 }
  0x83   :  { %1007 = vmatmul.mubr.bf16.vlgmr.msra.gmra.mrb[0].mxu0 %v1051_v15 }
 0x155   :  { %v922_v24 = vpop.f32.mrb[0].mxu1 }
 0x156   :  { %v1008_v25 = vpop.f32.mrb[0].mxu0  ;;  %v1185_v27 = vadd.f32 %v922_v24, %v158_v21  ;;  %v924_v29 = vpop.f32.mrb[1].mxu1 }
 0x157   :  { %v1010_v30 = vpop.f32.mrb[1].mxu0  ;;  %v1187_v31 = vadd.f32 %v924_v29, %v162_v23  ;;  %v926_v33 = vpop.f32.mrb[2].mxu1 }
 0x158   :  { %v1012_v34 = vpop.f32.mrb[2].mxu0  ;;  %v1186_v35 = vadd.f32 %v1185_v27, %v1008_v25  ;;  %v1189_v36 = vadd.f32 %v926_v33, %v158_v21  ;;  %v928_v38 = vpop.f32.mrb[3].mxu1 }
 0x159   :  { %v1014_v39 = vpop.f32.mrb[3].mxu0  ;;  %v1188_v40 = vadd.f32 %v1187_v31, %v1010_v30  ;;  %v1191_v41 = vadd.f32 %v928_v38, %v162_v23 }
 0x15a   :  { %v1023_v43 = vadd.f32 %v1186_v35, %v1019_v28  ;;  %v1190_v44 = vadd.f32 %v1189_v36, %v1012_v34 }
 0x15b   :  { %v1024_v45 = vadd.f32 %v1188_v40, %v1020_v32  ;;  %v1192_v46 = vadd.f32 %v1191_v41, %v1014_v39 }
 0x15c   :  { %v1025_v47 = vadd.f32 %v1190_v44, %v1021_v37 }
 0x15d   :  { %v1183_v48 = vpack.c.bf16 %v1024_v45, %v1023_v43  ;;  %v1026_v49 = vadd.f32 %v1192_v46, %v1022_v42 }
 0x15f   :  { %1039 = vst [vmem:[%s1861_s4] sm:$0xff] %v1183_v48  ;;  %v1184_v50 = vpack.c.bf16 %v1026_v49, %v1025_v47 }
 0x161   :  { %1040 = vst [vmem:[%s1861_s4 + $0x8] sm:$0xff] %v1184_v50 }

// kernel: gpt2_forward.18
= control target key start
LH: loop header
LB: loop body
LE: loop exit
PB: predicated region body
PF: predicated region fallthrough
CT: control target
= control target key end

     0   :  { %v53_v34 = vlaneseq  ;;  %s535_s1 = inlined_call_operand.vmem [shape: bf16[256,256], index: 1, kind: input, shape index: {}]   ;;  %s536_s0 = inlined_call_operand.vmem [shape: bf16[16,256], index: 0, kind: input, shape index: {}]   ;;  %s537_s2 = inlined_call_operand.vmem [shape: f32[1,256], index: 2, kind: input, shape index: {}]   ;;  %s538_s3 = inlined_call_operand.vmem [shape: bf16[16,256], index: 3, kind: input, shape index: {}]   ;;  %s539_s4 = inlined_call_operand.vmem [shape: bf16[16,256], index: 4, kind: output, shape index: {}]  }
   0x1   :  { %v342_v0 = vld [vmem:[%s535_s1 + $0x4] ss:$8 sps:$4 sm:$0xff]   ;;  %v344_v1 = vld [vmem:[%s535_s1] ss:$8 sps:$4 sm:$0xff]   ;;  %v345_v2 = vld [vmem:[%s535_s1 + $0x14] ss:$8 sps:$4 sm:$0xff]  }
   0x2   :  { %233 = vmatprep.subr.bf16.mxu0 %v342_v0  ;;  %v347_v3 = vld [vmem:[%s535_s1 + $0x10] ss:$8 sps:$4 sm:$0xff]   ;;  %v348_v4 = vld [vmem:[%s535_s1 + $0x24] ss:$8 sps:$4 sm:$0xff]   ;;  %v350_v5 = vld [vmem:[%s535_s1 + $0x20] ss:$8 sps:$4 sm:$0xff]  }
   0x3   :  { %234 = vmatpush1.bf16.msra.mxu0 %v344_v1  ;;  %v351_v6 = vld [vmem:[%s535_s1 + $0x34] ss:$8 sps:$4 sm:$0xff]   ;;  %v353_v7 = vld [vmem:[%s535_s1 + $0x30] ss:$8 sps:$4 sm:$0xff]   ;;  %v354_v8 = vld [vmem:[%s535_s1 + $0x44] ss:$8 sps:$4 sm:$0xff]  }
   0x4   :  { %235 = vmatprep.subr.bf16.mxu0 %v345_v2  ;;  %v356_v9 = vld [vmem:[%s535_s1 + $0x40] ss:$8 sps:$4 sm:$0xff]   ;;  %v357_v10 = vld [vmem:[%s535_s1 + $0x54] ss:$8 sps:$4 sm:$0xff]   ;;  %v359_v11 = vld [vmem:[%s535_s1 + $0x50] ss:$8 sps:$4 sm:$0xff]  }
   0x5   :  { %v360_v12 = vld [vmem:[%s535_s1 + $0x64] ss:$8 sps:$4 sm:$0xff]   ;;  %v362_v14 = vld [vmem:[%s535_s1 + $0x60] ss:$8 sps:$4 sm:$0xff]   ;;  %v363_v15 = vld [vmem:[%s535_s1 + $0x74] ss:$8 sps:$4 sm:$0xff]  }
   0x6   :  { %v392_v13 = vld [vmem:[%s536_s0 + $0x4] ss:$8 sps:$4 sm:$0xff]   ;;  %v365_v16 = vld [vmem:[%s535_s1 + $0x70] ss:$8 sps:$4 sm:$0xff]   ;;  %v368_v18 = vld [vmem:[%s535_s1 + $0x80] ss:$8 sps:$4 sm:$0xff]  }
   0x7   :  { %236 = vmatpush1.bf16.msra.mxu0 %v347_v3  ;;  %265 = vmatprep.mubr.bf16.mxu0 %v392_v13  ;;  %v366_v17 = vld [vmem:[%s535_s1 + $0x84] ss:$8 sps:$4 sm:$0xff]   ;;  %v369_v19 = vld [vmem:[%s535_s1 + $0x94] ss:$8 sps:$4 sm:$0xff]   ;;  %v371_v20 = vld [vmem:[%s535_s1 + $0x90] ss:$8 sps:$4 sm:$0xff]  }
   0x8   :  { %237 = vmatprep.subr.bf16.mxu0 %v348_v4  ;;  %v372_v21 = vld [vmem:[%s535_s1 + $0xa4] ss:$8 sps:$4 sm:$0xff]   ;;  %v374_v22 = vld [vmem:[%s535_s1 + $0xa0] ss:$8 sps:$4 sm:$0xff]   ;;  %v375_v23 = vld [vmem:[%s535_s1 + $0xb4] ss:$8 sps:$4 sm:$0xff]  }
   0x9   :  { %v377_v24 = vld [vmem:[%s535_s1 + $0xb0] ss:$8 sps:$4 sm:$0xff]   ;;  %v378_v25 = vld [vmem:[%s535_s1 + $0xc4] ss:$8 sps:$4 sm:$0xff]   ;;  %v380_v26 = vld [vmem:[%s535_s1 + $0xc0] ss:$8 sps:$4 sm:$0xff]  }
   0xa   :  { %v381_v27 = vld [vmem:[%s535_s1 + $0xd4] ss:$8 sps:$4 sm:$0xff]   ;;  %v383_v28 = vld [vmem:[%s535_s1 + $0xd0] ss:$8 sps:$4 sm:$0xff]   ;;  %v384_v29 = vld [vmem:[%s535_s1 + $0xe4] ss:$8 sps:$4 sm:$0xff]  }
   0xb   :  { %238 = vmatpush1.bf16.msra.mxu0 %v350_v5  ;;  %v386_v30 = vld [vmem:[%s535_s1 + $0xe0] ss:$8 sps:$4 sm:$0xff]   ;;  %v387_v31 = vld [vmem:[%s535_s1 + $0xf4] ss:$8 sps:$4 sm:$0xff]   ;;  %v389_v32 = vld [vmem:[%s535_s1 + $0xf0] ss:$8 sps:$4 sm:$0xff]  }
   0xc   :  { %239 = vmatprep.subr.bf16.mxu0 %v351_v6  ;;  %v390_v33 = vld [vmem:[%s536_s0] ss:$8 sps:$4 sm:$0xff]   ;;  %v54_v35 = vshrl.u32 %v53_v34, 7 }
   0xd   :  { %v51_v37 = vld [vmem:[%s537_s2] sm:$0x3]  ;;  %v277_v42 = vld [vmem:[%s538_s3 + $0x8] sm:$0xff] }
   0xe   :  { %v55_v36 = vsub.s32 0, %v54_v35  ;;  %v59_v38 = vsub.s32 1, %v54_v35  ;;  %v276_v39 = vld [vmem:[%s538_s3] sm:$0xff]  ;;  %v280_v48 = vunpack.c.l.bf16 %v277_v42  ;;  %v281_v51 = vunpack.c.h.bf16 %v277_v42 }
   0xf   :  { %240 = vmatpush1.bf16.msra.mxu0 %v353_v7  ;;  %v278_v43 = vunpack.c.l.bf16 %v276_v39  ;;  %v279_v45 = vunpack.c.h.bf16 %v276_v39 }
  0x10   :  { %241 = vmatprep.subr.bf16.mxu0 %v354_v8  ;;  %v56_v40 = vrot.slane %v51_v37, %v55_v36  ;;  %v60_v41 = vrot.slane %v51_v37, %v59_v38 }
  0x13   :  { %242 = vmatpush1.bf16.msra.mxu0 %v356_v9 }
  0x14   :  { %243 = vmatprep.subr.bf16.mxu0 %v357_v10 }
  0x17   :  { %244 = vmatpush1.bf16.msra.mxu0 %v359_v11 }
  0x18   :  { %245 = vmatprep.subr.bf16.mxu0 %v360_v12 }
  0x1b   :  { %246 = vmatpush1.bf16.msra.mxu0 %v362_v14 }
  0x1c   :  { %247 = vmatprep.subr.bf16.mxu0 %v363_v15 }
  0x1f   :  { %248 = vmatpush1.bf16.msra.mxu0 %v365_v16 }
  0x20   :  { %249 = vmatprep.subr.bf16.mxu0 %v366_v17 }
  0x23   :  { %250 = vmatpush1.bf16.msra.mxu0 %v368_v18 }
  0x24   :  { %251 = vmatprep.subr.bf16.mxu0 %v369_v19 }
  0x27   :  { %252 = vmatpush1.bf16.msra.mxu0 %v371_v20 }
  0x28   :  { %253 = vmatprep.subr.bf16.mxu0 %v372_v21 }
  0x2b   :  { %254 = vmatpush1.bf16.msra.mxu0 %v374_v22 }
  0x2c   :  { %255 = vmatprep.subr.bf16.mxu0 %v375_v23 }
  0x2f   :  { %256 = vmatpush1.bf16.msra.mxu0 %v377_v24 }
  0x30   :  { %257 = vmatprep.subr.bf16.mxu0 %v378_v25 }
  0x33   :  { %258 = vmatpush1.bf16.msra.mxu0 %v380_v26 }
  0x34   :  { %259 = vmatprep.subr.bf16.mxu0 %v381_v27 }
  0x37   :  { %260 = vmatpush1.bf16.msra.mxu0 %v383_v28 }
  0x38   :  { %261 = vmatprep.subr.bf16.mxu0 %v384_v29 }
  0x3b   :  { %262 = vmatpush1.bf16.msra.mxu0 %v386_v30 }
  0x3c   :  { %263 = vmatprep.subr.bf16.mxu0 %v387_v31 }
  0x3f   :  { %264 = vmatpush1.bf16.msra.mxu0 %v389_v32 }
  0x42   :  { %266 = vmatmul.mubr.bf16.vlgmr.msra.gmra.mrb[0].mxu0 %v390_v33 }
 0x115   :  { %v267_v44 = vpop.f32.mrb[0].mxu0 }
 0x116   :  { %v268_v46 = vadd.f32 %v267_v44, %v56_v40  ;;  %v269_v47 = vpop.f32.mrb[1].mxu0 }
 0x117   :  { %v270_v49 = vadd.f32 %v269_v47, %v60_v41  ;;  %v271_v50 = vpop.f32.mrb[2].mxu0 }
 0x118   :  { %v282_v52 = vadd.f32 %v278_v43, %v268_v46  ;;  %v272_v53 = vadd.f32 %v271_v50, %v56_v40  ;;  %v273_v54 = vpop.f32.mrb[3].mxu0 }
 0x119   :  { %v283_v55 = vadd.f32 %v279_v45, %v270_v49  ;;  %v274_v56 = vadd.f32 %v273_v54, %v60_v41 }
 0x11a   :  { %v284_v57 = vadd.f32 %v280_v48, %v272_v53 }
 0x11b   :  { %v340_v58 = vpack.c.bf16 %v283_v55, %v282_v52  ;;  %v285_v59 = vadd.f32 %v281_v51, %v274_v56 }
 0x11d   :  { %298 = vst [vmem:[%s539_s4] sm:$0xff] %v340_v58  ;;  %v341_v60 = vpack.c.bf16 %v285_v59, %v284_v57 }
 0x11f   :  { %299 = vst [vmem:[%s539_s4 + $0x8] sm:$0xff] %v341_v60 }

// kernel: gpt2_forward.16
= control target key start
LH: loop header
LB: loop body
LE: loop exit
PB: predicated region body
PF: predicated region fallthrough
CT: control target
= control target key end

     0   :  { %s1550_s0 = inlined_call_operand.vmem [shape: bf16[16,256], index: 0, kind: input, shape index: {}]   ;;  %s1551_s1 = inlined_call_operand.vmem [shape: bf16[256,768], index: 1, kind: input, shape index: {}]   ;;  %s1552_s3 = inlined_call_operand.vmem [shape: f32[1,256], index: 3, kind: input, shape index: {}]   ;;  %s1553_s4 = inlined_call_operand.vmem [shape: f32[1,256], index: 4, kind: input, shape index: {}]   ;;  %s1554_s2 = inlined_call_operand.vmem [shape: f32[1,768], index: 2, kind: input, shape index: {}]   ;;  %s1555_s5 = inlined_call_operand.vmem [shape: bf16[16,768], index: 5, kind: output, shape index: {}]  }
   0x1   :  { %v1165_v0 = vld [vmem:[%s1550_s0] sm:$0xff]  ;;  %v1170_v1 = vld [vmem:[%s1550_s0 + $0x8] sm:$0xff]  ;;  %v993_v14 = vld [vmem:[%s1551_s1 + $0x3c] ss:$24 sps:$4 sm:$0xff]  }
   0x2   :  { %v22_v2 = vunpack.c.l.bf16 %v1165_v0  ;;  %v23_v3 = vunpack.c.h.bf16 %v1165_v0  ;;  %v24_v4 = vunpack.c.l.bf16 %v1170_v1  ;;  %v25_v5 = vunpack.c.h.bf16 %v1170_v1  ;;  %v984_v8 = vld [vmem:[%s1551_s1 + $0x4] ss:$24 sps:$4 sm:$0xff]   ;;  %v986_v9 = vld [vmem:[%s1551_s1] ss:$24 sps:$4 sm:$0xff]   ;;  %v990_v12 = vld [vmem:[%s1551_s1 + $0x34] ss:$24 sps:$4 sm:$0xff]  }
   0x3   :  { %701 = vmatprep.subr.bf16.mxu0 %v984_v8  ;;  %v987_v10 = vld [vmem:[%s1551_s1 + $0xc] ss:$24 sps:$4 sm:$0xff]   ;;  %v989_v11 = vld [vmem:[%s1551_s1 + $0x8] ss:$24 sps:$4 sm:$0xff]   ;;  %v995_v15 = vld [vmem:[%s1551_s1 + $0x38] ss:$24 sps:$4 sm:$0xff]  }
   0x4   :  { %v26_v6 = vadd.f32 %v23_v3, %v22_v2  ;;  %v29_v7 = vadd.f32 %v25_v5, %v24_v4  ;;  %702 = vmatpush1.bf16.msra.mxu0 %v986_v9  ;;  %v992_v13 = vld [vmem:[%s1551_s1 + $0x30] ss:$24 sps:$4 sm:$0xff]   ;;  %744 = vmatprep.subr.bf16.mxu1 %v987_v10  ;;  %v996_v16 = vld [vmem:[%s1551_s1 + $0x64] ss:$24 sps:$4 sm:$0xff]   ;;  %v998_v17 = vld [vmem:[%s1551_s1 + $0x60] ss:$24 sps:$4 sm:$0xff]  }
   0x5   :  { %745 = vmatpush1.bf16.msra.mxu1 %v989_v11  ;;  %703 = vmatprep.subr.bf16.mxu0 %v990_v12  ;;  %v999_v18 = vld [vmem:[%s1551_s1 + $0x6c] ss:$24 sps:$4 sm:$0xff]   ;;  %v1001_v20 = vld [vmem:[%s1551_s1 + $0x68] ss:$24 sps:$4 sm:$0xff]   ;;  %v1005_v21 = vld [vmem:[%s1551_s1 + $0x9c] ss:$24 sps:$4 sm:$0xff]  }
   0x6   :  { %27 = vadd.xlane.f32.xlu0 %v26_v6  ;;  %746 = vmatprep.subr.bf16.mxu1 %v993_v14  ;;  %v1002_v19 = vld [vmem:[%s1551_s1 + $0x94] ss:$24 sps:$4 sm:$0xff]   ;;  %v1004_v22 = vld [vmem:[%s1551_s1 + $0x90] ss:$24 sps:$4 sm:$0xff]   ;;  %v1008_v23 = vld [vmem:[%s1551_s1 + $0xc4] ss:$24 sps:$4 sm:$0xff]  }
   0x7   :  { %v1007_v24 = vld [vmem:[%s1551_s1 + $0x98] ss:$24 sps:$4 sm:$0xff]   ;;  %v1011_v25 = vld [vmem:[%s1551_s1 + $0xcc] ss:$24 sps:$4 sm:$0xff]   ;;  %v1013_v28 = vld [vmem:[%s1551_s1 + $0xc8] ss:$24 sps:$4 sm:$0xff]  }
   0x8   :  { %704 = vmatpush1.bf16.msra.mxu0 %v992_v13  ;;  %v1010_v26 = vld [vmem:[%s1551_s1 + $0xc0] ss:$24 sps:$4 sm:$0xff]   ;;  %v1014_v27 = vld [vmem:[%s1551_s1 + $0xf4] ss:$24 sps:$4 sm:$0xff]   ;;  %v1016_v30 = vld [vmem:[%s1551_s1 + $0xf0] ss:$24 sps:$4 sm:$0xff]  }
   0x9   :  { %705 = vmatprep.subr.bf16.mxu0 %v996_v16  ;;  %747 = vmatpush1.bf16.msra.mxu1 %v995_v15  ;;  %v1017_v29 = vld [vmem:[%s1551_s1 + $0xfc] ss:$24 sps:$4 sm:$0xff]   ;;  %v1019_v32 = vld [vmem:[%s1551_s1 + $0xf8] ss:$24 sps:$4 sm:$0xff]   ;;  %v1023_v34 = vld [vmem:[%s1551_s1 + $0x12c] ss:$24 sps:$4 sm:$0xff]  }
   0xa   :  { %30 = vadd.xlane.f32.xlu0 %v29_v7  ;;  %748 = vmatprep.subr.bf16.mxu1 %v999_v18  ;;  %v1020_v31 = vld [vmem:[%s1551_s1 + $0x124] ss:$24 sps:$4 sm:$0xff]   ;;  %v1022_v33 = vld [vmem:[%s1551_s1 + $0x120] ss:$24 sps:$4 sm:$0xff]   ;;  %v1026_v36 = vld [vmem:[%s1551_s1 + $0x154] ss:$24 sps:$4 sm:$0xff]  }
   0xb   :  { %v1025_v35 = vld [vmem:[%s1551_s1 + $0x128] ss:$24 sps:$4 sm:$0xff]   ;;  %v1029_v37 = vld [vmem:[%s1551_s1 + $0x15c] ss:$24 sps:$4 sm:$0xff]   ;;  %v1031_v40 = vld [vmem:[%s1551_s1 + $0x158] ss:$24 sps:$4 sm:$0xff]  }
   0xc   :  { %706 = vmatpush1.bf16.msra.mxu0 %v998_v17  ;;  %v1028_v38 = vld [vmem:[%s1551_s1 + $0x150] ss:$24 sps:$4 sm:$0xff]   ;;  %v1032_v39 = vld [vmem:[%s1551_s1 + $0x184] ss:$24 sps:$4 sm:$0xff]   ;;  %v1034_v42 = vld [vmem:[%s1551_s1 + $0x180] ss:$24 sps:$4 sm:$0xff]  }
   0xd   :  { %707 = vmatprep.subr.bf16.mxu0 %v1002_v19  ;;  %749 = vmatpush1.bf16.msra.mxu1 %v1001_v20  ;;  %v1035_v41 = vld [vmem:[%s1551_s1 + $0x18c] ss:$24 sps:$4 sm:$0xff]   ;;  %v1037_v44 = vld [vmem:[%s1551_s1 + $0x188] ss:$24 sps:$4 sm:$0xff]   ;;  %v1041_v60 = vld [vmem:[%s1551_s1 + $0x1bc] ss:$24 sps:$4 sm:$0xff]  }
   0xe   :  { %750 = vmatprep.subr.bf16.mxu1 %v1005_v21  ;;  %v1038_v43 = vld [vmem:[%s1551_s1 + $0x1b4] ss:$24 sps:$4 sm:$0xff]   ;;  %v1040_v59 = vld [vmem:[%s1551_s1 + $0x1b0] ss:$24 sps:$4 sm:$0xff]   ;;  %v1044_v62 = vld [vmem:[%s1551_s1 + $0x1e4] ss:$24 sps:$4 sm:$0xff]  }
   0xf   :  { %v1043_v61 = vld [vmem:[%s1551_s1 + $0x1b8] ss:$24 sps:$4 sm:$0xff]   ;;  %v1047_v0 = vld [vmem:[%s1551_s1 + $0x1ec] ss:$24 sps:$4 sm:$0xff]   ;;  %v1049_v1 = vld [vmem:[%s1551_s1 + $0x1e8] ss:$24 sps:$4 sm:$0xff]  }
  0x10   :  { %708 = vmatpush1.bf16.msra.mxu0 %v1004_v22  ;;  %v1046_v63 = vld [vmem:[%s1551_s1 + $0x1e0] ss:$24 sps:$4 sm:$0xff]   ;;  %v1056_v6 = vld [vmem:[%s1551_s1 + $0x244] ss:$24 sps:$4 sm:$0xff]   ;;  %v1062_v10 = vld [vmem:[%s1551_s1 + $0x274] ss:$24 sps:$4 sm:$0xff]  }
  0x11   :  { %709 = vmatprep.subr.bf16.mxu0 %v1008_v23  ;;  %751 = vmatpush1.bf16.msra.mxu1 %v1007_v24  ;;  %v1058_v7 = vld [vmem:[%s1551_s1 + $0x240] ss:$24 sps:$4 sm:$0xff]   ;;  %v1059_v8 = vld [vmem:[%s1551_s1 + $0x24c] ss:$24 sps:$4 sm:$0xff]   ;;  %v1065_v11 = vld [vmem:[%s1551_s1 + $0x27c] ss:$24 sps:$4 sm:$0xff]  }
  0x12   :  { %752 = vmatprep.subr.bf16.mxu1 %v1011_v25  ;;  %v1061_v9 = vld [vmem:[%s1551_s1 + $0x248] ss:$24 sps:$4 sm:$0xff]   ;;  %v1067_v13 = vld [vmem:[%s1551_s1 + $0x278] ss:$24 sps:$4 sm:$0xff]   ;;  %v1068_v14 = vld [vmem:[%s1551_s1 + $0x2a4] ss:$24 sps:$4 sm:$0xff]  }
  0x13   :  { %v1064_v12 = vld [vmem:[%s1551_s1 + $0x270] ss:$24 sps:$4 sm:$0xff]   ;;  %v1071_v15 = vld [vmem:[%s1551_s1 + $0x2ac] ss:$24 sps:$4 sm:$0xff]   ;;  %v1070_v16 = vld [vmem:[%s1551_s1 + $0x2a0] ss:$24 sps:$4 sm:$0xff]  }
  0x14   :  { %710 = vmatpush1.bf16.msra.mxu0 %v1010_v26  ;;  %v1073_v17 = vld [vmem:[%s1551_s1 + $0x2a8] ss:$24 sps:$4 sm:$0xff]   ;;  %v1074_v18 = vld [vmem:[%s1551_s1 + $0x2d4] ss:$24 sps:$4 sm:$0xff]   ;;  %v1079_v21 = vld [vmem:[%s1551_s1 + $0x2d8] ss:$24 sps:$4 sm:$0xff]  }
  0x15   :  { %711 = vmatprep.subr.bf16.mxu0 %v1014_v27  ;;  %753 = vmatpush1.bf16.msra.mxu1 %v1013_v28  ;;  %v1077_v19 = vld [vmem:[%s1551_s1 + $0x2dc] ss:$24 sps:$4 sm:$0xff]   ;;  %v1076_v20 = vld [vmem:[%s1551_s1 + $0x2d0] ss:$24 sps:$4 sm:$0xff]   ;;  %v61_v27 = vlaneseq }
  0x16   :  { %754 = vmatprep.subr.bf16.mxu1 %v1017_v29  ;;  %v1082_v22 = vld [vmem:[%s1551_s1 + $0x14] ss:$24 sps:$4 sm:$0xff]  }
  0x18   :  { %712 = vmatpush1.bf16.msra.mxu0 %v1016_v30  ;;  %v1403_v30 = vshrl.u32 %v61_v27, 7 }
  0x19   :  { %713 = vmatprep.subr.bf16.mxu0 %v1020_v31  ;;  %755 = vmatpush1.bf16.msra.mxu1 %v1019_v32 }
  0x1a   :  { %756 = vmatprep.subr.bf16.mxu1 %v1023_v34  ;;  %v1406_v31 = vsub.s32 1, %v1403_v30  ;;  %v1409_v32 = vsub.s32 0, %v1403_v30 }
  0x1c   :  { %714 = vmatpush1.bf16.msra.mxu0 %v1022_v33  ;;  %v59_v33 = vld [vmem:[%s1552_s3] sm:$0x3] }
  0x1d   :  { %715 = vmatprep.subr.bf16.mxu0 %v1026_v36  ;;  %757 = vmatpush1.bf16.msra.mxu1 %v1025_v35  ;;  %v68_v36 = vrot.slane %v59_v33, %v1406_v31 }
  0x1e   :  { %758 = vmatprep.subr.bf16.mxu1 %v1029_v37  ;;  %v75_v37 = vld [vmem:[%s1553_s4] sm:$0x3] }
  0x20   :  { %716 = vmatpush1.bf16.msra.mxu0 %v1028_v38 }
  0x21   :  { %717 = vmatprep.subr.bf16.mxu0 %v1032_v39  ;;  %759 = vmatpush1.bf16.msra.mxu1 %v1031_v40  ;;  %v64_v39 = vrot.slane %v59_v33, %v1409_v32 }
  0x22   :  { %760 = vmatprep.subr.bf16.mxu1 %v1035_v41  ;;  %v84_v41 = vrot.slane %v75_v37, %v1406_v31 }
  0x24   :  { %718 = vmatpush1.bf16.msra.mxu0 %v1034_v42  ;;  %v80_v42 = vrot.slane %v75_v37, %v1409_v32 }
  0x25   :  { %719 = vmatprep.subr.bf16.mxu0 %v1038_v43  ;;  %761 = vmatpush1.bf16.msra.mxu1 %v1037_v44 }
  0x26   :  { %762 = vmatprep.subr.bf16.mxu1 %v1041_v60  ;;  %v1091_v60 = vld [vmem:[%s1551_s1 + $0xa4] ss:$24 sps:$4 sm:$0xff]  }
  0x28   :  { %720 = vmatpush1.bf16.msra.mxu0 %v1040_v59  ;;  %v1086_v59 = vld [vmem:[%s1551_s1 + $0x70] ss:$24 sps:$4 sm:$0xff]  }
  0x29   :  { %763 = vmatpush1.bf16.msra.mxu1 %v1043_v61  ;;  %721 = vmatprep.subr.bf16.mxu0 %v1044_v62  ;;  %v1089_v61 = vld [vmem:[%s1551_s1 + $0xa0] ss:$24 sps:$4 sm:$0xff]   ;;  %v1094_v62 = vld [vmem:[%s1551_s1 + $0xd4] ss:$24 sps:$4 sm:$0xff]  }
  0x2a   :  { %764 = vmatprep.subr.bf16.mxu1 %v1047_v0  ;;  %v1097_v0 = vld [vmem:[%s1551_s1 + $0x104] ss:$24 sps:$4 sm:$0xff]  }
  0x2c   :  { %722 = vmatpush1.bf16.msra.mxu0 %v1046_v63  ;;  %v1092_v63 = vld [vmem:[%s1551_s1 + $0xd0] ss:$24 sps:$4 sm:$0xff]  }
  0x2d   :  { %765 = vmatpush1.bf16.msra.mxu1 %v1049_v1  ;;  %v1095_v1 = vld [vmem:[%s1551_s1 + $0x100] ss:$24 sps:$4 sm:$0xff]  }
  0x93   :  { %v28_v45 = vpop.xlane.xlu0 %27 }
  0x94   :  { %v33_v46 = vmul.f32 0.00390625, %v28_v45 }
  0x96   :  { %v1297_v47 = vsub.f32 %v22_v2, %v33_v46  ;;  %v1301_v48 = vsub.f32 %v23_v3, %v33_v46  ;;  %v1050_v2 = vld [vmem:[%s1551_s1 + $0x214] ss:$24 sps:$4 sm:$0xff]   ;;  %v1052_v3 = vld [vmem:[%s1551_s1 + $0x210] ss:$24 sps:$4 sm:$0xff]  }
  0x97   :  { %v31_v49 = vpop.xlane.xlu0 %30  ;;  %723 = vmatprep.subr.bf16.mxu0 %v1050_v2  ;;  %v1100_v2 = vld [vmem:[%s1551_s1 + $0x134] ss:$24 sps:$4 sm:$0xff]  }
  0x98   :  { %v34_v50 = vmul.f32 0.00390625, %v31_v49  ;;  %v39_v51 = vmul.f32 %v1297_v47, %v1297_v47  ;;  %v40_v52 = vmul.f32 %v1301_v48, %v1301_v48  ;;  %724 = vmatpush1.bf16.msra.mxu0 %v1052_v3  ;;  %v1098_v3 = vld [vmem:[%s1551_s1 + $0x130] ss:$24 sps:$4 sm:$0xff]  }
  0x99   :  { %725 = vmatprep.subr.bf16.mxu0 %v1056_v6  ;;  %v1106_v6 = vld [vmem:[%s1551_s1 + $0x194] ss:$24 sps:$4 sm:$0xff]  }
  0x9a   :  { %v1309_v53 = vsub.f32 %v24_v4, %v34_v50  ;;  %v1313_v54 = vsub.f32 %v25_v5, %v34_v50  ;;  %v43_v55 = vadd.f32 %v40_v52, %v39_v51  ;;  %v1053_v4 = vld [vmem:[%s1551_s1 + $0x21c] ss:$24 sps:$4 sm:$0xff]   ;;  %v1055_v5 = vld [vmem:[%s1551_s1 + $0x218] ss:$24 sps:$4 sm:$0xff]  }
  0x9b   :  { %766 = vmatprep.subr.bf16.mxu1 %v1053_v4  ;;  %v1103_v4 = vld [vmem:[%s1551_s1 + $0x164] ss:$24 sps:$4 sm:$0xff]  }
  0x9c   :  { %44 = vadd.xlane.f32.xlu1 %v43_v55  ;;  %v41_v56 = vmul.f32 %v1309_v53, %v1309_v53  ;;  %v42_v57 = vmul.f32 %v1313_v54, %v1313_v54  ;;  %767 = vmatpush1.bf16.msra.mxu1 %v1055_v5  ;;  %v1101_v5 = vld [vmem:[%s1551_s1 + $0x160] ss:$24 sps:$4 sm:$0xff]  }
  0x9d   :  { %768 = vmatprep.subr.bf16.mxu1 %v1059_v8  ;;  %726 = vmatpush1.bf16.msra.mxu0 %v1058_v7  ;;  %v1104_v7 = vld [vmem:[%s1551_s1 + $0x190] ss:$24 sps:$4 sm:$0xff]   ;;  %v1109_v8 = vld [vmem:[%s1551_s1 + $0x1c4] ss:$24 sps:$4 sm:$0xff]  }
  0x9e   :  { %v46_v58 = vadd.f32 %v42_v57, %v41_v56  ;;  %727 = vmatprep.subr.bf16.mxu0 %v1062_v10  ;;  %v1080_v56 = vld [vmem:[%s1551_s1 + $0x10] ss:$24 sps:$4 sm:$0xff]   ;;  %v1112_v10 = vld [vmem:[%s1551_s1 + $0x1f4] ss:$24 sps:$4 sm:$0xff]  }
  0xa0   :  { %47 = vadd.xlane.f32.xlu1 %v46_v58  ;;  %769 = vmatpush1.bf16.msra.mxu1 %v1061_v9  ;;  %v1088_v58 = vld [vmem:[%s1551_s1 + $0x74] ss:$24 sps:$4 sm:$0xff]   ;;  %v1107_v9 = vld [vmem:[%s1551_s1 + $0x1c0] ss:$24 sps:$4 sm:$0xff]  }
  0xa1   :  { %770 = vmatprep.subr.bf16.mxu1 %v1065_v11  ;;  %728 = vmatpush1.bf16.msra.mxu0 %v1064_v12  ;;  %v1110_v11 = vld [vmem:[%s1551_s1 + $0x1f0] ss:$24 sps:$4 sm:$0xff]   ;;  %v1115_v12 = vld [vmem:[%s1551_s1 + $0x224] ss:$24 sps:$4 sm:$0xff]  }
  0xa2   :  { %729 = vmatprep.subr.bf16.mxu0 %v1068_v14  ;;  %v1118_v14 = vld [vmem:[%s1551_s1 + $0x254] ss:$24 sps:$4 sm:$0xff]  }
  0xa4   :  { %771 = vmatpush1.bf16.msra.mxu1 %v1067_v13  ;;  %v1113_v13 = vld [vmem:[%s1551_s1 + $0x220] ss:$24 sps:$4 sm:$0xff]  }
  0xa5   :  { %772 = vmatprep.subr.bf16.mxu1 %v1071_v15  ;;  %730 = vmatpush1.bf16.msra.mxu0 %v1070_v16  ;;  %v1116_v15 = vld [vmem:[%s1551_s1 + $0x250] ss:$24 sps:$4 sm:$0xff]   ;;  %v1121_v16 = vld [vmem:[%s1551_s1 + $0x284] ss:$24 sps:$4 sm:$0xff]  }
  0xa6   :  { %731 = vmatprep.subr.bf16.mxu0 %v1074_v18  ;;  %v1124_v18 = vld [vmem:[%s1551_s1 + $0x2b4] ss:$24 sps:$4 sm:$0xff]  }
  0xa8   :  { %773 = vmatpush1.bf16.msra.mxu1 %v1073_v17  ;;  %v1119_v17 = vld [vmem:[%s1551_s1 + $0x280] ss:$24 sps:$4 sm:$0xff]  }
  0xa9   :  { %774 = vmatprep.subr.bf16.mxu1 %v1077_v19  ;;  %732 = vmatpush1.bf16.msra.mxu0 %v1076_v20  ;;  %v1122_v19 = vld [vmem:[%s1551_s1 + $0x2b0] ss:$24 sps:$4 sm:$0xff]   ;;  %v1127_v20 = vld [vmem:[%s1551_s1 + $0x2e4] ss:$24 sps:$4 sm:$0xff]  }
  0xaa   :  { %787 = vmatprep.subr.bf16.mxu0 %v1082_v22  ;;  %v201_v22 = vsub.s32 2, %v1403_v30 }
  0xac   :  { %775 = vmatpush1.bf16.msra.mxu1 %v1079_v21  ;;  %v1125_v21 = vld [vmem:[%s1551_s1 + $0x2e0] ss:$24 sps:$4 sm:$0xff]  }
 0x129   :  { %v45_v23 = vpop.xlane.xlu1 %44 }
 0x12a   :  { %v49_v24 = vmul.f32 0.00390625, %v45_v23  ;;  %v189_v23 = vld [vmem:[%s1554_s2] sm:$0x3f] }
 0x12b   :  { %v198_v27 = vrot.slane %v189_v23, %v1406_v31 }
 0x12c   :  { %v51_v25 = vadd.f32 1e-05, %v49_v24  ;;  %v205_v24 = vsub.s32 3, %v1403_v30 }
 0x12d   :  { %v48_v26 = vpop.xlane.xlu1 %47 }
 0x12e   :  { %1128 = vrsqrt.f32 %v51_v25  ;;  %v50_v28 = vmul.f32 0.00390625, %v48_v26  ;;  %v194_v25 = vrot.slane %v189_v23, %v1409_v32  ;;  %v202_v26 = vrot.slane %v189_v23, %v201_v22 }
 0x130   :  { %v52_v29 = vadd.f32 1e-05, %v50_v28  ;;  %v206_v28 = vrot.slane %v189_v23, %v205_v24 }
 0x132   :  { %1130 = vrsqrt.f32 %v52_v29 }
 0x138   :  { %v1129_v34 = vpop.eup %1128 }
 0x139   :  { %v56_v35 = vmul.f32 %v1129_v34, %v1301_v48  ;;  %v55_v38 = vmul.f32 %v1129_v34, %v1297_v47 }
 0x13b   :  { %v72_v44 = vmul.f32 %v68_v36, %v56_v35  ;;  %v71_v46 = vmul.f32 %v64_v39, %v55_v38 }
 0x13c   :  { %v1131_v40 = vpop.eup %1130 }
 0x13d   :  { %v58_v43 = vmul.f32 %v1131_v40, %v1313_v54  ;;  %v57_v45 = vmul.f32 %v1131_v40, %v1309_v53  ;;  %v88_v50 = vadd.f32 %v84_v41, %v72_v44  ;;  %v87_v52 = vadd.f32 %v80_v42, %v71_v46  ;;  %v1085_v54 = vld [vmem:[%s1551_s1 + $0x44] ss:$24 sps:$4 sm:$0xff]   ;;  %v1083_v53 = vld [vmem:[%s1551_s1 + $0x40] ss:$24 sps:$4 sm:$0xff]  }
 0x13f   :  { %v74_v48 = vmul.f32 %v68_v36, %v58_v43  ;;  %v73_v49 = vmul.f32 %v64_v39, %v57_v45 }
 0x141   :  { %v90_v51 = vadd.f32 %v84_v41, %v74_v48  ;;  %v89_v55 = vadd.f32 %v80_v42, %v73_v49 }
 0x143   :  { %v92_v47 = vpack.c.bf16 %v90_v51, %v88_v50  ;;  %v1428_v57 = vpack.c.bf16 %v89_v55, %v87_v52  ;;  %v209_v51 = vsub.s32 4, %v1403_v30  ;;  %v213_v52 = vsub.s32 5, %v1403_v30 }
 0x145   :  { %733 = vmatprep.mubr.bf16.mxu0 %v92_v47  ;;  %776 = vmatprep.mubr.bf16.mxu1 %v92_v47  ;;  %v210_v55 = vrot.slane %v189_v23, %v209_v51 }
 0x146   :  { %734 = vmatmul.mubr.bf16.vlgmr.msra.gmra.mrb[0].mxu0 %v1428_v57  ;;  %777 = vmatmul.mubr.bf16.vlgmr.msra.gmra.mrb[0].mxu1 %v1428_v57 }
 0x147   :  { %788 = vmatpush1.bf16.msra.mxu0 %v1080_v56  ;;  %819 = vmatprep.mubr.bf16.mxu0 %v92_v47  ;;  %v214_v47 = vrot.slane %v189_v23, %v213_v52 }
 0x148   :  { %789 = vmatprep.subr.bf16.mxu0 %v1085_v54 }
 0x14b   :  { %790 = vmatpush1.bf16.msra.mxu0 %v1083_v53 }
 0x14c   :  { %791 = vmatprep.subr.bf16.mxu0 %v1088_v58 }
 0x14f   :  { %792 = vmatpush1.bf16.msra.mxu0 %v1086_v59 }
 0x150   :  { %793 = vmatprep.subr.bf16.mxu0 %v1091_v60 }
 0x153   :  { %794 = vmatpush1.bf16.msra.mxu0 %v1089_v61 }
 0x154   :  { %795 = vmatprep.subr.bf16.mxu0 %v1094_v62 }
 0x157   :  { %796 = vmatpush1.bf16.msra.mxu0 %v1092_v63 }
 0x158   :  { %797 = vmatprep.subr.bf16.mxu0 %v1097_v0 }
 0x15b   :  { %798 = vmatpush1.bf16.msra.mxu0 %v1095_v1 }
 0x15c   :  { %799 = vmatprep.subr.bf16.mxu0 %v1100_v2 }
 0x15f   :  { %800 = vmatpush1.bf16.msra.mxu0 %v1098_v3 }
 0x160   :  { %801 = vmatprep.subr.bf16.mxu0 %v1103_v4 }
 0x163   :  { %802 = vmatpush1.bf16.msra.mxu0 %v1101_v5 }
 0x164   :  { %803 = vmatprep.subr.bf16.mxu0 %v1106_v6 }
 0x167   :  { %804 = vmatpush1.bf16.msra.mxu0 %v1104_v7 }
 0x168   :  { %805 = vmatprep.subr.bf16.mxu0 %v1109_v8 }
 0x16b   :  { %806 = vmatpush1.bf16.msra.mxu0 %v1107_v9 }
 0x16c   :  { %807 = vmatprep.subr.bf16.mxu0 %v1112_v10 }
 0x16f   :  { %808 = vmatpush1.bf16.msra.mxu0 %v1110_v11 }
 0x170   :  { %809 = vmatprep.subr.bf16.mxu0 %v1115_v12 }
 0x173   :  { %810 = vmatpush1.bf16.msra.mxu0 %v1113_v13 }
 0x174   :  { %811 = vmatprep.subr.bf16.mxu0 %v1118_v14 }
 0x177   :  { %812 = vmatpush1.bf16.msra.mxu0 %v1116_v15 }
 0x178   :  { %813 = vmatprep.subr.bf16.mxu0 %v1121_v16 }
 0x17b   :  { %814 = vmatpush1.bf16.msra.mxu0 %v1119_v17 }
 0x17c   :  { %815 = vmatprep.subr.bf16.mxu0 %v1124_v18 }
 0x17f   :  { %816 = vmatpush1.bf16.msra.mxu0 %v1122_v19 }
 0x180   :  { %817 = vmatprep.subr.bf16.mxu0 %v1127_v20 }
 0x183   :  { %818 = vmatpush1.bf16.msra.mxu0 %v1125_v21 }
 0x186   :  { %820 = vmatmul.mubr.bf16.vlgmr.msra.gmra.mrb[4].mxu0 %v1428_v57 }
 0x219   :  { %v735_v29 = vpop.f32.mrb[0].mxu0  ;;  %v778_v33 = vpop.f32.mrb[0].mxu1 }
 0x21a   :  { %v736_v34 = vadd.f32 %v735_v29, %v194_v25  ;;  %v779_v35 = vadd.f32 %v778_v33, %v202_v26  ;;  %v737_v36 = vpop.f32.mrb[1].mxu0  ;;  %v780_v37 = vpop.f32.mrb[1].mxu1 }
 0x21b   :  { %v738_v38 = vadd.f32 %v737_v36, %v198_v27  ;;  %v781_v39 = vadd.f32 %v780_v37, %v206_v28  ;;  %v739_v40 = vpop.f32.mrb[2].mxu0  ;;  %v782_v41 = vpop.f32.mrb[2].mxu1 }
 0x21c   :  { %v740_v42 = vadd.f32 %v739_v40, %v194_v25  ;;  %v783_v43 = vadd.f32 %v782_v41, %v202_v26  ;;  %v741_v44 = vpop.f32.mrb[3].mxu0  ;;  %v784_v45 = vpop.f32.mrb[3].mxu1 }
 0x21d   :  { %v978_v46 = vpack.c.bf16 %v738_v38, %v736_v34  ;;  %v979_v32 = vpack.c.bf16 %v781_v39, %v779_v35  ;;  %v742_v48 = vadd.f32 %v741_v44, %v198_v27  ;;  %v785_v49 = vadd.f32 %v784_v45, %v206_v28 }
 0x21f   :  { %866 = vst [vmem:[%s1555_s5] sm:$0xff] %v978_v46  ;;  %867 = vst [vmem:[%s1555_s5 + $0x8] sm:$0xff] %v979_v32  ;;  %v981_v31 = vpack.c.bf16 %v742_v48, %v740_v42  ;;  %v982_v50 = vpack.c.bf16 %v785_v49, %v783_v43 }
 0x221   :  { %869 = vst [vmem:[%s1555_s5 + $0x18] sm:$0xff] %v981_v31  ;;  %870 = vst [vmem:[%s1555_s5 + $0x20] sm:$0xff] %v982_v50 }
 0x259   :  { %v821_v56 = vpop.f32.mrb[4].mxu0 }
 0x25a   :  { %v822_v57 = vadd.f32 %v821_v56, %v210_v55  ;;  %v823_v54 = vpop.f32.mrb[5].mxu0 }
 0x25b   :  { %v824_v53 = vadd.f32 %v823_v54, %v214_v47  ;;  %v825_v58 = vpop.f32.mrb[6].mxu0 }
 0x25c   :  { %v826_v59 = vadd.f32 %v825_v58, %v210_v55  ;;  %v827_v60 = vpop.f32.mrb[7].mxu0 }
 0x25d   :  { %v980_v61 = vpack.c.bf16 %v824_v53, %v822_v57  ;;  %v828_v62 = vadd.f32 %v827_v60, %v214_v47 }
 0x25f   :  { %868 = vst [vmem:[%s1555_s5 + $0x10] sm:$0xff] %v980_v61  ;;  %v983_v63 = vpack.c.bf16 %v828_v62, %v826_v59 }
 0x261   :  { %871 = vst [vmem:[%s1555_s5 + $0x28] sm:$0xff] %v983_v63 }

// kernel: gpt2_forward.19
= control target key start
LH: loop header
LB: loop body
LE: loop exit
PB: predicated region body
PF: predicated region fallthrough
CT: control target
= control target key end

     0   :  { %s2104_s0 = inlined_call_operand.vmem [shape: bf16[16,256], index: 0, kind: input, shape index: {}]   ;;  %s2105_s1 = inlined_call_operand.vmem [shape: bf16[256,1024], index: 1, kind: input, shape index: {}]   ;;  %s2106_s3 = inlined_call_operand.vmem [shape: f32[1,256], index: 3, kind: input, shape index: {}]   ;;  %s2107_s4 = inlined_call_operand.vmem [shape: f32[1,256], index: 4, kind: input, shape index: {}]   ;;  %s2108_s2 = inlined_call_operand.vmem [shape: f32[1,1024], index: 2, kind: input, shape index: {}]   ;;  %s2109_s5 = inlined_call_operand.vmem [shape: bf16[16,1024], index: 5, kind: output, shape index: {}]  }
   0x1   :  { %v1492_v0 = vld [vmem:[%s2104_s0] sm:$0xff]  ;;  %v1497_v1 = vld [vmem:[%s2104_s0 + $0x8] sm:$0xff] }
   0x2   :  { %v22_v2 = vunpack.c.l.bf16 %v1492_v0  ;;  %v23_v3 = vunpack.c.h.bf16 %v1492_v0  ;;  %v24_v4 = vunpack.c.l.bf16 %v1497_v1  ;;  %v25_v5 = vunpack.c.h.bf16 %v1497_v1  ;;  %v93_v8 = vld [vmem:[%s2105_s1] sm:$0xff]  ;;  %v94_v10 = vld [vmem:[%s2105_s1 + $0x8] sm:$0xff] }
   0x3   :  { %v97_v9 = vld [vmem:[%s2105_s1 + $0x20] sm:$0xff]  ;;  %v98_v12 = vld [vmem:[%s2105_s1 + $0x28] sm:$0xff] }
   0x4   :  { %v26_v6 = vadd.f32 %v23_v3, %v22_v2  ;;  %v29_v7 = vadd.f32 %v25_v5, %v24_v4  ;;  %v1280_v11 = vcombine.high %v93_v8, %v97_v9  ;;  %v1279_v13 = vcombine.low %v93_v8, %v97_v9  ;;  %v101_v14 = vld [vmem:[%s2105_s1 + $0x40] sm:$0xff]  ;;  %v102_v19 = vld [vmem:[%s2105_s1 + $0x48] sm:$0xff] }
   0x5   :  { %v105_v15 = vld [vmem:[%s2105_s1 + $0x60] sm:$0xff]  ;;  %v1282_v16 = vcombine.high %v94_v10, %v98_v12  ;;  %v1281_v17 = vcombine.low %v94_v10, %v98_v12  ;;  %v106_v20 = vld [vmem:[%s2105_s1 + $0x68] sm:$0xff] }
   0x6   :  { %27 = vadd.xlane.f32.xlu0 %v26_v6  ;;  %v1288_v18 = vcombine.high %v101_v14, %v105_v15  ;;  %v109_v21 = vld [vmem:[%s2105_s1 + $0x80] sm:$0xff]  ;;  %903 = vmatprep.subr.bf16.mxu0 %v1280_v11  ;;  %v1290_v22 = vcombine.high %v102_v19, %v106_v20  ;;  %v110_v24 = vld [vmem:[%s2105_s1 + $0x88] sm:$0xff]  ;;  %v1287_v26 = vcombine.low %v101_v14, %v105_v15 }
   0x7   :  { %v113_v23 = vld [vmem:[%s2105_s1 + $0xa0] sm:$0xff]  ;;  %v114_v25 = vld [vmem:[%s2105_s1 + $0xa8] sm:$0xff]  ;;  %946 = vmatprep.subr.bf16.mxu1 %v1282_v16  ;;  %904 = vmatpush1.bf16.msra.mxu0 %v1279_v13  ;;  %v1289_v27 = vcombine.low %v102_v19, %v106_v20 }
   0x8   :  { %947 = vmatpush1.bf16.msra.mxu1 %v1281_v17  ;;  %905 = vmatprep.subr.bf16.mxu0 %v1288_v18  ;;  %v1296_v28 = vcombine.high %v109_v21, %v113_v23  ;;  %v1298_v29 = vcombine.high %v110_v24, %v114_v25  ;;  %v117_v30 = vld [vmem:[%s2105_s1 + $0xc0] sm:$0xff]  ;;  %v118_v32 = vld [vmem:[%s2105_s1 + $0xc8] sm:$0xff]  ;;  %v1295_v34 = vcombine.low %v109_v21, %v113_v23 }
   0x9   :  { %948 = vmatprep.subr.bf16.mxu1 %v1290_v22  ;;  %v121_v31 = vld [vmem:[%s2105_s1 + $0xe0] sm:$0xff]  ;;  %v122_v33 = vld [vmem:[%s2105_s1 + $0xe8] sm:$0xff]  ;;  %v1297_v35 = vcombine.low %v110_v24, %v114_v25 }
   0xa   :  { %30 = vadd.xlane.f32.xlu0 %v29_v7  ;;  %v1304_v36 = vcombine.high %v117_v30, %v121_v31  ;;  %v1306_v37 = vcombine.high %v118_v32, %v122_v33  ;;  %v125_v38 = vld [vmem:[%s2105_s1 + $0x100] sm:$0xff]  ;;  %v126_v40 = vld [vmem:[%s2105_s1 + $0x108] sm:$0xff]  ;;  %v1303_v42 = vcombine.low %v117_v30, %v121_v31  ;;  %v1305_v43 = vcombine.low %v118_v32, %v122_v33 }
   0xb   :  { %906 = vmatpush1.bf16.msra.mxu0 %v1287_v26  ;;  %v129_v39 = vld [vmem:[%s2105_s1 + $0x120] sm:$0xff]  ;;  %v130_v41 = vld [vmem:[%s2105_s1 + $0x128] sm:$0xff] }
   0xc   :  { %949 = vmatpush1.bf16.msra.mxu1 %v1289_v27  ;;  %907 = vmatprep.subr.bf16.mxu0 %v1296_v28  ;;  %v1312_v44 = vcombine.high %v125_v38, %v129_v39  ;;  %v1314_v45 = vcombine.high %v126_v40, %v130_v41  ;;  %v133_v46 = vld [vmem:[%s2105_s1 + $0x140] sm:$0xff]  ;;  %v134_v48 = vld [vmem:[%s2105_s1 + $0x148] sm:$0xff]  ;;  %v1311_v50 = vcombine.low %v125_v38, %v129_v39 }
   0xd   :  { %950 = vmatprep.subr.bf16.mxu1 %v1298_v29  ;;  %v137_v47 = vld [vmem:[%s2105_s1 + $0x160] sm:$0xff]  ;;  %v138_v49 = vld [vmem:[%s2105_s1 + $0x168] sm:$0xff]  ;;  %v1313_v51 = vcombine.low %v126_v40, %v130_v41 }
   0xe   :  { %v1320_v52 = vcombine.high %v133_v46, %v137_v47  ;;  %v1322_v53 = vcombine.high %v134_v48, %v138_v49  ;;  %v141_v54 = vld [vmem:[%s2105_s1 + $0x180] sm:$0xff]  ;;  %v142_v56 = vld [vmem:[%s2105_s1 + $0x188] sm:$0xff]  ;;  %v1319_v58 = vcombine.low %v133_v46, %v137_v47  ;;  %v1321_v59 = vcombine.low %v134_v48, %v138_v49 }
   0xf   :  { %908 = vmatpush1.bf16.msra.mxu0 %v1295_v34  ;;  %v145_v55 = vld [vmem:[%s2105_s1 + $0x1a0] sm:$0xff]  ;;  %v146_v57 = vld [vmem:[%s2105_s1 + $0x1a8] sm:$0xff] }
  0x10   :  { %951 = vmatpush1.bf16.msra.mxu1 %v1297_v35  ;;  %909 = vmatprep.subr.bf16.mxu0 %v1304_v36  ;;  %v1328_v60 = vcombine.high %v141_v54, %v145_v55  ;;  %v1330_v61 = vcombine.high %v142_v56, %v146_v57  ;;  %v149_v62 = vld [vmem:[%s2105_s1 + $0x1c0] sm:$0xff]  ;;  %v150_v6 = vld [vmem:[%s2105_s1 + $0x1c8] sm:$0xff]  ;;  %v1327_v8 = vcombine.low %v141_v54, %v145_v55 }
  0x11   :  { %952 = vmatprep.subr.bf16.mxu1 %v1306_v37  ;;  %v153_v63 = vld [vmem:[%s2105_s1 + $0x1e0] sm:$0xff]  ;;  %v154_v7 = vld [vmem:[%s2105_s1 + $0x1e8] sm:$0xff]  ;;  %v1329_v9 = vcombine.low %v142_v56, %v146_v57 }
  0x12   :  { %v1336_v10 = vcombine.high %v149_v62, %v153_v63  ;;  %v1338_v11 = vcombine.high %v150_v6, %v154_v7  ;;  %v157_v12 = vld [vmem:[%s2105_s1 + $0x200] sm:$0xff]  ;;  %v158_v14 = vld [vmem:[%s2105_s1 + $0x208] sm:$0xff]  ;;  %v1335_v16 = vcombine.low %v149_v62, %v153_v63  ;;  %v1337_v17 = vcombine.low %v150_v6, %v154_v7 }
  0x13   :  { %910 = vmatpush1.bf16.msra.mxu0 %v1303_v42  ;;  %v161_v13 = vld [vmem:[%s2105_s1 + $0x220] sm:$0xff]  ;;  %v162_v15 = vld [vmem:[%s2105_s1 + $0x228] sm:$0xff] }
  0x14   :  { %953 = vmatpush1.bf16.msra.mxu1 %v1305_v43  ;;  %911 = vmatprep.subr.bf16.mxu0 %v1312_v44  ;;  %v1344_v18 = vcombine.high %v157_v12, %v161_v13  ;;  %v1346_v19 = vcombine.high %v158_v14, %v162_v15  ;;  %v165_v20 = vld [vmem:[%s2105_s1 + $0x240] sm:$0xff]  ;;  %v166_v22 = vld [vmem:[%s2105_s1 + $0x248] sm:$0xff]  ;;  %v1343_v24 = vcombine.low %v157_v12, %v161_v13 }
  0x15   :  { %954 = vmatprep.subr.bf16.mxu1 %v1314_v45  ;;  %v169_v21 = vld [vmem:[%s2105_s1 + $0x260] sm:$0xff]  ;;  %v170_v23 = vld [vmem:[%s2105_s1 + $0x268] sm:$0xff]  ;;  %v1345_v25 = vcombine.low %v158_v14, %v162_v15 }
  0x16   :  { %v1352_v26 = vcombine.high %v165_v20, %v169_v21  ;;  %v1354_v27 = vcombine.high %v166_v22, %v170_v23  ;;  %v1351_v39 = vcombine.low %v165_v20, %v169_v21  ;;  %v1353_v40 = vcombine.low %v166_v22, %v170_v23  ;;  %v173_v1 = vld [vmem:[%s2105_s1 + $0x280] sm:$0xff]  ;;  %v178_v42 = vld [vmem:[%s2105_s1 + $0x2a8] sm:$0xff] }
  0x17   :  { %912 = vmatpush1.bf16.msra.mxu0 %v1311_v50  ;;  %v181_v46 = vld [vmem:[%s2105_s1 + $0x2c0] sm:$0xff]  ;;  %v182_v48 = vld [vmem:[%s2105_s1 + $0x2c8] sm:$0xff] }
  0x18   :  { %955 = vmatpush1.bf16.msra.mxu1 %v1313_v51  ;;  %913 = vmatprep.subr.bf16.mxu0 %v1320_v52  ;;  %v185_v47 = vld [vmem:[%s2105_s1 + $0x2e0] sm:$0xff]  ;;  %v186_v50 = vld [vmem:[%s2105_s1 + $0x2e8] sm:$0xff] }
  0x19   :  { %956 = vmatprep.subr.bf16.mxu1 %v1322_v53  ;;  %v1368_v49 = vcombine.high %v181_v46, %v185_v47  ;;  %v1370_v51 = vcombine.high %v182_v48, %v186_v50  ;;  %v1367_v52 = vcombine.low %v181_v46, %v185_v47  ;;  %v1369_v53 = vcombine.low %v182_v48, %v186_v50  ;;  %v189_v54 = vld [vmem:[%s2105_s1 + $0x300] sm:$0xff]  ;;  %v190_v56 = vld [vmem:[%s2105_s1 + $0x308] sm:$0xff] }
  0x1a   :  { %v193_v55 = vld [vmem:[%s2105_s1 + $0x320] sm:$0xff]  ;;  %v198_v6 = vld [vmem:[%s2105_s1 + $0x348] sm:$0xff] }
  0x1b   :  { %914 = vmatpush1.bf16.msra.mxu0 %v1319_v58  ;;  %v1376_v57 = vcombine.high %v189_v54, %v193_v55  ;;  %v194_v58 = vld [vmem:[%s2105_s1 + $0x328] sm:$0xff]  ;;  %v197_v62 = vld [vmem:[%s2105_s1 + $0x340] sm:$0xff] }
  0x1c   :  { %957 = vmatpush1.bf16.msra.mxu1 %v1321_v59  ;;  %915 = vmatprep.subr.bf16.mxu0 %v1328_v60  ;;  %v1378_v59 = vcombine.high %v190_v56, %v194_v58  ;;  %v1375_v60 = vcombine.low %v189_v54, %v193_v55  ;;  %v201_v63 = vld [vmem:[%s2105_s1 + $0x360] sm:$0xff]  ;;  %v206_v14 = vld [vmem:[%s2105_s1 + $0x388] sm:$0xff] }
  0x1d   :  { %958 = vmatprep.subr.bf16.mxu1 %v1330_v61  ;;  %v1377_v61 = vcombine.low %v190_v56, %v194_v58  ;;  %v1384_v7 = vcombine.high %v197_v62, %v201_v63  ;;  %v205_v12 = vld [vmem:[%s2105_s1 + $0x380] sm:$0xff]  ;;  %v214_v22 = vld [vmem:[%s2105_s1 + $0x3c8] sm:$0xff] }
  0x1e   :  { %v209_v13 = vld [vmem:[%s2105_s1 + $0x3a0] sm:$0xff] }
  0x1f   :  { %916 = vmatpush1.bf16.msra.mxu0 %v1327_v8  ;;  %v202_v8 = vld [vmem:[%s2105_s1 + $0x368] sm:$0xff]  ;;  %v1392_v15 = vcombine.high %v205_v12, %v209_v13  ;;  %v213_v20 = vld [vmem:[%s2105_s1 + $0x3c0] sm:$0xff] }
  0x20   :  { %959 = vmatpush1.bf16.msra.mxu1 %v1329_v9  ;;  %917 = vmatprep.subr.bf16.mxu0 %v1336_v10  ;;  %v1386_v9 = vcombine.high %v198_v6, %v202_v8  ;;  %v1383_v10 = vcombine.low %v197_v62, %v201_v63  ;;  %v217_v21 = vld [vmem:[%s2105_s1 + $0x3e0] sm:$0xff]  ;;  %v103_v62 = vld [vmem:[%s2105_s1 + $0x50] sm:$0xff] }
  0x21   :  { %960 = vmatprep.subr.bf16.mxu1 %v1338_v11  ;;  %v1385_v11 = vcombine.low %v198_v6, %v202_v8  ;;  %v1400_v23 = vcombine.high %v213_v20, %v217_v21  ;;  %v107_v63 = vld [vmem:[%s2105_s1 + $0x70] sm:$0xff] }
  0x22   :  { %v111_v8 = vld [vmem:[%s2105_s1 + $0x90] sm:$0xff] }
  0x23   :  { %918 = vmatpush1.bf16.msra.mxu0 %v1335_v16  ;;  %v210_v16 = vld [vmem:[%s2105_s1 + $0x3a8] sm:$0xff] }
  0x24   :  { %961 = vmatpush1.bf16.msra.mxu1 %v1337_v17  ;;  %919 = vmatprep.subr.bf16.mxu0 %v1344_v18  ;;  %v1394_v17 = vcombine.high %v206_v14, %v210_v16  ;;  %v1391_v18 = vcombine.low %v205_v12, %v209_v13  ;;  %v112_v12 = vld [vmem:[%s2105_s1 + $0x98] sm:$0xff] }
  0x25   :  { %962 = vmatprep.subr.bf16.mxu1 %v1346_v19  ;;  %v1393_v19 = vcombine.low %v206_v14, %v210_v16  ;;  %v116_v13 = vld [vmem:[%s2105_s1 + $0xb8] sm:$0xff]  ;;  %v1291_v14 = vcombine.low %v103_v62, %v107_v63 }
  0x27   :  { %920 = vmatpush1.bf16.msra.mxu0 %v1343_v24  ;;  %v218_v24 = vld [vmem:[%s2105_s1 + $0x3e8] sm:$0xff] }
  0x28   :  { %963 = vmatpush1.bf16.msra.mxu1 %v1345_v25  ;;  %921 = vmatprep.subr.bf16.mxu0 %v1352_v26  ;;  %v1399_v25 = vcombine.low %v213_v20, %v217_v21  ;;  %v1402_v26 = vcombine.high %v214_v22, %v218_v24  ;;  %v120_v20 = vld [vmem:[%s2105_s1 + $0xd8] sm:$0xff] }
  0x29   :  { %964 = vmatprep.subr.bf16.mxu1 %v1354_v27  ;;  %v1401_v27 = vcombine.low %v214_v22, %v218_v24  ;;  %v124_v21 = vld [vmem:[%s2105_s1 + $0xf8] sm:$0xff] }
  0x2b   :  { %922 = vmatpush1.bf16.msra.mxu0 %v1351_v39 }
  0x2c   :  { %965 = vmatpush1.bf16.msra.mxu1 %v1353_v40 }
  0x93   :  { %v28_v28 = vpop.xlane.xlu0 %27 }
  0x94   :  { %v33_v29 = vmul.f32 0.00390625, %v28_v28  ;;  %v95_v28 = vld [vmem:[%s2105_s1 + $0x10] sm:$0xff] }
  0x96   :  { %v1633_v30 = vsub.f32 %v22_v2, %v33_v29  ;;  %v1637_v31 = vsub.f32 %v23_v3, %v33_v29  ;;  %v99_v29 = vld [vmem:[%s2105_s1 + $0x30] sm:$0xff] }
  0x97   :  { %v31_v32 = vpop.xlane.xlu0 %30 }
  0x98   :  { %v34_v33 = vmul.f32 0.00390625, %v31_v32  ;;  %v39_v34 = vmul.f32 %v1633_v30, %v1633_v30  ;;  %v40_v35 = vmul.f32 %v1637_v31, %v1637_v31  ;;  %v96_v32 = vld [vmem:[%s2105_s1 + $0x18] sm:$0xff] }
  0x9a   :  { %v1645_v36 = vsub.f32 %v24_v4, %v34_v33  ;;  %v1649_v2 = vsub.f32 %v25_v5, %v34_v33  ;;  %v43_v37 = vadd.f32 %v40_v35, %v39_v34  ;;  %v177_v4 = vld [vmem:[%s2105_s1 + $0x2a0] sm:$0xff]  ;;  %v174_v5 = vld [vmem:[%s2105_s1 + $0x288] sm:$0xff]  ;;  %v1284_v33 = vcombine.high %v95_v28, %v99_v29  ;;  %v100_v34 = vld [vmem:[%s2105_s1 + $0x38] sm:$0xff] }
  0x9b   :  { %v1360_v41 = vcombine.high %v173_v1, %v177_v4  ;;  %v1362_v43 = vcombine.high %v174_v5, %v178_v42  ;;  %v1359_v44 = vcombine.low %v173_v1, %v177_v4  ;;  %v1361_v45 = vcombine.low %v174_v5, %v178_v42 }
  0x9c   :  { %44 = vadd.xlane.f32.xlu1 %v43_v37  ;;  %v41_v0 = vmul.f32 %v1645_v36, %v1645_v36  ;;  %v42_v3 = vmul.f32 %v1649_v2, %v1649_v2  ;;  %v1283_v35 = vcombine.low %v95_v28, %v99_v29  ;;  %v1285_v37 = vcombine.low %v96_v32, %v100_v34  ;;  %v128_v28 = vld [vmem:[%s2105_s1 + $0x118] sm:$0xff] }
  0x9d   :  { %923 = vmatprep.subr.bf16.mxu0 %v1360_v41  ;;  %966 = vmatprep.subr.bf16.mxu1 %v1362_v43  ;;  %v61_v1 = vlaneseq  ;;  %v132_v29 = vld [vmem:[%s2105_s1 + $0x138] sm:$0xff] }
  0x9e   :  { %v46_v38 = vadd.f32 %v42_v3, %v41_v0  ;;  %924 = vmatpush1.bf16.msra.mxu0 %v1359_v44  ;;  %967 = vmatpush1.bf16.msra.mxu1 %v1361_v45  ;;  %v1286_v0 = vcombine.high %v96_v32, %v100_v34  ;;  %v59_v44 = vld [vmem:[%s2106_s3] sm:$0x3] }
  0x9f   :  { %925 = vmatprep.subr.bf16.mxu0 %v1368_v49  ;;  %968 = vmatprep.subr.bf16.mxu1 %v1370_v51  ;;  %v1739_v41 = vshrl.u32 %v61_v1, 7  ;;  %v75_v49 = vld [vmem:[%s2107_s4] sm:$0x3] }
  0xa0   :  { %47 = vadd.xlane.f32.xlu1 %v46_v38 }
  0xa1   :  { %v1742_v42 = vsub.s32 1, %v1739_v41  ;;  %v1745_v43 = vsub.s32 0, %v1739_v41 }
  0xa2   :  { %926 = vmatpush1.bf16.msra.mxu0 %v1367_v52  ;;  %969 = vmatpush1.bf16.msra.mxu1 %v1369_v53 }
  0xa3   :  { %927 = vmatprep.subr.bf16.mxu0 %v1376_v57  ;;  %970 = vmatprep.subr.bf16.mxu1 %v1378_v59  ;;  %v68_v48 = vrot.slane %v59_v44, %v1742_v42  ;;  %v64_v50 = vrot.slane %v59_v44, %v1745_v43  ;;  %v84_v52 = vrot.slane %v75_v49, %v1742_v42  ;;  %v147_v44 = vld [vmem:[%s2105_s1 + $0x1b0] sm:$0xff] }
  0xa4   :  { %v80_v53 = vrot.slane %v75_v49, %v1745_v43 }
  0xa6   :  { %928 = vmatpush1.bf16.msra.mxu0 %v1375_v60  ;;  %971 = vmatpush1.bf16.msra.mxu1 %v1377_v61 }
  0xa7   :  { %929 = vmatprep.subr.bf16.mxu0 %v1384_v7  ;;  %972 = vmatprep.subr.bf16.mxu1 %v1386_v9  ;;  %v1292_v9 = vcombine.high %v103_v62, %v107_v63 }
  0xaa   :  { %930 = vmatpush1.bf16.msra.mxu0 %v1383_v10  ;;  %973 = vmatpush1.bf16.msra.mxu1 %v1385_v11  ;;  %v115_v11 = vld [vmem:[%s2105_s1 + $0xb0] sm:$0xff] }
  0xab   :  { %931 = vmatprep.subr.bf16.mxu0 %v1392_v15  ;;  %974 = vmatprep.subr.bf16.mxu1 %v1394_v17  ;;  %v1300_v16 = vcombine.high %v111_v8, %v115_v11  ;;  %v1302_v17 = vcombine.high %v112_v12, %v116_v13  ;;  %v1299_v22 = vcombine.low %v111_v8, %v115_v11  ;;  %v168_v8 = vld [vmem:[%s2105_s1 + $0x258] sm:$0xff] }
  0xae   :  { %932 = vmatpush1.bf16.msra.mxu0 %v1391_v18  ;;  %975 = vmatpush1.bf16.msra.mxu1 %v1393_v19  ;;  %v119_v18 = vld [vmem:[%s2105_s1 + $0xd0] sm:$0xff] }
  0xaf   :  { %933 = vmatprep.subr.bf16.mxu0 %v1400_v23  ;;  %976 = vmatprep.subr.bf16.mxu1 %v1402_v26  ;;  %v123_v19 = vld [vmem:[%s2105_s1 + $0xf0] sm:$0xff]  ;;  %v1301_v23 = vcombine.low %v112_v12, %v116_v13 }
  0xb0   :  { %v1308_v24 = vcombine.high %v119_v18, %v123_v19  ;;  %v127_v26 = vld [vmem:[%s2105_s1 + $0x110] sm:$0xff]  ;;  %v1307_v32 = vcombine.low %v119_v18, %v123_v19 }
  0xb2   :  { %934 = vmatpush1.bf16.msra.mxu0 %v1399_v25  ;;  %977 = vmatpush1.bf16.msra.mxu1 %v1401_v27  ;;  %v1310_v25 = vcombine.high %v120_v20, %v124_v21  ;;  %v131_v27 = vld [vmem:[%s2105_s1 + $0x130] sm:$0xff] }
  0xb3   :  { %989 = vmatprep.subr.bf16.mxu0 %v1284_v33  ;;  %1032 = vmatprep.subr.bf16.mxu1 %v1286_v0  ;;  %v1309_v33 = vcombine.low %v120_v20, %v124_v21  ;;  %v1316_v34 = vcombine.high %v127_v26, %v131_v27  ;;  %v139_v0 = vld [vmem:[%s2105_s1 + $0x170] sm:$0xff] }
 0x129   :  { %v45_v3 = vpop.xlane.xlu1 %44 }
 0x12a   :  { %v49_v38 = vmul.f32 0.00390625, %v45_v3  ;;  %v136_v3 = vld [vmem:[%s2105_s1 + $0x158] sm:$0xff] }
 0x12c   :  { %v51_v39 = vadd.f32 1e-05, %v49_v38  ;;  %v140_v38 = vld [vmem:[%s2105_s1 + $0x178] sm:$0xff] }
 0x12d   :  { %v48_v40 = vpop.xlane.xlu1 %47 }
 0x12e   :  { %1423 = vrsqrt.f32 %v51_v39  ;;  %v50_v4 = vmul.f32 0.00390625, %v48_v40  ;;  %v1315_v39 = vcombine.low %v127_v26, %v131_v27  ;;  %v1317_v40 = vcombine.low %v128_v28, %v132_v29 }
 0x130   :  { %v52_v5 = vadd.f32 1e-05, %v50_v4  ;;  %v1326_v4 = vcombine.high %v136_v3, %v140_v38 }
 0x132   :  { %1425 = vrsqrt.f32 %v52_v5  ;;  %v143_v5 = vld [vmem:[%s2105_s1 + $0x190] sm:$0xff] }
 0x133   :  { %v1332_v49 = vcombine.high %v143_v5, %v147_v44 }
 0x138   :  { %v1424_v45 = vpop.eup %1423 }
 0x139   :  { %v55_v46 = vmul.f32 %v1424_v45, %v1633_v30  ;;  %v56_v47 = vmul.f32 %v1424_v45, %v1637_v31  ;;  %v144_v45 = vld [vmem:[%s2105_s1 + $0x198] sm:$0xff] }
 0x13b   :  { %v72_v30 = vmul.f32 %v68_v48, %v56_v47  ;;  %v71_v56 = vmul.f32 %v64_v50, %v55_v46  ;;  %v148_v46 = vld [vmem:[%s2105_s1 + $0x1b8] sm:$0xff] }
 0x13c   :  { %v1426_v51 = vpop.eup %1425 }
 0x13d   :  { %v57_v54 = vmul.f32 %v1426_v51, %v1645_v36  ;;  %v58_v55 = vmul.f32 %v1426_v51, %v1649_v2  ;;  %v88_v58 = vadd.f32 %v84_v52, %v72_v30  ;;  %v87_v60 = vadd.f32 %v80_v53, %v71_v56  ;;  %v104_v36 = vld [vmem:[%s2105_s1 + $0x58] sm:$0xff]  ;;  %v151_v51 = vld [vmem:[%s2105_s1 + $0x1d0] sm:$0xff] }
 0x13e   :  { %v108_v2 = vld [vmem:[%s2105_s1 + $0x78] sm:$0xff]  ;;  %v1333_v30 = vcombine.low %v144_v45, %v148_v46 }
 0x13f   :  { %v74_v31 = vmul.f32 %v68_v48, %v58_v55  ;;  %v73_v57 = vmul.f32 %v64_v50, %v57_v54  ;;  %v1294_v10 = vcombine.high %v104_v36, %v108_v2  ;;  %v1293_v15 = vcombine.low %v104_v36, %v108_v2  ;;  %v156_v54 = vld [vmem:[%s2105_s1 + $0x1f8] sm:$0xff]  ;;  %v167_v2 = vld [vmem:[%s2105_s1 + $0x250] sm:$0xff] }
 0x140   :  { %v1325_v48 = vcombine.low %v136_v3, %v140_v38  ;;  %v1334_v50 = vcombine.high %v144_v45, %v148_v46  ;;  %v1331_v55 = vcombine.low %v143_v5, %v147_v44 }
 0x141   :  { %v90_v59 = vadd.f32 %v84_v52, %v74_v31  ;;  %v89_v61 = vadd.f32 %v80_v53, %v73_v57  ;;  %v155_v52 = vld [vmem:[%s2105_s1 + $0x1f0] sm:$0xff]  ;;  %v152_v53 = vld [vmem:[%s2105_s1 + $0x1d8] sm:$0xff] }
 0x142   :  { %v1340_v56 = vcombine.high %v151_v51, %v155_v52  ;;  %v1342_v31 = vcombine.high %v152_v53, %v156_v54  ;;  %v159_v57 = vld [vmem:[%s2105_s1 + $0x210] sm:$0xff]  ;;  %v1341_v62 = vcombine.low %v152_v53, %v156_v54 }
 0x143   :  { %v92_v6 = vpack.c.bf16 %v90_v59, %v88_v58  ;;  %v1773_v7 = vpack.c.bf16 %v89_v61, %v87_v60  ;;  %v163_v58 = vld [vmem:[%s2105_s1 + $0x230] sm:$0xff]  ;;  %v160_v59 = vld [vmem:[%s2105_s1 + $0x218] sm:$0xff]  ;;  %v1339_v61 = vcombine.low %v151_v51, %v155_v52 }
 0x144   :  { %v164_v60 = vld [vmem:[%s2105_s1 + $0x238] sm:$0xff]  ;;  %v1348_v63 = vcombine.high %v159_v57, %v163_v58 }
 0x145   :  { %935 = vmatprep.mubr.bf16.mxu0 %v92_v6  ;;  %978 = vmatprep.mubr.bf16.mxu1 %v92_v6  ;;  %v1350_v36 = vcombine.high %v160_v59, %v164_v60  ;;  %v1349_v11 = vcombine.low %v160_v59, %v164_v60 }
 0x146   :  { %936 = vmatmul.mubr.bf16.vlgmr.msra.gmra.mrb[0].mxu0 %v1773_v7  ;;  %979 = vmatmul.mubr.bf16.vlgmr.msra.gmra.mrb[0].mxu1 %v1773_v7 }
 0x147   :  { %990 = vmatpush1.bf16.msra.mxu0 %v1283_v35  ;;  %1033 = vmatpush1.bf16.msra.mxu1 %v1285_v37  ;;  %v1318_v35 = vcombine.high %v128_v28, %v132_v29  ;;  %v135_v37 = vld [vmem:[%s2105_s1 + $0x150] sm:$0xff] }
 0x148   :  { %1021 = vmatprep.mubr.bf16.mxu0 %v92_v6  ;;  %1064 = vmatprep.mubr.bf16.mxu1 %v92_v6  ;;  %v1324_v1 = vcombine.high %v135_v37, %v139_v0  ;;  %v1323_v47 = vcombine.low %v135_v37, %v139_v0  ;;  %v171_v6 = vld [vmem:[%s2105_s1 + $0x270] sm:$0xff] }
 0x149   :  { %991 = vmatprep.subr.bf16.mxu0 %v1292_v9  ;;  %1034 = vmatprep.subr.bf16.mxu1 %v1294_v10  ;;  %v172_v9 = vld [vmem:[%s2105_s1 + $0x278] sm:$0xff]  ;;  %v1347_v10 = vcombine.low %v159_v57, %v163_v58  ;;  %v1356_v12 = vcombine.high %v167_v2, %v171_v6  ;;  %v1355_v18 = vcombine.low %v167_v2, %v171_v6  ;;  %v237_v2 = vsub.s32 3, %v1739_v41 }
 0x14a   :  { %v1358_v13 = vcombine.high %v168_v8, %v172_v9  ;;  %v1357_v19 = vcombine.low %v168_v8, %v172_v9 }
 0x14b   :  { %992 = vmatpush1.bf16.msra.mxu0 %v1291_v14  ;;  %1035 = vmatpush1.bf16.msra.mxu1 %v1293_v15  ;;  %v175_v14 = vld [vmem:[%s2105_s1 + $0x290] sm:$0xff] }
 0x14c   :  { %993 = vmatprep.subr.bf16.mxu0 %v1300_v16  ;;  %1036 = vmatprep.subr.bf16.mxu1 %v1302_v17  ;;  %v179_v15 = vld [vmem:[%s2105_s1 + $0x2b0] sm:$0xff]  ;;  %v176_v16 = vld [vmem:[%s2105_s1 + $0x298] sm:$0xff] }
 0x14d   :  { %v180_v17 = vld [vmem:[%s2105_s1 + $0x2b8] sm:$0xff]  ;;  %v1364_v20 = vcombine.high %v175_v14, %v179_v15  ;;  %v1363_v26 = vcombine.low %v175_v14, %v179_v15 }
 0x14e   :  { %v1366_v21 = vcombine.high %v176_v16, %v180_v17  ;;  %v1365_v27 = vcombine.low %v176_v16, %v180_v17 }
 0x14f   :  { %994 = vmatpush1.bf16.msra.mxu0 %v1299_v22  ;;  %1037 = vmatpush1.bf16.msra.mxu1 %v1301_v23  ;;  %v183_v22 = vld [vmem:[%s2105_s1 + $0x2d0] sm:$0xff] }
 0x150   :  { %995 = vmatprep.subr.bf16.mxu0 %v1308_v24  ;;  %1038 = vmatprep.subr.bf16.mxu1 %v1310_v25  ;;  %v187_v23 = vld [vmem:[%s2105_s1 + $0x2f0] sm:$0xff]  ;;  %v184_v24 = vld [vmem:[%s2105_s1 + $0x2d8] sm:$0xff] }
 0x151   :  { %v188_v25 = vld [vmem:[%s2105_s1 + $0x2f8] sm:$0xff]  ;;  %v1372_v28 = vcombine.high %v183_v22, %v187_v23  ;;  %v1371_v37 = vcombine.low %v183_v22, %v187_v23 }
 0x152   :  { %v1374_v29 = vcombine.high %v184_v24, %v188_v25  ;;  %v1373_v0 = vcombine.low %v184_v24, %v188_v25 }
 0x153   :  { %996 = vmatpush1.bf16.msra.mxu0 %v1307_v32  ;;  %1039 = vmatpush1.bf16.msra.mxu1 %v1309_v33  ;;  %v191_v32 = vld [vmem:[%s2105_s1 + $0x310] sm:$0xff] }
 0x154   :  { %997 = vmatprep.subr.bf16.mxu0 %v1316_v34  ;;  %1040 = vmatprep.subr.bf16.mxu1 %v1318_v35  ;;  %v195_v33 = vld [vmem:[%s2105_s1 + $0x330] sm:$0xff]  ;;  %v192_v34 = vld [vmem:[%s2105_s1 + $0x318] sm:$0xff] }
 0x155   :  { %v196_v35 = vld [vmem:[%s2105_s1 + $0x338] sm:$0xff]  ;;  %v1380_v3 = vcombine.high %v191_v32, %v195_v33  ;;  %v1379_v5 = vcombine.low %v191_v32, %v195_v33 }
 0x156   :  { %v1382_v38 = vcombine.high %v192_v34, %v196_v35  ;;  %v1381_v44 = vcombine.low %v192_v34, %v196_v35 }
 0x157   :  { %998 = vmatpush1.bf16.msra.mxu0 %v1315_v39  ;;  %1041 = vmatpush1.bf16.msra.mxu1 %v1317_v40  ;;  %v199_v39 = vld [vmem:[%s2105_s1 + $0x350] sm:$0xff] }
 0x158   :  { %999 = vmatprep.subr.bf16.mxu0 %v1324_v1  ;;  %1042 = vmatprep.subr.bf16.mxu1 %v1326_v4  ;;  %v203_v40 = vld [vmem:[%s2105_s1 + $0x370] sm:$0xff]  ;;  %v200_v1 = vld [vmem:[%s2105_s1 + $0x358] sm:$0xff] }
 0x159   :  { %v204_v4 = vld [vmem:[%s2105_s1 + $0x378] sm:$0xff]  ;;  %v1388_v45 = vcombine.high %v199_v39, %v203_v40  ;;  %v1387_v51 = vcombine.low %v199_v39, %v203_v40 }
 0x15a   :  { %v1390_v46 = vcombine.high %v200_v1, %v204_v4  ;;  %v1389_v52 = vcombine.low %v200_v1, %v204_v4 }
 0x15b   :  { %1000 = vmatpush1.bf16.msra.mxu0 %v1323_v47  ;;  %1043 = vmatpush1.bf16.msra.mxu1 %v1325_v48  ;;  %v207_v47 = vld [vmem:[%s2105_s1 + $0x390] sm:$0xff] }
 0x15c   :  { %1001 = vmatprep.subr.bf16.mxu0 %v1332_v49  ;;  %1044 = vmatprep.subr.bf16.mxu1 %v1334_v50  ;;  %v211_v48 = vld [vmem:[%s2105_s1 + $0x3b0] sm:$0xff]  ;;  %v208_v49 = vld [vmem:[%s2105_s1 + $0x398] sm:$0xff] }
 0x15d   :  { %v212_v50 = vld [vmem:[%s2105_s1 + $0x3b8] sm:$0xff]  ;;  %v1396_v53 = vcombine.high %v207_v47, %v211_v48  ;;  %v1395_v57 = vcombine.low %v207_v47, %v211_v48 }
 0x15e   :  { %v1398_v54 = vcombine.high %v208_v49, %v212_v50  ;;  %v1397_v58 = vcombine.low %v208_v49, %v212_v50 }
 0x15f   :  { %1002 = vmatpush1.bf16.msra.mxu0 %v1331_v55  ;;  %1045 = vmatpush1.bf16.msra.mxu1 %v1333_v30  ;;  %v215_v55 = vld [vmem:[%s2105_s1 + $0x3d0] sm:$0xff] }
 0x160   :  { %1003 = vmatprep.subr.bf16.mxu0 %v1340_v56  ;;  %1046 = vmatprep.subr.bf16.mxu1 %v1342_v31  ;;  %v219_v30 = vld [vmem:[%s2105_s1 + $0x3f0] sm:$0xff]  ;;  %v216_v56 = vld [vmem:[%s2105_s1 + $0x3d8] sm:$0xff] }
 0x161   :  { %v220_v31 = vld [vmem:[%s2105_s1 + $0x3f8] sm:$0xff]  ;;  %v1404_v59 = vcombine.high %v215_v55, %v219_v30 }
 0x162   :  { %v1406_v60 = vcombine.high %v216_v56, %v220_v31 }
 0x163   :  { %1004 = vmatpush1.bf16.msra.mxu0 %v1339_v61  ;;  %1047 = vmatpush1.bf16.msra.mxu1 %v1341_v62  ;;  %v1403_v61 = vcombine.low %v215_v55, %v219_v30  ;;  %v1405_v62 = vcombine.low %v216_v56, %v220_v31 }
 0x164   :  { %1005 = vmatprep.subr.bf16.mxu0 %v1348_v63  ;;  %1048 = vmatprep.subr.bf16.mxu1 %v1350_v36  ;;  %v233_v63 = vsub.s32 2, %v1739_v41  ;;  %v1951_v36 = vld [vmem:[%s2108_s2] sm:$0xff] }
 0x165   :  { %v226_v6 = vrot.slane %v1951_v36, %v1745_v43  ;;  %v230_v9 = vrot.slane %v1951_v36, %v1742_v42 }
 0x166   :  { %v234_v8 = vrot.slane %v1951_v36, %v233_v63 }
 0x167   :  { %1006 = vmatpush1.bf16.msra.mxu0 %v1347_v10  ;;  %1049 = vmatpush1.bf16.msra.mxu1 %v1349_v11  ;;  %v238_v10 = vrot.slane %v1951_v36, %v237_v2 }
 0x168   :  { %1007 = vmatprep.subr.bf16.mxu0 %v1356_v12  ;;  %1050 = vmatprep.subr.bf16.mxu1 %v1358_v13 }
 0x16b   :  { %1008 = vmatpush1.bf16.msra.mxu0 %v1355_v18  ;;  %1051 = vmatpush1.bf16.msra.mxu1 %v1357_v19 }
 0x16c   :  { %1009 = vmatprep.subr.bf16.mxu0 %v1364_v20  ;;  %1052 = vmatprep.subr.bf16.mxu1 %v1366_v21 }
 0x16f   :  { %1010 = vmatpush1.bf16.msra.mxu0 %v1363_v26  ;;  %1053 = vmatpush1.bf16.msra.mxu1 %v1365_v27 }
 0x170   :  { %1011 = vmatprep.subr.bf16.mxu0 %v1372_v28  ;;  %1054 = vmatprep.subr.bf16.mxu1 %v1374_v29 }
 0x173   :  { %1012 = vmatpush1.bf16.msra.mxu0 %v1371_v37  ;;  %1055 = vmatpush1.bf16.msra.mxu1 %v1373_v0 }
 0x174   :  { %1013 = vmatprep.subr.bf16.mxu0 %v1380_v3  ;;  %1056 = vmatprep.subr.bf16.mxu1 %v1382_v38 }
 0x177   :  { %1014 = vmatpush1.bf16.msra.mxu0 %v1379_v5  ;;  %1057 = vmatpush1.bf16.msra.mxu1 %v1381_v44 }
 0x178   :  { %1015 = vmatprep.subr.bf16.mxu0 %v1388_v45  ;;  %1058 = vmatprep.subr.bf16.mxu1 %v1390_v46 }
 0x17b   :  { %1016 = vmatpush1.bf16.msra.mxu0 %v1387_v51  ;;  %1059 = vmatpush1.bf16.msra.mxu1 %v1389_v52 }
 0x17c   :  { %1017 = vmatprep.subr.bf16.mxu0 %v1396_v53  ;;  %1060 = vmatprep.subr.bf16.mxu1 %v1398_v54 }
 0x17f   :  { %1018 = vmatpush1.bf16.msra.mxu0 %v1395_v57  ;;  %1061 = vmatpush1.bf16.msra.mxu1 %v1397_v58 }
 0x180   :  { %1019 = vmatprep.subr.bf16.mxu0 %v1404_v59  ;;  %1062 = vmatprep.subr.bf16.mxu1 %v1406_v60 }
 0x183   :  { %1020 = vmatpush1.bf16.msra.mxu0 %v1403_v61  ;;  %1063 = vmatpush1.bf16.msra.mxu1 %v1405_v62 }
 0x186   :  { %1022 = vmatmul.mubr.bf16.vlgmr.msra.gmra.mrb[4].mxu0 %v1773_v7  ;;  %1065 = vmatmul.mubr.bf16.vlgmr.msra.gmra.mrb[4].mxu1 %v1773_v7 }
 0x219   :  { %v937_v7 = vpop.f32.mrb[0].mxu0  ;;  %v980_v11 = vpop.f32.mrb[0].mxu1 }
 0x21a   :  { %v1960_v12 = vadd.f32 %v937_v7, %v226_v6  ;;  %v1962_v13 = vadd.f32 %v980_v11, %v234_v8  ;;  %v939_v14 = vpop.f32.mrb[1].mxu0  ;;  %v982_v15 = vpop.f32.mrb[1].mxu1 }
 0x21b   :  { %v1964_v16 = vadd.f32 %v939_v14, %v230_v9  ;;  %v1966_v17 = vadd.f32 %v982_v15, %v238_v10  ;;  %v941_v43 = vpop.f32.mrb[2].mxu0  ;;  %v984_v18 = vpop.f32.mrb[2].mxu1 }
 0x21c   :  { %v1091_v19 = vmul.f32 0.044715, %v1960_v12  ;;  %v1093_v42 = vmul.f32 0.044715, %v1962_v13  ;;  %v1974_v24 = vadd.f32 %v941_v43, %v226_v6  ;;  %v1976_v25 = vadd.f32 %v984_v18, %v234_v8  ;;  %v943_v26 = vpop.f32.mrb[3].mxu0  ;;  %v986_v27 = vpop.f32.mrb[3].mxu1 }
 0x21d   :  { %v1092_v20 = vmul.f32 0.044715, %v1964_v16  ;;  %v1094_v21 = vmul.f32 0.044715, %v1966_v17  ;;  %v1980_v32 = vadd.f32 %v943_v26, %v230_v9  ;;  %v1991_v1 = vadd.f32 %v986_v27, %v238_v10 }
 0x21e   :  { %v1107_v22 = vmul.f32 %v1091_v19, %v1960_v12  ;;  %v1109_v23 = vmul.f32 %v1093_v42, %v1962_v13  ;;  %v1099_v35 = vmul.f32 0.044715, %v1974_v24  ;;  %v1101_v3 = vmul.f32 0.044715, %v1976_v25 }
 0x21f   :  { %v1108_v28 = vmul.f32 %v1092_v20, %v1964_v16  ;;  %v1110_v29 = vmul.f32 %v1094_v21, %v1966_v17  ;;  %v1100_v45 = vmul.f32 0.044715, %v1980_v32  ;;  %v1102_v54 = vmul.f32 0.044715, %v1991_v1 }
 0x220   :  { %v1123_v33 = vmul.f32 %v1107_v22, %v1960_v12  ;;  %v1125_v34 = vmul.f32 %v1109_v23, %v1962_v13  ;;  %v1115_v40 = vmul.f32 %v1099_v35, %v1974_v24  ;;  %v1117_v44 = vmul.f32 %v1101_v3, %v1976_v25 }
 0x221   :  { %v1124_v37 = vmul.f32 %v1108_v28, %v1964_v16  ;;  %v1126_v0 = vmul.f32 %v1110_v29, %v1966_v17  ;;  %v1116_v52 = vmul.f32 %v1100_v45, %v1980_v32  ;;  %v1118_v31 = vmul.f32 %v1102_v54, %v1991_v1 }
 0x222   :  { %v1139_v38 = vadd.f32 %v1123_v33, %v1960_v12  ;;  %v1141_v39 = vadd.f32 %v1125_v34, %v1962_v13  ;;  %v1131_v48 = vmul.f32 %v1115_v40, %v1974_v24  ;;  %v1133_v51 = vmul.f32 %v1117_v44, %v1976_v25 }
 0x223   :  { %v1140_v4 = vadd.f32 %v1124_v37, %v1964_v16  ;;  %v1142_v5 = vadd.f32 %v1126_v0, %v1966_v17  ;;  %v1132_v30 = vmul.f32 %v1116_v52, %v1980_v32  ;;  %v1134_v59 = vmul.f32 %v1118_v31, %v1991_v1 }
 0x224   :  { %v1155_v46 = vmul.f32 0.7978846, %v1139_v38  ;;  %v1157_v47 = vmul.f32 0.7978846, %v1141_v39  ;;  %v1147_v53 = vadd.f32 %v1131_v48, %v1974_v24  ;;  %v1149_v55 = vadd.f32 %v1133_v51, %v1976_v25 }
 0x225   :  { %v1156_v49 = vmul.f32 0.7978846, %v1140_v4  ;;  %v1158_v50 = vmul.f32 0.7978846, %v1142_v5  ;;  %v1148_v58 = vadd.f32 %v1132_v30, %v1980_v32  ;;  %v1150_v61 = vadd.f32 %v1134_v59, %v1991_v1 }
 0x226   :  { %1427 = vtanh.f32 %v1155_v46  ;;  %v1163_v56 = vmul.f32 0.7978846, %v1147_v53  ;;  %v1165_v57 = vmul.f32 0.7978846, %v1149_v55  ;;  %v1075_v6 = vmul.f32 0.5, %v1960_v12 }
 0x227   :  { %1429 = vtanh.f32 %v1157_v47  ;;  %v1164_v60 = vmul.f32 0.7978846, %v1148_v58  ;;  %v1166_v62 = vmul.f32 0.7978846, %v1150_v61  ;;  %v1077_v10 = vmul.f32 0.5, %v1962_v13 }
 0x228   :  { %1431 = vtanh.f32 %v1156_v49  ;;  %v1076_v15 = vmul.f32 0.5, %v1964_v16  ;;  %v1078_v42 = vmul.f32 0.5, %v1966_v17  ;;  %v1083_v12 = vmul.f32 0.5, %v1974_v24 }
 0x229   :  { %1433 = vtanh.f32 %v1158_v50  ;;  %v1084_v34 = vmul.f32 0.5, %v1980_v32  ;;  %v1085_v17 = vmul.f32 0.5, %v1976_v25  ;;  %v1086_v0 = vmul.f32 0.5, %v1991_v1 }
 0x22a   :  { %1435 = vtanh.f32 %v1163_v56  ;;  %v241_v25 = vsub.s32 4, %v1739_v41  ;;  %v249_v40 = vsub.s32 6, %v1739_v41  ;;  %v245_v4 = vsub.s32 5, %v1739_v41 }
 0x22b   :  { %1437 = vtanh.f32 %v1165_v57  ;;  %v253_v1 = vsub.s32 7, %v1739_v41 }
 0x22c   :  { %1439 = vtanh.f32 %v1164_v60  ;;  %v242_v5 = vrot.slane %v1951_v36, %v241_v25  ;;  %v250_v44 = vrot.slane %v1951_v36, %v249_v40  ;;  %v246_v45 = vrot.slane %v1951_v36, %v245_v4 }
 0x22d   :  { %1441 = vtanh.f32 %v1166_v62  ;;  %v254_v46 = vrot.slane %v1951_v36, %v253_v1 }
 0x230   :  { %v1428_v63 = vpop.eup %1427 }
 0x231   :  { %v1430_v2 = vpop.eup %1429  ;;  %v1187_v8 = vadd.f32 1.0, %v1428_v63 }
 0x232   :  { %v1432_v9 = vpop.eup %1431  ;;  %v1189_v7 = vadd.f32 1.0, %v1430_v2 }
 0x233   :  { %v1434_v11 = vpop.eup %1433  ;;  %v1203_v14 = vmul.f32 %v1187_v8, %v1075_v6  ;;  %v1188_v43 = vadd.f32 1.0, %v1432_v9 }
 0x234   :  { %v1436_v18 = vpop.eup %1435  ;;  %v1205_v19 = vmul.f32 %v1189_v7, %v1077_v10  ;;  %v1190_v20 = vadd.f32 1.0, %v1434_v11 }
 0x235   :  { %v1438_v21 = vpop.eup %1437  ;;  %v1204_v22 = vmul.f32 %v1188_v43, %v1076_v15  ;;  %v1195_v23 = vadd.f32 1.0, %v1436_v18 }
 0x236   :  { %v1206_v26 = vmul.f32 %v1190_v20, %v1078_v42  ;;  %v1440_v27 = vpop.eup %1439  ;;  %v1197_v13 = vadd.f32 1.0, %v1438_v21 }
 0x237   :  { %v1415_v28 = vpack.c.bf16 %v1204_v22, %v1203_v14  ;;  %v1211_v33 = vmul.f32 %v1195_v23, %v1083_v12  ;;  %v1196_v16 = vadd.f32 1.0, %v1440_v27  ;;  %v1442_v35 = vpop.eup %1441 }
 0x238   :  { %v1416_v29 = vpack.c.bf16 %v1206_v26, %v1205_v19  ;;  %v1213_v37 = vmul.f32 %v1197_v13, %v1085_v17  ;;  %v1198_v3 = vadd.f32 1.0, %v1442_v35 }
 0x239   :  { %1267 = vst [vmem:[%s2109_s5] sm:$0xff] %v1415_v28  ;;  %v1212_v24 = vmul.f32 %v1196_v16, %v1084_v34 }
 0x23a   :  { %1268 = vst [vmem:[%s2109_s5 + $0x8] sm:$0xff] %v1416_v29  ;;  %v1214_v39 = vmul.f32 %v1198_v3, %v1086_v0 }
 0x23b   :  { %v1419_v38 = vpack.c.bf16 %v1212_v24, %v1211_v33 }
 0x23c   :  { %v1420_v32 = vpack.c.bf16 %v1214_v39, %v1213_v37 }
 0x23d   :  { %1271 = vst [vmem:[%s2109_s5 + $0x20] sm:$0xff] %v1419_v38 }
 0x23e   :  { %1272 = vst [vmem:[%s2109_s5 + $0x28] sm:$0xff] %v1420_v32 }
 0x259   :  { %v1023_v47 = vpop.f32.mrb[4].mxu0  ;;  %v1066_v48 = vpop.f32.mrb[4].mxu1 }
 0x25a   :  { %v2036_v49 = vadd.f32 %v1023_v47, %v242_v5  ;;  %v2038_v50 = vadd.f32 %v1066_v48, %v250_v44  ;;  %v1025_v51 = vpop.f32.mrb[5].mxu0  ;;  %v1068_v52 = vpop.f32.mrb[5].mxu1 }
 0x25b   :  { %v2040_v53 = vadd.f32 %v1025_v51, %v246_v45  ;;  %v2042_v54 = vadd.f32 %v1068_v52, %v254_v46  ;;  %v1027_v41 = vpop.f32.mrb[6].mxu0  ;;  %v1070_v55 = vpop.f32.mrb[6].mxu1 }
 0x25c   :  { %v1095_v30 = vmul.f32 0.044715, %v2036_v49  ;;  %v1097_v56 = vmul.f32 0.044715, %v2038_v50  ;;  %v2050_v59 = vadd.f32 %v1027_v41, %v242_v5  ;;  %v2052_v60 = vadd.f32 %v1070_v55, %v250_v44  ;;  %v1029_v61 = vpop.f32.mrb[7].mxu0  ;;  %v1072_v62 = vpop.f32.mrb[7].mxu1 }
 0x25d   :  { %v1096_v36 = vmul.f32 0.044715, %v2040_v53  ;;  %v1098_v31 = vmul.f32 0.044715, %v2042_v54  ;;  %v2056_v6 = vadd.f32 %v1029_v61, %v246_v45  ;;  %v2067_v19 = vadd.f32 %v1072_v62, %v254_v46 }
 0x25e   :  { %v1111_v57 = vmul.f32 %v1095_v30, %v2036_v49  ;;  %v1113_v58 = vmul.f32 %v1097_v56, %v2038_v50  ;;  %v1103_v10 = vmul.f32 0.044715, %v2050_v59  ;;  %v1105_v14 = vmul.f32 0.044715, %v2052_v60 }
 0x25f   :  { %v1112_v63 = vmul.f32 %v1096_v36, %v2040_v53  ;;  %v1114_v2 = vmul.f32 %v1098_v31, %v2042_v54  ;;  %v1104_v22 = vmul.f32 0.044715, %v2056_v6  ;;  %v1106_v34 = vmul.f32 0.044715, %v2067_v19 }
 0x260   :  { %v1127_v8 = vmul.f32 %v1111_v57, %v2036_v49  ;;  %v1129_v9 = vmul.f32 %v1113_v58, %v2038_v50  ;;  %v1119_v18 = vmul.f32 %v1103_v10, %v2050_v59  ;;  %v1121_v21 = vmul.f32 %v1105_v14, %v2052_v60 }
 0x261   :  { %v1128_v7 = vmul.f32 %v1112_v63, %v2040_v53  ;;  %v1130_v11 = vmul.f32 %v1114_v2, %v2042_v54  ;;  %v1120_v29 = vmul.f32 %v1104_v22, %v2056_v6  ;;  %v1122_v24 = vmul.f32 %v1106_v34, %v2067_v19 }
 0x262   :  { %v1143_v15 = vadd.f32 %v1127_v8, %v2036_v49  ;;  %v1145_v43 = vadd.f32 %v1129_v9, %v2038_v50  ;;  %v1135_v12 = vmul.f32 %v1119_v18, %v2050_v59  ;;  %v1137_v13 = vmul.f32 %v1121_v21, %v2052_v60 }
 0x263   :  { %v1144_v42 = vadd.f32 %v1128_v7, %v2040_v53  ;;  %v1146_v20 = vadd.f32 %v1130_v11, %v2042_v54  ;;  %v1136_v17 = vmul.f32 %v1120_v29, %v2056_v6  ;;  %v1138_v3 = vmul.f32 %v1122_v24, %v2067_v19 }
 0x264   :  { %v1159_v23 = vmul.f32 0.7978846, %v1143_v15  ;;  %v1161_v26 = vmul.f32 0.7978846, %v1145_v43  ;;  %v1151_v33 = vadd.f32 %v1135_v12, %v2050_v59  ;;  %v1153_v16 = vadd.f32 %v1137_v13, %v2052_v60 }
 0x265   :  { %v1160_v27 = vmul.f32 0.7978846, %v1144_v42  ;;  %v1162_v28 = vmul.f32 0.7978846, %v1146_v20  ;;  %v1152_v0 = vadd.f32 %v1136_v17, %v2056_v6  ;;  %v1154_v39 = vadd.f32 %v1138_v3, %v2067_v19 }
 0x266   :  { %1443 = vtanh.f32 %v1159_v23  ;;  %v1167_v35 = vmul.f32 0.7978846, %v1151_v33  ;;  %v1169_v37 = vmul.f32 0.7978846, %v1153_v16  ;;  %v1079_v4 = vmul.f32 0.5, %v2036_v49 }
 0x267   :  { %1445 = vtanh.f32 %v1161_v26  ;;  %v1168_v38 = vmul.f32 0.7978846, %v1152_v0  ;;  %v1170_v32 = vmul.f32 0.7978846, %v1154_v39  ;;  %v1081_v44 = vmul.f32 0.5, %v2038_v50 }
 0x268   :  { %1447 = vtanh.f32 %v1160_v27  ;;  %v1080_v48 = vmul.f32 0.5, %v2040_v53  ;;  %v1082_v55 = vmul.f32 0.5, %v2042_v54  ;;  %v1087_v49 = vmul.f32 0.5, %v2050_v59 }
 0x269   :  { %1449 = vtanh.f32 %v1162_v28  ;;  %v1088_v2 = vmul.f32 0.5, %v2056_v6  ;;  %v1089_v54 = vmul.f32 0.5, %v2052_v60  ;;  %v1090_v10 = vmul.f32 0.5, %v2067_v19 }
 0x26a   :  { %1451 = vtanh.f32 %v1167_v35 }
 0x26b   :  { %1453 = vtanh.f32 %v1169_v37 }
 0x26c   :  { %1455 = vtanh.f32 %v1168_v38 }
 0x26d   :  { %1457 = vtanh.f32 %v1170_v32 }
 0x270   :  { %v1444_v25 = vpop.eup %1443 }
 0x271   :  { %v1446_v40 = vpop.eup %1445  ;;  %v1191_v1 = vadd.f32 1.0, %v1444_v25 }
 0x272   :  { %v1448_v5 = vpop.eup %1447  ;;  %v1193_v45 = vadd.f32 1.0, %v1446_v40 }
 0x273   :  { %v1450_v46 = vpop.eup %1449  ;;  %v1207_v47 = vmul.f32 %v1191_v1, %v1079_v4  ;;  %v1192_v51 = vadd.f32 1.0, %v1448_v5 }
 0x274   :  { %v1452_v52 = vpop.eup %1451  ;;  %v1209_v41 = vmul.f32 %v1193_v45, %v1081_v44  ;;  %v1194_v30 = vadd.f32 1.0, %v1450_v46 }
 0x275   :  { %v1454_v56 = vpop.eup %1453  ;;  %v1208_v36 = vmul.f32 %v1192_v51, %v1080_v48  ;;  %v1199_v31 = vadd.f32 1.0, %v1452_v52 }
 0x276   :  { %v1210_v57 = vmul.f32 %v1194_v30, %v1082_v55  ;;  %v1456_v58 = vpop.eup %1455  ;;  %v1201_v50 = vadd.f32 1.0, %v1454_v56 }
 0x277   :  { %v1417_v61 = vpack.c.bf16 %v1208_v36, %v1207_v47  ;;  %v1215_v63 = vmul.f32 %v1199_v31, %v1087_v49  ;;  %v1200_v53 = vadd.f32 1.0, %v1456_v58  ;;  %v1458_v8 = vpop.eup %1457 }
 0x278   :  { %v1418_v62 = vpack.c.bf16 %v1210_v57, %v1209_v41  ;;  %v1217_v9 = vmul.f32 %v1201_v50, %v1089_v54  ;;  %v1202_v7 = vadd.f32 1.0, %v1458_v8 }
 0x279   :  { %1269 = vst [vmem:[%s2109_s5 + $0x10] sm:$0xff] %v1417_v61  ;;  %v1216_v59 = vmul.f32 %v1200_v53, %v1088_v2 }
 0x27a   :  { %1270 = vst [vmem:[%s2109_s5 + $0x18] sm:$0xff] %v1418_v62  ;;  %v1218_v14 = vmul.f32 %v1202_v7, %v1090_v10 }
 0x27b   :  { %v1421_v11 = vpack.c.bf16 %v1216_v59, %v1215_v63 }
 0x27c   :  { %v1422_v6 = vpack.c.bf16 %v1218_v14, %v1217_v9 }
 0x27d   :  { %1273 = vst [vmem:[%s2109_s5 + $0x30] sm:$0xff] %v1421_v11 }
 0x27e   :  { %1274 = vst [vmem:[%s2109_s5 + $0x38] sm:$0xff] %v1422_v6 }

// kernel: gpt2_forward.21
= control target key start
LH: loop header
LB: loop body
LE: loop exit
PB: predicated region body
PF: predicated region fallthrough
CT: control target
= control target key end

     0   :  { %13 = vsyncpa [#allocation8], 0  ;;  %s3496_s0 = inlined_call_operand.vmem [shape: bf16[16,256], index: 0, kind: input, shape index: {}]   ;;  %s3497_s1 = inlined_call_operand.vmem [shape: bf16[256,2048], index: 1, kind: input, shape index: {}]   ;;  %s3498_s2 = inlined_call_operand.hbm [shape: f32[1,256], index: 2, kind: input, shape index: {}]   ;;  %s3499_s3 = inlined_call_operand.hbm [shape: f32[1,256], index: 3, kind: input, shape index: {}]   ;;  %s3500_s4 = inlined_call_operand.vmem [shape: s32[16,1], index: 4, kind: input, shape index: {}]   ;;  %s3501_s5 = inlined_call_operand.vmem [shape: f32[16,1], index: 5, kind: input, shape index: {}]   ;;  %s3502_s6 = inlined_call_operand.hbm [shape: bf16[16,2048], index: 6, kind: output, shape index: {0}]   ;;  %s3503_s7 = inlined_call_operand.vmem [shape: f32[16,1], index: 7, kind: output, shape index: {1}]  }
   0x1   :  { %14 = vsyncpa [#allocation11], 0 }
   0x2   :  { %15 = vsyncpa [#allocation9], 0 }
   0x3   :  { %17 = vsyncpa [#allocation9 + $0x1], 0  ;;  %s2671_s24 = smov 0   ;;  %s2673_s25 = smov 0  }
   0x4   :  { %s2675_s26 = smov 0   ;;  %s2677_s27 = smov 0  }
   0x5   :  { %s2679_s28 = smov 0   ;;  %s2681_s29 = smov 0  }
   0x6 LB: > { %s2177_s30 = sadd.s32 4294967295, %s2620_s29   ;;  %s2178_s8 = sadd.s32 4294967294, %s2620_s29   ;;  %s2620_s29 = sphi %s2681_s29, %s23_s29   ;;  %s2616_s28 = sphi %s2679_s28, %s3528_s28   ;;  %s2612_s27 = sphi %s2677_s27, %s3527_s27   ;;  %s2608_s26 = sphi %s2675_s26, %s3526_s26   ;;  %s2604_s25 = sphi %s2673_s25, %s3525_s25   ;;  %s2600_s24 = sphi %s2671_s24, %s3524_s24  }
   0x7   : > { %s32_s9 = sadd.s32 1, %s2616_s28  ;;  %s68_s10 = sadd.s32 1, %s2608_s26 }
   0x8   : > { %p33_p0 = scmp.ge.s32.totalorder %s32_s9, 2  ;;  %p75_p1 = scmp.ne.s32.totalorder %s2608_s26, %s2604_s25 }
   0x9   : > { %p76_p2 = scmp.eq.s32.totalorder %s2620_s29, 0  ;;  %p201_p3 = scmp.eq.s32.totalorder %s2177_s30, 1 }
   0xa   : > { %s3530_s9 = smov (%p33_p0, %s32_s9), 0  ;;  %p206_p6 = scmp.ne.s32.totalorder %s2604_s25, %s2600_s24 }
   0xb   : > { %3509 = sst [smem:[#allocation16_spill]] %s3530_s9  ;;  %p2710_p4 = por %p76_p2, %p75_p1 }
   0xc   : > { %p2714_p5 = por %p201_p3, %p75_p1  ;;  %s65_s13 = ssub.s32 %s2616_s28, %s3530_s9 }
   0xd   : > { %s3510_s11 = scalar_select %p2710_p4, 1, 0 }
   0xe   : > { %s3511_s12 = scalar_select %p2714_p5, 1, 0 }
   0xf   : > { %p66_p7 = scmp.eq.s32.totalorder %s65_s13, 0  ;;  %p207_p8 = scmp.eq.s32.totalorder %s2178_s8, 1 }
  0x10   : > { %p2179_p9 = scmp.ge.s32.totalorder %s2620_s29, 1  ;;  %p240_p10 = scmp.lt.s32.totalorder %s2620_s29, 3 }
  0x11   : > { %s2725_s14 = scalar_select %p66_p7, %s2608_s26, %s68_s10  }
  0x12   : > { %p2727_p11 = por %p207_p8, %p206_p6  ;;  %p2731_p12 = pnand %p2179_p9, %p240_p10 }
  0x13   : > { %3512 = sst [smem:[#allocation17_spill]] %s2725_s14  ;;  %p2735_p13 = scmp.eq.s32.totalorder %s2177_s30, 0 }
  0x14   : > { %s3513_s15 = scalar_select %p2727_p11, 1, 0 }
  0x15   : > { %s3514_s16 = scalar_select %p2731_p12, 1, 0 }
  0x16   : > { %s3515_s17 = scalar_select %p2735_p13, 1, 0 }
  0x17   : > { %p2360_p0 = pneg %p2731_p12  ;;  %s2622_s18 = smov [#allocation7]  }
  0x18   : > { %s263_s19 = sshll.u32 %s2622_s18, 4  ;;  %s2623_s21 = smov [#allocation10]   ;;  %s264_s19 = int_to_ptr.vmem [resolvable:$true] %s263_s19 }
  0x19   : > { %p2743_p1 = pnand %p2735_p13, %p2360_p0  ;;  %s274_s22 = sshll.u32 %s2623_s21, 4  ;;  %s2747_s22 = int_to_ptr.vmem [resolvable:$true] %s274_s22 }
  0x1a   : > { %s2478_s8 = scalar_lea.hbm %s3498_s2, 32 }
  0x1b   : > { %p2479_p2 = scmp.ne.s32.totalorder %s3498_s2, %s2478_s8  ;;  %p2480_p3 = pneg %p2743_p1 }
  0x1c   : > { %p2485_p8 = scmp.lt.u32.totalorder %s2478_s8, %s3498_s2 }
  0x1d   : > { %p2481_p6 = pnand %p2480_p3, %p2479_p2 }
  0x1f   : > { %p2482_p7 = pneg %p2481_p6 }
  0x21   : > { %p2487_p9 = pnand %p2485_p8, %p2482_p7 }
  0x23   : > { %2490 = shalt.err (!%p2487_p9)
}
  0x24   : > { %s2491_s21 = scalar_lea.vmem %s264_s19, 32  ;;  %p2499_p5 = scmp.lt.s32.totalorder %s264_s19, %s264_s19 }
  0x25   : > { %p2492_p10 = scmp.ne.s32.totalorder %s264_s19, %s2491_s21  ;;  %p2500_p13 = scmp.lt.s32.totalorder %s2491_s21, %s2491_s21 }
  0x27   : > { %p2494_p0 = pnand %p2492_p10, %p2480_p3  ;;  %p2501_p12 = por %p2500_p13, %p2499_p5 }
  0x29   : > { %p2495_p11 = pneg %p2494_p0 }
  0x2b   : > { %p2502_p4 = pnand %p2501_p12, %p2495_p11 }
  0x2d   : > { %2505 = shalt.err (!%p2502_p4)
}
  0x2e   : > { %2363 = dma.hbm_to_vmem [thread:$0]  (!%p2743_p1), %s3498_s2, 32, %s264_s19, [#allocation8]  }
  0x2f   : > { %s2506_s10 = scalar_lea.hbm %s3499_s3, 32 }
  0x30   : > { %p2507_p2 = scmp.ne.s32.totalorder %s3499_s3, %s2506_s10  ;;  %p2513_p4 = scmp.lt.u32.totalorder %s2506_s10, %s3499_s3 }
  0x32   : > { %p2509_p5 = pnand %p2507_p2, %p2480_p3 }
  0x34   : > { %p2510_p11 = pneg %p2509_p5 }
  0x36   : > { %p2515_p12 = pnand %p2513_p4, %p2510_p11 }
  0x38   : > { %2518 = shalt.err (!%p2515_p12)
}
  0x39   : > { %s2519_s19 = scalar_lea.vmem %s2747_s22, 32  ;;  %p2527_p8 = scmp.lt.s32.totalorder %s2747_s22, %s2747_s22 }
  0x3a   : > { %p2520_p13 = scmp.ne.s32.totalorder %s2747_s22, %s2519_s19  ;;  %p2528_p9 = scmp.lt.s32.totalorder %s2519_s19, %s2519_s19 }
  0x3c   : > { %p2522_p6 = pnand %p2520_p13, %p2480_p3  ;;  %p2529_p10 = por %p2528_p9, %p2527_p8 }
  0x3e   : > { %p2523_p7 = pneg %p2522_p6 }
  0x40   : > { %p2530_p0 = pnand %p2529_p10, %p2523_p7 }
  0x42   : > { %2533 = shalt.err (!%p2530_p0)
}
  0x43   : > { %2366 = dma.hbm_to_vmem [thread:$0]  (!%p2743_p1), %s3499_s3, 32, %s2747_s22, [#allocation11]  }
  0x44   : > { %p2185_p2 = scmp.ge.s32.totalorder %s2620_s29, 2 }
  0x45   : > { %p3517_p3 = scmp.ne.s32.totalorder (!%p2185_p2), %s3510_s11, 0 }
  0x46   : > { %299 = sbr.rel (%p2185_p2) target bundleno = 145 (0x91), region = 36 }
  0x4d   : > { %302 = sbr.rel (!%p3517_p3) target bundleno = 145 (0x91), region = 40  ;;  %s304_s30 = sand.u32 (%p3517_p3), 1, %s2608_s26  }
  0x4e   : > { %s2340_s9 = sshll.u32 (%p3517_p3), %s2616_s28, 5  ;;  %s2186_s8 = sshll.u32 (%p3517_p3), %s304_s30, 10 }
  0x4f   : > { %s2806_s13 = scalar_lea.vmem (%p3517_p3), %s3497_s1, %s2340_s9  ;;  %s2811_s11 = scalar_lea.vmem (%p3517_p3), [#allocation6], %s2186_s8 }
  0x50   : > { %v322_v0 = vld [vmem:[%s2806_s13] sm:$0xff] (%p3517_p3)  ;;  %v324_v1 = vld [vmem:[%s2806_s13 + $0x8] sm:$0xff] (%p3517_p3)  ;;  %v326_v2 = vld [vmem:[%s2806_s13 + $0x10] sm:$0xff] (%p3517_p3) }
  0x51   : > { %323 = vst [vmem:[%s2811_s11] sm:$0xff] (%p3517_p3), %v322_v0  ;;  %325 = vst [vmem:[%s2811_s11 + $0x8] sm:$0xff] (%p3517_p3), %v324_v1  ;;  %v328_v3 = vld [vmem:[%s2806_s13 + $0x18] sm:$0xff] (%p3517_p3)  ;;  %v330_v4 = vld [vmem:[%s2806_s13 + $0x40] sm:$0xff] (%p3517_p3) }
  0x52   : > { %327 = vst [vmem:[%s2811_s11 + $0x10] sm:$0xff] (%p3517_p3), %v326_v2  ;;  %v332_v5 = vld [vmem:[%s2806_s13 + $0x48] sm:$0xff] (%p3517_p3)  ;;  %329 = vst [vmem:[%s2811_s11 + $0x18] sm:$0xff] (%p3517_p3), %v328_v3  ;;  %v334_v6 = vld [vmem:[%s2806_s13 + $0x50] sm:$0xff] (%p3517_p3) }
  0x53   : > { %331 = vst [vmem:[%s2811_s11 + $0x20] sm:$0xff] (%p3517_p3), %v330_v4  ;;  %333 = vst [vmem:[%s2811_s11 + $0x28] sm:$0xff] (%p3517_p3), %v332_v5  ;;  %v336_v7 = vld [vmem:[%s2806_s13 + $0x58] sm:$0xff] (%p3517_p3)  ;;  %v338_v8 = vld [vmem:[%s2806_s13 + $0x80] sm:$0xff] (%p3517_p3) }
  0x54   : > { %335 = vst [vmem:[%s2811_s11 + $0x30] sm:$0xff] %v334_v6  ;;  %337 = vst [vmem:[%s2811_s11 + $0x38] sm:$0xff] %v336_v7  ;;  %v340_v9 = vld [vmem:[%s2806_s13 + $0x88] sm:$0xff]  ;;  %v342_v10 = vld [vmem:[%s2806_s13 + $0x90] sm:$0xff] }
  0x55   : > { %339 = vst [vmem:[%s2811_s11 + $0x40] sm:$0xff] %v338_v8  ;;  %v344_v11 = vld [vmem:[%s2806_s13 + $0x98] sm:$0xff]  ;;  %341 = vst [vmem:[%s2811_s11 + $0x48] sm:$0xff] %v340_v9  ;;  %v346_v12 = vld [vmem:[%s2806_s13 + $0xc0] sm:$0xff] }
  0x56   : > { %343 = vst [vmem:[%s2811_s11 + $0x50] sm:$0xff] %v342_v10  ;;  %345 = vst [vmem:[%s2811_s11 + $0x58] sm:$0xff] %v344_v11  ;;  %v348_v13 = vld [vmem:[%s2806_s13 + $0xc8] sm:$0xff]  ;;  %v350_v14 = vld [vmem:[%s2806_s13 + $0xd0] sm:$0xff] }
  0x57   : > { %347 = vst [vmem:[%s2811_s11 + $0x60] sm:$0xff] %v346_v12  ;;  %349 = vst [vmem:[%s2811_s11 + $0x68] sm:$0xff] %v348_v13  ;;  %v352_v15 = vld [vmem:[%s2806_s13 + $0xd8] sm:$0xff]  ;;  %v354_v16 = vld [vmem:[%s2806_s13 + $0x100] sm:$0xff] }
  0x58   : > { %351 = vst [vmem:[%s2811_s11 + $0x70] sm:$0xff] %v350_v14  ;;  %v356_v17 = vld [vmem:[%s2806_s13 + $0x108] sm:$0xff]  ;;  %353 = vst [vmem:[%s2811_s11 + $0x78] sm:$0xff] %v352_v15  ;;  %v358_v18 = vld [vmem:[%s2806_s13 + $0x110] sm:$0xff] }
  0x59   : > { %355 = vst [vmem:[%s2811_s11 + $0x80] sm:$0xff] %v354_v16  ;;  %357 = vst [vmem:[%s2811_s11 + $0x88] sm:$0xff] %v356_v17  ;;  %v360_v19 = vld [vmem:[%s2806_s13 + $0x118] sm:$0xff]  ;;  %v362_v20 = vld [vmem:[%s2806_s13 + $0x140] sm:$0xff] }
  0x5a   : > { %359 = vst [vmem:[%s2811_s11 + $0x90] sm:$0xff] %v358_v18  ;;  %361 = vst [vmem:[%s2811_s11 + $0x98] sm:$0xff] %v360_v19  ;;  %v364_v21 = vld [vmem:[%s2806_s13 + $0x148] sm:$0xff]  ;;  %v366_v22 = vld [vmem:[%s2806_s13 + $0x150] sm:$0xff] }
  0x5b   : > { %363 = vst [vmem:[%s2811_s11 + $0xa0] sm:$0xff] %v362_v20  ;;  %v368_v23 = vld [vmem:[%s2806_s13 + $0x158] sm:$0xff]  ;;  %365 = vst [vmem:[%s2811_s11 + $0xa8] sm:$0xff] %v364_v21  ;;  %v370_v24 = vld [vmem:[%s2806_s13 + $0x180] sm:$0xff] }
  0x5c   : > { %367 = vst [vmem:[%s2811_s11 + $0xb0] sm:$0xff] %v366_v22  ;;  %369 = vst [vmem:[%s2811_s11 + $0xb8] sm:$0xff] %v368_v23  ;;  %v372_v25 = vld [vmem:[%s2806_s13 + $0x188] sm:$0xff]  ;;  %v374_v26 = vld [vmem:[%s2806_s13 + $0x190] sm:$0xff] }
  0x5d   : > { %371 = vst [vmem:[%s2811_s11 + $0xc0] sm:$0xff] %v370_v24  ;;  %373 = vst [vmem:[%s2811_s11 + $0xc8] sm:$0xff] %v372_v25  ;;  %v376_v27 = vld [vmem:[%s2806_s13 + $0x198] sm:$0xff]  ;;  %v378_v28 = vld [vmem:[%s2806_s13 + $0x1c0] sm:$0xff] }
  0x5e   : > { %375 = vst [vmem:[%s2811_s11 + $0xd0] sm:$0xff] %v374_v26  ;;  %v380_v29 = vld [vmem:[%s2806_s13 + $0x1c8] sm:$0xff]  ;;  %377 = vst [vmem:[%s2811_s11 + $0xd8] sm:$0xff] %v376_v27  ;;  %v382_v30 = vld [vmem:[%s2806_s13 + $0x1d0] sm:$0xff] }
  0x5f   : > { %379 = vst [vmem:[%s2811_s11 + $0xe0] sm:$0xff] %v378_v28  ;;  %381 = vst [vmem:[%s2811_s11 + $0xe8] sm:$0xff] %v380_v29  ;;  %v384_v31 = vld [vmem:[%s2806_s13 + $0x1d8] sm:$0xff]  ;;  %v386_v32 = vld [vmem:[%s2806_s13 + $0x200] sm:$0xff] }
  0x60   : > { %383 = vst [vmem:[%s2811_s11 + $0xf0] sm:$0xff] %v382_v30  ;;  %385 = vst [vmem:[%s2811_s11 + $0xf8] sm:$0xff] %v384_v31  ;;  %v388_v33 = vld [vmem:[%s2806_s13 + $0x208] sm:$0xff]  ;;  %v390_v34 = vld [vmem:[%s2806_s13 + $0x210] sm:$0xff] }
  0x61   : > { %387 = vst [vmem:[%s2811_s11 + $0x100] sm:$0xff] %v386_v32  ;;  %v392_v35 = vld [vmem:[%s2806_s13 + $0x218] sm:$0xff]  ;;  %389 = vst [vmem:[%s2811_s11 + $0x108] sm:$0xff] %v388_v33  ;;  %v394_v36 = vld [vmem:[%s2806_s13 + $0x240] sm:$0xff] }
  0x62   : > { %391 = vst [vmem:[%s2811_s11 + $0x110] sm:$0xff] %v390_v34  ;;  %393 = vst [vmem:[%s2811_s11 + $0x118] sm:$0xff] %v392_v35  ;;  %v396_v37 = vld [vmem:[%s2806_s13 + $0x248] sm:$0xff]  ;;  %v398_v38 = vld [vmem:[%s2806_s13 + $0x250] sm:$0xff] }
  0x63   : > { %395 = vst [vmem:[%s2811_s11 + $0x120] sm:$0xff] %v394_v36  ;;  %397 = vst [vmem:[%s2811_s11 + $0x128] sm:$0xff] %v396_v37  ;;  %v400_v39 = vld [vmem:[%s2806_s13 + $0x258] sm:$0xff]  ;;  %v402_v40 = vld [vmem:[%s2806_s13 + $0x280] sm:$0xff] }
  0x64   : > { %399 = vst [vmem:[%s2811_s11 + $0x130] sm:$0xff] %v398_v38  ;;  %v404_v41 = vld [vmem:[%s2806_s13 + $0x288] sm:$0xff]  ;;  %401 = vst [vmem:[%s2811_s11 + $0x138] sm:$0xff] %v400_v39  ;;  %v406_v42 = vld [vmem:[%s2806_s13 + $0x290] sm:$0xff] }
  0x65   : > { %403 = vst [vmem:[%s2811_s11 + $0x140] sm:$0xff] %v402_v40  ;;  %405 = vst [vmem:[%s2811_s11 + $0x148] sm:$0xff] %v404_v41  ;;  %v408_v43 = vld [vmem:[%s2806_s13 + $0x298] sm:$0xff]  ;;  %v410_v44 = vld [vmem:[%s2806_s13 + $0x2c0] sm:$0xff] }
  0x66   : > { %407 = vst [vmem:[%s2811_s11 + $0x150] sm:$0xff] %v406_v42  ;;  %409 = vst [vmem:[%s2811_s11 + $0x158] sm:$0xff] %v408_v43  ;;  %v412_v45 = vld [vmem:[%s2806_s13 + $0x2c8] sm:$0xff]  ;;  %v414_v46 = vld [vmem:[%s2806_s13 + $0x2d0] sm:$0xff] }
  0x67   : > { %411 = vst [vmem:[%s2811_s11 + $0x160] sm:$0xff] %v410_v44  ;;  %v416_v47 = vld [vmem:[%s2806_s13 + $0x2d8] sm:$0xff]  ;;  %413 = vst [vmem:[%s2811_s11 + $0x168] sm:$0xff] %v412_v45  ;;  %v418_v48 = vld [vmem:[%s2806_s13 + $0x300] sm:$0xff] }
  0x68   : > { %415 = vst [vmem:[%s2811_s11 + $0x170] sm:$0xff] %v414_v46  ;;  %417 = vst [vmem:[%s2811_s11 + $0x178] sm:$0xff] %v416_v47  ;;  %v420_v49 = vld [vmem:[%s2806_s13 + $0x308] sm:$0xff]  ;;  %v422_v50 = vld [vmem:[%s2806_s13 + $0x310] sm:$0xff] }
  0x69   : > { %419 = vst [vmem:[%s2811_s11 + $0x180] sm:$0xff] %v418_v48  ;;  %421 = vst [vmem:[%s2811_s11 + $0x188] sm:$0xff] %v420_v49  ;;  %v424_v51 = vld [vmem:[%s2806_s13 + $0x318] sm:$0xff]  ;;  %v426_v52 = vld [vmem:[%s2806_s13 + $0x340] sm:$0xff] }
  0x6a   : > { %423 = vst [vmem:[%s2811_s11 + $0x190] sm:$0xff] %v422_v50  ;;  %v428_v53 = vld [vmem:[%s2806_s13 + $0x348] sm:$0xff]  ;;  %425 = vst [vmem:[%s2811_s11 + $0x198] sm:$0xff] %v424_v51  ;;  %v430_v54 = vld [vmem:[%s2806_s13 + $0x350] sm:$0xff] }
  0x6b   : > { %427 = vst [vmem:[%s2811_s11 + $0x1a0] sm:$0xff] %v426_v52  ;;  %429 = vst [vmem:[%s2811_s11 + $0x1a8] sm:$0xff] %v428_v53  ;;  %v432_v55 = vld [vmem:[%s2806_s13 + $0x358] sm:$0xff]  ;;  %v434_v56 = vld [vmem:[%s2806_s13 + $0x380] sm:$0xff] }
  0x6c   : > { %431 = vst [vmem:[%s2811_s11 + $0x1b0] sm:$0xff] %v430_v54  ;;  %433 = vst [vmem:[%s2811_s11 + $0x1b8] sm:$0xff] %v432_v55  ;;  %v436_v57 = vld [vmem:[%s2806_s13 + $0x388] sm:$0xff]  ;;  %v438_v58 = vld [vmem:[%s2806_s13 + $0x390] sm:$0xff] }
  0x6d   : > { %435 = vst [vmem:[%s2811_s11 + $0x1c0] sm:$0xff] %v434_v56  ;;  %v440_v59 = vld [vmem:[%s2806_s13 + $0x398] sm:$0xff]  ;;  %437 = vst [vmem:[%s2811_s11 + $0x1c8] sm:$0xff] %v436_v57  ;;  %v442_v60 = vld [vmem:[%s2806_s13 + $0x3c0] sm:$0xff] }
  0x6e   : > { %439 = vst [vmem:[%s2811_s11 + $0x1d0] sm:$0xff] %v438_v58  ;;  %441 = vst [vmem:[%s2811_s11 + $0x1d8] sm:$0xff] %v440_v59  ;;  %v444_v61 = vld [vmem:[%s2806_s13 + $0x3c8] sm:$0xff]  ;;  %v446_v62 = vld [vmem:[%s2806_s13 + $0x3d0] sm:$0xff] }
  0x6f   : > { %443 = vst [vmem:[%s2811_s11 + $0x1e0] sm:$0xff] %v442_v60  ;;  %445 = vst [vmem:[%s2811_s11 + $0x1e8] sm:$0xff] %v444_v61  ;;  %v448_v63 = vld [vmem:[%s2806_s13 + $0x3d8] sm:$0xff]  ;;  %v450_v0 = vld [vmem:[%s2806_s13 + $0x400] sm:$0xff] }
  0x70   : > { %447 = vst [vmem:[%s2811_s11 + $0x1f0] sm:$0xff] %v446_v62  ;;  %v452_v1 = vld [vmem:[%s2806_s13 + $0x408] sm:$0xff]  ;;  %449 = vst [vmem:[%s2811_s11 + $0x1f8] sm:$0xff] %v448_v63  ;;  %v454_v2 = vld [vmem:[%s2806_s13 + $0x410] sm:$0xff] }
  0x71   : > { %451 = vst [vmem:[%s2811_s11 + $0x200] sm:$0xff] %v450_v0  ;;  %453 = vst [vmem:[%s2811_s11 + $0x208] sm:$0xff] %v452_v1  ;;  %v456_v3 = vld [vmem:[%s2806_s13 + $0x418] sm:$0xff]  ;;  %v458_v4 = vld [vmem:[%s2806_s13 + $0x440] sm:$0xff] }
  0x72   : > { %455 = vst [vmem:[%s2811_s11 + $0x210] sm:$0xff] %v454_v2  ;;  %457 = vst [vmem:[%s2811_s11 + $0x218] sm:$0xff] %v456_v3  ;;  %v460_v5 = vld [vmem:[%s2806_s13 + $0x448] sm:$0xff]  ;;  %v462_v6 = vld [vmem:[%s2806_s13 + $0x450] sm:$0xff] }
  0x73   : > { %459 = vst [vmem:[%s2811_s11 + $0x220] sm:$0xff] %v458_v4  ;;  %v464_v7 = vld [vmem:[%s2806_s13 + $0x458] sm:$0xff]  ;;  %461 = vst [vmem:[%s2811_s11 + $0x228] sm:$0xff] %v460_v5  ;;  %v466_v8 = vld [vmem:[%s2806_s13 + $0x480] sm:$0xff] }
  0x74   : > { %463 = vst [vmem:[%s2811_s11 + $0x230] sm:$0xff] %v462_v6  ;;  %465 = vst [vmem:[%s2811_s11 + $0x238] sm:$0xff] %v464_v7  ;;  %v468_v9 = vld [vmem:[%s2806_s13 + $0x488] sm:$0xff]  ;;  %v470_v10 = vld [vmem:[%s2806_s13 + $0x490] sm:$0xff] }
  0x75   : > { %467 = vst [vmem:[%s2811_s11 + $0x240] sm:$0xff] %v466_v8  ;;  %469 = vst [vmem:[%s2811_s11 + $0x248] sm:$0xff] %v468_v9  ;;  %v472_v11 = vld [vmem:[%s2806_s13 + $0x498] sm:$0xff]  ;;  %v474_v12 = vld [vmem:[%s2806_s13 + $0x4c0] sm:$0xff] }
  0x76   : > { %471 = vst [vmem:[%s2811_s11 + $0x250] sm:$0xff] %v470_v10  ;;  %v476_v13 = vld [vmem:[%s2806_s13 + $0x4c8] sm:$0xff]  ;;  %473 = vst [vmem:[%s2811_s11 + $0x258] sm:$0xff] %v472_v11  ;;  %v478_v14 = vld [vmem:[%s2806_s13 + $0x4d0] sm:$0xff] }
  0x77   : > { %475 = vst [vmem:[%s2811_s11 + $0x260] sm:$0xff] %v474_v12  ;;  %477 = vst [vmem:[%s2811_s11 + $0x268] sm:$0xff] %v476_v13  ;;  %v480_v15 = vld [vmem:[%s2806_s13 + $0x4d8] sm:$0xff]  ;;  %v482_v16 = vld [vmem:[%s2806_s13 + $0x500] sm:$0xff] }
  0x78   : > { %479 = vst [vmem:[%s2811_s11 + $0x270] sm:$0xff] %v478_v14  ;;  %481 = vst [vmem:[%s2811_s11 + $0x278] sm:$0xff] %v480_v15  ;;  %v484_v17 = vld [vmem:[%s2806_s13 + $0x508] sm:$0xff]  ;;  %v486_v18 = vld [vmem:[%s2806_s13 + $0x510] sm:$0xff] }
  0x79   : > { %483 = vst [vmem:[%s2811_s11 + $0x280] sm:$0xff] %v482_v16  ;;  %v488_v19 = vld [vmem:[%s2806_s13 + $0x518] sm:$0xff]  ;;  %485 = vst [vmem:[%s2811_s11 + $0x288] sm:$0xff] %v484_v17  ;;  %v490_v20 = vld [vmem:[%s2806_s13 + $0x540] sm:$0xff] }
  0x7a   : > { %487 = vst [vmem:[%s2811_s11 + $0x290] sm:$0xff] %v486_v18  ;;  %489 = vst [vmem:[%s2811_s11 + $0x298] sm:$0xff] %v488_v19  ;;  %v492_v21 = vld [vmem:[%s2806_s13 + $0x548] sm:$0xff]  ;;  %v494_v22 = vld [vmem:[%s2806_s13 + $0x550] sm:$0xff] }
  0x7b   : > { %491 = vst [vmem:[%s2811_s11 + $0x2a0] sm:$0xff] %v490_v20  ;;  %493 = vst [vmem:[%s2811_s11 + $0x2a8] sm:$0xff] %v492_v21  ;;  %v496_v23 = vld [vmem:[%s2806_s13 + $0x558] sm:$0xff]  ;;  %v498_v24 = vld [vmem:[%s2806_s13 + $0x580] sm:$0xff] }
  0x7c   : > { %495 = vst [vmem:[%s2811_s11 + $0x2b0] sm:$0xff] %v494_v22  ;;  %v500_v25 = vld [vmem:[%s2806_s13 + $0x588] sm:$0xff]  ;;  %497 = vst [vmem:[%s2811_s11 + $0x2b8] sm:$0xff] %v496_v23  ;;  %v502_v26 = vld [vmem:[%s2806_s13 + $0x590] sm:$0xff] }
  0x7d   : > { %499 = vst [vmem:[%s2811_s11 + $0x2c0] sm:$0xff] %v498_v24  ;;  %501 = vst [vmem:[%s2811_s11 + $0x2c8] sm:$0xff] %v500_v25  ;;  %v504_v27 = vld [vmem:[%s2806_s13 + $0x598] sm:$0xff]  ;;  %v506_v28 = vld [vmem:[%s2806_s13 + $0x5c0] sm:$0xff] }
  0x7e   : > { %503 = vst [vmem:[%s2811_s11 + $0x2d0] sm:$0xff] %v502_v26  ;;  %505 = vst [vmem:[%s2811_s11 + $0x2d8] sm:$0xff] %v504_v27  ;;  %v508_v29 = vld [vmem:[%s2806_s13 + $0x5c8] sm:$0xff]  ;;  %v510_v30 = vld [vmem:[%s2806_s13 + $0x5d0] sm:$0xff] }
  0x7f   : > { %507 = vst [vmem:[%s2811_s11 + $0x2e0] sm:$0xff] %v506_v28  ;;  %v512_v31 = vld [vmem:[%s2806_s13 + $0x5d8] sm:$0xff]  ;;  %509 = vst [vmem:[%s2811_s11 + $0x2e8] sm:$0xff] %v508_v29  ;;  %v514_v32 = vld [vmem:[%s2806_s13 + $0x600] sm:$0xff] }
  0x80   : > { %511 = vst [vmem:[%s2811_s11 + $0x2f0] sm:$0xff] %v510_v30  ;;  %513 = vst [vmem:[%s2811_s11 + $0x2f8] sm:$0xff] %v512_v31  ;;  %v516_v33 = vld [vmem:[%s2806_s13 + $0x608] sm:$0xff]  ;;  %v518_v34 = vld [vmem:[%s2806_s13 + $0x610] sm:$0xff] }
  0x81   : > { %515 = vst [vmem:[%s2811_s11 + $0x300] sm:$0xff] %v514_v32  ;;  %517 = vst [vmem:[%s2811_s11 + $0x308] sm:$0xff] %v516_v33  ;;  %v520_v35 = vld [vmem:[%s2806_s13 + $0x618] sm:$0xff]  ;;  %v522_v36 = vld [vmem:[%s2806_s13 + $0x640] sm:$0xff] }
  0x82   : > { %519 = vst [vmem:[%s2811_s11 + $0x310] sm:$0xff] %v518_v34  ;;  %v524_v37 = vld [vmem:[%s2806_s13 + $0x648] sm:$0xff]  ;;  %521 = vst [vmem:[%s2811_s11 + $0x318] sm:$0xff] %v520_v35  ;;  %v526_v38 = vld [vmem:[%s2806_s13 + $0x650] sm:$0xff] }
  0x83   : > { %523 = vst [vmem:[%s2811_s11 + $0x320] sm:$0xff] %v522_v36  ;;  %525 = vst [vmem:[%s2811_s11 + $0x328] sm:$0xff] %v524_v37  ;;  %v528_v39 = vld [vmem:[%s2806_s13 + $0x658] sm:$0xff]  ;;  %v530_v40 = vld [vmem:[%s2806_s13 + $0x680] sm:$0xff] }
  0x84   : > { %527 = vst [vmem:[%s2811_s11 + $0x330] sm:$0xff] %v526_v38  ;;  %529 = vst [vmem:[%s2811_s11 + $0x338] sm:$0xff] %v528_v39  ;;  %v532_v41 = vld [vmem:[%s2806_s13 + $0x688] sm:$0xff]  ;;  %v534_v42 = vld [vmem:[%s2806_s13 + $0x690] sm:$0xff] }
  0x85   : > { %531 = vst [vmem:[%s2811_s11 + $0x340] sm:$0xff] %v530_v40  ;;  %v536_v43 = vld [vmem:[%s2806_s13 + $0x698] sm:$0xff]  ;;  %533 = vst [vmem:[%s2811_s11 + $0x348] sm:$0xff] %v532_v41  ;;  %v538_v44 = vld [vmem:[%s2806_s13 + $0x6c0] sm:$0xff] }
  0x86   : > { %535 = vst [vmem:[%s2811_s11 + $0x350] sm:$0xff] %v534_v42  ;;  %537 = vst [vmem:[%s2811_s11 + $0x358] sm:$0xff] %v536_v43  ;;  %v540_v45 = vld [vmem:[%s2806_s13 + $0x6c8] sm:$0xff]  ;;  %v542_v46 = vld [vmem:[%s2806_s13 + $0x6d0] sm:$0xff] }
  0x87   : > { %539 = vst [vmem:[%s2811_s11 + $0x360] sm:$0xff] %v538_v44  ;;  %541 = vst [vmem:[%s2811_s11 + $0x368] sm:$0xff] %v540_v45  ;;  %v544_v47 = vld [vmem:[%s2806_s13 + $0x6d8] sm:$0xff]  ;;  %v546_v48 = vld [vmem:[%s2806_s13 + $0x700] sm:$0xff] }
  0x88   : > { %543 = vst [vmem:[%s2811_s11 + $0x370] sm:$0xff] %v542_v46  ;;  %v548_v49 = vld [vmem:[%s2806_s13 + $0x708] sm:$0xff]  ;;  %545 = vst [vmem:[%s2811_s11 + $0x378] sm:$0xff] %v544_v47  ;;  %v550_v50 = vld [vmem:[%s2806_s13 + $0x710] sm:$0xff] }
  0x89   : > { %547 = vst [vmem:[%s2811_s11 + $0x380] sm:$0xff] %v546_v48  ;;  %549 = vst [vmem:[%s2811_s11 + $0x388] sm:$0xff] %v548_v49  ;;  %v552_v51 = vld [vmem:[%s2806_s13 + $0x718] sm:$0xff]  ;;  %v554_v52 = vld [vmem:[%s2806_s13 + $0x740] sm:$0xff] }
  0x8a   : > { %551 = vst [vmem:[%s2811_s11 + $0x390] sm:$0xff] %v550_v50  ;;  %553 = vst [vmem:[%s2811_s11 + $0x398] sm:$0xff] %v552_v51  ;;  %v556_v53 = vld [vmem:[%s2806_s13 + $0x748] sm:$0xff]  ;;  %v558_v54 = vld [vmem:[%s2806_s13 + $0x750] sm:$0xff] }
  0x8b   : > { %555 = vst [vmem:[%s2811_s11 + $0x3a0] sm:$0xff] %v554_v52  ;;  %v560_v55 = vld [vmem:[%s2806_s13 + $0x758] sm:$0xff]  ;;  %557 = vst [vmem:[%s2811_s11 + $0x3a8] sm:$0xff] %v556_v53  ;;  %v562_v56 = vld [vmem:[%s2806_s13 + $0x780] sm:$0xff] }
  0x8c   : > { %559 = vst [vmem:[%s2811_s11 + $0x3b0] sm:$0xff] %v558_v54  ;;  %561 = vst [vmem:[%s2811_s11 + $0x3b8] sm:$0xff] %v560_v55  ;;  %v564_v57 = vld [vmem:[%s2806_s13 + $0x788] sm:$0xff]  ;;  %v566_v58 = vld [vmem:[%s2806_s13 + $0x790] sm:$0xff] }
  0x8d   : > { %563 = vst [vmem:[%s2811_s11 + $0x3c0] sm:$0xff] %v562_v56  ;;  %565 = vst [vmem:[%s2811_s11 + $0x3c8] sm:$0xff] %v564_v57  ;;  %v568_v59 = vld [vmem:[%s2806_s13 + $0x798] sm:$0xff]  ;;  %v570_v60 = vld [vmem:[%s2806_s13 + $0x7c0] sm:$0xff] }
  0x8e   : > { %567 = vst [vmem:[%s2811_s11 + $0x3d0] sm:$0xff] %v566_v58  ;;  %v572_v61 = vld [vmem:[%s2806_s13 + $0x7c8] sm:$0xff]  ;;  %569 = vst [vmem:[%s2811_s11 + $0x3d8] sm:$0xff] %v568_v59  ;;  %v574_v62 = vld [vmem:[%s2806_s13 + $0x7d0] sm:$0xff] }
  0x8f   : > { %571 = vst [vmem:[%s2811_s11 + $0x3e0] sm:$0xff] %v570_v60  ;;  %573 = vst [vmem:[%s2811_s11 + $0x3e8] sm:$0xff] %v572_v61  ;;  %v576_v63 = vld [vmem:[%s2806_s13 + $0x7d8] sm:$0xff] }
  0x90   : > { %575 = vst [vmem:[%s2811_s11 + $0x3f0] sm:$0xff] %v574_v62  ;;  %577 = vst [vmem:[%s2811_s11 + $0x3f8] sm:$0xff] %v576_v63 }
  0x91 PF: > { %p3518_p1 = scmp.ne.s32.totalorder %s3514_s16, 0 }
  0x92   : > { %s3069_s22 = sand.u32 (!%p3518_p1), 1, %s2604_s25   ;;  %p3519_p5 = scmp.ne.s32.totalorder (!%p3518_p1), %s3515_s17, 0 }
  0x93   : > { %586 = sbr.rel (%p3518_p1) target bundleno = 1340 (0x53c), region = 63  ;;  %s2190_s18 = sshll.u32 (!%p3518_p1), %s3069_s22, 10 }
  0x94   : > { %s3072_s21 = scalar_lea.vmem (!%p3518_p1), [#allocation6], %s2190_s18 }
  0x9a   : > { %2587 = dma.done.wait (%p3519_p5), [#allocation8], 32  }
  0x9b   : > { %2589 = vsyncadd (%p3519_p5), [#allocation8], 4294967264 }
  0x9c   : > { %2591 = dma.done.wait (%p3519_p5), [#allocation11], 32  }
  0x9d   : > { %2593 = vsyncadd (%p3519_p5), [#allocation11], 4294967264  ;;  %s2193_s16 = sshll.u32 %s3069_s22, 6  ;;  %p2194_p11 = scmp.ne.s32.totalorder %s2612_s27, 0 }
  0x9e   : > { %s3083_s19 = scalar_lea.vmem [#allocation12], %s2193_s16  ;;  %v681_v0 = vld [vmem:[%s3496_s0] sm:$0xff] (!%p2194_p11)  ;;  %v682_v1 = vld [vmem:[%s3496_s0 + $0x8] sm:$0xff] (!%p2194_p11)  ;;  %vm756_vm0 = vcmask (!%p2194_p11), 7168   ;;  %v2624_v22 = vmov (!%p2194_p11), -1e+30   ;;  %v722_v27 = vlaneseq (!%p2194_p11) }
  0x9f   : > { %680 = sbr.rel (%p2194_p11) target bundleno = 483 (0x1e3), region = 79  ;;  %v683_v2 = vunpack.c.l.bf16 (!%p2194_p11), %v681_v0  ;;  %v684_v3 = vunpack.c.h.bf16 (!%p2194_p11), %v681_v0  ;;  %v685_v4 = vunpack.c.l.bf16 (!%p2194_p11), %v682_v1  ;;  %v686_v5 = vunpack.c.h.bf16 (!%p2194_p11), %v682_v1  ;;  %757 = vst.msk [vmem:[#allocation3] sm:$0xff] (!%p2194_p11), %vm756_vm0, %v2624_v22  ;;  %758 = vst.msk [vmem:[#allocation3 + $0x8] sm:$0xff] (!%p2194_p11), %vm756_vm0, %v2624_v22  ;;  %v720_v34 = vld [vmem:[#allocation7] sm:$0x3] (!%p2194_p11) }
  0xa0   : > { %v2625_v23 = vmov (!%p2194_p11), 0.0   ;;  %v723_v31 = vshrl.u32 (!%p2194_p11), %v722_v27, 7  ;;  %v736_v38 = vld [vmem:[#allocation10] sm:$0x3] (!%p2194_p11) }
  0xa1   : > { %v687_v6 = vadd.f32 (!%p2194_p11), %v684_v3, %v683_v2  ;;  %v690_v7 = vadd.f32 (!%p2194_p11), %v686_v5, %v685_v4  ;;  %759 = vst.msk [vmem:[#allocation4] sm:$0xff] (!%p2194_p11), %vm756_vm0, %v2625_v23  ;;  %760 = vst.msk [vmem:[#allocation4 + $0x8] sm:$0xff] (!%p2194_p11), %vm756_vm0, %v2625_v23 }
  0xa2   : > { %761 = vst.msk [vmem:[#allocation5] sm:$0xff] (!%p2194_p11), %vm756_vm0, %v2625_v23  ;;  %762 = vst.msk [vmem:[#allocation5 + $0x8] sm:$0xff] (!%p2194_p11), %vm756_vm0, %v2625_v23  ;;  %v724_v32 = vsub.s32 (!%p2194_p11), 0, %v723_v31  ;;  %v728_v33 = vsub.s32 (!%p2194_p11), 1, %v723_v31 }
  0xa3   : > { %688 = vadd.xlane.f32.xlu0 (!%p2194_p11), %v687_v6 }
  0xa4   : > { %v725_v36 = vrot.slane (!%p2194_p11), %v720_v34, %v724_v32  ;;  %v729_v37 = vrot.slane (!%p2194_p11), %v720_v34, %v728_v33  ;;  %v741_v42 = vrot.slane (!%p2194_p11), %v736_v38, %v724_v32  ;;  %v745_v43 = vrot.slane (!%p2194_p11), %v736_v38, %v728_v33 }
  0xa7   : > { %691 = vadd.xlane.f32.xlu0 %v690_v7 }
 0x130   : > { %v689_v8 = vpop.xlane.xlu0 %688 }
 0x131   : > { %v694_v9 = vmul.f32 0.00390625, %v689_v8 }
 0x133   : > { %v696_v10 = vsub.f32 %v683_v2, %v694_v9  ;;  %v697_v11 = vsub.f32 %v684_v3, %v694_v9 }
 0x134   : > { %v692_v12 = vpop.xlane.xlu0 %691 }
 0x135   : > { %v695_v13 = vmul.f32 0.00390625, %v692_v12  ;;  %v700_v14 = vmul.f32 %v696_v10, %v696_v10  ;;  %v701_v15 = vmul.f32 %v697_v11, %v697_v11 }
 0x137   : > { %v698_v16 = vsub.f32 %v685_v4, %v695_v13  ;;  %v699_v17 = vsub.f32 %v686_v5, %v695_v13  ;;  %v704_v18 = vadd.f32 %v701_v15, %v700_v14 }
 0x139   : > { %705 = vadd.xlane.f32.xlu1 %v704_v18  ;;  %v702_v19 = vmul.f32 %v698_v16, %v698_v16  ;;  %v703_v20 = vmul.f32 %v699_v17, %v699_v17 }
 0x13b   : > { %v707_v21 = vadd.f32 %v703_v20, %v702_v19 }
 0x13d   : > { %708 = vadd.xlane.f32.xlu1 %v707_v21 }
 0x1c6   : > { %v706_v24 = vpop.xlane.xlu1 %705 }
 0x1c7   : > { %v710_v25 = vmul.f32 0.00390625, %v706_v24 }
 0x1c9   : > { %v712_v26 = vadd.f32 1e-05, %v710_v25 }
 0x1ca   : > { %v709_v28 = vpop.xlane.xlu1 %708 }
 0x1cb   : > { %2432 = vrsqrt.f32 %v712_v26  ;;  %v711_v29 = vmul.f32 0.00390625, %v709_v28 }
 0x1cd   : > { %v713_v30 = vadd.f32 1e-05, %v711_v29 }
 0x1cf   : > { %2434 = vrsqrt.f32 %v713_v30 }
 0x1d5   : > { %v2433_v35 = vpop.eup %2432 }
 0x1d6   : > { %v716_v39 = vmul.f32 %v2433_v35, %v696_v10  ;;  %v717_v40 = vmul.f32 %v2433_v35, %v697_v11 }
 0x1d8   : > { %v732_v44 = vmul.f32 %v725_v36, %v716_v39  ;;  %v733_v45 = vmul.f32 %v729_v37, %v717_v40 }
 0x1d9   : > { %v2435_v41 = vpop.eup %2434 }
 0x1da   : > { %v718_v46 = vmul.f32 %v2435_v41, %v698_v16  ;;  %v719_v47 = vmul.f32 %v2435_v41, %v699_v17  ;;  %v748_v50 = vadd.f32 %v741_v42, %v732_v44  ;;  %v749_v51 = vadd.f32 %v745_v43, %v733_v45 }
 0x1dc   : > { %v734_v48 = vmul.f32 %v725_v36, %v718_v46  ;;  %v735_v49 = vmul.f32 %v729_v37, %v719_v47 }
 0x1de   : > { %v750_v52 = vadd.f32 %v741_v42, %v734_v48  ;;  %v751_v53 = vadd.f32 %v745_v43, %v735_v49 }
 0x1e0   : > { %v752_v54 = vpack.c.bf16 %v750_v52, %v748_v50  ;;  %v753_v55 = vpack.c.bf16 %v751_v53, %v749_v51 }
 0x1e2   : > { %754 = vst [vmem:[#allocation2] sm:$0xff] %v752_v54  ;;  %755 = vst [vmem:[#allocation2 + $0x8] sm:$0xff] %v753_v55 }
 0x1e3 PF: > { %v765_v56 = vld [vmem:[%s3072_s21] sm:$0xff]  ;;  %v766_v58 = vld [vmem:[%s3072_s21 + $0x8] sm:$0xff]  ;;  %vm1842_vm1 = vcmask 7168   ;;  %s2331_s10 = sshll.u32 %s2612_s27, 10  ;;  %p2332_p4 = scmp.ne.s32.totalorder %s2612_s27, 1 }
 0x1e4   : > { %v769_v57 = vld [vmem:[%s3072_s21 + $0x20] sm:$0xff]  ;;  %v770_v60 = vld [vmem:[%s3072_s21 + $0x28] sm:$0xff] }
 0x1e5   : > { %v2196_v59 = vcombine.high %v765_v56, %v769_v57  ;;  %v2195_v61 = vcombine.low %v765_v56, %v769_v57  ;;  %v773_v62 = vld [vmem:[%s3072_s21 + $0x40] sm:$0xff]  ;;  %v2198_v0 = vcombine.high %v766_v58, %v770_v60  ;;  %v2197_v1 = vcombine.low %v766_v58, %v770_v60  ;;  %v774_v3 = vld [vmem:[%s3072_s21 + $0x48] sm:$0xff] }
 0x1e6   : > { %v777_v63 = vld [vmem:[%s3072_s21 + $0x60] sm:$0xff]  ;;  %v778_v4 = vld [vmem:[%s3072_s21 + $0x68] sm:$0xff] }
 0x1e7   : > { %v2204_v2 = vcombine.high %v773_v62, %v777_v63  ;;  %v781_v5 = vld [vmem:[%s3072_s21 + $0x80] sm:$0xff]  ;;  %1533 = vmatprep.subr.bf16.mxu0 %v2196_v59  ;;  %v2206_v6 = vcombine.high %v774_v3, %v778_v4  ;;  %v782_v8 = vld [vmem:[%s3072_s21 + $0x88] sm:$0xff]  ;;  %1576 = vmatprep.subr.bf16.mxu1 %v2198_v0  ;;  %v2203_v10 = vcombine.low %v773_v62, %v777_v63 }
 0x1e8   : > { %v785_v7 = vld [vmem:[%s3072_s21 + $0xa0] sm:$0xff]  ;;  %v786_v9 = vld [vmem:[%s3072_s21 + $0xa8] sm:$0xff]  ;;  %1534 = vmatpush1.bf16.msra.mxu0 %v2195_v61  ;;  %1577 = vmatpush1.bf16.msra.mxu1 %v2197_v1  ;;  %v2205_v11 = vcombine.low %v774_v3, %v778_v4 }
 0x1e9   : > { %1535 = vmatprep.subr.bf16.mxu0 %v2204_v2  ;;  %v2212_v12 = vcombine.high %v781_v5, %v785_v7  ;;  %1578 = vmatprep.subr.bf16.mxu1 %v2206_v6  ;;  %v2214_v13 = vcombine.high %v782_v8, %v786_v9  ;;  %v789_v14 = vld [vmem:[%s3072_s21 + $0xc0] sm:$0xff]  ;;  %v790_v16 = vld [vmem:[%s3072_s21 + $0xc8] sm:$0xff]  ;;  %v2211_v18 = vcombine.low %v781_v5, %v785_v7 }
 0x1ea   : > { %v793_v15 = vld [vmem:[%s3072_s21 + $0xe0] sm:$0xff]  ;;  %v794_v17 = vld [vmem:[%s3072_s21 + $0xe8] sm:$0xff]  ;;  %v2213_v19 = vcombine.low %v782_v8, %v786_v9 }
 0x1eb   : > { %v2220_v20 = vcombine.high %v789_v14, %v793_v15  ;;  %v2222_v21 = vcombine.high %v790_v16, %v794_v17  ;;  %v797_v22 = vld [vmem:[%s3072_s21 + $0x100] sm:$0xff]  ;;  %v798_v24 = vld [vmem:[%s3072_s21 + $0x108] sm:$0xff]  ;;  %v2219_v26 = vcombine.low %v789_v14, %v793_v15  ;;  %v2221_v27 = vcombine.low %v790_v16, %v794_v17 }
 0x1ec   : > { %1536 = vmatpush1.bf16.msra.mxu0 %v2203_v10  ;;  %1579 = vmatpush1.bf16.msra.mxu1 %v2205_v11  ;;  %v801_v23 = vld [vmem:[%s3072_s21 + $0x120] sm:$0xff]  ;;  %v802_v25 = vld [vmem:[%s3072_s21 + $0x128] sm:$0xff] }
 0x1ed   : > { %1537 = vmatprep.subr.bf16.mxu0 %v2212_v12  ;;  %1580 = vmatprep.subr.bf16.mxu1 %v2214_v13  ;;  %v2228_v28 = vcombine.high %v797_v22, %v801_v23  ;;  %v2230_v29 = vcombine.high %v798_v24, %v802_v25  ;;  %v805_v30 = vld [vmem:[%s3072_s21 + $0x140] sm:$0xff]  ;;  %v806_v32 = vld [vmem:[%s3072_s21 + $0x148] sm:$0xff]  ;;  %v2227_v34 = vcombine.low %v797_v22, %v801_v23 }
 0x1ee   : > { %v809_v31 = vld [vmem:[%s3072_s21 + $0x160] sm:$0xff]  ;;  %v810_v33 = vld [vmem:[%s3072_s21 + $0x168] sm:$0xff]  ;;  %v2229_v35 = vcombine.low %v798_v24, %v802_v25 }
 0x1ef   : > { %v2236_v36 = vcombine.high %v805_v30, %v809_v31  ;;  %v2238_v37 = vcombine.high %v806_v32, %v810_v33  ;;  %v813_v38 = vld [vmem:[%s3072_s21 + $0x180] sm:$0xff]  ;;  %v814_v40 = vld [vmem:[%s3072_s21 + $0x188] sm:$0xff]  ;;  %v2235_v42 = vcombine.low %v805_v30, %v809_v31  ;;  %v2237_v43 = vcombine.low %v806_v32, %v810_v33 }
 0x1f0   : > { %1538 = vmatpush1.bf16.msra.mxu0 %v2211_v18  ;;  %1581 = vmatpush1.bf16.msra.mxu1 %v2213_v19  ;;  %v817_v39 = vld [vmem:[%s3072_s21 + $0x1a0] sm:$0xff]  ;;  %v818_v41 = vld [vmem:[%s3072_s21 + $0x1a8] sm:$0xff] }
 0x1f1   : > { %1539 = vmatprep.subr.bf16.mxu0 %v2220_v20  ;;  %1582 = vmatprep.subr.bf16.mxu1 %v2222_v21  ;;  %v2244_v44 = vcombine.high %v813_v38, %v817_v39  ;;  %v3120_v45 = vld [vmem:[#allocation2 + $0x8] sm:$0xff]  ;;  %v2246_v46 = vcombine.high %v814_v40, %v818_v41  ;;  %v821_v47 = vld [vmem:[%s3072_s21 + $0x1c0] sm:$0xff]  ;;  %v2243_v51 = vcombine.low %v813_v38, %v817_v39 }
 0x1f2   : > { %v825_v48 = vld [vmem:[%s3072_s21 + $0x1e0] sm:$0xff]  ;;  %1565 = vmatprep.mubr.bf16.mxu0 %v3120_v45  ;;  %v822_v49 = vld [vmem:[%s3072_s21 + $0x1c8] sm:$0xff]  ;;  %1608 = vmatprep.mubr.bf16.mxu1 %v3120_v45  ;;  %v2245_v52 = vcombine.low %v814_v40, %v818_v41 }
 0x1f3   : > { %v826_v50 = vld [vmem:[%s3072_s21 + $0x1e8] sm:$0xff]  ;;  %v2252_v53 = vcombine.high %v821_v47, %v825_v48  ;;  %v829_v55 = vld [vmem:[%s3072_s21 + $0x200] sm:$0xff]  ;;  %v2251_v59 = vcombine.low %v821_v47, %v825_v48 }
 0x1f4   : > { %1540 = vmatpush1.bf16.msra.mxu0 %v2219_v26  ;;  %1583 = vmatpush1.bf16.msra.mxu1 %v2221_v27  ;;  %v2254_v54 = vcombine.high %v822_v49, %v826_v50  ;;  %v833_v56 = vld [vmem:[%s3072_s21 + $0x220] sm:$0xff]  ;;  %v830_v57 = vld [vmem:[%s3072_s21 + $0x208] sm:$0xff]  ;;  %v2253_v60 = vcombine.low %v822_v49, %v826_v50 }
 0x1f5   : > { %1541 = vmatprep.subr.bf16.mxu0 %v2228_v28  ;;  %1584 = vmatprep.subr.bf16.mxu1 %v2230_v29  ;;  %v834_v58 = vld [vmem:[%s3072_s21 + $0x228] sm:$0xff]  ;;  %v2260_v61 = vcombine.high %v829_v55, %v833_v56  ;;  %v837_v63 = vld [vmem:[%s3072_s21 + $0x240] sm:$0xff]  ;;  %v2259_v3 = vcombine.low %v829_v55, %v833_v56  ;;  %v767_v56 = vld [vmem:[%s3072_s21 + $0x10] sm:$0xff] }
 0x1f6   : > { %v2262_v62 = vcombine.high %v830_v57, %v834_v58  ;;  %v841_v0 = vld [vmem:[%s3072_s21 + $0x260] sm:$0xff]  ;;  %v838_v1 = vld [vmem:[%s3072_s21 + $0x248] sm:$0xff]  ;;  %v2261_v4 = vcombine.low %v830_v57, %v834_v58  ;;  %v771_v57 = vld [vmem:[%s3072_s21 + $0x30] sm:$0xff] }
 0x1f7   : > { %v842_v2 = vld [vmem:[%s3072_s21 + $0x268] sm:$0xff]  ;;  %v2268_v5 = vcombine.high %v837_v63, %v841_v0  ;;  %v845_v7 = vld [vmem:[%s3072_s21 + $0x280] sm:$0xff]  ;;  %v2267_v11 = vcombine.low %v837_v63, %v841_v0  ;;  %v768_v58 = vld [vmem:[%s3072_s21 + $0x18] sm:$0xff] }
 0x1f8   : > { %1542 = vmatpush1.bf16.msra.mxu0 %v2227_v34  ;;  %1585 = vmatpush1.bf16.msra.mxu1 %v2229_v35  ;;  %v2270_v6 = vcombine.high %v838_v1, %v842_v2  ;;  %v849_v8 = vld [vmem:[%s3072_s21 + $0x2a0] sm:$0xff]  ;;  %v846_v9 = vld [vmem:[%s3072_s21 + $0x288] sm:$0xff]  ;;  %v2269_v12 = vcombine.low %v838_v1, %v842_v2  ;;  %v775_v0 = vld [vmem:[%s3072_s21 + $0x50] sm:$0xff] }
 0x1f9   : > { %1543 = vmatprep.subr.bf16.mxu0 %v2236_v36  ;;  %1586 = vmatprep.subr.bf16.mxu1 %v2238_v37  ;;  %v850_v10 = vld [vmem:[%s3072_s21 + $0x2a8] sm:$0xff]  ;;  %v2276_v13 = vcombine.high %v845_v7, %v849_v8  ;;  %v853_v15 = vld [vmem:[%s3072_s21 + $0x2c0] sm:$0xff]  ;;  %v2275_v19 = vcombine.low %v845_v7, %v849_v8  ;;  %v779_v1 = vld [vmem:[%s3072_s21 + $0x70] sm:$0xff] }
 0x1fa   : > { %v2278_v14 = vcombine.high %v846_v9, %v850_v10  ;;  %v857_v16 = vld [vmem:[%s3072_s21 + $0x2e0] sm:$0xff]  ;;  %v854_v17 = vld [vmem:[%s3072_s21 + $0x2c8] sm:$0xff]  ;;  %v2277_v20 = vcombine.low %v846_v9, %v850_v10  ;;  %v776_v2 = vld [vmem:[%s3072_s21 + $0x58] sm:$0xff]  ;;  %v2208_v7 = vcombine.high %v775_v0, %v779_v1 }
 0x1fb   : > { %v858_v18 = vld [vmem:[%s3072_s21 + $0x2e8] sm:$0xff]  ;;  %v2284_v21 = vcombine.high %v853_v15, %v857_v16  ;;  %v861_v23 = vld [vmem:[%s3072_s21 + $0x300] sm:$0xff]  ;;  %v2283_v27 = vcombine.low %v853_v15, %v857_v16  ;;  %v783_v9 = vld [vmem:[%s3072_s21 + $0x90] sm:$0xff] }
 0x1fc   : > { %1544 = vmatpush1.bf16.msra.mxu0 %v2235_v42  ;;  %1587 = vmatpush1.bf16.msra.mxu1 %v2237_v43  ;;  %v2286_v22 = vcombine.high %v854_v17, %v858_v18  ;;  %v865_v24 = vld [vmem:[%s3072_s21 + $0x320] sm:$0xff]  ;;  %v862_v25 = vld [vmem:[%s3072_s21 + $0x308] sm:$0xff]  ;;  %v2285_v28 = vcombine.low %v854_v17, %v858_v18  ;;  %v787_v10 = vld [vmem:[%s3072_s21 + $0xb0] sm:$0xff] }
 0x1fd   : > { %1545 = vmatprep.subr.bf16.mxu0 %v2244_v44  ;;  %1588 = vmatprep.subr.bf16.mxu1 %v2246_v46  ;;  %v866_v26 = vld [vmem:[%s3072_s21 + $0x328] sm:$0xff]  ;;  %v2292_v29 = vcombine.high %v861_v23, %v865_v24  ;;  %v869_v31 = vld [vmem:[%s3072_s21 + $0x340] sm:$0xff]  ;;  %v2291_v35 = vcombine.low %v861_v23, %v865_v24  ;;  %v2216_v15 = vcombine.high %v783_v9, %v787_v10  ;;  %v791_v17 = vld [vmem:[%s3072_s21 + $0xd0] sm:$0xff] }
 0x1fe   : > { %v2294_v30 = vcombine.high %v862_v25, %v866_v26  ;;  %v873_v32 = vld [vmem:[%s3072_s21 + $0x360] sm:$0xff]  ;;  %v870_v33 = vld [vmem:[%s3072_s21 + $0x348] sm:$0xff]  ;;  %v2293_v36 = vcombine.low %v862_v25, %v866_v26  ;;  %v795_v18 = vld [vmem:[%s3072_s21 + $0xf0] sm:$0xff] }
 0x1ff   : > { %v874_v34 = vld [vmem:[%s3072_s21 + $0x368] sm:$0xff]  ;;  %v2300_v37 = vcombine.high %v869_v31, %v873_v32  ;;  %v877_v39 = vld [vmem:[%s3072_s21 + $0x380] sm:$0xff]  ;;  %v2299_v43 = vcombine.low %v869_v31, %v873_v32  ;;  %v2224_v23 = vcombine.high %v791_v17, %v795_v18  ;;  %v799_v25 = vld [vmem:[%s3072_s21 + $0x110] sm:$0xff] }
 0x200   : > { %1546 = vmatpush1.bf16.msra.mxu0 %v2243_v51  ;;  %1589 = vmatpush1.bf16.msra.mxu1 %v2245_v52  ;;  %v2302_v38 = vcombine.high %v870_v33, %v874_v34  ;;  %v881_v40 = vld [vmem:[%s3072_s21 + $0x3a0] sm:$0xff]  ;;  %v878_v41 = vld [vmem:[%s3072_s21 + $0x388] sm:$0xff]  ;;  %v2301_v44 = vcombine.low %v870_v33, %v874_v34  ;;  %v803_v26 = vld [vmem:[%s3072_s21 + $0x130] sm:$0xff] }
 0x201   : > { %1547 = vmatprep.subr.bf16.mxu0 %v2252_v53  ;;  %1590 = vmatprep.subr.bf16.mxu1 %v2254_v54  ;;  %v882_v42 = vld [vmem:[%s3072_s21 + $0x3a8] sm:$0xff]  ;;  %v2308_v46 = vcombine.high %v877_v39, %v881_v40  ;;  %v885_v48 = vld [vmem:[%s3072_s21 + $0x3c0] sm:$0xff]  ;;  %v2307_v52 = vcombine.low %v877_v39, %v881_v40  ;;  %v807_v32 = vld [vmem:[%s3072_s21 + $0x150] sm:$0xff] }
 0x202   : > { %v2310_v47 = vcombine.high %v878_v41, %v882_v42  ;;  %v889_v49 = vld [vmem:[%s3072_s21 + $0x3e0] sm:$0xff]  ;;  %v886_v50 = vld [vmem:[%s3072_s21 + $0x3c8] sm:$0xff]  ;;  %v2309_v53 = vcombine.low %v878_v41, %v882_v42  ;;  %v811_v33 = vld [vmem:[%s3072_s21 + $0x170] sm:$0xff] }
 0x203   : > { %v890_v51 = vld [vmem:[%s3072_s21 + $0x3e8] sm:$0xff]  ;;  %v2316_v54 = vcombine.high %v885_v48, %v889_v49  ;;  %v808_v34 = vld [vmem:[%s3072_s21 + $0x158] sm:$0xff]  ;;  %v815_v40 = vld [vmem:[%s3072_s21 + $0x190] sm:$0xff] }
 0x204   : > { %1548 = vmatpush1.bf16.msra.mxu0 %v2251_v59  ;;  %1591 = vmatpush1.bf16.msra.mxu1 %v2253_v60  ;;  %v2318_v55 = vcombine.high %v886_v50, %v890_v51  ;;  %v772_v59 = vld [vmem:[%s3072_s21 + $0x38] sm:$0xff]  ;;  %v2315_v60 = vcombine.low %v885_v48, %v889_v49  ;;  %v819_v41 = vld [vmem:[%s3072_s21 + $0x1b0] sm:$0xff] }
 0x205   : > { %1549 = vmatprep.subr.bf16.mxu0 %v2260_v61  ;;  %1592 = vmatprep.subr.bf16.mxu1 %v2262_v62  ;;  %v2317_v61 = vcombine.low %v886_v50, %v890_v51  ;;  %v2200_v62 = vcombine.high %v767_v56, %v771_v57  ;;  %v2202_v63 = vcombine.high %v768_v58, %v772_v59  ;;  %v816_v42 = vld [vmem:[%s3072_s21 + $0x198] sm:$0xff]  ;;  %v823_v49 = vld [vmem:[%s3072_s21 + $0x1d0] sm:$0xff] }
 0x206   : > { %v827_v50 = vld [vmem:[%s3072_s21 + $0x1f0] sm:$0xff]  ;;  %v824_v51 = vld [vmem:[%s3072_s21 + $0x1d8] sm:$0xff] }
 0x208   : > { %1550 = vmatpush1.bf16.msra.mxu0 %v2259_v3  ;;  %1593 = vmatpush1.bf16.msra.mxu1 %v2261_v4  ;;  %v780_v3 = vld [vmem:[%s3072_s21 + $0x78] sm:$0xff]  ;;  %v3168_v4 = vld [vmem:[#allocation2] sm:$0xff] }
 0x209   : > { %1551 = vmatprep.subr.bf16.mxu0 %v2268_v5  ;;  %1594 = vmatprep.subr.bf16.mxu1 %v2270_v6  ;;  %v2199_v5 = vcombine.low %v767_v56, %v771_v57  ;;  %v2201_v6 = vcombine.low %v768_v58, %v772_v59  ;;  %v2210_v8 = vcombine.high %v776_v2, %v780_v3  ;;  %v831_v57 = vld [vmem:[%s3072_s21 + $0x210] sm:$0xff]  ;;  %v832_v59 = vld [vmem:[%s3072_s21 + $0x218] sm:$0xff] }
 0x20a   : > { %v835_v58 = vld [vmem:[%s3072_s21 + $0x230] sm:$0xff] }
 0x20c   : > { %1552 = vmatpush1.bf16.msra.mxu0 %v2267_v11  ;;  %1595 = vmatpush1.bf16.msra.mxu1 %v2269_v12  ;;  %v784_v11 = vld [vmem:[%s3072_s21 + $0x98] sm:$0xff] }
 0x20d   : > { %1553 = vmatprep.subr.bf16.mxu0 %v2276_v13  ;;  %1596 = vmatprep.subr.bf16.mxu1 %v2278_v14  ;;  %v788_v12 = vld [vmem:[%s3072_s21 + $0xb8] sm:$0xff]  ;;  %v2207_v13 = vcombine.low %v775_v0, %v779_v1  ;;  %v2209_v14 = vcombine.low %v776_v2, %v780_v3  ;;  %v839_v1 = vld [vmem:[%s3072_s21 + $0x250] sm:$0xff] }
 0x20e   : > { %v2218_v16 = vcombine.high %v784_v11, %v788_v12  ;;  %v843_v2 = vld [vmem:[%s3072_s21 + $0x270] sm:$0xff]  ;;  %v840_v3 = vld [vmem:[%s3072_s21 + $0x258] sm:$0xff] }
 0x210   : > { %1554 = vmatpush1.bf16.msra.mxu0 %v2275_v19  ;;  %1597 = vmatpush1.bf16.msra.mxu1 %v2277_v20  ;;  %v792_v19 = vld [vmem:[%s3072_s21 + $0xd8] sm:$0xff] }
 0x211   : > { %1555 = vmatprep.subr.bf16.mxu0 %v2284_v21  ;;  %1598 = vmatprep.subr.bf16.mxu1 %v2286_v22  ;;  %v796_v20 = vld [vmem:[%s3072_s21 + $0xf8] sm:$0xff]  ;;  %v2215_v21 = vcombine.low %v783_v9, %v787_v10  ;;  %v2217_v22 = vcombine.low %v784_v11, %v788_v12  ;;  %v847_v10 = vld [vmem:[%s3072_s21 + $0x290] sm:$0xff] }
 0x212   : > { %v2226_v24 = vcombine.high %v792_v19, %v796_v20  ;;  %v851_v11 = vld [vmem:[%s3072_s21 + $0x2b0] sm:$0xff]  ;;  %v848_v12 = vld [vmem:[%s3072_s21 + $0x298] sm:$0xff] }
 0x214   : > { %1556 = vmatpush1.bf16.msra.mxu0 %v2283_v27  ;;  %1599 = vmatpush1.bf16.msra.mxu1 %v2285_v28  ;;  %v800_v27 = vld [vmem:[%s3072_s21 + $0x118] sm:$0xff] }
 0x215   : > { %1557 = vmatprep.subr.bf16.mxu0 %v2292_v29  ;;  %1600 = vmatprep.subr.bf16.mxu1 %v2294_v30  ;;  %v804_v28 = vld [vmem:[%s3072_s21 + $0x138] sm:$0xff]  ;;  %v2223_v29 = vcombine.low %v791_v17, %v795_v18  ;;  %v2232_v30 = vcombine.high %v799_v25, %v803_v26  ;;  %v855_v18 = vld [vmem:[%s3072_s21 + $0x2d0] sm:$0xff] }
 0x216   : > { %v2234_v31 = vcombine.high %v800_v27, %v804_v28 }
 0x218   : > { %1558 = vmatpush1.bf16.msra.mxu0 %v2291_v35  ;;  %1601 = vmatpush1.bf16.msra.mxu1 %v2293_v36  ;;  %v812_v35 = vld [vmem:[%s3072_s21 + $0x178] sm:$0xff]  ;;  %v2231_v36 = vcombine.low %v799_v25, %v803_v26  ;;  %v863_v26 = vld [vmem:[%s3072_s21 + $0x310] sm:$0xff] }
 0x219   : > { %1559 = vmatprep.subr.bf16.mxu0 %v2300_v37  ;;  %1602 = vmatprep.subr.bf16.mxu1 %v2302_v38  ;;  %v2233_v37 = vcombine.low %v800_v27, %v804_v28  ;;  %v2240_v38 = vcombine.high %v807_v32, %v811_v33  ;;  %v2242_v39 = vcombine.high %v808_v34, %v812_v35  ;;  %v867_v27 = vld [vmem:[%s3072_s21 + $0x330] sm:$0xff]  ;;  %v864_v28 = vld [vmem:[%s3072_s21 + $0x318] sm:$0xff] }
 0x21c   : > { %1560 = vmatpush1.bf16.msra.mxu0 %v2299_v43  ;;  %1603 = vmatpush1.bf16.msra.mxu1 %v2301_v44  ;;  %v820_v43 = vld [vmem:[%s3072_s21 + $0x1b8] sm:$0xff]  ;;  %v2239_v44 = vcombine.low %v807_v32, %v811_v33  ;;  %v871_v33 = vld [vmem:[%s3072_s21 + $0x350] sm:$0xff] }
 0x21d   : > { %1561 = vmatprep.subr.bf16.mxu0 %v2308_v46  ;;  %1604 = vmatprep.subr.bf16.mxu1 %v2310_v47  ;;  %v2241_v46 = vcombine.low %v808_v34, %v812_v35  ;;  %v2248_v47 = vcombine.high %v815_v40, %v819_v41  ;;  %v2250_v48 = vcombine.high %v816_v42, %v820_v43  ;;  %v875_v34 = vld [vmem:[%s3072_s21 + $0x370] sm:$0xff]  ;;  %v872_v35 = vld [vmem:[%s3072_s21 + $0x358] sm:$0xff] }
 0x220   : > { %1562 = vmatpush1.bf16.msra.mxu0 %v2307_v52  ;;  %1605 = vmatpush1.bf16.msra.mxu1 %v2309_v53  ;;  %v828_v52 = vld [vmem:[%s3072_s21 + $0x1f8] sm:$0xff]  ;;  %v2247_v53 = vcombine.low %v815_v40, %v819_v41  ;;  %v879_v41 = vld [vmem:[%s3072_s21 + $0x390] sm:$0xff] }
 0x221   : > { %1563 = vmatprep.subr.bf16.mxu0 %v2316_v54  ;;  %1606 = vmatprep.subr.bf16.mxu1 %v2318_v55  ;;  %v2249_v54 = vcombine.low %v816_v42, %v820_v43  ;;  %v2256_v55 = vcombine.high %v823_v49, %v827_v50  ;;  %v2258_v56 = vcombine.high %v824_v51, %v828_v52  ;;  %v883_v42 = vld [vmem:[%s3072_s21 + $0x3b0] sm:$0xff]  ;;  %v880_v43 = vld [vmem:[%s3072_s21 + $0x398] sm:$0xff] }
 0x224   : > { %1564 = vmatpush1.bf16.msra.mxu0 %v2315_v60  ;;  %1607 = vmatpush1.bf16.msra.mxu1 %v2317_v61  ;;  %v836_v60 = vld [vmem:[%s3072_s21 + $0x238] sm:$0xff]  ;;  %v2255_v61 = vcombine.low %v823_v49, %v827_v50  ;;  %v887_v50 = vld [vmem:[%s3072_s21 + $0x3d0] sm:$0xff] }
 0x225   : > { %1619 = vmatprep.subr.bf16.mxu0 %v2200_v62  ;;  %1662 = vmatprep.subr.bf16.mxu1 %v2202_v63  ;;  %v2257_v62 = vcombine.low %v824_v51, %v828_v52  ;;  %v2264_v63 = vcombine.high %v831_v57, %v835_v58  ;;  %v2266_v0 = vcombine.high %v832_v59, %v836_v60  ;;  %v891_v51 = vld [vmem:[%s3072_s21 + $0x3f0] sm:$0xff]  ;;  %v888_v52 = vld [vmem:[%s3072_s21 + $0x3d8] sm:$0xff] }
 0x227   : > { %1566 = vmatmul.mubr.bf16.vlgmr.msra.gmra.mrb[0].mxu0 %v3168_v4  ;;  %1609 = vmatmul.mubr.bf16.vlgmr.msra.gmra.mrb[0].mxu1 %v3168_v4 }
 0x228   : > { %1620 = vmatpush1.bf16.msra.mxu0 %v2199_v5  ;;  %1663 = vmatpush1.bf16.msra.mxu1 %v2201_v6  ;;  %v844_v5 = vld [vmem:[%s3072_s21 + $0x278] sm:$0xff]  ;;  %v2263_v6 = vcombine.low %v831_v57, %v835_v58  ;;  %v2319_v58 = vcombine.low %v887_v50, %v891_v51 }
 0x229   : > { %1621 = vmatprep.subr.bf16.mxu0 %v2208_v7  ;;  %1664 = vmatprep.subr.bf16.mxu1 %v2210_v8  ;;  %v2265_v7 = vcombine.low %v832_v59, %v836_v60  ;;  %v2272_v8 = vcombine.high %v839_v1, %v843_v2  ;;  %v2274_v9 = vcombine.high %v840_v3, %v844_v5  ;;  %v2626_v60 = vmov 0  }
 0x22a   : > { %1651 = vmatprep.mubr.bf16.mxu0 %v3120_v45  ;;  %1694 = vmatprep.mubr.bf16.mxu1 %v3120_v45  ;;  %v2225_v45 = vcombine.low %v792_v19, %v796_v20  ;;  %v859_v19 = vld [vmem:[%s3072_s21 + $0x2f0] sm:$0xff]  ;;  %v856_v20 = vld [vmem:[%s3072_s21 + $0x2d8] sm:$0xff] }
 0x22b   : > { %2437 = vset.pattern.permute.xlu0 %v2626_v60  ;;  %2436 = vset.pattern.permute.xlu1 %v2626_v60 }
 0x22c   : > { %1622 = vmatpush1.bf16.msra.mxu0 %v2207_v13  ;;  %1665 = vmatpush1.bf16.msra.mxu1 %v2209_v14  ;;  %v852_v13 = vld [vmem:[%s3072_s21 + $0x2b8] sm:$0xff]  ;;  %v2271_v14 = vcombine.low %v839_v1, %v843_v2 }
 0x22d   : > { %1623 = vmatprep.subr.bf16.mxu0 %v2216_v15  ;;  %1666 = vmatprep.subr.bf16.mxu1 %v2218_v16  ;;  %v2273_v15 = vcombine.low %v840_v3, %v844_v5  ;;  %v2280_v16 = vcombine.high %v847_v10, %v851_v11  ;;  %v2282_v17 = vcombine.high %v848_v12, %v852_v13 }
 0x230   : > { %1624 = vmatpush1.bf16.msra.mxu0 %v2215_v21  ;;  %1667 = vmatpush1.bf16.msra.mxu1 %v2217_v22  ;;  %v860_v21 = vld [vmem:[%s3072_s21 + $0x2f8] sm:$0xff]  ;;  %v2279_v22 = vcombine.low %v847_v10, %v851_v11 }
 0x231   : > { %1625 = vmatprep.subr.bf16.mxu0 %v2224_v23  ;;  %1668 = vmatprep.subr.bf16.mxu1 %v2226_v24  ;;  %v2281_v23 = vcombine.low %v848_v12, %v852_v13  ;;  %v2288_v24 = vcombine.high %v855_v18, %v859_v19  ;;  %v2290_v25 = vcombine.high %v856_v20, %v860_v21 }
 0x234   : > { %1626 = vmatpush1.bf16.msra.mxu0 %v2223_v29  ;;  %1669 = vmatpush1.bf16.msra.mxu1 %v2225_v45  ;;  %v868_v29 = vld [vmem:[%s3072_s21 + $0x338] sm:$0xff]  ;;  %v2287_v45 = vcombine.low %v855_v18, %v859_v19 }
 0x235   : > { %1627 = vmatprep.subr.bf16.mxu0 %v2232_v30  ;;  %1670 = vmatprep.subr.bf16.mxu1 %v2234_v31  ;;  %v2289_v30 = vcombine.low %v856_v20, %v860_v21  ;;  %v2296_v31 = vcombine.high %v863_v26, %v867_v27  ;;  %v2298_v32 = vcombine.high %v864_v28, %v868_v29 }
 0x238   : > { %1628 = vmatpush1.bf16.msra.mxu0 %v2231_v36  ;;  %1671 = vmatpush1.bf16.msra.mxu1 %v2233_v37  ;;  %v876_v36 = vld [vmem:[%s3072_s21 + $0x378] sm:$0xff]  ;;  %v2295_v37 = vcombine.low %v863_v26, %v867_v27 }
 0x239   : > { %1629 = vmatprep.subr.bf16.mxu0 %v2240_v38  ;;  %1672 = vmatprep.subr.bf16.mxu1 %v2242_v39  ;;  %v2297_v38 = vcombine.low %v864_v28, %v868_v29  ;;  %v2304_v39 = vcombine.high %v871_v33, %v875_v34  ;;  %v2306_v40 = vcombine.high %v872_v35, %v876_v36 }
 0x23c   : > { %1630 = vmatpush1.bf16.msra.mxu0 %v2239_v44  ;;  %1673 = vmatpush1.bf16.msra.mxu1 %v2241_v46  ;;  %v884_v44 = vld [vmem:[%s3072_s21 + $0x3b8] sm:$0xff]  ;;  %v2303_v46 = vcombine.low %v871_v33, %v875_v34  ;;  %v1782_v34 = vld [vmem:[%s3500_s4] sm:$0xff] }
 0x23d   : > { %1631 = vmatprep.subr.bf16.mxu0 %v2248_v47  ;;  %1674 = vmatprep.subr.bf16.mxu1 %v2250_v48  ;;  %v2305_v47 = vcombine.low %v872_v35, %v876_v36  ;;  %v2312_v48 = vcombine.high %v879_v41, %v883_v42  ;;  %v2314_v49 = vcombine.high %v880_v43, %v884_v44  ;;  %v1762_v35 = vlaneseq  ;;  %v3307_v36 = vld [vmem:[#allocation3] sm:$0xff] }
 0x240   : > { %1632 = vmatpush1.bf16.msra.mxu0 %v2247_v53  ;;  %1675 = vmatpush1.bf16.msra.mxu1 %v2249_v54  ;;  %v892_v53 = vld [vmem:[%s3072_s21 + $0x3f8] sm:$0xff]  ;;  %v2311_v54 = vcombine.low %v879_v41, %v883_v42 }
 0x241   : > { %1633 = vmatprep.subr.bf16.mxu0 %v2256_v55  ;;  %1676 = vmatprep.subr.bf16.mxu1 %v2258_v56  ;;  %v2313_v55 = vcombine.low %v880_v43, %v884_v44  ;;  %v2320_v56 = vcombine.high %v887_v50, %v891_v51  ;;  %v2322_v57 = vcombine.high %v888_v52, %v892_v53 }
 0x242   : > { %v2321_v59 = vcombine.low %v888_v52, %v892_v53 }
 0x244   : > { %1634 = vmatpush1.bf16.msra.mxu0 %v2255_v61  ;;  %1677 = vmatpush1.bf16.msra.mxu1 %v2257_v62 }
 0x245   : > { %1635 = vmatprep.subr.bf16.mxu0 %v2264_v63  ;;  %1678 = vmatprep.subr.bf16.mxu1 %v2266_v0 }
 0x248   : > { %1636 = vmatpush1.bf16.msra.mxu0 %v2263_v6  ;;  %1679 = vmatpush1.bf16.msra.mxu1 %v2265_v7 }
 0x249   : > { %1637 = vmatprep.subr.bf16.mxu0 %v2272_v8  ;;  %1680 = vmatprep.subr.bf16.mxu1 %v2274_v9 }
 0x24c   : > { %1638 = vmatpush1.bf16.msra.mxu0 %v2271_v14  ;;  %1681 = vmatpush1.bf16.msra.mxu1 %v2273_v15 }
 0x24d   : > { %1639 = vmatprep.subr.bf16.mxu0 %v2280_v16  ;;  %1682 = vmatprep.subr.bf16.mxu1 %v2282_v17 }
 0x250   : > { %1640 = vmatpush1.bf16.msra.mxu0 %v2279_v22  ;;  %1683 = vmatpush1.bf16.msra.mxu1 %v2281_v23 }
 0x251   : > { %1641 = vmatprep.subr.bf16.mxu0 %v2288_v24  ;;  %1684 = vmatprep.subr.bf16.mxu1 %v2290_v25 }
 0x254   : > { %1642 = vmatpush1.bf16.msra.mxu0 %v2287_v45  ;;  %1685 = vmatpush1.bf16.msra.mxu1 %v2289_v30 }
 0x255   : > { %1643 = vmatprep.subr.bf16.mxu0 %v2296_v31  ;;  %1686 = vmatprep.subr.bf16.mxu1 %v2298_v32 }
 0x258   : > { %1644 = vmatpush1.bf16.msra.mxu0 %v2295_v37  ;;  %1687 = vmatpush1.bf16.msra.mxu1 %v2297_v38 }
 0x259   : > { %1645 = vmatprep.subr.bf16.mxu0 %v2304_v39  ;;  %1688 = vmatprep.subr.bf16.mxu1 %v2306_v40  ;;  %v1763_v39 = vand.u32 127, %v1762_v35  ;;  %v3312_v40 = vld [vmem:[#allocation3 + $0x8] sm:$0xff] }
 0x25b   : > { %v1764_v44 = vadd.s32 128, %v1763_v39  ;;  %v1766_v50 = vadd.s32 384, %v1763_v39  ;;  %v1767_v53 = vadd.s32 512, %v1763_v39 }
 0x25c   : > { %1646 = vmatpush1.bf16.msra.mxu0 %v2303_v46  ;;  %1689 = vmatpush1.bf16.msra.mxu1 %v2305_v47  ;;  %v1771_v46 = vstv %s2331_s10 }
 0x25d   : > { %1647 = vmatprep.subr.bf16.mxu0 %v2312_v48  ;;  %1690 = vmatprep.subr.bf16.mxu1 %v2314_v49  ;;  %v1765_v48 = vadd.s32 256, %v1763_v39  ;;  %v1783_v49 = vld [vmem:[%s3500_s4 + $0x8] sm:$0xff]  ;;  %v3331_v51 = vadd.s32 %v1771_v46, %v1763_v39  ;;  %v3333_v52 = vadd.s32 %v1771_v46, %v1764_v44 }
 0x260   : > { %1648 = vmatpush1.bf16.msra.mxu0 %v2311_v54  ;;  %1691 = vmatpush1.bf16.msra.mxu1 %v2313_v55  ;;  %v3335_v54 = vadd.s32 %v1771_v46, %v1765_v48 }
 0x261   : > { %1649 = vmatprep.subr.bf16.mxu0 %v2320_v56  ;;  %1692 = vmatprep.subr.bf16.mxu1 %v2322_v57  ;;  %v1768_v56 = vadd.s32 640, %v1763_v39  ;;  %v3337_v57 = vadd.s32 %v1771_v46, %v1766_v50 }
 0x264   : > { %1650 = vmatpush1.bf16.msra.mxu0 %v2319_v58  ;;  %1693 = vmatpush1.bf16.msra.mxu1 %v2321_v59  ;;  %v1769_v58 = vadd.s32 768, %v1763_v39  ;;  %v3341_v59 = vadd.s32 %v1771_v46, %v1767_v53 }
 0x267   : > { %1652 = vmatmul.mubr.bf16.vlgmr.msra.gmra.mrb[4].mxu0 %v3168_v4  ;;  %1695 = vmatmul.mubr.bf16.vlgmr.msra.gmra.mrb[4].mxu1 %v3168_v4 }
 0x2fa   : > { %v3232_v61 = vpop.f32.mrb[0].mxu0  ;;  %v3234_v62 = vpop.f32.mrb[0].mxu1 }
 0x2fb   : > { %v3236_v63 = vpop.f32.mrb[1].mxu0  ;;  %v1847_v0 = vmax.f32 %v3232_v61, %v3234_v62  ;;  %v3242_v2 = vpop.f32.mrb[1].mxu1 }
 0x2fc   : > { %v2341_v1 = vpack.c.bf16 %v3236_v63, %v3232_v61  ;;  %v3244_v4 = vpop.f32.mrb[2].mxu0  ;;  %v2342_v3 = vpack.c.bf16 %v3242_v2, %v3234_v62  ;;  %v1848_v5 = vmax.f32 %v3236_v63, %v3242_v2  ;;  %v3250_v6 = vpop.f32.mrb[2].mxu1 }
 0x2fd   : > { %v3252_v7 = vpop.f32.mrb[3].mxu0  ;;  %v1856_v8 = vmax.f32 %v3244_v4, %v3250_v6  ;;  %v3259_v10 = vpop.f32.mrb[3].mxu1 }
 0x2fe   : > { %1753 = vst [vmem:[%s3083_s19] sm:$0xff] %v2341_v1  ;;  %v2345_v9 = vpack.c.bf16 %v3252_v7, %v3244_v4  ;;  %1754 = vst [vmem:[%s3083_s19 + $0x8] sm:$0xff] %v2342_v3  ;;  %v2346_v11 = vpack.c.bf16 %v3259_v10, %v3250_v6  ;;  %v1857_v12 = vmax.f32 %v3252_v7, %v3259_v10  ;;  %v1770_v1 = vadd.s32 896, %v1763_v39 }
 0x2ff   : > { %v3346_v3 = vadd.s32 %v1771_v46, %v1768_v56 }
 0x300   : > { %1757 = vst [vmem:[%s3083_s19 + $0x20] sm:$0xff] %v2345_v9  ;;  %1758 = vst [vmem:[%s3083_s19 + $0x28] sm:$0xff] %v2346_v11  ;;  %v3350_v9 = vadd.s32 %v1771_v46, %v1769_v58 }
 0x33a   : > { %v3268_v13 = vpop.f32.mrb[4].mxu0  ;;  %v3270_v14 = vpop.f32.mrb[4].mxu1 }
 0x33b   : > { %v3272_v15 = vpop.f32.mrb[5].mxu0  ;;  %v1849_v16 = vmax.f32 %v1847_v0, %v3268_v13  ;;  %v3277_v18 = vpop.f32.mrb[5].mxu1 }
 0x33c   : > { %v2343_v17 = vpack.c.bf16 %v3272_v15, %v3268_v13  ;;  %v3279_v19 = vpop.f32.mrb[6].mxu0  ;;  %v1850_v20 = vmax.f32 %v1848_v5, %v3272_v15  ;;  %v2344_v21 = vpack.c.bf16 %v3277_v18, %v3270_v14  ;;  %v3284_v22 = vpop.f32.mrb[6].mxu1 }
 0x33d   : > { %v3286_v23 = vpop.f32.mrb[7].mxu0  ;;  %v1851_v24 = vmax.f32 %v1849_v16, %v3270_v14  ;;  %v1858_v25 = vmax.f32 %v1856_v8, %v3279_v19  ;;  %v3294_v28 = vpop.f32.mrb[7].mxu1  ;;  %v3354_v16 = vadd.s32 %v1771_v46, %v1770_v1 }
 0x33e   : > { %1755 = vst [vmem:[%s3083_s19 + $0x10] sm:$0xff] %v2343_v17  ;;  %v2347_v26 = vpack.c.bf16 %v3286_v23, %v3279_v19  ;;  %v1859_v27 = vmax.f32 %v1857_v12, %v3286_v23  ;;  %v1852_v29 = vmax.f32 %v1850_v20, %v3277_v18  ;;  %1756 = vst [vmem:[%s3083_s19 + $0x18] sm:$0xff] %v2344_v21 }
 0x33f   : > { %v2348_v45 = vpack.c.bf16 %v3294_v28, %v3284_v22  ;;  %v1860_v30 = vmax.f32 %v1858_v25, %v3284_v22 }
 0x340   : > { %1759 = vst [vmem:[%s3083_s19 + $0x30] sm:$0xff] %v2347_v26  ;;  %v1853_v31 = vmax.f32 %v1851_v24, %v1852_v29  ;;  %v1861_v32 = vmax.f32 %v1859_v27, %v3294_v28 }
 0x341   : > { %1760 = vst [vmem:[%s3083_s19 + $0x38] sm:$0xff] %v2348_v45 }
 0x342   : > { %1854 = vmax.xlane.f32.xlu0 %v1853_v31  ;;  %v1862_v33 = vmax.f32 %v1860_v30, %v1861_v32 }
 0x346   : > { %1863 = vmax.xlane.f32.xlu0 %v1862_v33 }
 0x35c   : > { %1785 = vperm.xlu0 %2437, %v1782_v34  }
 0x3cf   : > { %v1855_v37 = vpop.xlane.xlu0 %1854 }
 0x3d0   : > { %v3310_v38 = vmax.f32 %v3307_v36, %v1855_v37 }
 0x3d2   : > { %v1869_v41 = vsub.f32 %v3307_v36, %v3310_v38  ;;  %1957 = vst.msk [vmem:[#allocation3] sm:$0xff] %vm1842_vm1, %v3310_v38  ;;  %1879 = vperm.xlu1 %2436, %v3310_v38  }
 0x3d3   : > { %v1864_v42 = vpop.xlane.xlu0 %1863 }
 0x3d4   : > { %v3321_v43 = vmax.f32 %v3312_v40, %v1864_v42 }
 0x3d6   : > { %v1870_v47 = vsub.f32 %v3312_v40, %v3321_v43  ;;  %1958 = vst.msk [vmem:[#allocation3 + $0x8] sm:$0xff] %vm1842_vm1, %v3321_v43  ;;  %1884 = vperm.xlu1 %2436, %v3321_v43  }
 0x3da   : > { %1788 = vperm.xlu1 %2436, %v1783_v49  }
 0x3db   : > { %v1786_v55 = vpop.permute.xlu0 %1785 }
 0x3dc   : > { %vm1790_vm2 = vcmp.eq.s32.totalorder %v3331_v51, %v1786_v55  ;;  %vm1791_vm3 = vcmp.eq.s32.totalorder %v3333_v52, %v1786_v55  ;;  %vm1792_vm4 = vcmp.eq.s32.totalorder %v3335_v54, %v1786_v55  ;;  %vm1793_vm5 = vcmp.eq.s32.totalorder %v3337_v57, %v1786_v55 }
 0x3dd   : > { %v1806_v60 = vsel %vm1790_vm2, %v3232_v61, 0.0  ;;  %v1807_v0 = vsel %vm1791_vm3, %v3236_v63, 0.0  ;;  %v1808_v8 = vsel %vm1792_vm4, %v3234_v62, 0.0  ;;  %vm1794_vm6 = vcmp.eq.s32.totalorder %v3341_v59, %v1786_v55 }
 0x3de   : > { %v1822_v5 = vadd.f32 %v1807_v0, %v1806_v60  ;;  %v1809_v12 = vsel %vm1793_vm5, %v3242_v2, 0.0  ;;  %vm1795_vm7 = vcmp.eq.s32.totalorder %v3346_v3, %v1786_v55  ;;  %v1810_v20 = vsel %vm1794_vm6, %v3268_v13, 0.0 }
 0x3df   : > { %vm1796_vm8 = vcmp.eq.s32.totalorder %v3350_v9, %v1786_v55  ;;  %v1811_v24 = vsel %vm1795_vm7, %v3272_v15, 0.0  ;;  %vm1797_vm9 = vcmp.eq.s32.totalorder %v3354_v16, %v1786_v55 }
 0x3e0   : > { %v1823_v11 = vadd.f32 %v1822_v5, %v1808_v8  ;;  %v1812_v26 = vsel %vm1796_vm8, %v3270_v14, 0.0  ;;  %v1813_v29 = vsel %vm1797_vm9, %v3277_v18, 0.0 }
 0x3e2   : > { %v1824_v17 = vadd.f32 %v1823_v11, %v1809_v12 }
 0x3e4   : > { %v1825_v21 = vadd.f32 %v1824_v17, %v1810_v20 }
 0x3e6   : > { %v1826_v25 = vadd.f32 %v1825_v21, %v1811_v24 }
 0x3e8   : > { %v1827_v27 = vadd.f32 %v1826_v25, %v1812_v26 }
 0x3ea   : > { %v1828_v45 = vadd.f32 %v1827_v27, %v1813_v29 }
 0x3fe   : > { %1829 = vadd.xlane.f32.xlu1 %v1828_v45 }
 0x451   : > { %v1880_v30 = vpop.permute.xlu1 %1879 }
 0x452   : > { %v1887_v31 = vsub.f32 %v3232_v61, %v1880_v30  ;;  %v1888_v32 = vsub.f32 %v3236_v63, %v1880_v30  ;;  %v1889_v33 = vsub.f32 %v3234_v62, %v1880_v30  ;;  %v1890_v34 = vsub.f32 %v3242_v2, %v1880_v30 }
 0x453   : > { %v1891_v62 = vsub.f32 %v3268_v13, %v1880_v30  ;;  %v1892_v53 = vsub.f32 %v3272_v15, %v1880_v30  ;;  %v1893_v55 = vsub.f32 %v3270_v14, %v1880_v30  ;;  %v1894_v58 = vsub.f32 %v3277_v18, %v1880_v30 }
 0x454   : > { %v1903_v35 = vmul.f32 1.442695, %v1887_v31  ;;  %v1905_v37 = vmul.f32 1.442695, %v1888_v32  ;;  %v1907_v39 = vmul.f32 1.442695, %v1889_v33 }
 0x455   : > { %v1909_v42 = vmul.f32 1.442695, %v1890_v34  ;;  %v3367_v44 = vpop.permute.xlu1 %1884  ;;  %v1911_v56 = vmul.f32 1.442695, %v1891_v62  ;;  %v1913_v60 = vmul.f32 1.442695, %v1892_v53 }
 0x456   : > { %2438 = vpow2.f32 %v1903_v35  ;;  %v1895_v46 = vsub.f32 %v3244_v4, %v3367_v44  ;;  %v1896_v48 = vsub.f32 %v3252_v7, %v3367_v44  ;;  %v1897_v61 = vsub.f32 %v3250_v6, %v3367_v44 }
 0x457   : > { %2440 = vpow2.f32 %v1905_v37  ;;  %v1898_v13 = vsub.f32 %v3259_v10, %v3367_v44  ;;  %v1915_v0 = vmul.f32 1.442695, %v1893_v55  ;;  %v1902_v24 = vsub.f32 %v3294_v28, %v3367_v44 }
 0x458   : > { %2442 = vpow2.f32 %v1907_v39  ;;  %v1919_v63 = vmul.f32 1.442695, %v1895_v46  ;;  %v1921_v2 = vmul.f32 1.442695, %v1896_v48  ;;  %v1923_v49 = vmul.f32 1.442695, %v1897_v61 }
 0x459   : > { %v3376_v50 = vpop.permute.xlu1 %1788  ;;  %2444 = vpow2.f32 %v1909_v42  ;;  %v1925_v1 = vmul.f32 1.442695, %v1898_v13  ;;  %v1933_v34 = vmul.f32 1.442695, %v1902_v24 }
 0x45a   : > { %2446 = vpow2.f32 %v1919_v63  ;;  %vm1798_vm10 = vcmp.eq.s32.totalorder %v3331_v51, %v3376_v50  ;;  %vm1799_vm11 = vcmp.eq.s32.totalorder %v3333_v52, %v3376_v50  ;;  %vm1800_vm12 = vcmp.eq.s32.totalorder %v3335_v54, %v3376_v50 }
 0x45b   : > { %2448 = vpow2.f32 %v1921_v2  ;;  %v1814_v15 = vsel %vm1798_vm10, %v3244_v4, 0.0  ;;  %v1815_v51 = vsel %vm1799_vm11, %v3252_v7, 0.0  ;;  %v1899_v52 = vsub.f32 %v3279_v19, %v3367_v44 }
 0x45c   : > { %2450 = vpow2.f32 %v1923_v49  ;;  %vm1801_vm13 = vcmp.eq.s32.totalorder %v3337_v57, %v3376_v50  ;;  %v1831_v14 = vadd.f32 %v1815_v51, %v1814_v15  ;;  %v1816_v5 = vsel %vm1800_vm12, %v3250_v6, 0.0  ;;  %v1780_v15 = vld [vmem:[#allocation5] sm:$0xff] }
 0x45d   : > { %2452 = vpow2.f32 %v1911_v56  ;;  %v1900_v4 = vsub.f32 %v3286_v23, %v3367_v44  ;;  %vm1802_vm14 = vcmp.eq.s32.totalorder %v3341_v59, %v3376_v50  ;;  %v1917_v54 = vmul.f32 1.442695, %v1894_v58 }
 0x45e   : > { %v1832_v7 = vadd.f32 %v1831_v14, %v1816_v5  ;;  %v1817_v11 = vsel %vm1801_vm13, %v3259_v10, 0.0  ;;  %2454 = vpow2.f32 %v1913_v60  ;;  %v1901_v57 = vsub.f32 %v3284_v22, %v3367_v44  ;;  %v1781_v14 = vld [vmem:[#allocation5 + $0x8] sm:$0xff] }
 0x45f   : > { %v1927_v12 = vmul.f32 1.442695, %v1899_v52  ;;  %vm1803_vm15 = vcmp.eq.s32.totalorder %v3346_v3, %v3376_v50  ;;  %2456 = vpow2.f32 %v1915_v0  ;;  %v1818_v59 = vsel %vm1802_vm14, %v3279_v19, 0.0 }
 0x460   : > { %v2439_v18 = vpop.eup %2438  ;;  %v1833_v6 = vadd.f32 %v1832_v7, %v1817_v11  ;;  %2458 = vpow2.f32 %v1925_v1  ;;  %v1929_v10 = vmul.f32 1.442695, %v1900_v4  ;;  %vm1804_vm0 = vcmp.eq.s32.totalorder %v3350_v9, %v3376_v50  ;;  %v1867_v4 = vld [vmem:[#allocation4] sm:$0xff]  ;;  %v1868_v11 = vld [vmem:[#allocation4 + $0x8] sm:$0xff] }
 0x461   : > { %v2441_v8 = vpop.eup %2440  ;;  %2460 = vpow2.f32 %v1917_v54  ;;  %v1819_v3 = vsel %vm1803_vm15, %v3286_v23, 0.0  ;;  %v1931_v45 = vmul.f32 1.442695, %v1901_v57  ;;  %vm1805_vm2 = vcmp.eq.s32.totalorder %v3354_v16, %v3376_v50  ;;  %v1963_v57 = vld [vmem:[#allocation3] sm:$0xff] (!%p2332_p4) }
 0x462   : > { %v2443_v17 = vpop.eup %2442  ;;  %v1935_v20 = vadd.f32 %v2441_v8, %v2439_v18  ;;  %v1834_v26 = vadd.f32 %v1833_v6, %v1818_v59  ;;  %2462 = vpow2.f32 %v1927_v12  ;;  %v1820_v33 = vsel %vm1804_vm0, %v3284_v22, 0.0  ;;  %v1964_v6 = vld [vmem:[#allocation3 + $0x8] sm:$0xff] (!%p2332_p4) }
 0x463   : > { %v2445_v21 = vpop.eup %2444  ;;  %2464 = vpow2.f32 %v1929_v10  ;;  %v1821_v39 = vsel %vm1805_vm2, %v3294_v28, 0.0  ;;  %v1871_v60 = vmul.f32 1.442695, %v1869_v41  ;;  %v1873_v52 = vmul.f32 1.442695, %v1870_v47  ;;  %v1977_v10 = vld [vmem:[%s3501_s5] sm:$0xff] (!%p2332_p4) }
 0x464   : > { %v2447_v25 = vpop.eup %2446  ;;  %v1936_v27 = vadd.f32 %v2443_v17, %v1935_v20  ;;  %v1835_v19 = vadd.f32 %v1834_v26, %v1819_v3  ;;  %2466 = vpow2.f32 %v1931_v45 }
 0x465   : > { %v2449_v29 = vpop.eup %2448  ;;  %2468 = vpow2.f32 %v1933_v34 }
 0x466   : > { %v1937_v30 = vadd.f32 %v2445_v21, %v1936_v27  ;;  %v1944_v31 = vadd.f32 %v2449_v29, %v2447_v25  ;;  %v2451_v32 = vpop.eup %2450  ;;  %v1836_v9 = vadd.f32 %v1835_v19, %v1820_v33  ;;  %2470 = vpow2.f32 %v1871_v60  ;;  %v1978_v27 = vld [vmem:[%s3501_s5 + $0x8] sm:$0xff] (!%p2332_p4) }
 0x467   : > { %v2453_v37 = vpop.eup %2452  ;;  %2472 = vpow2.f32 %v1873_v52 }
 0x468   : > { %v1945_v35 = vadd.f32 %v2451_v32, %v1944_v31  ;;  %v1837_v23 = vadd.f32 %v1836_v9, %v1821_v39  ;;  %v1938_v42 = vadd.f32 %v2453_v37, %v1937_v30  ;;  %v2455_v44 = vpop.eup %2454 }
 0x469   : > { %v2457_v46 = vpop.eup %2456 }
 0x46a   : > { %1838 = vadd.xlane.f32.xlu1 %v1837_v23  ;;  %v1939_v16 = vadd.f32 %v2455_v44, %v1938_v42  ;;  %v2459_v48 = vpop.eup %2458 }
 0x46b   : > { %v2461_v61 = vpop.eup %2460  ;;  %v1946_v63 = vadd.f32 %v2459_v48, %v1945_v35 }
 0x46c   : > { %v1940_v62 = vadd.f32 %v2457_v46, %v1939_v16  ;;  %v2463_v22 = vpop.eup %2462 }
 0x46d   : > { %v1947_v49 = vadd.f32 %v2463_v22, %v1946_v63  ;;  %v2465_v50 = vpop.eup %2464 }
 0x46e   : > { %v1941_v2 = vadd.f32 %v2461_v61, %v1940_v62  ;;  %v2467_v55 = vpop.eup %2466 }
 0x46f   : > { %v1948_v53 = vadd.f32 %v2465_v50, %v1947_v49  ;;  %v2469_v13 = vpop.eup %2468 }
 0x470   : > { %1942 = vadd.xlane.f32.xlu0 %v1941_v2  ;;  %v2471_v5 = vpop.eup %2470 }
 0x471   : > { %v1949_v28 = vadd.f32 %v2467_v55, %v1948_v53  ;;  %v1875_v18 = vmul.f32 %v2471_v5, %v1867_v4  ;;  %v2473_v8 = vpop.eup %2472 }
 0x472   : > { %v1876_v36 = vmul.f32 %v2473_v8, %v1868_v11 }
 0x473   : > { %v1950_v56 = vadd.f32 %v2469_v13, %v1949_v28 }
 0x475   : > { %1951 = vadd.xlane.f32.xlu1 %v1950_v56 }
 0x48b   : > { %v1830_v58 = vpop.xlane.xlu1 %1829 }
 0x48c   : > { %v1840_v51 = vadd.f32 %v1830_v58, %v1780_v15 }
 0x48e   : > { %1843 = vst.msk [vmem:[#allocation5] sm:$0xff] %vm1842_vm1, %v1840_v51 }
 0x495   : > { %v1973_v20 = vld [vmem:[#allocation5] sm:$0xff] (!%p2332_p4) }
 0x4f7   : > { %v1839_v0 = vpop.xlane.xlu1 %1838 }
 0x4f8   : > { %v1841_v1 = vadd.f32 %v1839_v0, %v1781_v14 }
 0x4fa   : > { %1844 = vst.msk [vmem:[#allocation5 + $0x8] sm:$0xff] %vm1842_vm1, %v1841_v1 }
 0x4fd   : > { %v1943_v7 = vpop.xlane.xlu0 %1942 }
 0x4fe   : > { %v1953_v54 = vadd.f32 %v1943_v7, %v1875_v18 }
 0x4ff   : > { %1962 = sbr.rel (%p2332_p4) target bundleno = 1313 (0x521), region = 83 }
 0x500   : > { %1955 = vst.msk [vmem:[#allocation4] sm:$0xff] %vm1842_vm1, %v1953_v54 }
 0x501   : > { %v1974_v24 = vld [vmem:[#allocation5 + $0x8] sm:$0xff] (!%p2332_p4) }
 0x502   : > { %v1952_v38 = vpop.xlane.xlu1 %1951 }
 0x503   : > { %v1954_v41 = vadd.f32 %v1952_v38, %v1876_v36 }
 0x505   : > { %1956 = vst.msk [vmem:[#allocation4 + $0x8] sm:$0xff] %vm1842_vm1, %v1954_v41 }
 0x507   : > { %v1965_v40 = vld [vmem:[#allocation4] sm:$0xff] }
 0x508   : > { %2474 = vlog2.f32 %v1965_v40 }
 0x50c   : > { %v1966_v43 = vld [vmem:[#allocation4 + $0x8] sm:$0xff] }
 0x50d   : > { %2476 = vlog2.f32 %v1966_v43 }
 0x512   : > { %v2475_v47 = vpop.eup %2474 }
 0x513   : > { %v1968_v17 = vmul.f32 0.6931472, %v2475_v47 }
 0x515   : > { %v1971_v59 = vadd.f32 %v1968_v17, %v1963_v57 }
 0x517   : > { %v2477_v12 = vpop.eup %2476  ;;  %v1975_v26 = vsub.f32 %v1971_v59, %v1973_v20 }
 0x518   : > { %v1970_v21 = vmul.f32 0.6931472, %v2477_v12 }
 0x519   : > { %v1979_v3 = vmul.f32 %v1977_v10, %v1975_v26 }
 0x51a   : > { %v1972_v25 = vadd.f32 %v1970_v21, %v1964_v6 }
 0x51b   : > { %1981 = vst.msk [vmem:[%s3503_s7] sm:$0xff] %vm1842_vm1, %v1979_v3 }
 0x51c   : > { %v1976_v29 = vsub.f32 %v1972_v25, %v1974_v24 }
 0x51e   : > { %v1980_v45 = vmul.f32 %v1978_v27, %v1976_v29 }
 0x520   : > { %1982 = vst.msk [vmem:[%s3503_s7 + $0x8] sm:$0xff] %vm1842_vm1, %v1980_v45 }
 0x521 PF: > { %s2349_s17 = sshll.u32 %s2612_s27, 9  ;;  %s2005_s13 = sshll.u32 %s3083_s19, 4  ;;  %s3447_s13 = int_to_ptr.vmem [resolvable:$true] %s2005_s13 }
 0x522   : > { %s3444_s20 = scalar_lea.hbm %s3502_s6, %s2349_s17  ;;  %s1984_s11 = scalar_lea.sflag [#allocation9], %s3069_s22 }
 0x523   : > { %s2534_s18 = scalar_lea.vmem %s3447_s13, 1024  ;;  %p3520_p13 = scmp.ne.s32.totalorder %s3511_s12, 0 }
 0x524   : > { %p2535_p12 = scmp.ne.s32.totalorder %s3447_s13, %s2534_s18  ;;  %s2627_s21 = smov [#allocation12]  }
 0x525   : > { %s2538_s16 = sshll.u32 %s2627_s21, 4  ;;  %s2539_s16 = int_to_ptr.vmem [resolvable:$false] %s2538_s16 }
 0x526   : > { %p2536_p6 = pnand %p2535_p12, %p3520_p13  ;;  %s2540_s27 = scalar_lea.vmem %s2539_s16, 2048 }
 0x527   : > { %p2541_p8 = scmp.lt.s32.totalorder %s3447_s13, %s2539_s16  ;;  %p2542_p9 = scmp.lt.s32.totalorder %s2540_s27, %s2534_s18 }
 0x528   : > { %p2537_p7 = pneg %p2536_p6 }
 0x529   : > { %p2543_p10 = por %p2542_p9, %p2541_p8 }
 0x52b   : > { %p2544_p0 = pnand %p2543_p10, %p2537_p7 }
 0x52d   : > { %2547 = shalt.err (!%p2544_p0)
}
 0x52e   : > { %s2548_s19 = scalar_lea.hbm %s3444_s20, 1024  ;;  %s2552_s30 = scalar_lea.hbm %s3502_s6, 2048 }
 0x52f   : > { %p2549_p3 = scmp.ne.s32.totalorder %s3444_s20, %s2548_s19  ;;  %p2553_p11 = scmp.lt.u32.totalorder %s3444_s20, %s3502_s6 }
 0x530   : > { %p2554_p4 = scmp.lt.u32.totalorder %s2552_s30, %s2548_s19  ;;  %p2556_p6 = scmp.lt.u32.totalorder %s2548_s19, %s3444_s20 }
 0x531   : > { %p2550_p1 = pnand %p2549_p3, %p3520_p13 }
 0x532   : > { %p2555_p12 = por %p2554_p4, %p2553_p11 }
 0x533   : > { %p2551_p5 = pneg %p2550_p1 }
 0x534   : > { %p2557_p7 = por %p2556_p6, %p2555_p12 }
 0x536   : > { %p2558_p8 = pnand %p2557_p7, %p2551_p5 }
 0x538   : > { %2561 = shalt.err (!%p2558_p8)
}
 0x539   : > { %s2628_s8 = smov 512   ;;  %s2629_s10 = smov 1024  }
 0x53a   : > { %s2630_s18 = smov 32  }
 0x53b   : > { %2358 = dma.vmem_to_hbm [thread:$0]  (%p3520_p13), %s3447_s13, 1024, %s3444_s20, %s1984_s11, %s2628_s8, %s2629_s10, %s2630_s18  }
 0x53c PF: > { %s2032_s21 = sand.u32 1, %s2600_s24   ;;  %p3521_p9 = scmp.ne.s32.totalorder %s3513_s15, 0 }
 0x53d   : > { %s2033_s16 = scalar_lea.sflag [#allocation9], %s2032_s21 }
 0x53e   : > { %p2368_p10 = pnand %p2185_p2, %p3521_p9 }
 0x540   : > { %2595 = dma.done.wait (!%p2368_p10), %s2033_s16, 1024  }
 0x541   : > { %2597 = vsyncadd (!%p2368_p10), %s2033_s16, 4294966272  ;;  %s23_s29 = sadd.s32 1, %s2620_s29   ;;  %s3522_s27 = sld [smem:[#allocation17_spill]] }
 0x542   : > { %p20_p0 = scmp.ge.s32.totalorder %s23_s29, 4   ;;  %s3523_s12 = sld [smem:[#allocation16_spill]] }
 0x543   : > { %s3524_s24 = smov %s2604_s25  ;;  %s3525_s25 = smov %s2608_s26 }
 0x544   :  { %22 = sbr.rel (!%p20_p0) target bundleno = 6 (0x6), region = 145 }
 0x547   : > { %s3526_s26 = smov %s3522_s27  ;;  %s3527_s27 = smov %s2616_s28 }
 0x548   : > { %s3528_s28 = smov %s3523_s12 }
 0x54b   :  { %2038 = vsyncpa [#allocation8], 1 }
 0x54c   :  { %2040 = vsyncpa [#allocation8 + $0x1], 1 }
 0x54d   :  { %2041 = vsyncpa [#allocation11], 1 }
 0x54e   :  { %2042 = vsyncpa [#allocation9], 1 }
 0x54f   :  { %2044 = vsyncpa [#allocation9 + $0x1], 1 }

</bundles_post_ra>
